<compile_context>
chip_gen: v7x
topology: tpu7x:2x2x1
jax: 0.10.0
libtpu: 0.0.40
codegen_flags: <defaults>
</compile_context>

<pallas_src>
import functools

import jax
import jax.numpy as jnp
from jax import lax
from jax.experimental import pallas as pl
from jax.experimental.pallas import tpu as pltpu

# ---- model constants (as in mc_model.__init__) ----
NUM_NETWORK_INPUTS = 10
NUM_NEURONS = 400          # nobs == num_neurons
NUM_MUSCLE = 6
NUM_REACH = 8
TAU_X = 10.0 / 200.0       # 0.05
TAU_M = 10.0 / 50.0        # 0.2
TAU_RISE = 6.0
TAU_DECAY = 60.0
XSTARS_STD = 0.2

N_PAD = 512                # 400 -> 4 * 128 lanes
M_PAD = 128                # 6   -> 1 * 128 lanes
MAX_CHUNK_T = 64           # time steps per grid chunk (bounds VMEM for large T)


def _make_kernel(chunk_T, R):
    unroll = True if chunk_T <= 16 else 8

    def kernel(x0_ref, wt_ref, ct_ref, bias_ref, r_out_ref, mus_out_ref,
               x_state, mus_state):
        # Initialize carried state on the first time chunk only.
        @pl.when(pl.program_id(0) == 0)
        def _init():
            x_state[...] = x0_ref[...]
            mus_state[...] = jnp.zeros_like(mus_state)

        wt = wt_ref[...]                                   # (512, 512) bf16, resident

        # ---- serial recurrence: only r @ W.T on the per-step critical path ----
        def step_body(step, x):
            r = jnp.maximum(x, 0.0)                        # mc_act = ReLU (f32 VPU)
            row = pl.multiple_of(step * R, R)
            r_out_ref[pl.ds(row, R), :] = r                # networkactivity_list[step]
            z = jnp.dot(r.astype(jnp.bfloat16), wt,
                        preferred_element_type=jnp.float32)        # (R, 512) MXU
            # x <- x + tau_x * (r @ W.T - x + h_inp + cis)
            return TAU_X * (z - x + bias_ref[step]) + x

        x = lax.fori_loop(0, chunk_T, step_body, x_state[...], unroll=unroll)
        x_state[...] = x

        # ---- deferred muscle path: one batched matmul over the whole chunk ----
        # drive[t] = LeakyReLU_0.4(tau_m * r_t @ c.T); does not feed back into x.
        r_all = r_out_ref[...].astype(jnp.bfloat16)        # (chunk_T*R, 512)
        zc = TAU_M * jnp.dot(r_all, ct_ref[...],
                             preferred_element_type=jnp.float32)    # (chunk_T*R, 128)
        mus_out_ref[...] = jnp.maximum(zc, 0.4 * zc)       # LeakyReLU(0.4)

        # muscle_t = drive_t + (1 - tau_m) * muscle_{t-1}  (short VPU scan, in place)
        def mus_body(step, mus):
            row = pl.multiple_of(step * R, R)
            mus = mus_out_ref[pl.ds(row, R), :] + (1.0 - TAU_M) * mus
            mus_out_ref[pl.ds(row, R), :] = mus
            return mus

        mus_state[...] = lax.fori_loop(0, chunk_T, mus_body, mus_state[...],
                                       unroll=unroll)

    return kernel


def pad_weight_transposed(W):
    """Once per parameter set: zero-padded bf16 W.T, shape (512, 512)."""
    wt = jnp.zeros((N_PAD, N_PAD), jnp.float32).at[:NUM_NEURONS, :NUM_NEURONS].set(
        jnp.asarray(W, jnp.float32).T)
    return wt.astype(jnp.bfloat16)


def run_mc_dynamics(T, x0, wt_pad, c, h_inp, g):
    """T-step recurrent dynamics; returns (T, R, N) activity and (T, R, M) muscle."""
    R, N = x0.shape            # (8, 400)
    M = c.shape[0]             # 6

    chunk_T = T if T <= MAX_CHUNK_T else MAX_CHUNK_T
    num_chunks = pl.cdiv(T, chunk_T)
    T_pad = num_chunks * chunk_T

    # Muscle readout columns, padded + bf16 (tiny, per-forward since c depends on targets).
    ct = jnp.zeros((N_PAD, M_PAD), jnp.bfloat16).at[:N, :M].set(
        jnp.asarray(c, jnp.float32).T.astype(jnp.bfloat16))

    # Per-step additive drive: bias[t] = h_inp + (5+g)/0.6968*(e^{-(t+1)/60} - e^{-(t+1)/6})
    t = jnp.arange(1, T + 1, dtype=jnp.float32)[:, None]                  # (T, 1)
    decay = jnp.exp(-t / TAU_DECAY) - jnp.exp(-t / TAU_RISE)              # (T, 1)
    bias_core = (jnp.asarray(h_inp, jnp.float32)
                 + (5.0 + jnp.asarray(g, jnp.float32)) / 0.6968 * decay)  # (T, N)
    bias = jnp.zeros((T_pad, 1, N_PAD), jnp.float32).at[:T, 0, :N].set(bias_core)

    x0p = jnp.zeros((R, N_PAD), jnp.float32).at[:, :N].set(
        jnp.asarray(x0, jnp.float32))

    kernel = _make_kernel(chunk_T, R)

    r_flat, mus_flat = pl.pallas_call(
        kernel,
        grid_spec=pltpu.PrefetchScalarGridSpec(
            num_scalar_prefetch=0,
            grid=(num_chunks,),
            in_specs=[
                pl.BlockSpec((R, N_PAD), lambda i: (0, 0)),           # x0
                pl.BlockSpec((N_PAD, N_PAD), lambda i: (0, 0)),       # W.T   (bf16)
                pl.BlockSpec((N_PAD, M_PAD), lambda i: (0, 0)),       # c.T   (bf16)
                pl.BlockSpec((chunk_T, 1, N_PAD), lambda i: (i, 0, 0)),  # bias table
            ],
            out_specs=[
                pl.BlockSpec((chunk_T * R, N_PAD), lambda i: (i, 0)),    # r trajectory
                pl.BlockSpec((chunk_T * R, M_PAD), lambda i: (i, 0)),    # muscle traj.
            ],
            scratch_shapes=[
                pltpu.VMEM((R, N_PAD), jnp.float32),                  # carried x
                pltpu.VMEM((R, M_PAD), jnp.float32),                  # carried muscle
            ],
        ),
        out_shape=[
            jax.ShapeDtypeStruct((T_pad * R, N_PAD), jnp.float32),
            jax.ShapeDtypeStruct((T_pad * R, M_PAD), jnp.float32),
        ],
        compiler_params=pltpu.CompilerParams(
            dimension_semantics=("arbitrary",),
        ),
    )(x0p, wt_pad, ct, bias)

    # Strip time/lane padding back to logical sizes.
    r_traj = r_flat.reshape(T_pad, R, N_PAD)[:T, :, :N]
    mus_traj = mus_flat.reshape(T_pad, R, M_PAD)[:T, :, :M]
    return r_traj, mus_traj


def init_params(key):
    keys = jax.random.split(key, 7)
    spontaneous = 1.0 + 0.15 * jax.random.normal(keys[0], (NUM_NEURONS, 1), jnp.float32)
    w_in = (1.0 / NUM_NETWORK_INPUTS ** 0.5) * jax.random.normal(
        keys[1], (NUM_NEURONS, NUM_NETWORK_INPUTS), jnp.float32)
    # TODO(synk): original W comes from np.loadtxt('isn_1.2_0.9.txt'); substitute a
    # deterministic synthetic recurrent matrix of the same shape/scale.
    W = (0.9 / NUM_NEURONS ** 0.5) * jax.random.normal(
        keys[2], (NUM_NEURONS, NUM_NEURONS), jnp.float32)
    xstars_prms = (1.5 / NUM_NEURONS ** 0.5) * jax.random.normal(
        keys[3], (NUM_NEURONS, NUM_REACH), jnp.float32)
    c_prms = (0.1 / NUM_NEURONS ** 0.5) * jax.random.normal(
        keys[4], (NUM_MUSCLE, NUM_NEURONS), jnp.float32)
    g = 0.2 * jax.random.normal(keys[5], (1, NUM_NEURONS), jnp.float32)
    # TODO(synk): param_unpack() uses Make(w_rec - I).O.top(nobs) from an external lib;
    # substitute a deterministic orthonormal basis of the same shape (N, nobs).
    top_obs = jnp.linalg.qr(
        jax.random.normal(keys[6], (NUM_NEURONS, NUM_NEURONS), jnp.float32))[0]
    h_inp = (spontaneous - W @ spontaneous).T                    # (1, N)
    z = float(NUM_NEURONS * NUM_REACH * XSTARS_STD ** 2)
    wt_pad = pad_weight_transposed(W)                            # hoisted once per params
    return dict(spontaneous=spontaneous, w_in=w_in, W=W, wt_pad=wt_pad,
                xstars_prms=xstars_prms, c_prms=c_prms, g=g, top_obs=top_obs,
                h_inp=h_inp, z=z)


def unpack(params, joint_targ):
    """mc_model.unpack: fixed-point targets, readout projection, initial state."""
    xstars_tar = joint_targ @ params["w_in"][:, :2].T                    # (R, N)
    xstars = params["top_obs"] @ params["xstars_prms"] + xstars_tar.T    # (N, R)
    xstars = jnp.sqrt(params["z"] / jnp.sum(xstars ** 2)) * xstars
    xstars_motor = jnp.concatenate(
        [xstars + params["spontaneous"], params["spontaneous"]], axis=1)  # (N, R+1)
    h = jnp.linalg.solve(xstars_motor.T @ xstars_motor, xstars_motor.T)   # (R+1, N)
    c = params["c_prms"] - params["c_prms"] @ (xstars_motor @ h)          # (M, N)
    x0 = (params["spontaneous"] + xstars).T                               # (R, N)
    return x0, c, xstars_tar


@functools.partial(jax.jit, static_argnums=(1,))
def mc_model_forward(params, T, des_cart, home_cart_state, ptb=None):
    joint_targ = des_cart - home_cart_state
    x0, c, xstars_tar = unpack(params, joint_targ)
    # u = -xstars_tar @ W.T + xstars_tar is computed but unused in the reference forward.
    if ptb is not None:
        x0 = x0 + ptb
    r_list, mus_list = run_mc_dynamics(
        T, x0, params["wt_pad"], c, params["h_inp"], params["g"])
    # TODO(synk): muscular_arm (self.adyn.forward / armkin) is not defined in the provided
    # source, so cartesianstate_list / force_list / jointstate_list cannot be reproduced;
    # we return the network activity and muscle-output trajectories (the compute hot path).
    return r_list, mus_list


if __name__ == "__main__":
    key = jax.random.PRNGKey(0)
    pkey, dkey = jax.random.split(key)
    params = init_params(pkey)

    home_cart_state = 0.3 * jnp.ones((NUM_REACH, 2), jnp.float32)
    des_cart = 0.3 + 0.1 * jax.random.normal(dkey, (NUM_REACH, 2), jnp.float32)
    T = 12

    r_list, mus_list = mc_model_forward(params, T, des_cart, home_cart_state)
    jax.block_until_ready((r_list, mus_list))

    assert r_list.shape == (T, NUM_REACH, NUM_NEURONS)
    assert mus_list.shape == (T, NUM_REACH, NUM_MUSCLE)
    assert bool(jnp.all(jnp.isfinite(r_list))) and bool(jnp.all(jnp.isfinite(mus_list)))
    print("KERNEL_OK")
</pallas_src>

<mosaic_0001>
module attributes {stable_mosaic.version = 11 : i64} {
  func.func @kernel(%arg0: i32, %arg1: memref<8x512xf32, #tpu.memory_space<vmem>>, %arg2: memref<512x512xbf16, #tpu.memory_space<vmem>>, %arg3: memref<512x128xbf16, #tpu.memory_space<vmem>>, %arg4: memref<12x1x512xf32, #tpu.memory_space<vmem>>, %arg5: memref<96x512xf32, #tpu.memory_space<vmem>>, %arg6: memref<96x128xf32, #tpu.memory_space<vmem>>, %arg7: memref<8x512xf32, #tpu.memory_space<vmem>>, %arg8: memref<8x128xf32, #tpu.memory_space<vmem>>) attributes {dimension_semantics = [#tpu.dimension_semantics<arbitrary>], iteration_bounds = array<i64: 1>, scalar_prefetch = 0 : i64, scratch_operands = 2 : i64, tpu.core_type = #tpu.core_type<tc>, window_params = [{pipeline_mode = #tpu.pipeline_mode<synchronous>, transform_indices = @transform_0, window_bounds = array<i64: 8, 512>}, {pipeline_mode = #tpu.pipeline_mode<synchronous>, transform_indices = @transform_1, window_bounds = array<i64: 512, 512>}, {pipeline_mode = #tpu.pipeline_mode<synchronous>, transform_indices = @transform_2, window_bounds = array<i64: 512, 128>}, {transform_indices = @transform_3, window_bounds = array<i64: 12, 1, 512>}, {transform_indices = @transform_4, window_bounds = array<i64: 96, 512>}, {transform_indices = @transform_5, window_bounds = array<i64: 96, 128>}]} {
    %c0_i32 = arith.constant 0 : i32
    %0 = arith.cmpi eq, %arg0, %c0_i32 : i32
    %1 = arith.extui %0 : i1 to i32
    %c0_i32_0 = arith.constant 0 : i32
    %2 = arith.cmpi ne, %1, %c0_i32_0 : i32
    scf.if %2 {
      %c0_164 = arith.constant 0 : index
      %c0_165 = arith.constant 0 : index
      %330 = vector.load %arg1[%c0_164, %c0_165] : memref<8x512xf32, #tpu.memory_space<vmem>>, vector<8x512xf32>
      %c0_166 = arith.constant 0 : index
      %c0_167 = arith.constant 0 : index
      %331 = vector.load %arg7[%c0_166, %c0_167] : memref<8x512xf32, #tpu.memory_space<vmem>>, vector<8x512xf32>
      tpu.vector_store %arg7[%c0_166, %c0_167], %330 {strides = array<i32>} : memref<8x512xf32, #tpu.memory_space<vmem>>, vector<8x512xf32>,
      %cst_168 = arith.constant 0.000000e+00 : f32
      %332 = vector.broadcast %cst_168 : f32 to vector<8x128xf32>
      %c0_169 = arith.constant 0 : index
      %c0_170 = arith.constant 0 : index
      %333 = vector.load %arg8[%c0_169, %c0_170] : memref<8x128xf32, #tpu.memory_space<vmem>>, vector<8x128xf32>
      tpu.vector_store %arg8[%c0_169, %c0_170], %332 {strides = array<i32>} : memref<8x128xf32, #tpu.memory_space<vmem>>, vector<8x128xf32>,
    } else {
    }
    %c0 = arith.constant 0 : index
    %c0_1 = arith.constant 0 : index
    %3 = vector.load %arg2[%c0, %c0_1] : memref<512x512xbf16, #tpu.memory_space<vmem>>, vector<512x512xbf16>
    %c0_2 = arith.constant 0 : index
    %c0_3 = arith.constant 0 : index
    %4 = vector.load %arg7[%c0_2, %c0_3] : memref<8x512xf32, #tpu.memory_space<vmem>>, vector<8x512xf32>
    %c0_i32_4 = arith.constant 0 : i32
    %cst = arith.constant 0.000000e+00 : f32
    %5 = vector.broadcast %cst : f32 to vector<8x512xf32>
    %6 = arith.maximumf %4, %5 : vector<8x512xf32>
    %c8_i32 = arith.constant 8 : i32
    %7 = arith.muli %c0_i32_4, %c8_i32 : i32
    %8 = tpu.assume_multiple %7, 8 : i32
    %9 = arith.index_cast %8 : i32 to index
    %c0_5 = arith.constant 0 : index
    %10 = vector.load %arg5[%9, %c0_5] : memref<96x512xf32, #tpu.memory_space<vmem>>, vector<8x512xf32>
    tpu.vector_store %arg5[%9, %c0_5], %6 {strides = array<i32>} : memref<96x512xf32, #tpu.memory_space<vmem>>, vector<8x512xf32>,
    %11 = arith.truncf %6 : vector<8x512xf32> to vector<8x512xbf16>
    %cst_6 = arith.constant dense<0.000000e+00> : vector<8x512xf32>
    %12 = tpu.matmul %11, %3, %cst_6 {dimension_numbers = #tpu.dot_dimension_numbers<[1], [0], [0], [1], [0, 0, 1, 1], [], []>} : vector<8x512xbf16>, vector<512x512xbf16>, vector<8x512xf32> -> vector<8x512xf32>
    %13 = arith.subf %12, %4 : vector<8x512xf32>
    %14 = arith.index_cast %c0_i32_4 : i32 to index
    %c0_7 = arith.constant 0 : index
    %c0_8 = arith.constant 0 : index
    %15 = vector.load %arg4[%14, %c0_7, %c0_8] : memref<12x1x512xf32, #tpu.memory_space<vmem>>, vector<1x1x512xf32>
    %16 = vector.shape_cast %15 : vector<1x1x512xf32> to vector<1x512xf32>
    %17 = vector.broadcast %16 : vector<1x512xf32> to vector<8x512xf32>
    %18 = arith.addf %13, %17 : vector<8x512xf32>
    %cst_9 = arith.constant 5.000000e-02 : f32
    %19 = vector.broadcast %cst_9 : f32 to vector<8x512xf32>
    %20 = arith.mulf %19, %18 : vector<8x512xf32>
    %21 = arith.addf %20, %4 : vector<8x512xf32>
    %c1_i32 = arith.constant 1 : i32
    %cst_10 = arith.constant 0.000000e+00 : f32
    %22 = vector.broadcast %cst_10 : f32 to vector<8x512xf32>
    %23 = arith.maximumf %21, %22 : vector<8x512xf32>
    %c8_i32_11 = arith.constant 8 : i32
    %24 = arith.muli %c1_i32, %c8_i32_11 : i32
    %25 = tpu.assume_multiple %24, 8 : i32
    %26 = arith.index_cast %25 : i32 to index
    %c0_12 = arith.constant 0 : index
    %27 = vector.load %arg5[%26, %c0_12] : memref<96x512xf32, #tpu.memory_space<vmem>>, vector<8x512xf32>
    tpu.vector_store %arg5[%26, %c0_12], %23 {strides = array<i32>} : memref<96x512xf32, #tpu.memory_space<vmem>>, vector<8x512xf32>,
    %28 = arith.truncf %23 : vector<8x512xf32> to vector<8x512xbf16>
    %cst_13 = arith.constant dense<0.000000e+00> : vector<8x512xf32>
    %29 = tpu.matmul %28, %3, %cst_13 {dimension_numbers = #tpu.dot_dimension_numbers<[1], [0], [0], [1], [0, 0, 1, 1], [], []>} : vector<8x512xbf16>, vector<512x512xbf16>, vector<8x512xf32> -> vector<8x512xf32>
    %30 = arith.subf %29, %21 : vector<8x512xf32>
    %31 = arith.index_cast %c1_i32 : i32 to index
    %c0_14 = arith.constant 0 : index
    %c0_15 = arith.constant 0 : index
    %32 = vector.load %arg4[%31, %c0_14, %c0_15] : memref<12x1x512xf32, #tpu.memory_space<vmem>>, vector<1x1x512xf32>
    %33 = vector.shape_cast %32 : vector<1x1x512xf32> to vector<1x512xf32>
    %34 = vector.broadcast %33 : vector<1x512xf32> to vector<8x512xf32>
    %35 = arith.addf %30, %34 : vector<8x512xf32>
    %cst_16 = arith.constant 5.000000e-02 : f32
    %36 = vector.broadcast %cst_16 : f32 to vector<8x512xf32>
    %37 = arith.mulf %36, %35 : vector<8x512xf32>
    %38 = arith.addf %37, %21 : vector<8x512xf32>
    %c2_i32 = arith.constant 2 : i32
    %cst_17 = arith.constant 0.000000e+00 : f32
    %39 = vector.broadcast %cst_17 : f32 to vector<8x512xf32>
    %40 = arith.maximumf %38, %39 : vector<8x512xf32>
    %c8_i32_18 = arith.constant 8 : i32
    %41 = arith.muli %c2_i32, %c8_i32_18 : i32
    %42 = tpu.assume_multiple %41, 8 : i32
    %43 = arith.index_cast %42 : i32 to index
    %c0_19 = arith.constant 0 : index
    %44 = vector.load %arg5[%43, %c0_19] : memref<96x512xf32, #tpu.memory_space<vmem>>, vector<8x512xf32>
    tpu.vector_store %arg5[%43, %c0_19], %40 {strides = array<i32>} : memref<96x512xf32, #tpu.memory_space<vmem>>, vector<8x512xf32>,
    %45 = arith.truncf %40 : vector<8x512xf32> to vector<8x512xbf16>
    %cst_20 = arith.constant dense<0.000000e+00> : vector<8x512xf32>
    %46 = tpu.matmul %45, %3, %cst_20 {dimension_numbers = #tpu.dot_dimension_numbers<[1], [0], [0], [1], [0, 0, 1, 1], [], []>} : vector<8x512xbf16>, vector<512x512xbf16>, vector<8x512xf32> -> vector<8x512xf32>
    %47 = arith.subf %46, %38 : vector<8x512xf32>
    %48 = arith.index_cast %c2_i32 : i32 to index
    %c0_21 = arith.constant 0 : index
    %c0_22 = arith.constant 0 : index
    %49 = vector.load %arg4[%48, %c0_21, %c0_22] : memref<12x1x512xf32, #tpu.memory_space<vmem>>, vector<1x1x512xf32>
    %50 = vector.shape_cast %49 : vector<1x1x512xf32> to vector<1x512xf32>
    %51 = vector.broadcast %50 : vector<1x512xf32> to vector<8x512xf32>
    %52 = arith.addf %47, %51 : vector<8x512xf32>
    %cst_23 = arith.constant 5.000000e-02 : f32
    %53 = vector.broadcast %cst_23 : f32 to vector<8x512xf32>
    %54 = arith.mulf %53, %52 : vector<8x512xf32>
    %55 = arith.addf %54, %38 : vector<8x512xf32>
    %c3_i32 = arith.constant 3 : i32
    %cst_24 = arith.constant 0.000000e+00 : f32
    %56 = vector.broadcast %cst_24 : f32 to vector<8x512xf32>
    %57 = arith.maximumf %55, %56 : vector<8x512xf32>
    %c8_i32_25 = arith.constant 8 : i32
    %58 = arith.muli %c3_i32, %c8_i32_25 : i32
    %59 = tpu.assume_multiple %58, 8 : i32
    %60 = arith.index_cast %59 : i32 to index
    %c0_26 = arith.constant 0 : index
    %61 = vector.load %arg5[%60, %c0_26] : memref<96x512xf32, #tpu.memory_space<vmem>>, vector<8x512xf32>
    tpu.vector_store %arg5[%60, %c0_26], %57 {strides = array<i32>} : memref<96x512xf32, #tpu.memory_space<vmem>>, vector<8x512xf32>,
    %62 = arith.truncf %57 : vector<8x512xf32> to vector<8x512xbf16>
    %cst_27 = arith.constant dense<0.000000e+00> : vector<8x512xf32>
    %63 = tpu.matmul %62, %3, %cst_27 {dimension_numbers = #tpu.dot_dimension_numbers<[1], [0], [0], [1], [0, 0, 1, 1], [], []>} : vector<8x512xbf16>, vector<512x512xbf16>, vector<8x512xf32> -> vector<8x512xf32>
    %64 = arith.subf %63, %55 : vector<8x512xf32>
    %65 = arith.index_cast %c3_i32 : i32 to index
    %c0_28 = arith.constant 0 : index
    %c0_29 = arith.constant 0 : index
    %66 = vector.load %arg4[%65, %c0_28, %c0_29] : memref<12x1x512xf32, #tpu.memory_space<vmem>>, vector<1x1x512xf32>
    %67 = vector.shape_cast %66 : vector<1x1x512xf32> to vector<1x512xf32>
    %68 = vector.broadcast %67 : vector<1x512xf32> to vector<8x512xf32>
    %69 = arith.addf %64, %68 : vector<8x512xf32>
    %cst_30 = arith.constant 5.000000e-02 : f32
    %70 = vector.broadcast %cst_30 : f32 to vector<8x512xf32>
    %71 = arith.mulf %70, %69 : vector<8x512xf32>
    %72 = arith.addf %71, %55 : vector<8x512xf32>
    %c4_i32 = arith.constant 4 : i32
    %cst_31 = arith.constant 0.000000e+00 : f32
    %73 = vector.broadcast %cst_31 : f32 to vector<8x512xf32>
    %74 = arith.maximumf %72, %73 : vector<8x512xf32>
    %c8_i32_32 = arith.constant 8 : i32
    %75 = arith.muli %c4_i32, %c8_i32_32 : i32
    %76 = tpu.assume_multiple %75, 8 : i32
    %77 = arith.index_cast %76 : i32 to index
    %c0_33 = arith.constant 0 : index
    %78 = vector.load %arg5[%77, %c0_33] : memref<96x512xf32, #tpu.memory_space<vmem>>, vector<8x512xf32>
    tpu.vector_store %arg5[%77, %c0_33], %74 {strides = array<i32>} : memref<96x512xf32, #tpu.memory_space<vmem>>, vector<8x512xf32>,
    %79 = arith.truncf %74 : vector<8x512xf32> to vector<8x512xbf16>
    %cst_34 = arith.constant dense<0.000000e+00> : vector<8x512xf32>
    %80 = tpu.matmul %79, %3, %cst_34 {dimension_numbers = #tpu.dot_dimension_numbers<[1], [0], [0], [1], [0, 0, 1, 1], [], []>} : vector<8x512xbf16>, vector<512x512xbf16>, vector<8x512xf32> -> vector<8x512xf32>
    %81 = arith.subf %80, %72 : vector<8x512xf32>
    %82 = arith.index_cast %c4_i32 : i32 to index
    %c0_35 = arith.constant 0 : index
    %c0_36 = arith.constant 0 : index
    %83 = vector.load %arg4[%82, %c0_35, %c0_36] : memref<12x1x512xf32, #tpu.memory_space<vmem>>, vector<1x1x512xf32>
    %84 = vector.shape_cast %83 : vector<1x1x512xf32> to vector<1x512xf32>
    %85 = vector.broadcast %84 : vector<1x512xf32> to vector<8x512xf32>
    %86 = arith.addf %81, %85 : vector<8x512xf32>
    %cst_37 = arith.constant 5.000000e-02 : f32
    %87 = vector.broadcast %cst_37 : f32 to vector<8x512xf32>
    %88 = arith.mulf %87, %86 : vector<8x512xf32>
    %89 = arith.addf %88, %72 : vector<8x512xf32>
    %c5_i32 = arith.constant 5 : i32
    %cst_38 = arith.constant 0.000000e+00 : f32
    %90 = vector.broadcast %cst_38 : f32 to vector<8x512xf32>
    %91 = arith.maximumf %89, %90 : vector<8x512xf32>
    %c8_i32_39 = arith.constant 8 : i32
    %92 = arith.muli %c5_i32, %c8_i32_39 : i32
    %93 = tpu.assume_multiple %92, 8 : i32
    %94 = arith.index_cast %93 : i32 to index
    %c0_40 = arith.constant 0 : index
    %95 = vector.load %arg5[%94, %c0_40] : memref<96x512xf32, #tpu.memory_space<vmem>>, vector<8x512xf32>
    tpu.vector_store %arg5[%94, %c0_40], %91 {strides = array<i32>} : memref<96x512xf32, #tpu.memory_space<vmem>>, vector<8x512xf32>,
    %96 = arith.truncf %91 : vector<8x512xf32> to vector<8x512xbf16>
    %cst_41 = arith.constant dense<0.000000e+00> : vector<8x512xf32>
    %97 = tpu.matmul %96, %3, %cst_41 {dimension_numbers = #tpu.dot_dimension_numbers<[1], [0], [0], [1], [0, 0, 1, 1], [], []>} : vector<8x512xbf16>, vector<512x512xbf16>, vector<8x512xf32> -> vector<8x512xf32>
    %98 = arith.subf %97, %89 : vector<8x512xf32>
    %99 = arith.index_cast %c5_i32 : i32 to index
    %c0_42 = arith.constant 0 : index
    %c0_43 = arith.constant 0 : index
    %100 = vector.load %arg4[%99, %c0_42, %c0_43] : memref<12x1x512xf32, #tpu.memory_space<vmem>>, vector<1x1x512xf32>
    %101 = vector.shape_cast %100 : vector<1x1x512xf32> to vector<1x512xf32>
    %102 = vector.broadcast %101 : vector<1x512xf32> to vector<8x512xf32>
    %103 = arith.addf %98, %102 : vector<8x512xf32>
    %cst_44 = arith.constant 5.000000e-02 : f32
    %104 = vector.broadcast %cst_44 : f32 to vector<8x512xf32>
    %105 = arith.mulf %104, %103 : vector<8x512xf32>
    %106 = arith.addf %105, %89 : vector<8x512xf32>
    %c6_i32 = arith.constant 6 : i32
    %cst_45 = arith.constant 0.000000e+00 : f32
    %107 = vector.broadcast %cst_45 : f32 to vector<8x512xf32>
    %108 = arith.maximumf %106, %107 : vector<8x512xf32>
    %c8_i32_46 = arith.constant 8 : i32
    %109 = arith.muli %c6_i32, %c8_i32_46 : i32
    %110 = tpu.assume_multiple %109, 8 : i32
    %111 = arith.index_cast %110 : i32 to index
    %c0_47 = arith.constant 0 : index
    %112 = vector.load %arg5[%111, %c0_47] : memref<96x512xf32, #tpu.memory_space<vmem>>, vector<8x512xf32>
    tpu.vector_store %arg5[%111, %c0_47], %108 {strides = array<i32>} : memref<96x512xf32, #tpu.memory_space<vmem>>, vector<8x512xf32>,
    %113 = arith.truncf %108 : vector<8x512xf32> to vector<8x512xbf16>
    %cst_48 = arith.constant dense<0.000000e+00> : vector<8x512xf32>
    %114 = tpu.matmul %113, %3, %cst_48 {dimension_numbers = #tpu.dot_dimension_numbers<[1], [0], [0], [1], [0, 0, 1, 1], [], []>} : vector<8x512xbf16>, vector<512x512xbf16>, vector<8x512xf32> -> vector<8x512xf32>
    %115 = arith.subf %114, %106 : vector<8x512xf32>
    %116 = arith.index_cast %c6_i32 : i32 to index
    %c0_49 = arith.constant 0 : index
    %c0_50 = arith.constant 0 : index
    %117 = vector.load %arg4[%116, %c0_49, %c0_50] : memref<12x1x512xf32, #tpu.memory_space<vmem>>, vector<1x1x512xf32>
    %118 = vector.shape_cast %117 : vector<1x1x512xf32> to vector<1x512xf32>
    %119 = vector.broadcast %118 : vector<1x512xf32> to vector<8x512xf32>
    %120 = arith.addf %115, %119 : vector<8x512xf32>
    %cst_51 = arith.constant 5.000000e-02 : f32
    %121 = vector.broadcast %cst_51 : f32 to vector<8x512xf32>
    %122 = arith.mulf %121, %120 : vector<8x512xf32>
    %123 = arith.addf %122, %106 : vector<8x512xf32>
    %c7_i32 = arith.constant 7 : i32
    %cst_52 = arith.constant 0.000000e+00 : f32
    %124 = vector.broadcast %cst_52 : f32 to vector<8x512xf32>
    %125 = arith.maximumf %123, %124 : vector<8x512xf32>
    %c8_i32_53 = arith.constant 8 : i32
    %126 = arith.muli %c7_i32, %c8_i32_53 : i32
    %127 = tpu.assume_multiple %126, 8 : i32
    %128 = arith.index_cast %127 : i32 to index
    %c0_54 = arith.constant 0 : index
    %129 = vector.load %arg5[%128, %c0_54] : memref<96x512xf32, #tpu.memory_space<vmem>>, vector<8x512xf32>
    tpu.vector_store %arg5[%128, %c0_54], %125 {strides = array<i32>} : memref<96x512xf32, #tpu.memory_space<vmem>>, vector<8x512xf32>,
    %130 = arith.truncf %125 : vector<8x512xf32> to vector<8x512xbf16>
    %cst_55 = arith.constant dense<0.000000e+00> : vector<8x512xf32>
    %131 = tpu.matmul %130, %3, %cst_55 {dimension_numbers = #tpu.dot_dimension_numbers<[1], [0], [0], [1], [0, 0, 1, 1], [], []>} : vector<8x512xbf16>, vector<512x512xbf16>, vector<8x512xf32> -> vector<8x512xf32>
    %132 = arith.subf %131, %123 : vector<8x512xf32>
    %133 = arith.index_cast %c7_i32 : i32 to index
    %c0_56 = arith.constant 0 : index
    %c0_57 = arith.constant 0 : index
    %134 = vector.load %arg4[%133, %c0_56, %c0_57] : memref<12x1x512xf32, #tpu.memory_space<vmem>>, vector<1x1x512xf32>
    %135 = vector.shape_cast %134 : vector<1x1x512xf32> to vector<1x512xf32>
    %136 = vector.broadcast %135 : vector<1x512xf32> to vector<8x512xf32>
    %137 = arith.addf %132, %136 : vector<8x512xf32>
    %cst_58 = arith.constant 5.000000e-02 : f32
    %138 = vector.broadcast %cst_58 : f32 to vector<8x512xf32>
    %139 = arith.mulf %138, %137 : vector<8x512xf32>
    %140 = arith.addf %139, %123 : vector<8x512xf32>
    %c8_i32_59 = arith.constant 8 : i32
    %cst_60 = arith.constant 0.000000e+00 : f32
    %141 = vector.broadcast %cst_60 : f32 to vector<8x512xf32>
    %142 = arith.maximumf %140, %141 : vector<8x512xf32>
    %c8_i32_61 = arith.constant 8 : i32
    %143 = arith.muli %c8_i32_59, %c8_i32_61 : i32
    %144 = tpu.assume_multiple %143, 8 : i32
    %145 = arith.index_cast %144 : i32 to index
    %c0_62 = arith.constant 0 : index
    %146 = vector.load %arg5[%145, %c0_62] : memref<96x512xf32, #tpu.memory_space<vmem>>, vector<8x512xf32>
    tpu.vector_store %arg5[%145, %c0_62], %142 {strides = array<i32>} : memref<96x512xf32, #tpu.memory_space<vmem>>, vector<8x512xf32>,
    %147 = arith.truncf %142 : vector<8x512xf32> to vector<8x512xbf16>
    %cst_63 = arith.constant dense<0.000000e+00> : vector<8x512xf32>
    %148 = tpu.matmul %147, %3, %cst_63 {dimension_numbers = #tpu.dot_dimension_numbers<[1], [0], [0], [1], [0, 0, 1, 1], [], []>} : vector<8x512xbf16>, vector<512x512xbf16>, vector<8x512xf32> -> vector<8x512xf32>
    %149 = arith.subf %148, %140 : vector<8x512xf32>
    %150 = arith.index_cast %c8_i32_59 : i32 to index
    %c0_64 = arith.constant 0 : index
    %c0_65 = arith.constant 0 : index
    %151 = vector.load %arg4[%150, %c0_64, %c0_65] : memref<12x1x512xf32, #tpu.memory_space<vmem>>, vector<1x1x512xf32>
    %152 = vector.shape_cast %151 : vector<1x1x512xf32> to vector<1x512xf32>
    %153 = vector.broadcast %152 : vector<1x512xf32> to vector<8x512xf32>
    %154 = arith.addf %149, %153 : vector<8x512xf32>
    %cst_66 = arith.constant 5.000000e-02 : f32
    %155 = vector.broadcast %cst_66 : f32 to vector<8x512xf32>
    %156 = arith.mulf %155, %154 : vector<8x512xf32>
    %157 = arith.addf %156, %140 : vector<8x512xf32>
    %c9_i32 = arith.constant 9 : i32
    %cst_67 = arith.constant 0.000000e+00 : f32
    %158 = vector.broadcast %cst_67 : f32 to vector<8x512xf32>
    %159 = arith.maximumf %157, %158 : vector<8x512xf32>
    %c8_i32_68 = arith.constant 8 : i32
    %160 = arith.muli %c9_i32, %c8_i32_68 : i32
    %161 = tpu.assume_multiple %160, 8 : i32
    %162 = arith.index_cast %161 : i32 to index
    %c0_69 = arith.constant 0 : index
    %163 = vector.load %arg5[%162, %c0_69] : memref<96x512xf32, #tpu.memory_space<vmem>>, vector<8x512xf32>
    tpu.vector_store %arg5[%162, %c0_69], %159 {strides = array<i32>} : memref<96x512xf32, #tpu.memory_space<vmem>>, vector<8x512xf32>,
    %164 = arith.truncf %159 : vector<8x512xf32> to vector<8x512xbf16>
    %cst_70 = arith.constant dense<0.000000e+00> : vector<8x512xf32>
    %165 = tpu.matmul %164, %3, %cst_70 {dimension_numbers = #tpu.dot_dimension_numbers<[1], [0], [0], [1], [0, 0, 1, 1], [], []>} : vector<8x512xbf16>, vector<512x512xbf16>, vector<8x512xf32> -> vector<8x512xf32>
    %166 = arith.subf %165, %157 : vector<8x512xf32>
    %167 = arith.index_cast %c9_i32 : i32 to index
    %c0_71 = arith.constant 0 : index
    %c0_72 = arith.constant 0 : index
    %168 = vector.load %arg4[%167, %c0_71, %c0_72] : memref<12x1x512xf32, #tpu.memory_space<vmem>>, vector<1x1x512xf32>
    %169 = vector.shape_cast %168 : vector<1x1x512xf32> to vector<1x512xf32>
    %170 = vector.broadcast %169 : vector<1x512xf32> to vector<8x512xf32>
    %171 = arith.addf %166, %170 : vector<8x512xf32>
    %cst_73 = arith.constant 5.000000e-02 : f32
    %172 = vector.broadcast %cst_73 : f32 to vector<8x512xf32>
    %173 = arith.mulf %172, %171 : vector<8x512xf32>
    %174 = arith.addf %173, %157 : vector<8x512xf32>
    %c10_i32 = arith.constant 10 : i32
    %cst_74 = arith.constant 0.000000e+00 : f32
    %175 = vector.broadcast %cst_74 : f32 to vector<8x512xf32>
    %176 = arith.maximumf %174, %175 : vector<8x512xf32>
    %c8_i32_75 = arith.constant 8 : i32
    %177 = arith.muli %c10_i32, %c8_i32_75 : i32
    %178 = tpu.assume_multiple %177, 8 : i32
    %179 = arith.index_cast %178 : i32 to index
    %c0_76 = arith.constant 0 : index
    %180 = vector.load %arg5[%179, %c0_76] : memref<96x512xf32, #tpu.memory_space<vmem>>, vector<8x512xf32>
    tpu.vector_store %arg5[%179, %c0_76], %176 {strides = array<i32>} : memref<96x512xf32, #tpu.memory_space<vmem>>, vector<8x512xf32>,
    %181 = arith.truncf %176 : vector<8x512xf32> to vector<8x512xbf16>
    %cst_77 = arith.constant dense<0.000000e+00> : vector<8x512xf32>
    %182 = tpu.matmul %181, %3, %cst_77 {dimension_numbers = #tpu.dot_dimension_numbers<[1], [0], [0], [1], [0, 0, 1, 1], [], []>} : vector<8x512xbf16>, vector<512x512xbf16>, vector<8x512xf32> -> vector<8x512xf32>
    %183 = arith.subf %182, %174 : vector<8x512xf32>
    %184 = arith.index_cast %c10_i32 : i32 to index
    %c0_78 = arith.constant 0 : index
    %c0_79 = arith.constant 0 : index
    %185 = vector.load %arg4[%184, %c0_78, %c0_79] : memref<12x1x512xf32, #tpu.memory_space<vmem>>, vector<1x1x512xf32>
    %186 = vector.shape_cast %185 : vector<1x1x512xf32> to vector<1x512xf32>
    %187 = vector.broadcast %186 : vector<1x512xf32> to vector<8x512xf32>
    %188 = arith.addf %183, %187 : vector<8x512xf32>
    %cst_80 = arith.constant 5.000000e-02 : f32
    %189 = vector.broadcast %cst_80 : f32 to vector<8x512xf32>
    %190 = arith.mulf %189, %188 : vector<8x512xf32>
    %191 = arith.addf %190, %174 : vector<8x512xf32>
    %c11_i32 = arith.constant 11 : i32
    %cst_81 = arith.constant 0.000000e+00 : f32
    %192 = vector.broadcast %cst_81 : f32 to vector<8x512xf32>
    %193 = arith.maximumf %191, %192 : vector<8x512xf32>
    %c8_i32_82 = arith.constant 8 : i32
    %194 = arith.muli %c11_i32, %c8_i32_82 : i32
    %195 = tpu.assume_multiple %194, 8 : i32
    %196 = arith.index_cast %195 : i32 to index
    %c0_83 = arith.constant 0 : index
    %197 = vector.load %arg5[%196, %c0_83] : memref<96x512xf32, #tpu.memory_space<vmem>>, vector<8x512xf32>
    tpu.vector_store %arg5[%196, %c0_83], %193 {strides = array<i32>} : memref<96x512xf32, #tpu.memory_space<vmem>>, vector<8x512xf32>,
    %198 = arith.truncf %193 : vector<8x512xf32> to vector<8x512xbf16>
    %cst_84 = arith.constant dense<0.000000e+00> : vector<8x512xf32>
    %199 = tpu.matmul %198, %3, %cst_84 {dimension_numbers = #tpu.dot_dimension_numbers<[1], [0], [0], [1], [0, 0, 1, 1], [], []>} : vector<8x512xbf16>, vector<512x512xbf16>, vector<8x512xf32> -> vector<8x512xf32>
    %200 = arith.subf %199, %191 : vector<8x512xf32>
    %201 = arith.index_cast %c11_i32 : i32 to index
    %c0_85 = arith.constant 0 : index
    %c0_86 = arith.constant 0 : index
    %202 = vector.load %arg4[%201, %c0_85, %c0_86] : memref<12x1x512xf32, #tpu.memory_space<vmem>>, vector<1x1x512xf32>
    %203 = vector.shape_cast %202 : vector<1x1x512xf32> to vector<1x512xf32>
    %204 = vector.broadcast %203 : vector<1x512xf32> to vector<8x512xf32>
    %205 = arith.addf %200, %204 : vector<8x512xf32>
    %cst_87 = arith.constant 5.000000e-02 : f32
    %206 = vector.broadcast %cst_87 : f32 to vector<8x512xf32>
    %207 = arith.mulf %206, %205 : vector<8x512xf32>
    %208 = arith.addf %207, %191 : vector<8x512xf32>
    %c12_i32 = arith.constant 12 : i32
    %c0_88 = arith.constant 0 : index
    %c0_89 = arith.constant 0 : index
    %209 = vector.load %arg7[%c0_88, %c0_89] : memref<8x512xf32, #tpu.memory_space<vmem>>, vector<8x512xf32>
    tpu.vector_store %arg7[%c0_88, %c0_89], %208 {strides = array<i32>} : memref<8x512xf32, #tpu.memory_space<vmem>>, vector<8x512xf32>,
    %c0_90 = arith.constant 0 : index
    %c0_91 = arith.constant 0 : index
    %210 = vector.load %arg5[%c0_90, %c0_91] : memref<96x512xf32, #tpu.memory_space<vmem>>, vector<96x512xf32>
    %211 = arith.truncf %210 : vector<96x512xf32> to vector<96x512xbf16>
    %c0_92 = arith.constant 0 : index
    %c0_93 = arith.constant 0 : index
    %212 = vector.load %arg3[%c0_92, %c0_93] : memref<512x128xbf16, #tpu.memory_space<vmem>>, vector<512x128xbf16>
    %cst_94 = arith.constant dense<0.000000e+00> : vector<96x128xf32>
    %213 = tpu.matmul %211, %212, %cst_94 {dimension_numbers = #tpu.dot_dimension_numbers<[1], [0], [0], [1], [0, 0, 1, 1], [], []>} : vector<96x512xbf16>, vector<512x128xbf16>, vector<96x128xf32> -> vector<96x128xf32>
    %cst_95 = arith.constant 2.000000e-01 : f32
    %214 = vector.broadcast %cst_95 : f32 to vector<96x128xf32>
    %215 = arith.mulf %214, %213 : vector<96x128xf32>
    %cst_96 = arith.constant 4.000000e-01 : f32
    %216 = vector.broadcast %cst_96 : f32 to vector<96x128xf32>
    %217 = arith.mulf %216, %215 : vector<96x128xf32>
    %218 = arith.maximumf %215, %217 : vector<96x128xf32>
    %c0_97 = arith.constant 0 : index
    %c0_98 = arith.constant 0 : index
    %219 = vector.load %arg6[%c0_97, %c0_98] : memref<96x128xf32, #tpu.memory_space<vmem>>, vector<96x128xf32>
    tpu.vector_store %arg6[%c0_97, %c0_98], %218 {strides = array<i32>} : memref<96x128xf32, #tpu.memory_space<vmem>>, vector<96x128xf32>,
    %c0_99 = arith.constant 0 : index
    %c0_100 = arith.constant 0 : index
    %220 = vector.load %arg8[%c0_99, %c0_100] : memref<8x128xf32, #tpu.memory_space<vmem>>, vector<8x128xf32>
    %c0_i32_101 = arith.constant 0 : i32
    %c8_i32_102 = arith.constant 8 : i32
    %221 = arith.muli %c0_i32_101, %c8_i32_102 : i32
    %222 = tpu.assume_multiple %221, 8 : i32
    %223 = arith.index_cast %222 : i32 to index
    %c0_103 = arith.constant 0 : index
    %224 = vector.load %arg6[%223, %c0_103] : memref<96x128xf32, #tpu.memory_space<vmem>>, vector<8x128xf32>
    %cst_104 = arith.constant 8.000000e-01 : f32
    %225 = vector.broadcast %cst_104 : f32 to vector<8x128xf32>
    %226 = arith.mulf %225, %220 : vector<8x128xf32>
    %227 = arith.addf %224, %226 : vector<8x128xf32>
    %228 = arith.index_cast %222 : i32 to index
    %c0_105 = arith.constant 0 : index
    %229 = vector.load %arg6[%228, %c0_105] : memref<96x128xf32, #tpu.memory_space<vmem>>, vector<8x128xf32>
    tpu.vector_store %arg6[%228, %c0_105], %227 {strides = array<i32>} : memref<96x128xf32, #tpu.memory_space<vmem>>, vector<8x128xf32>,
    %c1_i32_106 = arith.constant 1 : i32
    %c8_i32_107 = arith.constant 8 : i32
    %230 = arith.muli %c1_i32_106, %c8_i32_107 : i32
    %231 = tpu.assume_multiple %230, 8 : i32
    %232 = arith.index_cast %231 : i32 to index
    %c0_108 = arith.constant 0 : index
    %233 = vector.load %arg6[%232, %c0_108] : memref<96x128xf32, #tpu.memory_space<vmem>>, vector<8x128xf32>
    %cst_109 = arith.constant 8.000000e-01 : f32
    %234 = vector.broadcast %cst_109 : f32 to vector<8x128xf32>
    %235 = arith.mulf %234, %227 : vector<8x128xf32>
    %236 = arith.addf %233, %235 : vector<8x128xf32>
    %237 = arith.index_cast %231 : i32 to index
    %c0_110 = arith.constant 0 : index
    %238 = vector.load %arg6[%237, %c0_110] : memref<96x128xf32, #tpu.memory_space<vmem>>, vector<8x128xf32>
    tpu.vector_store %arg6[%237, %c0_110], %236 {strides = array<i32>} : memref<96x128xf32, #tpu.memory_space<vmem>>, vector<8x128xf32>,
    %c2_i32_111 = arith.constant 2 : i32
    %c8_i32_112 = arith.constant 8 : i32
    %239 = arith.muli %c2_i32_111, %c8_i32_112 : i32
    %240 = tpu.assume_multiple %239, 8 : i32
    %241 = arith.index_cast %240 : i32 to index
    %c0_113 = arith.constant 0 : index
    %242 = vector.load %arg6[%241, %c0_113] : memref<96x128xf32, #tpu.memory_space<vmem>>, vector<8x128xf32>
    %cst_114 = arith.constant 8.000000e-01 : f32
    %243 = vector.broadcast %cst_114 : f32 to vector<8x128xf32>
    %244 = arith.mulf %243, %236 : vector<8x128xf32>
    %245 = arith.addf %242, %244 : vector<8x128xf32>
    %246 = arith.index_cast %240 : i32 to index
    %c0_115 = arith.constant 0 : index
    %247 = vector.load %arg6[%246, %c0_115] : memref<96x128xf32, #tpu.memory_space<vmem>>, vector<8x128xf32>
    tpu.vector_store %arg6[%246, %c0_115], %245 {strides = array<i32>} : memref<96x128xf32, #tpu.memory_space<vmem>>, vector<8x128xf32>,
    %c3_i32_116 = arith.constant 3 : i32
    %c8_i32_117 = arith.constant 8 : i32
    %248 = arith.muli %c3_i32_116, %c8_i32_117 : i32
    %249 = tpu.assume_multiple %248, 8 : i32
    %250 = arith.index_cast %249 : i32 to index
    %c0_118 = arith.constant 0 : index
    %251 = vector.load %arg6[%250, %c0_118] : memref<96x128xf32, #tpu.memory_space<vmem>>, vector<8x128xf32>
    %cst_119 = arith.constant 8.000000e-01 : f32
    %252 = vector.broadcast %cst_119 : f32 to vector<8x128xf32>
    %253 = arith.mulf %252, %245 : vector<8x128xf32>
    %254 = arith.addf %251, %253 : vector<8x128xf32>
    %255 = arith.index_cast %249 : i32 to index
    %c0_120 = arith.constant 0 : index
    %256 = vector.load %arg6[%255, %c0_120] : memref<96x128xf32, #tpu.memory_space<vmem>>, vector<8x128xf32>
    tpu.vector_store %arg6[%255, %c0_120], %254 {strides = array<i32>} : memref<96x128xf32, #tpu.memory_space<vmem>>, vector<8x128xf32>,
    %c4_i32_121 = arith.constant 4 : i32
    %c8_i32_122 = arith.constant 8 : i32
    %257 = arith.muli %c4_i32_121, %c8_i32_122 : i32
    %258 = tpu.assume_multiple %257, 8 : i32
    %259 = arith.index_cast %258 : i32 to index
    %c0_123 = arith.constant 0 : index
    %260 = vector.load %arg6[%259, %c0_123] : memref<96x128xf32, #tpu.memory_space<vmem>>, vector<8x128xf32>
    %cst_124 = arith.constant 8.000000e-01 : f32
    %261 = vector.broadcast %cst_124 : f32 to vector<8x128xf32>
    %262 = arith.mulf %261, %254 : vector<8x128xf32>
    %263 = arith.addf %260, %262 : vector<8x128xf32>
    %264 = arith.index_cast %258 : i32 to index
    %c0_125 = arith.constant 0 : index
    %265 = vector.load %arg6[%264, %c0_125] : memref<96x128xf32, #tpu.memory_space<vmem>>, vector<8x128xf32>
    tpu.vector_store %arg6[%264, %c0_125], %263 {strides = array<i32>} : memref<96x128xf32, #tpu.memory_space<vmem>>, vector<8x128xf32>,
    %c5_i32_126 = arith.constant 5 : i32
    %c8_i32_127 = arith.constant 8 : i32
    %266 = arith.muli %c5_i32_126, %c8_i32_127 : i32
    %267 = tpu.assume_multiple %266, 8 : i32
    %268 = arith.index_cast %267 : i32 to index
    %c0_128 = arith.constant 0 : index
    %269 = vector.load %arg6[%268, %c0_128] : memref<96x128xf32, #tpu.memory_space<vmem>>, vector<8x128xf32>
    %cst_129 = arith.constant 8.000000e-01 : f32
    %270 = vector.broadcast %cst_129 : f32 to vector<8x128xf32>
    %271 = arith.mulf %270, %263 : vector<8x128xf32>
    %272 = arith.addf %269, %271 : vector<8x128xf32>
    %273 = arith.index_cast %267 : i32 to index
    %c0_130 = arith.constant 0 : index
    %274 = vector.load %arg6[%273, %c0_130] : memref<96x128xf32, #tpu.memory_space<vmem>>, vector<8x128xf32>
    tpu.vector_store %arg6[%273, %c0_130], %272 {strides = array<i32>} : memref<96x128xf32, #tpu.memory_space<vmem>>, vector<8x128xf32>,
    %c6_i32_131 = arith.constant 6 : i32
    %c8_i32_132 = arith.constant 8 : i32
    %275 = arith.muli %c6_i32_131, %c8_i32_132 : i32
    %276 = tpu.assume_multiple %275, 8 : i32
    %277 = arith.index_cast %276 : i32 to index
    %c0_133 = arith.constant 0 : index
    %278 = vector.load %arg6[%277, %c0_133] : memref<96x128xf32, #tpu.memory_space<vmem>>, vector<8x128xf32>
    %cst_134 = arith.constant 8.000000e-01 : f32
    %279 = vector.broadcast %cst_134 : f32 to vector<8x128xf32>
    %280 = arith.mulf %279, %272 : vector<8x128xf32>
    %281 = arith.addf %278, %280 : vector<8x128xf32>
    %282 = arith.index_cast %276 : i32 to index
    %c0_135 = arith.constant 0 : index
    %283 = vector.load %arg6[%282, %c0_135] : memref<96x128xf32, #tpu.memory_space<vmem>>, vector<8x128xf32>
    tpu.vector_store %arg6[%282, %c0_135], %281 {strides = array<i32>} : memref<96x128xf32, #tpu.memory_space<vmem>>, vector<8x128xf32>,
    %c7_i32_136 = arith.constant 7 : i32
    %c8_i32_137 = arith.constant 8 : i32
    %284 = arith.muli %c7_i32_136, %c8_i32_137 : i32
    %285 = tpu.assume_multiple %284, 8 : i32
    %286 = arith.index_cast %285 : i32 to index
    %c0_138 = arith.constant 0 : index
    %287 = vector.load %arg6[%286, %c0_138] : memref<96x128xf32, #tpu.memory_space<vmem>>, vector<8x128xf32>
    %cst_139 = arith.constant 8.000000e-01 : f32
    %288 = vector.broadcast %cst_139 : f32 to vector<8x128xf32>
    %289 = arith.mulf %288, %281 : vector<8x128xf32>
    %290 = arith.addf %287, %289 : vector<8x128xf32>
    %291 = arith.index_cast %285 : i32 to index
    %c0_140 = arith.constant 0 : index
    %292 = vector.load %arg6[%291, %c0_140] : memref<96x128xf32, #tpu.memory_space<vmem>>, vector<8x128xf32>
    tpu.vector_store %arg6[%291, %c0_140], %290 {strides = array<i32>} : memref<96x128xf32, #tpu.memory_space<vmem>>, vector<8x128xf32>,
    %c8_i32_141 = arith.constant 8 : i32
    %c8_i32_142 = arith.constant 8 : i32
    %293 = arith.muli %c8_i32_141, %c8_i32_142 : i32
    %294 = tpu.assume_multiple %293, 8 : i32
    %295 = arith.index_cast %294 : i32 to index
    %c0_143 = arith.constant 0 : index
    %296 = vector.load %arg6[%295, %c0_143] : memref<96x128xf32, #tpu.memory_space<vmem>>, vector<8x128xf32>
    %cst_144 = arith.constant 8.000000e-01 : f32
    %297 = vector.broadcast %cst_144 : f32 to vector<8x128xf32>
    %298 = arith.mulf %297, %290 : vector<8x128xf32>
    %299 = arith.addf %296, %298 : vector<8x128xf32>
    %300 = arith.index_cast %294 : i32 to index
    %c0_145 = arith.constant 0 : index
    %301 = vector.load %arg6[%300, %c0_145] : memref<96x128xf32, #tpu.memory_space<vmem>>, vector<8x128xf32>
    tpu.vector_store %arg6[%300, %c0_145], %299 {strides = array<i32>} : memref<96x128xf32, #tpu.memory_space<vmem>>, vector<8x128xf32>,
    %c9_i32_146 = arith.constant 9 : i32
    %c8_i32_147 = arith.constant 8 : i32
    %302 = arith.muli %c9_i32_146, %c8_i32_147 : i32
    %303 = tpu.assume_multiple %302, 8 : i32
    %304 = arith.index_cast %303 : i32 to index
    %c0_148 = arith.constant 0 : index
    %305 = vector.load %arg6[%304, %c0_148] : memref<96x128xf32, #tpu.memory_space<vmem>>, vector<8x128xf32>
    %cst_149 = arith.constant 8.000000e-01 : f32
    %306 = vector.broadcast %cst_149 : f32 to vector<8x128xf32>
    %307 = arith.mulf %306, %299 : vector<8x128xf32>
    %308 = arith.addf %305, %307 : vector<8x128xf32>
    %309 = arith.index_cast %303 : i32 to index
    %c0_150 = arith.constant 0 : index
    %310 = vector.load %arg6[%309, %c0_150] : memref<96x128xf32, #tpu.memory_space<vmem>>, vector<8x128xf32>
    tpu.vector_store %arg6[%309, %c0_150], %308 {strides = array<i32>} : memref<96x128xf32, #tpu.memory_space<vmem>>, vector<8x128xf32>,
    %c10_i32_151 = arith.constant 10 : i32
    %c8_i32_152 = arith.constant 8 : i32
    %311 = arith.muli %c10_i32_151, %c8_i32_152 : i32
    %312 = tpu.assume_multiple %311, 8 : i32
    %313 = arith.index_cast %312 : i32 to index
    %c0_153 = arith.constant 0 : index
    %314 = vector.load %arg6[%313, %c0_153] : memref<96x128xf32, #tpu.memory_space<vmem>>, vector<8x128xf32>
    %cst_154 = arith.constant 8.000000e-01 : f32
    %315 = vector.broadcast %cst_154 : f32 to vector<8x128xf32>
    %316 = arith.mulf %315, %308 : vector<8x128xf32>
    %317 = arith.addf %314, %316 : vector<8x128xf32>
    %318 = arith.index_cast %312 : i32 to index
    %c0_155 = arith.constant 0 : index
    %319 = vector.load %arg6[%318, %c0_155] : memref<96x128xf32, #tpu.memory_space<vmem>>, vector<8x128xf32>
    tpu.vector_store %arg6[%318, %c0_155], %317 {strides = array<i32>} : memref<96x128xf32, #tpu.memory_space<vmem>>, vector<8x128xf32>,
    %c11_i32_156 = arith.constant 11 : i32
    %c8_i32_157 = arith.constant 8 : i32
    %320 = arith.muli %c11_i32_156, %c8_i32_157 : i32
    %321 = tpu.assume_multiple %320, 8 : i32
    %322 = arith.index_cast %321 : i32 to index
    %c0_158 = arith.constant 0 : index
    %323 = vector.load %arg6[%322, %c0_158] : memref<96x128xf32, #tpu.memory_space<vmem>>, vector<8x128xf32>
    %cst_159 = arith.constant 8.000000e-01 : f32
    %324 = vector.broadcast %cst_159 : f32 to vector<8x128xf32>
    %325 = arith.mulf %324, %317 : vector<8x128xf32>
    %326 = arith.addf %323, %325 : vector<8x128xf32>
    %327 = arith.index_cast %321 : i32 to index
    %c0_160 = arith.constant 0 : index
    %328 = vector.load %arg6[%327, %c0_160] : memref<96x128xf32, #tpu.memory_space<vmem>>, vector<8x128xf32>
    tpu.vector_store %arg6[%327, %c0_160], %326 {strides = array<i32>} : memref<96x128xf32, #tpu.memory_space<vmem>>, vector<8x128xf32>,
    %c12_i32_161 = arith.constant 12 : i32
    %c0_162 = arith.constant 0 : index
    %c0_163 = arith.constant 0 : index
    %329 = vector.load %arg8[%c0_162, %c0_163] : memref<8x128xf32, #tpu.memory_space<vmem>>, vector<8x128xf32>
    tpu.vector_store %arg8[%c0_162, %c0_163], %326 {strides = array<i32>} : memref<8x128xf32, #tpu.memory_space<vmem>>, vector<8x128xf32>,
    return
  }
  func.func @transform_0(%arg0: i32) -> (i32, i32) {
    %c0_i32 = arith.constant 0 : i32
    %c0_i32_0 = arith.constant 0 : i32
    %c0_i32_1 = arith.constant 0 : i32
    return %c0_i32, %c0_i32_0 : i32, i32
  }
  func.func @transform_1(%arg0: i32) -> (i32, i32) {
    %c0_i32 = arith.constant 0 : i32
    %c0_i32_0 = arith.constant 0 : i32
    %c0_i32_1 = arith.constant 0 : i32
    return %c0_i32, %c0_i32_0 : i32, i32
  }
  func.func @transform_2(%arg0: i32) -> (i32, i32) {
    %c0_i32 = arith.constant 0 : i32
    %c0_i32_0 = arith.constant 0 : i32
    %c0_i32_1 = arith.constant 0 : i32
    return %c0_i32, %c0_i32_0 : i32, i32
  }
  func.func @transform_3(%arg0: i32) -> (i32, i32, i32) {
    %c0_i32 = arith.constant 0 : i32
    %c0_i32_0 = arith.constant 0 : i32
    %c0_i32_1 = arith.constant 0 : i32
    return %arg0, %c0_i32, %c0_i32_0 : i32, i32, i32
  }
  func.func @transform_4(%arg0: i32) -> (i32, i32) {
    %c0_i32 = arith.constant 0 : i32
    %c0_i32_0 = arith.constant 0 : i32
    return %arg0, %c0_i32 : i32, i32
  }
  func.func @transform_5(%arg0: i32) -> (i32, i32) {
    %c0_i32 = arith.constant 0 : i32
    %c0_i32_0 = arith.constant 0 : i32
    return %arg0, %c0_i32 : i32, i32
  }
}

</mosaic_0001>

<bundles_post_ra>
// kernel: custom-call.8
= control target key start
LH: loop header
LB: loop body
LE: loop exit
PB: predicated region body
PF: predicated region fallthrough
CT: control target
= control target key end

     0   :  { %5 = vsyncpa [#allocation4], 0  ;;  %s878_s0 = inlined_call_operand.vmem [shape: f32[9,9], index: 0, kind: input, shape index: {}]   ;;  %s879_s1 = inlined_call_operand.vmem [shape: f32[9,9], index: 1, kind: output, shape index: {0}]   ;;  %s880_s2 = inlined_call_operand.hbm [shape: s32[9], index: 2, kind: output, shape index: {1}]   ;;  %s881_s3 = inlined_call_operand.vmem [shape: s32[9], index: 3, kind: output, shape index: {2}]  }
   0x1   :  { %s19_s14 = scalar_lea.vmem %s878_s0, 8 }
   0x2   :  { %p454_p0 = scmp.gt.s32.totalorder %s878_s0, %s19_s14 }
   0x3   :  { %s747_s17 = smov (!%p454_p0), [#allocation0]   ;;  %s751_s20 = smov (!%p454_p0), %s878_s0  }
   0x4   :  { %455 = sbr.rel (%p454_p0) target bundleno = 21 (0x15), region = 157 }
   0xb LB: > { %v53_v0 = vld [vmem:[%s753_s20] sm:$0xff]  ;;  %s55_s20 = scalar_lea.vmem %s753_s20, 8   ;;  %s753_s20 = sphi %s751_s20, %s55_s20   ;;  %s749_s17 = sphi %s747_s17, %s56_s17  }
   0xc   : > { %54 = vst [vmem:[%s749_s17] sm:$0xff] %v53_v0  ;;  %s56_s17 = scalar_lea.vmem %s749_s17, 8   ;;  %p50_p1 = scmp.gt.s32.totalorder %s55_s20, %s19_s14 }
   0xe   :  { %52 = sbr.rel (!%p50_p1) target bundleno = 11 (0xb), region = 163 }
  0x15 PF:  { %v68_v1 = vld [vmem:[#allocation0] sm:$0xff]  ;;  %v72_v2 = vld [vmem:[#allocation0 + $0x8] sm:$0xff]  ;;  %v75_v3 = vlaneseq  ;;  %v771_v4 = vmov 0   ;;  %s755_s0 = smov 0  }
  0x16   :  { %69 = vst [vmem:[#allocation1] sm:$0xff] %v68_v1  ;;  %73 = vst [vmem:[#allocation1 + $0x8] sm:$0xff] %v72_v2 }
  0x17   :  { %74 = vst [vmem:[#allocation2] sm:$0x1] %v771_v4  ;;  %v803_v5 = vshrl.u32 %v75_v3, 7 }
  0x18 LB: > { %s512_s21 = sshll.u32 %s757_s0, 3  ;;  %s83_s0 = sadd.s32 1, %s757_s0   ;;  %s757_s0 = sphi %s755_s0, %s83_s0  }
  0x19   : > { %v87_v6 = vstv %s512_s21  ;;  %s85_s22 = scalar_lea.vmem [#allocation7], %s512_s21  ;;  %p80_p2 = scmp.ge.s32.totalorder %s83_s0, 2  }
  0x1a   : > { %v88_v7 = vadd.s32 %v87_v6, %v803_v5  ;;  %s806_s23 = smov (%p80_p2), 0  }
  0x1b   :  { %82 = sbr.rel (!%p80_p2) target bundleno = 24 (0x18), region = 174 }
  0x1c   : > { %89 = vst [vmem:[%s85_s22] sm:$0xff] %v88_v7 }
  0x22 LB: > { %v100_v8 = vld [vmem:[#allocation1] sm:$0xff]  ;;  %v112_v9 = vld [vmem:[#allocation1 + $0x8] sm:$0xff]  ;;  %v812_v10 = vadd.s32 8, %v803_v5  ;;  %v815_v12 = vstv %s761_s23  ;;  %s158_s24 = ssub.s32 128, %s761_s23  ;;  %v164_v45 = vand.u32 127, %v75_v3  ;;  %s170_s25 = scalar_lea.vmem [#allocation1], %s761_s23  ;;  %s761_s23 = sphi %s806_s23, %s95_s23  }
  0x23   : > { %v101_v11 = vand.u32 2147483647, %v100_v8  ;;  %v113_v13 = vand.u32 2147483647, %v112_v9  ;;  %vm104_vm1 = vcmp.ge.s32.totalorder %v803_v5, %v815_v12  ;;  %v167_v48 = vld [vmem:[#allocation2] ss:$0 sm:$0xff] }
  0x24   : > { %vm117_vm0 = vcmp.lt.s32.totalorder %v812_v10, 9  ;;  %vm116_vm3 = vcmp.ge.s32.totalorder %v812_v10, %v815_v12  ;;  %vm188_vm15 = vcmp.gt.s32.totalorder %v164_v45, %v815_v12  ;;  %v172_v49 = vld [vmem:[%s170_s25] ss:$0 sm:$0xff]  ;;  %s176_s27 = scalar_lea.vmem [#allocation7], %s761_s23  ;;  %s95_s23 = sadd.s32 1, %s761_s23  }
  0x25   : > { %vm514_vm2 = vcmp.gt.f32.partialorder %v101_v11, -inf  ;;  %vm118_vm5 = vmand %vm116_vm3, %vm117_vm0  ;;  %vm211_vm0 = vcmp.gt.s32.totalorder %v812_v10, %v815_v12  ;;  %v178_v50 = vld [vmem:[%s176_s27] ss:$0 sm:$0xff]  ;;  %p92_p3 = scmp.ge.s32.totalorder %s95_s23, 9  }
  0x26   : > { %vm108_vm4 = vmand %vm104_vm1, %vm514_vm2  ;;  %vm165_vm1 = vcmp.eq.s32.totalorder %v164_v45, %v815_v12  ;;  %s763_s5 = smov (%p92_p3), %s879_s1   ;;  %s767_s6 = smov (%p92_p3), [#allocation1]  }
  0x27   : > { %v109_v14 = vsel %vm108_vm4, %v803_v5, %v815_v12  ;;  %v110_v15 = vsel %vm108_vm4, %v101_v11, -inf  ;;  %vm836_vm2 = vmand %vm211_vm0, %vm165_vm1  ;;  %vm196_vm4 = vcmp.gt.s32.totalorder %v803_v5, %v815_v12 }
  0x28   : > { %vm119_vm6 = vcmp.lt.f32.partialorder %v110_v15, %v113_v13 }
  0x29   : > { %vm120_vm7 = vmand %vm118_vm5, %vm119_vm6 }
  0x2a   : > { %v121_v16 = vsel %vm120_vm7, %v812_v10, %v109_v14  ;;  %v122_v17 = vsel %vm120_vm7, %v113_v13, %v110_v15  ;;  %vm200_vm6 = vmand %vm196_vm4, %vm165_vm1 }
  0x2b   : > { %v123_v18 = vrot.slane %v122_v17, 1  ;;  %v124_v19 = vrot.slane %v121_v16, 1 }
  0x2d   : > { %vm125_vm8 = vcmp.ge.f32.partialorder %v123_v18, %v122_v17  ;;  %v128_v20 = vrot.slane %v123_v18, 1  ;;  %v129_v21 = vrot.slane %v124_v19, 1 }
  0x2e   : > { %v126_v22 = vsel %vm125_vm8, %v123_v18, %v122_v17  ;;  %v127_v23 = vsel %vm125_vm8, %v124_v19, %v121_v16 }
  0x2f   : > { %vm130_vm9 = vcmp.ge.f32.partialorder %v128_v20, %v126_v22  ;;  %v133_v24 = vrot.slane %v128_v20, 1  ;;  %v134_v25 = vrot.slane %v129_v21, 1 }
  0x30   : > { %v131_v26 = vsel %vm130_vm9, %v128_v20, %v126_v22  ;;  %v132_v27 = vsel %vm130_vm9, %v129_v21, %v127_v23 }
  0x31   : > { %vm135_vm10 = vcmp.ge.f32.partialorder %v133_v24, %v131_v26  ;;  %v138_v28 = vrot.slane %v133_v24, 1  ;;  %v139_v29 = vrot.slane %v134_v25, 1 }
  0x32   : > { %v136_v30 = vsel %vm135_vm10, %v133_v24, %v131_v26  ;;  %v137_v31 = vsel %vm135_vm10, %v134_v25, %v132_v27 }
  0x33   : > { %vm140_vm11 = vcmp.ge.f32.partialorder %v138_v28, %v136_v30  ;;  %v143_v32 = vrot.slane %v138_v28, 1  ;;  %v144_v33 = vrot.slane %v139_v29, 1 }
  0x34   : > { %v141_v34 = vsel %vm140_vm11, %v138_v28, %v136_v30  ;;  %v142_v35 = vsel %vm140_vm11, %v139_v29, %v137_v31 }
  0x35   : > { %vm145_vm12 = vcmp.ge.f32.partialorder %v143_v32, %v141_v34  ;;  %v148_v36 = vrot.slane %v143_v32, 1  ;;  %v149_v37 = vrot.slane %v144_v33, 1 }
  0x36   : > { %v146_v38 = vsel %vm145_vm12, %v143_v32, %v141_v34  ;;  %v147_v39 = vsel %vm145_vm12, %v144_v33, %v142_v35 }
  0x37   : > { %vm150_vm13 = vcmp.ge.f32.partialorder %v148_v36, %v146_v38  ;;  %v153_v40 = vrot.slane %v148_v36, 1  ;;  %v154_v41 = vrot.slane %v149_v37, 1 }
  0x38   : > { %v151_v42 = vsel %vm150_vm13, %v148_v36, %v146_v38  ;;  %v152_v43 = vsel %vm150_vm13, %v149_v37, %v147_v39 }
  0x39   : > { %vm155_vm14 = vcmp.ge.f32.partialorder %v153_v40, %v151_v42 }
  0x3a   : > { %v157_v44 = vsel %vm155_vm14, %v154_v41, %v152_v43 }
  0x3b   : > { %159 = vrot.lane.b32.xlu0 %v157_v44, %s158_s24 }
  0xad   : > { %v160_v47 = vpop.permute.xlu0 %159 }
  0xae   : > { %522 = vpush %v160_v47 }
  0xdf   : > { %s523_s26 = spop %522 }
  0xe0   : > { %v166_v51 = vstv %s523_s26  ;;  %s171_s28 = scalar_lea.vmem [#allocation1], %s523_s26  ;;  %s177_s29 = scalar_lea.vmem [#allocation7], %s523_s26 }
  0xe1   : > { %v168_v52 = vsel %vm165_vm1, %v166_v51, %v167_v48  ;;  %v173_v53 = vld [vmem:[%s171_s28] ss:$0 sm:$0xff] }
  0xe2   : > { %v179_v54 = vld [vmem:[%s177_s29] ss:$0 sm:$0xff]  ;;  %169 = vst [vmem:[#allocation2] sm:$0x1] %v168_v52  ;;  %174 = vst [vmem:[%s171_s28] sm:$0x1] %v172_v49  ;;  %vm182_vm3 = vcmp.ne.f32.partialorder %v173_v53, 0.0 }
  0xe3   : > { %180 = vst [vmem:[%s177_s29] sm:$0x1] %v178_v50  ;;  %175 = vst [vmem:[%s170_s25] sm:$0x1] %v173_v53  ;;  %v189_v2 = vsel %vm188_vm15, %v173_v53, 0.0 }
  0xe4   : > { %181 = vst [vmem:[%s176_s27] sm:$0x1] %v179_v54  ;;  %vm183_vm5 = vmand %vm165_vm1, %vm182_vm3 }
  0xe5   : > { %v184_v55 = vsel %vm183_vm5, %v173_v53, 1.0 }
  0xe6   : > { %v212_v56 = vsel %vm211_vm0, %v184_v55, 1.0  ;;  %v197_v57 = vsel %vm196_vm4, %v184_v55, 1.0 }
  0xe7   : > { %655 = vrcp.f32 %v212_v56 }
  0xe8   : > { %657 = vrcp.f32 %v197_v57 }
  0xe9   :  { %v275_v12 = vld [vmem:[#allocation2] sm:$0x1] (%p92_p3) }
  0xea   : > { %v208_v59 = vld [vmem:[#allocation1 + $0x8] sm:$0xff]  ;;  %v193_v62 = vld [vmem:[#allocation1] sm:$0xff]  ;;  %277 = vst [vmem:[#allocation3] sm:$0x1] (%p92_p3), %v275_v12 }
  0xeb   :  { %v222_v11 = vld [vmem:[#allocation7] sm:$0xff] (%p92_p3)  ;;  %v224_v13 = vld [vmem:[#allocation7 + $0x8] sm:$0xff] (%p92_p3) }
  0xf1   : > { %v656_v58 = vpop.eup %655 }
  0xf2   : > { %v658_v60 = vpop.eup %657  ;;  %v214_v61 = vmul.f32 %v656_v58, %v208_v59 }
  0xf3   : > { %v199_v63 = vmul.f32 %v658_v60, %v193_v62 }
  0xf4   : > { %v216_v0 = vsel %vm836_vm2, %v214_v61, 0.0 }
  0xf5   : > { %217 = vadd.xlane.f32.xlu1 %v216_v0  ;;  %v201_v1 = vsel %vm200_vm6, %v199_v63, 0.0 }
  0xf6   : > { %202 = vadd.xlane.f32.xlu0 %v201_v1 }
 0x123   :  { %239 = vxpose.xlu0.b32.start [1/2] (short) (narrow) (%p92_p3), %v222_v11, 8 }
 0x127   :  { %240 = vxpose.xlu0.b32.end [2/2] (short) (narrow) (%p92_p3), %v224_v13, 8 }
 0x182   : > { %v218_v4 = vpop.xlane.xlu1 %217  ;;  %94 = sbr.rel (!%p92_p3) target bundleno = 34 (0x22), region = 185 }
 0x183   : > { %v219_v6 = vmul.f32 %v218_v4, %v189_v2  ;;  %v203_v7 = vpop.xlane.xlu0 %202 }
 0x184   : > { %v204_v8 = vmul.f32 %v203_v7, %v189_v2 }
 0x185   : > { %v220_v9 = vsub.f32 %v214_v61, %v219_v6 }
 0x186   : > { %v205_v10 = vsub.f32 %v199_v63, %v204_v8 }
 0x187   : > { %221 = vst [vmem:[#allocation1 + $0x8] sm:$0xff] %v220_v9 }
 0x188   : > { %206 = vst [vmem:[#allocation1] sm:$0xff] %v205_v10 }
 0x1a3   :  { %v255_v14 = vpop.trf.xlu0 }
 0x1a4   :  { %271 = vst [vmem:[#allocation5] sm:$0x1] %v255_v14 }
 0x1ab   :  { %v281_v15 = vld [vmem:[#allocation5] sm:$0x1] }
 0x1ac   :  { %283 = vst [vmem:[#allocation6] sm:$0x1] %v281_v15 }
 0x1ad LB: > { %v331_v16 = vld [vmem:[%s769_s6] sm:$0xff]  ;;  %s333_s6 = scalar_lea.vmem %s769_s6, 8   ;;  %s769_s6 = sphi %s767_s6, %s333_s6   ;;  %s765_s5 = sphi %s763_s5, %s334_s5  }
 0x1ae   : > { %332 = vst [vmem:[%s765_s5] sm:$0xff] %v331_v16  ;;  %s334_s5 = scalar_lea.vmem %s765_s5, 8   ;;  %p328_p4 = scmp.gt.s32.totalorder %s333_s6, [#allocation1 + $0x8] }
 0x1af   :  { %s772_s7 = smov (%p328_p4), [#allocation3]  }
 0x1b0   :  { %330 = sbr.rel (!%p328_p4) target bundleno = 429 (0x1ad), region = 207  ;;  %s351_s8 = sshll.u32 (%p328_p4), %s772_s7, 4  ;;  %s352_s8 = int_to_ptr.vmem [resolvable:$true] %s351_s8 }
 0x1b1   :  { %s659_s1 = scalar_lea.vmem (%p328_p4), %s352_s8, 16  ;;  %s663_s11 = scalar_lea.vmem (%p328_p4), %s352_s8, 32 }
 0x1b2   :  { %p660_p5 = scmp.ne.s32.totalorder (%p328_p4), %s352_s8, %s659_s1  ;;  %p664_p6 = scmp.lt.s32.totalorder (%p328_p4), %s352_s8, %s352_s8 }
 0x1b3   :  { %v417_v3 = vld [vmem:[#allocation6] sm:$0x1] (%p328_p4)  ;;  %p665_p7 = scmp.lt.s32.totalorder (%p328_p4), %s663_s11, %s659_s1 }
 0x1b4   :  { %418 = vst [vmem:[%s881_s3] sm:$0x1] (%p328_p4), %v417_v3 }
 0x1b5   :  { %p666_p8 = por (%p328_p4), %p665_p7, %p664_p6 }
 0x1b7   :  { %p667_p9 = pnand %p666_p8, %p660_p5 }
 0x1b9   :  { %670 = shalt.err (!%p667_p9)
}
 0x1ba   :  { %s671_s14 = scalar_lea.hbm %s880_s2, 16 }
 0x1bb   :  { %p672_p10 = scmp.ne.s32.totalorder %s880_s2, %s671_s14  ;;  %p675_p11 = scmp.lt.u32.totalorder %s671_s14, %s880_s2 }
 0x1bd   :  { %p677_p12 = pnand %p675_p11, %p672_p10 }
 0x1bf   :  { %680 = shalt.err (!%p677_p12)
}
 0x1c0   :  { %354 = dma.vmem_to_hbm [thread:$0]  %s352_s8, 16, %s880_s2, [#allocation4]  }
 0x1c1   :  { %745 = dma.done.wait [#allocation4], 16  }
 0x1c2   :  { %746 = vsyncadd [#allocation4], 4294967280 }
 0x1c3   :  { %424 = vsyncpa [#allocation4], 1 }

// kernel: custom-call.9
= control target key start
LH: loop header
LB: loop body
LE: loop exit
PB: predicated region body
PF: predicated region fallthrough
CT: control target
= control target key end

     0   :  { %v38_v0 = vlaneseq  ;;  %v261_v10 = vmov -1.0   ;;  %v262_v14 = vmov 0.0   ;;  %s314_s0 = inlined_call_operand.vmem [shape: f32[1,9,9], index: 0, kind: input, shape index: {}]   ;;  %s315_s1 = inlined_call_operand.vmem [shape: f32[1,9,9], index: 1, kind: output, shape index: {}]  }
   0x1   :  { %v31_v1 = vld [vmem:[%s314_s0] sm:$0xff] }
   0x2   :  { %v276_v2 = vand.u32 127, %v38_v0  ;;  %v42_v3 = vshrl.u32 %v38_v0, 7 }
   0x4   :  { %vm40_vm0 = vcmp.lt.s32.totalorder %v276_v2, 9  ;;  %vm44_vm1 = vcmp.eq.s32.totalorder %v42_v3, %v276_v2  ;;  %vm49_vm2 = vcmp.le.s32.totalorder %v42_v3, %v276_v2  ;;  %v287_v9 = vadd.s32 8, %v42_v3 }
   0x5   :  { %v46_v4 = vsel %vm44_vm1, %v31_v1, 0.0  ;;  %vm50_vm3 = vmand %vm49_vm2, %vm40_vm0  ;;  %vm86_vm4 = vcmp.eq.s32.totalorder %v276_v2, 8  ;;  %vm76_vm6 = vcmp.eq.s32.totalorder %v276_v2, %v42_v3  ;;  %vm94_vm7 = vcmp.eq.s32.totalorder %v276_v2, 7 }
   0x6   :  { %v51_v5 = vsel %vm50_vm3, %v31_v1, 0.0  ;;  %47 = vadd.xlane.f32.xlu0 %v46_v4  ;;  %vm83_vm5 = vcmp.eq.s32.totalorder %v276_v2, %v287_v9  ;;  %v87_v11 = vsel %vm86_vm4, 1.0, %v261_v10  ;;  %v77_v15 = vsel %vm76_vm6, -1.0, %v262_v14  ;;  %v33_v4 = vld [vmem:[%s314_s0 + $0x8] sm:$0xff] }
   0x7   :  { %v88_v12 = vsel %vm83_vm5, %v87_v11, 0.0  ;;  %vm108_vm8 = vcmp.eq.s32.totalorder %v276_v2, 6  ;;  %vm122_vm9 = vcmp.eq.s32.totalorder %v276_v2, 5  ;;  %vm136_vm10 = vcmp.eq.s32.totalorder %v276_v2, 4 }
   0x8   :  { %vm150_vm11 = vcmp.eq.s32.totalorder %v276_v2, 3  ;;  %vm164_vm12 = vcmp.eq.s32.totalorder %v276_v2, 2  ;;  %vm60_vm13 = vcmp.eq.s32.totalorder %v287_v9, %v276_v2  ;;  %vm178_vm14 = vcmp.eq.s32.totalorder %v276_v2, 1 }
   0x9   :  { %vm191_vm15 = vcmp.eq.s32.totalorder %v276_v2, 0 }
  0x93   :  { %v281_v6 = vpop.xlane.xlu0 %47 }
  0x94   :  { %257 = vrcp.f32 %v281_v6  ;;  %vm202_vm0 = vweird.f32 %v281_v6 }
  0x9e   :  { %v284_v7 = vpop.eup %257 }
  0x9f   :  { %v53_v8 = vmul.f32 %v284_v7, %v51_v5  ;;  %v62_v5 = vsel %vm60_vm13, %v33_v4, 0.0 }
  0xa1   :  { %54 = vst [vmem:[#allocation2] sm:$0xff] %v53_v8 }
  0xa8   :  { %v90_v13 = vld [vmem:[#allocation2 + $0x7] ss:$0 sm:$0xff]  ;;  %v104_v19 = vld [vmem:[#allocation2 + $0x6] ss:$0 sm:$0xff]  ;;  %v118_v27 = vld [vmem:[#allocation2 + $0x5] ss:$0 sm:$0xff] }
  0xa9   :  { %v91_v16 = vxor.u32 2147483648, %v90_v13  ;;  %v105_v22 = vxor.u32 2147483648, %v104_v19  ;;  %v119_v30 = vxor.u32 2147483648, %v118_v27  ;;  %v132_v35 = vld [vmem:[#allocation2 + $0x4] ss:$0 sm:$0xff] }
  0xaa   :  { %v133_v38 = vxor.u32 2147483648, %v132_v35  ;;  %v146_v43 = vld [vmem:[#allocation2 + $0x3] ss:$0 sm:$0xff]  ;;  %v160_v51 = vld [vmem:[#allocation2 + $0x2] ss:$0 sm:$0xff] }
  0xab   :  { %v99_v17 = vmul.f32 %v91_v16, %v88_v12  ;;  %v95_v18 = vmul.f32 %v91_v16, %v77_v15  ;;  %v147_v46 = vxor.u32 2147483648, %v146_v43  ;;  %v161_v54 = vxor.u32 2147483648, %v160_v51  ;;  %v174_v59 = vld [vmem:[#allocation2 + $0x1] ss:$0 sm:$0xff]  ;;  %v187_v8 = vld [vmem:[#allocation2] ss:$0 sm:$0xff] }
  0xac   :  { %v175_v62 = vxor.u32 2147483648, %v174_v59 }
  0xad   :  { %100 = vadd.xlane.f32.xlu1 %v99_v17  ;;  %96 = vadd.xlane.f32.xlu0 %v95_v18 }
 0x13a   :  { %v101_v20 = vpop.xlane.xlu1 %100  ;;  %v97_v21 = vpop.xlane.xlu0 %96 }
 0x13b   :  { %v102_v23 = vsel %vm94_vm7, %v101_v20, %v88_v12  ;;  %v98_v24 = vsel %vm94_vm7, %v97_v21, %v77_v15  ;;  %v188_v12 = vxor.u32 2147483648, %v187_v8 }
 0x13c   :  { %v113_v25 = vmul.f32 %v105_v22, %v102_v23  ;;  %v109_v26 = vmul.f32 %v105_v22, %v98_v24 }
 0x13e   :  { %114 = vadd.xlane.f32.xlu0 %v113_v25  ;;  %110 = vadd.xlane.f32.xlu1 %v109_v26 }
 0x1cb   :  { %v111_v28 = vpop.xlane.xlu1 %110  ;;  %v115_v29 = vpop.xlane.xlu0 %114 }
 0x1cc   :  { %v112_v31 = vsel %vm108_vm8, %v111_v28, %v98_v24  ;;  %v116_v32 = vsel %vm108_vm8, %v115_v29, %v102_v23 }
 0x1cd   :  { %v123_v33 = vmul.f32 %v119_v30, %v112_v31  ;;  %v127_v34 = vmul.f32 %v119_v30, %v116_v32 }
 0x1cf   :  { %124 = vadd.xlane.f32.xlu1 %v123_v33  ;;  %128 = vadd.xlane.f32.xlu0 %v127_v34 }
 0x25c   :  { %v125_v36 = vpop.xlane.xlu1 %124  ;;  %v129_v37 = vpop.xlane.xlu0 %128 }
 0x25d   :  { %v126_v39 = vsel %vm122_vm9, %v125_v36, %v112_v31  ;;  %v130_v40 = vsel %vm122_vm9, %v129_v37, %v116_v32 }
 0x25e   :  { %v137_v41 = vmul.f32 %v133_v38, %v126_v39  ;;  %v141_v42 = vmul.f32 %v133_v38, %v130_v40 }
 0x260   :  { %138 = vadd.xlane.f32.xlu1 %v137_v41  ;;  %142 = vadd.xlane.f32.xlu0 %v141_v42 }
 0x2ed   :  { %v139_v44 = vpop.xlane.xlu1 %138  ;;  %v143_v45 = vpop.xlane.xlu0 %142 }
 0x2ee   :  { %v140_v47 = vsel %vm136_vm10, %v139_v44, %v126_v39  ;;  %v144_v48 = vsel %vm136_vm10, %v143_v45, %v130_v40 }
 0x2ef   :  { %v151_v49 = vmul.f32 %v147_v46, %v140_v47  ;;  %v155_v50 = vmul.f32 %v147_v46, %v144_v48 }
 0x2f1   :  { %152 = vadd.xlane.f32.xlu1 %v151_v49  ;;  %156 = vadd.xlane.f32.xlu0 %v155_v50 }
 0x37e   :  { %v153_v52 = vpop.xlane.xlu1 %152  ;;  %v157_v53 = vpop.xlane.xlu0 %156 }
 0x37f   :  { %v154_v55 = vsel %vm150_vm11, %v153_v52, %v140_v47  ;;  %v158_v56 = vsel %vm150_vm11, %v157_v53, %v144_v48 }
 0x380   :  { %v165_v57 = vmul.f32 %v161_v54, %v154_v55  ;;  %v169_v58 = vmul.f32 %v161_v54, %v158_v56 }
 0x382   :  { %166 = vadd.xlane.f32.xlu1 %v165_v57  ;;  %170 = vadd.xlane.f32.xlu0 %v169_v58 }
 0x40f   :  { %v167_v60 = vpop.xlane.xlu1 %166  ;;  %v171_v61 = vpop.xlane.xlu0 %170 }
 0x410   :  { %v168_v63 = vsel %vm164_vm12, %v167_v60, %v154_v55  ;;  %v172_v0 = vsel %vm164_vm12, %v171_v61, %v158_v56 }
 0x411   :  { %v179_v1 = vmul.f32 %v175_v62, %v168_v63  ;;  %v183_v3 = vmul.f32 %v175_v62, %v172_v0 }
 0x413   :  { %180 = vadd.xlane.f32.xlu1 %v179_v1  ;;  %184 = vadd.xlane.f32.xlu0 %v183_v3 }
 0x417   :  { %63 = vadd.xlane.f32.xlu1 %v62_v5 }
 0x4a0   :  { %v181_v10 = vpop.xlane.xlu1 %180  ;;  %v185_v11 = vpop.xlane.xlu0 %184 }
 0x4a1   :  { %v182_v13 = vsel %vm178_vm14, %v181_v10, %v168_v63  ;;  %v186_v14 = vsel %vm178_vm14, %v185_v11, %v172_v0 }
 0x4a2   :  { %v192_v15 = vmul.f32 %v188_v12, %v182_v13  ;;  %v196_v16 = vmul.f32 %v188_v12, %v186_v14 }
 0x4a4   :  { %193 = vadd.xlane.f32.xlu0 %v192_v15  ;;  %197 = vadd.xlane.f32.xlu1 %v196_v16  ;;  %v64_v17 = vpop.xlane.xlu1 %63 }
 0x4a5   :  { %259 = vrcp.f32 %v64_v17  ;;  %vm207_vm1 = vweird.f32 %v64_v17 }
 0x4af   :  { %v260_v18 = vpop.eup %259 }
 0x531   :  { %v198_v9 = vpop.xlane.xlu1 %197  ;;  %v194_v19 = vpop.xlane.xlu0 %193 }
 0x532   :  { %v199_v20 = vsel %vm191_vm15, %v198_v9, %v186_v14  ;;  %v195_v21 = vsel %vm191_vm15, %v194_v19, %v182_v13 }
 0x533   :  { %v206_v22 = vmul.f32 %v260_v18, %v199_v20  ;;  %v201_v23 = vmul.f32 %v284_v7, %v195_v21 }
 0x535   :  { %v208_v24 = vsel %vm207_vm1, %v199_v20, %v206_v22  ;;  %v203_v25 = vsel %vm202_vm0, %v195_v21, %v201_v23 }
 0x536   :  { %243 = vst [vmem:[%s315_s1 + $0x8] sm:$0xff] %v208_v24  ;;  %241 = vst [vmem:[%s315_s1] sm:$0xff] %v203_v25 }

// kernel: custom-call.10
= control target key start
LH: loop header
LB: loop body
LE: loop exit
PB: predicated region body
PF: predicated region fallthrough
CT: control target
= control target key end

     0   :  { %v38_v0 = vlaneseq  ;;  %v234_v9 = vmov -1.0   ;;  %v235_v53 = vmov 0.0   ;;  %s288_s0 = inlined_call_operand.vmem [shape: f32[1,9,9], index: 0, kind: input, shape index: {}]   ;;  %s289_s1 = inlined_call_operand.vmem [shape: f32[1,9,9], index: 1, kind: output, shape index: {}]  }
   0x1   :  { %v31_v1 = vld [vmem:[%s288_s0] sm:$0xff]  ;;  %v33_v36 = vld [vmem:[%s288_s0 + $0x8] sm:$0xff] }
   0x2   :  { %v249_v2 = vand.u32 127, %v38_v0  ;;  %v42_v3 = vshrl.u32 %v38_v0, 7 }
   0x4   :  { %vm44_vm0 = vcmp.eq.s32.totalorder %v42_v3, %v249_v2  ;;  %vm40_vm1 = vcmp.lt.s32.totalorder %v249_v2, 9  ;;  %vm49_vm2 = vcmp.ge.s32.totalorder %v42_v3, %v249_v2  ;;  %vm79_vm4 = vcmp.eq.s32.totalorder %v249_v2, 0 }
   0x5   :  { %v46_v4 = vsel %vm44_vm0, %v31_v1, 0.0  ;;  %vm50_vm3 = vmand %vm49_vm2, %vm40_vm1  ;;  %vm76_vm5 = vcmp.eq.s32.totalorder %v249_v2, %v42_v3  ;;  %v80_v10 = vsel %vm79_vm4, 1.0, %v234_v9  ;;  %vm94_vm6 = vcmp.eq.s32.totalorder %v249_v2, 1 }
   0x6   :  { %47 = vadd.xlane.f32.xlu0 %v46_v4  ;;  %v51_v6 = vsel %vm50_vm3, %v31_v1, 0.0  ;;  %v81_v11 = vsel %vm76_vm5, %v80_v10, 0.0  ;;  %vm104_vm7 = vcmp.eq.s32.totalorder %v249_v2, 2  ;;  %vm114_vm8 = vcmp.eq.s32.totalorder %v249_v2, 3 }
   0x7   :  { %vm124_vm9 = vcmp.eq.s32.totalorder %v249_v2, 4  ;;  %v59_v31 = vadd.s32 8, %v42_v3  ;;  %vm134_vm11 = vcmp.eq.s32.totalorder %v249_v2, 5  ;;  %vm144_vm14 = vcmp.eq.s32.totalorder %v249_v2, 6 }
   0x8   :  { %vm154_vm0 = vcmp.eq.s32.totalorder %v249_v2, 7 }
   0x9   :  { %vm60_vm10 = vcmp.eq.s32.totalorder %v59_v31, %v249_v2  ;;  %vm65_vm12 = vcmp.ge.s32.totalorder %v59_v31, %v249_v2  ;;  %vm87_vm15 = vcmp.eq.s32.totalorder %v249_v2, %v59_v31 }
   0xa   :  { %v62_v37 = vsel %vm60_vm10, %v33_v36, 0.0  ;;  %vm66_vm13 = vmand %vm65_vm12, %vm40_vm1  ;;  %v88_v54 = vsel %vm87_vm15, -1.0, %v235_v53  ;;  %vm164_vm1 = vcmp.eq.s32.totalorder %v249_v2, 8 }
   0xb   :  { %v67_v44 = vsel %vm66_vm13, %v33_v36, 0.0 }
  0x93   :  { %v252_v5 = vpop.xlane.xlu0 %47 }
  0x94   :  { %230 = vrcp.f32 %v252_v5  ;;  %vm175_vm3 = vweird.f32 %v252_v5 }
  0x9e   :  { %v259_v7 = vpop.eup %230 }
  0x9f   :  { %v53_v8 = vmul.f32 %v259_v7, %v51_v6 }
  0xa1   :  { %54 = vst [vmem:[#allocation2] sm:$0xff] %v53_v8 }
  0xa8   :  { %v90_v12 = vld [vmem:[#allocation2 + $0x1] ss:$0 sm:$0xff]  ;;  %v100_v15 = vld [vmem:[#allocation2 + $0x2] ss:$0 sm:$0xff]  ;;  %v110_v20 = vld [vmem:[#allocation2 + $0x3] ss:$0 sm:$0xff] }
  0xa9   :  { %v91_v13 = vxor.u32 2147483648, %v90_v12  ;;  %v101_v17 = vxor.u32 2147483648, %v100_v15  ;;  %v111_v22 = vxor.u32 2147483648, %v110_v20  ;;  %v120_v25 = vld [vmem:[#allocation2 + $0x4] ss:$0 sm:$0xff] }
  0xaa   :  { %v121_v27 = vxor.u32 2147483648, %v120_v25  ;;  %v130_v30 = vld [vmem:[#allocation2 + $0x5] ss:$0 sm:$0xff]  ;;  %v140_v38 = vld [vmem:[#allocation2 + $0x6] ss:$0 sm:$0xff] }
  0xab   :  { %v95_v14 = vmul.f32 %v91_v13, %v81_v11  ;;  %v131_v33 = vxor.u32 2147483648, %v130_v30  ;;  %v141_v40 = vxor.u32 2147483648, %v140_v38  ;;  %v150_v47 = vld [vmem:[#allocation2 + $0x7] ss:$0 sm:$0xff] }
  0xac   :  { %v151_v50 = vxor.u32 2147483648, %v150_v47 }
  0xad   :  { %96 = vadd.xlane.f32.xlu0 %v95_v14 }
 0x13a   :  { %v97_v16 = vpop.xlane.xlu0 %96 }
 0x13b   :  { %v98_v18 = vsel %vm94_vm6, %v97_v16, %v81_v11 }
 0x13c   :  { %v105_v19 = vmul.f32 %v101_v17, %v98_v18 }
 0x13e   :  { %106 = vadd.xlane.f32.xlu1 %v105_v19 }
 0x1cb   :  { %v107_v21 = vpop.xlane.xlu1 %106 }
 0x1cc   :  { %v108_v23 = vsel %vm104_vm7, %v107_v21, %v98_v18 }
 0x1cd   :  { %v115_v24 = vmul.f32 %v111_v22, %v108_v23 }
 0x1cf   :  { %116 = vadd.xlane.f32.xlu1 %v115_v24 }
 0x25c   :  { %v117_v26 = vpop.xlane.xlu1 %116 }
 0x25d   :  { %v118_v28 = vsel %vm114_vm8, %v117_v26, %v108_v23 }
 0x25e   :  { %v125_v29 = vmul.f32 %v121_v27, %v118_v28 }
 0x260   :  { %126 = vadd.xlane.f32.xlu0 %v125_v29 }
 0x2ed   :  { %v127_v32 = vpop.xlane.xlu0 %126 }
 0x2ee   :  { %v128_v34 = vsel %vm124_vm9, %v127_v32, %v118_v28 }
 0x2ef   :  { %v135_v35 = vmul.f32 %v131_v33, %v128_v34 }
 0x2f1   :  { %136 = vadd.xlane.f32.xlu1 %v135_v35 }
 0x2f5   :  { %63 = vadd.xlane.f32.xlu1 %v62_v37 }
 0x37e   :  { %v137_v39 = vpop.xlane.xlu1 %136 }
 0x37f   :  { %v138_v41 = vsel %vm134_vm11, %v137_v39, %v128_v34 }
 0x380   :  { %v145_v42 = vmul.f32 %v141_v40, %v138_v41 }
 0x382   :  { %146 = vadd.xlane.f32.xlu0 %v145_v42  ;;  %v64_v43 = vpop.xlane.xlu1 %63 }
 0x383   :  { %232 = vrcp.f32 %v64_v43  ;;  %vm180_vm2 = vweird.f32 %v64_v43 }
 0x38d   :  { %v233_v45 = vpop.eup %232 }
 0x38e   :  { %v69_v46 = vmul.f32 %v233_v45, %v67_v44 }
 0x390   :  { %70 = vst [vmem:[#allocation2 + $0x8] sm:$0xff] %v69_v46 }
 0x397   :  { %v160_v48 = vld [vmem:[#allocation2 + $0x8] ss:$0 sm:$0xff] }
 0x398   :  { %v161_v51 = vxor.u32 2147483648, %v160_v48 }
 0x39a   :  { %v169_v56 = vmul.f32 %v161_v51, %v88_v54 }
 0x40f   :  { %v147_v49 = vpop.xlane.xlu0 %146 }
 0x410   :  { %v148_v52 = vsel %vm144_vm14, %v147_v49, %v138_v41 }
 0x411   :  { %v155_v55 = vmul.f32 %v151_v50, %v148_v52 }
 0x413   :  { %156 = vadd.xlane.f32.xlu0 %v155_v55 }
 0x417   :  { %170 = vadd.xlane.f32.xlu0 %v169_v56 }
 0x4a0   :  { %v157_v57 = vpop.xlane.xlu0 %156 }
 0x4a1   :  { %v158_v58 = vsel %vm154_vm0, %v157_v57, %v148_v52 }
 0x4a2   :  { %v165_v59 = vmul.f32 %v161_v51, %v158_v58 }
 0x4a4   :  { %v171_v60 = vpop.xlane.xlu0 %170  ;;  %166 = vadd.xlane.f32.xlu1 %v165_v59 }
 0x4a5   :  { %v172_v61 = vsel %vm164_vm1, %v171_v60, %v88_v54 }
 0x4a6   :  { %v179_v62 = vmul.f32 %v233_v45, %v172_v61 }
 0x4a8   :  { %v181_v63 = vsel %vm180_vm2, %v172_v61, %v179_v62 }
 0x4a9   :  { %216 = vst [vmem:[%s289_s1 + $0x8] sm:$0xff] %v181_v63 }
 0x531   :  { %v167_v0 = vpop.xlane.xlu1 %166 }
 0x532   :  { %v168_v1 = vsel %vm164_vm1, %v167_v0, %v158_v58 }
 0x533   :  { %v174_v3 = vmul.f32 %v259_v7, %v168_v1 }
 0x535   :  { %v176_v4 = vsel %vm175_vm3, %v168_v1, %v174_v3 }
 0x536   :  { %214 = vst [vmem:[%s289_s1] sm:$0xff] %v176_v4 }

// kernel: mc_model_forward.1
= control target key start
LH: loop header
LB: loop body
LE: loop exit
PB: predicated region body
PF: predicated region fallthrough
CT: control target
= control target key end

     0   :  { %s9957_s0 = inlined_call_operand.vmem [shape: f32[8,512], index: 0, kind: input, shape index: {}]   ;;  %s9958_s1 = inlined_call_operand.vmem [shape: bf16[512,512], index: 1, kind: input, shape index: {}]   ;;  %s9959_s2 = inlined_call_operand.vmem [shape: bf16[512,128], index: 2, kind: input, shape index: {}]   ;;  %s9960_s3 = inlined_call_operand.vmem [shape: f32[12,1,512], index: 3, kind: input, shape index: {}]   ;;  %s9961_s4 = inlined_call_operand.hbm [shape: f32[96,512], index: 4, kind: output, shape index: {0}]   ;;  %s9962_s5 = inlined_call_operand.vmem [shape: f32[96,128], index: 5, kind: output, shape index: {1}]  }
   0x1   :  { %v5173_v0 = vld [vmem:[%s9958_s1 + $0x4] ss:$16 sps:$4 sm:$0xff]   ;;  %v5178_v1 = vld [vmem:[%s9958_s1 + $0xc] ss:$16 sps:$4 sm:$0xff]   ;;  %v5184_v2 = vld [vmem:[%s9958_s1] ss:$16 sps:$4 sm:$0xff]  }
   0x2   :  { %821 = vmatprep.subr.bf16.mxu0 %v5173_v0  ;;  %v5189_v3 = vld [vmem:[%s9958_s1 + $0x8] ss:$16 sps:$4 sm:$0xff]   ;;  %903 = vmatprep.subr.bf16.mxu1 %v5178_v1  ;;  %v5195_v4 = vld [vmem:[%s9958_s1 + $0x24] ss:$16 sps:$4 sm:$0xff]   ;;  %v5202_v5 = vld [vmem:[%s9958_s1 + $0x2c] ss:$16 sps:$4 sm:$0xff]  }
   0x3   :  { %822 = vmatpush1.bf16.msra.mxu0 %v5184_v2  ;;  %904 = vmatpush1.bf16.msra.mxu1 %v5189_v3  ;;  %v5207_v6 = vld [vmem:[%s9958_s1 + $0x20] ss:$16 sps:$4 sm:$0xff]   ;;  %v5213_v7 = vld [vmem:[%s9958_s1 + $0x28] ss:$16 sps:$4 sm:$0xff]   ;;  %v5219_v8 = vld [vmem:[%s9958_s1 + $0x44] ss:$16 sps:$4 sm:$0xff]  }
   0x4   :  { %823 = vmatprep.subr.bf16.mxu0 %v5195_v4  ;;  %905 = vmatprep.subr.bf16.mxu1 %v5202_v5  ;;  %v5224_v9 = vld [vmem:[%s9958_s1 + $0x4c] ss:$16 sps:$4 sm:$0xff]   ;;  %v5229_v10 = vld [vmem:[%s9958_s1 + $0x40] ss:$16 sps:$4 sm:$0xff]   ;;  %v5234_v11 = vld [vmem:[%s9958_s1 + $0x48] ss:$16 sps:$4 sm:$0xff]  }
   0x5   :  { %v5241_v12 = vld [vmem:[%s9958_s1 + $0x64] ss:$16 sps:$4 sm:$0xff]   ;;  %v5248_v13 = vld [vmem:[%s9958_s1 + $0x6c] ss:$16 sps:$4 sm:$0xff]   ;;  %v5253_v14 = vld [vmem:[%s9958_s1 + $0x60] ss:$16 sps:$4 sm:$0xff]  }
   0x6   :  { %v5260_v15 = vld [vmem:[%s9958_s1 + $0x68] ss:$16 sps:$4 sm:$0xff]   ;;  %v5265_v16 = vld [vmem:[%s9958_s1 + $0x84] ss:$16 sps:$4 sm:$0xff]   ;;  %v5272_v17 = vld [vmem:[%s9958_s1 + $0x8c] ss:$16 sps:$4 sm:$0xff]  }
   0x7   :  { %824 = vmatpush1.bf16.msra.mxu0 %v5207_v6  ;;  %906 = vmatpush1.bf16.msra.mxu1 %v5213_v7  ;;  %v5277_v18 = vld [vmem:[%s9958_s1 + $0x80] ss:$16 sps:$4 sm:$0xff]   ;;  %v5282_v19 = vld [vmem:[%s9958_s1 + $0x88] ss:$16 sps:$4 sm:$0xff]   ;;  %v5289_v20 = vld [vmem:[%s9958_s1 + $0xa4] ss:$16 sps:$4 sm:$0xff]  }
   0x8   :  { %825 = vmatprep.subr.bf16.mxu0 %v5219_v8  ;;  %907 = vmatprep.subr.bf16.mxu1 %v5224_v9  ;;  %v5296_v21 = vld [vmem:[%s9958_s1 + $0xac] ss:$16 sps:$4 sm:$0xff]   ;;  %v5301_v22 = vld [vmem:[%s9958_s1 + $0xa0] ss:$16 sps:$4 sm:$0xff]   ;;  %v5308_v23 = vld [vmem:[%s9958_s1 + $0xa8] ss:$16 sps:$4 sm:$0xff]  }
   0x9   :  { %v5313_v24 = vld [vmem:[%s9958_s1 + $0xc4] ss:$16 sps:$4 sm:$0xff]   ;;  %v5320_v25 = vld [vmem:[%s9958_s1 + $0xcc] ss:$16 sps:$4 sm:$0xff]   ;;  %v5325_v26 = vld [vmem:[%s9958_s1 + $0xc0] ss:$16 sps:$4 sm:$0xff]  }
   0xa   :  { %v5330_v27 = vld [vmem:[%s9958_s1 + $0xc8] ss:$16 sps:$4 sm:$0xff]   ;;  %v5337_v28 = vld [vmem:[%s9958_s1 + $0xe4] ss:$16 sps:$4 sm:$0xff]   ;;  %v5344_v29 = vld [vmem:[%s9958_s1 + $0xec] ss:$16 sps:$4 sm:$0xff]  }
   0xb   :  { %826 = vmatpush1.bf16.msra.mxu0 %v5229_v10  ;;  %908 = vmatpush1.bf16.msra.mxu1 %v5234_v11  ;;  %v5349_v30 = vld [vmem:[%s9958_s1 + $0xe0] ss:$16 sps:$4 sm:$0xff]   ;;  %v5356_v31 = vld [vmem:[%s9958_s1 + $0xe8] ss:$16 sps:$4 sm:$0xff]   ;;  %v5361_v32 = vld [vmem:[%s9958_s1 + $0x104] ss:$16 sps:$4 sm:$0xff]  }
   0xc   :  { %827 = vmatprep.subr.bf16.mxu0 %v5241_v12  ;;  %909 = vmatprep.subr.bf16.mxu1 %v5248_v13  ;;  %v5368_v33 = vld [vmem:[%s9958_s1 + $0x10c] ss:$16 sps:$4 sm:$0xff]   ;;  %v5373_v34 = vld [vmem:[%s9958_s1 + $0x100] ss:$16 sps:$4 sm:$0xff]   ;;  %v5378_v35 = vld [vmem:[%s9958_s1 + $0x108] ss:$16 sps:$4 sm:$0xff]  }
   0xd   :  { %v5385_v36 = vld [vmem:[%s9958_s1 + $0x124] ss:$16 sps:$4 sm:$0xff]   ;;  %v5392_v37 = vld [vmem:[%s9958_s1 + $0x12c] ss:$16 sps:$4 sm:$0xff]   ;;  %v5397_v38 = vld [vmem:[%s9958_s1 + $0x120] ss:$16 sps:$4 sm:$0xff]  }
   0xe   :  { %v5404_v39 = vld [vmem:[%s9958_s1 + $0x128] ss:$16 sps:$4 sm:$0xff]   ;;  %v5409_v40 = vld [vmem:[%s9958_s1 + $0x144] ss:$16 sps:$4 sm:$0xff]   ;;  %v5416_v41 = vld [vmem:[%s9958_s1 + $0x14c] ss:$16 sps:$4 sm:$0xff]  }
   0xf   :  { %828 = vmatpush1.bf16.msra.mxu0 %v5253_v14  ;;  %910 = vmatpush1.bf16.msra.mxu1 %v5260_v15  ;;  %v5421_v42 = vld [vmem:[%s9958_s1 + $0x140] ss:$16 sps:$4 sm:$0xff]   ;;  %v5426_v43 = vld [vmem:[%s9958_s1 + $0x148] ss:$16 sps:$4 sm:$0xff]   ;;  %v5433_v44 = vld [vmem:[%s9958_s1 + $0x164] ss:$16 sps:$4 sm:$0xff]  }
  0x10   :  { %829 = vmatprep.subr.bf16.mxu0 %v5265_v16  ;;  %911 = vmatprep.subr.bf16.mxu1 %v5272_v17  ;;  %v5440_v45 = vld [vmem:[%s9958_s1 + $0x16c] ss:$16 sps:$4 sm:$0xff]   ;;  %v5450_v47 = vld [vmem:[%s9958_s1 + $0x160] ss:$16 sps:$4 sm:$0xff]   ;;  %v5458_v49 = vld [vmem:[%s9958_s1 + $0x168] ss:$16 sps:$4 sm:$0xff]  }
  0x11   :  { %v5445_v46 = vld [vmem:[%s9957_s0 + $0x8] sm:$0xff]  ;;  %v5465_v50 = vld [vmem:[%s9958_s1 + $0x184] ss:$16 sps:$4 sm:$0xff]   ;;  %v5481_v55 = vld [vmem:[%s9958_s1 + $0x180] ss:$16 sps:$4 sm:$0xff]  }
  0x12   :  { %10693 = vst [vmem:[#allocation7_spill] sm:$0xff] %v5445_v46  ;;  %v167_v48 = vmax.f32 %v5445_v46, 0.0  ;;  %v5470_v51 = vld [vmem:[%s9958_s1 + $0x18c] ss:$16 sps:$4 sm:$0xff]   ;;  %v5475_v53 = vld [vmem:[%s9957_s0] sm:$0xff]  ;;  %10695 = vst [vmem:[#allocation9_spill] sm:$0xff] %v5481_v55 }
  0x13   :  { %830 = vmatpush1.bf16.msra.mxu0 %v5277_v18  ;;  %912 = vmatpush1.bf16.msra.mxu1 %v5282_v19  ;;  %10694 = vst [vmem:[#allocation8_spill] sm:$0xff] %v5475_v53  ;;  %v166_v54 = vmax.f32 %v5475_v53, 0.0  ;;  %v5488_v56 = vld [vmem:[%s9958_s1 + $0x188] ss:$16 sps:$4 sm:$0xff]   ;;  %v5493_v57 = vld [vmem:[%s9958_s1 + $0x1a4] ss:$16 sps:$4 sm:$0xff]  }
  0x14   :  { %831 = vmatprep.subr.bf16.mxu0 %v5289_v20  ;;  %913 = vmatprep.subr.bf16.mxu1 %v5296_v21  ;;  %174 = vst [vmem:[#allocation4 + $0x8] sm:$0xff] %v167_v48  ;;  %v178_v52 = vpack.c.bf16 %v167_v48, %v167_v48  ;;  %10696 = vst [vmem:[#allocation10_spill] sm:$0xff] %v5488_v56  ;;  %v5500_v58 = vld [vmem:[%s9958_s1 + $0x1ac] ss:$16 sps:$4 sm:$0xff]   ;;  %v5505_v59 = vld [vmem:[%s9958_s1 + $0x1a0] ss:$16 sps:$4 sm:$0xff]  }
  0x15   :  { %10697 = vst [vmem:[#allocation11_spill] sm:$0xff] %v5493_v57  ;;  %173 = vst [vmem:[#allocation4] sm:$0xff] %v166_v54  ;;  %v5512_v60 = vld [vmem:[%s9958_s1 + $0x1a8] ss:$16 sps:$4 sm:$0xff]   ;;  %v5519_v61 = vld [vmem:[%s9958_s1 + $0x1c4] ss:$16 sps:$4 sm:$0xff]  }
  0x16   :  { %853 = vmatprep.mubr.bf16.mxu0 %v178_v52  ;;  %935 = vmatprep.mubr.bf16.mxu1 %v178_v52  ;;  %10698 = vst [vmem:[#allocation12_spill] sm:$0xff] %v5500_v58  ;;  %10699 = vst [vmem:[#allocation13_spill] sm:$0xff] %v5505_v59  ;;  %v5524_v62 = vld [vmem:[%s9958_s1 + $0x1cc] ss:$16 sps:$4 sm:$0xff]   ;;  %v5529_v63 = vld [vmem:[%s9958_s1 + $0x1c0] ss:$16 sps:$4 sm:$0xff]  }
  0x17   :  { %832 = vmatpush1.bf16.msra.mxu0 %v5301_v22  ;;  %914 = vmatpush1.bf16.msra.mxu1 %v5308_v23  ;;  %10700 = vst [vmem:[#allocation14_spill] sm:$0xff] %v5512_v60  ;;  %10701 = vst [vmem:[#allocation15_spill] sm:$0xff] %v5519_v61  ;;  %v5536_v48 = vld [vmem:[%s9958_s1 + $0x1c8] ss:$16 sps:$4 sm:$0xff]   ;;  %v5541_v52 = vld [vmem:[%s9958_s1 + $0x1e4] ss:$16 sps:$4 sm:$0xff]  }
  0x18   :  { %833 = vmatprep.subr.bf16.mxu0 %v5313_v24  ;;  %915 = vmatprep.subr.bf16.mxu1 %v5320_v25  ;;  %10702 = vst [vmem:[#allocation16_spill] sm:$0xff] %v5524_v62  ;;  %10703 = vst [vmem:[#allocation17_spill] sm:$0xff] %v5529_v63  ;;  %v5548_v46 = vld [vmem:[%s9958_s1 + $0x1ec] ss:$16 sps:$4 sm:$0xff]   ;;  %v5553_v53 = vld [vmem:[%s9958_s1 + $0x1e0] ss:$16 sps:$4 sm:$0xff]  }
  0x19   :  { %10704 = vst [vmem:[#allocation18_spill] sm:$0xff] %v5536_v48  ;;  %10705 = vst [vmem:[#allocation19_spill] sm:$0xff] %v5541_v52 }
  0x1a   :  { %10706 = vst [vmem:[#allocation20_spill] sm:$0xff] %v5548_v46  ;;  %10707 = vst [vmem:[#allocation21_spill] sm:$0xff] %v5553_v53 }
  0x1b   :  { %834 = vmatpush1.bf16.msra.mxu0 %v5325_v26  ;;  %916 = vmatpush1.bf16.msra.mxu1 %v5330_v27 }
  0x1c   :  { %835 = vmatprep.subr.bf16.mxu0 %v5337_v28  ;;  %917 = vmatprep.subr.bf16.mxu1 %v5344_v29 }
  0x1f   :  { %836 = vmatpush1.bf16.msra.mxu0 %v5349_v30  ;;  %918 = vmatpush1.bf16.msra.mxu1 %v5356_v31 }
  0x20   :  { %837 = vmatprep.subr.bf16.mxu0 %v5361_v32  ;;  %919 = vmatprep.subr.bf16.mxu1 %v5368_v33 }
  0x23   :  { %838 = vmatpush1.bf16.msra.mxu0 %v5373_v34  ;;  %920 = vmatpush1.bf16.msra.mxu1 %v5378_v35 }
  0x24   :  { %839 = vmatprep.subr.bf16.mxu0 %v5385_v36  ;;  %921 = vmatprep.subr.bf16.mxu1 %v5392_v37 }
  0x27   :  { %840 = vmatpush1.bf16.msra.mxu0 %v5397_v38  ;;  %922 = vmatpush1.bf16.msra.mxu1 %v5404_v39 }
  0x28   :  { %841 = vmatprep.subr.bf16.mxu0 %v5409_v40  ;;  %923 = vmatprep.subr.bf16.mxu1 %v5416_v41 }
  0x2b   :  { %842 = vmatpush1.bf16.msra.mxu0 %v5421_v42  ;;  %924 = vmatpush1.bf16.msra.mxu1 %v5426_v43 }
  0x2c   :  { %843 = vmatprep.subr.bf16.mxu0 %v5433_v44  ;;  %925 = vmatprep.subr.bf16.mxu1 %v5440_v45 }
  0x2f   :  { %844 = vmatpush1.bf16.msra.mxu0 %v5450_v47  ;;  %926 = vmatpush1.bf16.msra.mxu1 %v5458_v49 }
  0x30   :  { %845 = vmatprep.subr.bf16.mxu0 %v5465_v50  ;;  %927 = vmatprep.subr.bf16.mxu1 %v5470_v51 }
  0x33   :  { %846 = vmatpush1.bf16.msra.mxu0 %v5481_v55  ;;  %928 = vmatpush1.bf16.msra.mxu1 %v5488_v56  ;;  %v5760_v55 = vld [vmem:[%s9958_s1 + $0x2e0] ss:$16 sps:$4 sm:$0xff]  }
  0x34   :  { %847 = vmatprep.subr.bf16.mxu0 %v5493_v57  ;;  %929 = vmatprep.subr.bf16.mxu1 %v5500_v58  ;;  %10738 = vst [vmem:[#allocation52_spill] sm:$0xff] %v5760_v55 }
  0x37   :  { %848 = vmatpush1.bf16.msra.mxu0 %v5505_v59  ;;  %930 = vmatpush1.bf16.msra.mxu1 %v5512_v60  ;;  %v5577_v60 = vld [vmem:[%s9958_s1 + $0x200] ss:$16 sps:$4 sm:$0xff]   ;;  %v5746_v59 = vld [vmem:[%s9958_s1 + $0x2ec] ss:$16 sps:$4 sm:$0xff]  }
  0x38   :  { %849 = vmatprep.subr.bf16.mxu0 %v5519_v61  ;;  %931 = vmatprep.subr.bf16.mxu1 %v5524_v62  ;;  %v5560_v61 = vld [vmem:[%s9958_s1 + $0x1e8] ss:$16 sps:$4 sm:$0xff]   ;;  %v5567_v62 = vld [vmem:[%s9958_s1 + $0x204] ss:$16 sps:$4 sm:$0xff]   ;;  %10711 = vst [vmem:[#allocation25_spill] sm:$0xff] %v5577_v60  ;;  %10737 = vst [vmem:[#allocation51_spill] sm:$0xff] %v5746_v59 }
  0x39   :  { %10708 = vst [vmem:[#allocation22_spill] sm:$0xff] %v5560_v61  ;;  %10709 = vst [vmem:[#allocation23_spill] sm:$0xff] %v5567_v62 }
  0x3b   :  { %850 = vmatpush1.bf16.msra.mxu0 %v5529_v63  ;;  %932 = vmatpush1.bf16.msra.mxu1 %v5536_v48  ;;  %v5572_v63 = vld [vmem:[%s9958_s1 + $0x20c] ss:$16 sps:$4 sm:$0xff]   ;;  %v177_v48 = vpack.c.bf16 %v166_v54, %v166_v54 }
  0x3c   :  { %851 = vmatprep.subr.bf16.mxu0 %v5541_v52  ;;  %933 = vmatprep.subr.bf16.mxu1 %v5548_v46  ;;  %10710 = vst [vmem:[#allocation24_spill] sm:$0xff] %v5572_v63  ;;  %v5584_v46 = vld [vmem:[%s9958_s1 + $0x208] ss:$16 sps:$4 sm:$0xff]   ;;  %v5589_v52 = vld [vmem:[%s9958_s1 + $0x224] ss:$16 sps:$4 sm:$0xff]  }
  0x3d   :  { %10712 = vst [vmem:[#allocation26_spill] sm:$0xff] %v5584_v46  ;;  %10713 = vst [vmem:[#allocation27_spill] sm:$0xff] %v5589_v52  ;;  %v5596_v54 = vld [vmem:[%s9958_s1 + $0x22c] ss:$16 sps:$4 sm:$0xff]  }
  0x3e   :  { %10714 = vst [vmem:[#allocation28_spill] sm:$0xff] %v5596_v54 }
  0x3f   :  { %852 = vmatpush1.bf16.msra.mxu0 %v5553_v53  ;;  %934 = vmatpush1.bf16.msra.mxu1 %v5560_v61  ;;  %v5601_v61 = vld [vmem:[%s9958_s1 + $0x220] ss:$16 sps:$4 sm:$0xff]   ;;  %v5741_v53 = vld [vmem:[%s9958_s1 + $0x2e4] ss:$16 sps:$4 sm:$0xff]  }
  0x40   :  { %862 = vmatprep.subr.bf16.mxu0 %v5567_v62  ;;  %944 = vmatprep.subr.bf16.mxu1 %v5572_v63  ;;  %10715 = vst [vmem:[#allocation29_spill] sm:$0xff] %v5601_v61  ;;  %v5608_v63 = vld [vmem:[%s9958_s1 + $0x228] ss:$16 sps:$4 sm:$0xff]   ;;  %v5736_v62 = vld [vmem:[%s9957_s0 + $0x10] sm:$0xff]  ;;  %10736 = vst [vmem:[#allocation50_spill] sm:$0xff] %v5741_v53 }
  0x41   :  { %10716 = vst [vmem:[#allocation30_spill] sm:$0xff] %v5608_v63  ;;  %v5750_v57 = vmax.f32 %v5736_v62, 0.0 }
  0x42   :  { %854 = vmatmul.mubr.bf16.vlgmr.msra.gmra.mrb[0].mxu0 %v177_v48  ;;  %936 = vmatmul.mubr.bf16.vlgmr.msra.gmra.mrb[0].mxu1 %v177_v48  ;;  %v5615_v48 = vld [vmem:[%s9958_s1 + $0x244] ss:$16 sps:$4 sm:$0xff]  }
  0x43   :  { %863 = vmatpush1.bf16.msra.mxu0 %v5577_v60  ;;  %945 = vmatpush1.bf16.msra.mxu1 %v5584_v46  ;;  %10717 = vst [vmem:[#allocation31_spill] sm:$0xff] %v5615_v48  ;;  %v5620_v60 = vld [vmem:[%s9958_s1 + $0x24c] ss:$16 sps:$4 sm:$0xff]   ;;  %v5625_v46 = vld [vmem:[%s9958_s1 + $0x240] ss:$16 sps:$4 sm:$0xff]   ;;  %175 = vst [vmem:[#allocation4 + $0x10] sm:$0xff] %v5750_v57 }
  0x44   :  { %864 = vmatprep.subr.bf16.mxu0 %v5589_v52  ;;  %946 = vmatprep.subr.bf16.mxu1 %v5596_v54  ;;  %10718 = vst [vmem:[#allocation32_spill] sm:$0xff] %v5620_v60  ;;  %10719 = vst [vmem:[#allocation33_spill] sm:$0xff] %v5625_v46  ;;  %v5632_v54 = vld [vmem:[%s9958_s1 + $0x248] ss:$16 sps:$4 sm:$0xff]   ;;  %v5637_v52 = vld [vmem:[%s9958_s1 + $0x264] ss:$16 sps:$4 sm:$0xff]  }
  0x45   :  { %10720 = vst [vmem:[#allocation34_spill] sm:$0xff] %v5632_v54  ;;  %10721 = vst [vmem:[#allocation35_spill] sm:$0xff] %v5637_v52 }
  0x47   :  { %865 = vmatpush1.bf16.msra.mxu0 %v5601_v61  ;;  %947 = vmatpush1.bf16.msra.mxu1 %v5608_v63  ;;  %v5644_v61 = vld [vmem:[%s9958_s1 + $0x26c] ss:$16 sps:$4 sm:$0xff]   ;;  %v5649_v63 = vld [vmem:[%s9958_s1 + $0x260] ss:$16 sps:$4 sm:$0xff]  }
  0x48   :  { %866 = vmatprep.subr.bf16.mxu0 %v5615_v48  ;;  %948 = vmatprep.subr.bf16.mxu1 %v5620_v60  ;;  %10722 = vst [vmem:[#allocation36_spill] sm:$0xff] %v5644_v61  ;;  %10723 = vst [vmem:[#allocation37_spill] sm:$0xff] %v5649_v63  ;;  %v5656_v48 = vld [vmem:[%s9958_s1 + $0x268] ss:$16 sps:$4 sm:$0xff]   ;;  %v5663_v60 = vld [vmem:[%s9958_s1 + $0x284] ss:$16 sps:$4 sm:$0xff]  }
  0x49   :  { %10724 = vst [vmem:[#allocation38_spill] sm:$0xff] %v5656_v48  ;;  %10725 = vst [vmem:[#allocation39_spill] sm:$0xff] %v5663_v60 }
  0x4b   :  { %867 = vmatpush1.bf16.msra.mxu0 %v5625_v46  ;;  %949 = vmatpush1.bf16.msra.mxu1 %v5632_v54  ;;  %v5668_v46 = vld [vmem:[%s9958_s1 + $0x28c] ss:$16 sps:$4 sm:$0xff]   ;;  %v5673_v54 = vld [vmem:[%s9958_s1 + $0x280] ss:$16 sps:$4 sm:$0xff]  }
  0x4c   :  { %868 = vmatprep.subr.bf16.mxu0 %v5637_v52  ;;  %950 = vmatprep.subr.bf16.mxu1 %v5644_v61  ;;  %10726 = vst [vmem:[#allocation40_spill] sm:$0xff] %v5668_v46  ;;  %10727 = vst [vmem:[#allocation41_spill] sm:$0xff] %v5673_v54  ;;  %v5680_v61 = vld [vmem:[%s9958_s1 + $0x288] ss:$16 sps:$4 sm:$0xff]   ;;  %v5685_v52 = vld [vmem:[%s9958_s1 + $0x2a4] ss:$16 sps:$4 sm:$0xff]  }
  0x4d   :  { %10728 = vst [vmem:[#allocation42_spill] sm:$0xff] %v5680_v61  ;;  %10729 = vst [vmem:[#allocation43_spill] sm:$0xff] %v5685_v52 }
  0x4f   :  { %869 = vmatpush1.bf16.msra.mxu0 %v5649_v63  ;;  %951 = vmatpush1.bf16.msra.mxu1 %v5656_v48  ;;  %v5692_v63 = vld [vmem:[%s9958_s1 + $0x2ac] ss:$16 sps:$4 sm:$0xff]   ;;  %v5697_v48 = vld [vmem:[%s9958_s1 + $0x2a0] ss:$16 sps:$4 sm:$0xff]  }
  0x50   :  { %870 = vmatprep.subr.bf16.mxu0 %v5663_v60  ;;  %952 = vmatprep.subr.bf16.mxu1 %v5668_v46  ;;  %10730 = vst [vmem:[#allocation44_spill] sm:$0xff] %v5692_v63  ;;  %v5704_v60 = vld [vmem:[%s9958_s1 + $0x2a8] ss:$16 sps:$4 sm:$0xff]   ;;  %v5711_v46 = vld [vmem:[%s9958_s1 + $0x2c4] ss:$16 sps:$4 sm:$0xff]  }
  0x51   :  { %10731 = vst [vmem:[#allocation45_spill] sm:$0xff] %v5704_v60  ;;  %10732 = vst [vmem:[#allocation46_spill] sm:$0xff] %v5711_v46 }
  0x53   :  { %871 = vmatpush1.bf16.msra.mxu0 %v5673_v54  ;;  %953 = vmatpush1.bf16.msra.mxu1 %v5680_v61  ;;  %v5716_v54 = vld [vmem:[%s9958_s1 + $0x2cc] ss:$16 sps:$4 sm:$0xff]   ;;  %v5721_v61 = vld [vmem:[%s9958_s1 + $0x2c0] ss:$16 sps:$4 sm:$0xff]  }
  0x54   :  { %872 = vmatprep.subr.bf16.mxu0 %v5685_v52  ;;  %954 = vmatprep.subr.bf16.mxu1 %v5692_v63  ;;  %10733 = vst [vmem:[#allocation47_spill] sm:$0xff] %v5716_v54  ;;  %v5726_v52 = vld [vmem:[%s9958_s1 + $0x2c8] ss:$16 sps:$4 sm:$0xff]  }
  0x55   :  { %10734 = vst [vmem:[#allocation48_spill] sm:$0xff] %v5726_v52  ;;  %v5731_v63 = vld [vmem:[%s9957_s0 + $0x18] sm:$0xff] }
  0x56   :  { %10735 = vst [vmem:[#allocation49_spill] sm:$0xff] %v5731_v63  ;;  %v169_v58 = vmax.f32 %v5731_v63, 0.0  ;;  %v5765_v63 = vld [vmem:[%s9958_s1 + $0x2e8] ss:$16 sps:$4 sm:$0xff]  }
  0x57   :  { %873 = vmatpush1.bf16.msra.mxu0 %v5697_v48  ;;  %955 = vmatpush1.bf16.msra.mxu1 %v5704_v60  ;;  %10739 = vst [vmem:[#allocation53_spill] sm:$0xff] %v5765_v63  ;;  %v5789_v60 = vld [vmem:[%s9958_s1 + $0x308] ss:$16 sps:$4 sm:$0xff]  }
  0x58   :  { %874 = vmatprep.subr.bf16.mxu0 %v5711_v46  ;;  %956 = vmatprep.subr.bf16.mxu1 %v5716_v54  ;;  %176 = vst [vmem:[#allocation4 + $0x18] sm:$0xff] %v169_v58  ;;  %v180_v56 = vpack.c.bf16 %v169_v58, %v169_v58  ;;  %v5770_v46 = vld [vmem:[%s9958_s1 + $0x304] ss:$16 sps:$4 sm:$0xff]   ;;  %v5775_v58 = vld [vmem:[%s9958_s1 + $0x30c] ss:$16 sps:$4 sm:$0xff]   ;;  %10743 = vst [vmem:[#allocation57_spill] sm:$0xff] %v5789_v60 }
  0x59   :  { %10740 = vst [vmem:[#allocation54_spill] sm:$0xff] %v5770_v46  ;;  %10741 = vst [vmem:[#allocation55_spill] sm:$0xff] %v5775_v58  ;;  %v5784_v54 = vld [vmem:[%s9958_s1 + $0x300] ss:$16 sps:$4 sm:$0xff]  }
  0x5a   :  { %894 = vmatprep.mubr.bf16.mxu0 %v180_v56  ;;  %976 = vmatprep.mubr.bf16.mxu1 %v180_v56  ;;  %10742 = vst [vmem:[#allocation56_spill] sm:$0xff] %v5784_v54  ;;  %v5794_v56 = vld [vmem:[%s9958_s1 + $0x324] ss:$16 sps:$4 sm:$0xff]  }
  0x5b   :  { %875 = vmatpush1.bf16.msra.mxu0 %v5721_v61  ;;  %957 = vmatpush1.bf16.msra.mxu1 %v5726_v52  ;;  %10744 = vst [vmem:[#allocation58_spill] sm:$0xff] %v5794_v56  ;;  %v5813_v52 = vld [vmem:[%s9958_s1 + $0x328] ss:$16 sps:$4 sm:$0xff]  }
  0x5c   :  { %876 = vmatprep.subr.bf16.mxu0 %v5741_v53  ;;  %958 = vmatprep.subr.bf16.mxu1 %v5746_v59  ;;  %v5799_v53 = vld [vmem:[%s9958_s1 + $0x32c] ss:$16 sps:$4 sm:$0xff]   ;;  %v5808_v59 = vld [vmem:[%s9958_s1 + $0x320] ss:$16 sps:$4 sm:$0xff]  }
  0x5d   :  { %10745 = vst [vmem:[#allocation59_spill] sm:$0xff] %v5799_v53 }
  0x5f   :  { %877 = vmatpush1.bf16.msra.mxu0 %v5760_v55  ;;  %959 = vmatpush1.bf16.msra.mxu1 %v5765_v63  ;;  %v5818_v55 = vld [vmem:[%s9958_s1 + $0x344] ss:$16 sps:$4 sm:$0xff]   ;;  %v5837_v63 = vld [vmem:[%s9958_s1 + $0x348] ss:$16 sps:$4 sm:$0xff]  }
  0x60   :  { %878 = vmatprep.subr.bf16.mxu0 %v5770_v46  ;;  %960 = vmatprep.subr.bf16.mxu1 %v5775_v58  ;;  %v5823_v46 = vld [vmem:[%s9958_s1 + $0x34c] ss:$16 sps:$4 sm:$0xff]   ;;  %v5832_v58 = vld [vmem:[%s9958_s1 + $0x340] ss:$16 sps:$4 sm:$0xff]   ;;  %10748 = vst [vmem:[#allocation62_spill] sm:$0xff] %v5837_v63 }
  0x61   :  { %10746 = vst [vmem:[#allocation60_spill] sm:$0xff] %v5823_v46  ;;  %10747 = vst [vmem:[#allocation61_spill] sm:$0xff] %v5832_v58 }
  0x63   :  { %879 = vmatpush1.bf16.msra.mxu0 %v5784_v54  ;;  %961 = vmatpush1.bf16.msra.mxu1 %v5789_v60  ;;  %v5842_v54 = vld [vmem:[%s9958_s1 + $0x364] ss:$16 sps:$4 sm:$0xff]   ;;  %v5863_v60 = vld [vmem:[%s9958_s1 + $0x368] ss:$16 sps:$4 sm:$0xff]  }
  0x64   :  { %880 = vmatprep.subr.bf16.mxu0 %v5794_v56  ;;  %962 = vmatprep.subr.bf16.mxu1 %v5799_v53  ;;  %10749 = vst [vmem:[#allocation63_spill] sm:$0xff] %v5842_v54  ;;  %v5847_v56 = vld [vmem:[%s9958_s1 + $0x36c] ss:$16 sps:$4 sm:$0xff]   ;;  %v5856_v53 = vld [vmem:[%s9958_s1 + $0x360] ss:$16 sps:$4 sm:$0xff]   ;;  %10752 = vst [vmem:[#allocation66_spill] sm:$0xff] %v5863_v60 }
  0x65   :  { %10750 = vst [vmem:[#allocation64_spill] sm:$0xff] %v5847_v56  ;;  %10751 = vst [vmem:[#allocation65_spill] sm:$0xff] %v5856_v53 }
  0x67   :  { %881 = vmatpush1.bf16.msra.mxu0 %v5808_v59  ;;  %963 = vmatpush1.bf16.msra.mxu1 %v5813_v52 }
  0x68   :  { %882 = vmatprep.subr.bf16.mxu0 %v5818_v55  ;;  %964 = vmatprep.subr.bf16.mxu1 %v5823_v46 }
  0x6b   :  { %883 = vmatpush1.bf16.msra.mxu0 %v5832_v58  ;;  %965 = vmatpush1.bf16.msra.mxu1 %v5837_v63 }
  0x6c   :  { %11 = vsyncpa [#allocation5], 0  ;;  %884 = vmatprep.subr.bf16.mxu0 %v5842_v54  ;;  %966 = vmatprep.subr.bf16.mxu1 %v5847_v56  ;;  %v5870_v46 = vld [vmem:[%s9958_s1 + $0x384] ss:$16 sps:$4 sm:$0xff]   ;;  %v5875_v58 = vld [vmem:[%s9958_s1 + $0x38c] ss:$16 sps:$4 sm:$0xff]   ;;  %v179_v63 = vpack.c.bf16 %v5750_v57, %v5750_v57 }
  0x6d   :  { %10753 = vst [vmem:[#allocation67_spill] sm:$0xff] %v5870_v46  ;;  %10754 = vst [vmem:[#allocation68_spill] sm:$0xff] %v5875_v58  ;;  %v5882_v54 = vld [vmem:[%s9958_s1 + $0x380] ss:$16 sps:$4 sm:$0xff]   ;;  %v5887_v56 = vld [vmem:[%s9958_s1 + $0x388] ss:$16 sps:$4 sm:$0xff]  }
  0x6e   :  { %10755 = vst [vmem:[#allocation69_spill] sm:$0xff] %v5882_v54  ;;  %10756 = vst [vmem:[#allocation70_spill] sm:$0xff] %v5887_v56 }
  0x6f   :  { %885 = vmatpush1.bf16.msra.mxu0 %v5856_v53  ;;  %967 = vmatpush1.bf16.msra.mxu1 %v5863_v60  ;;  %v5894_v53 = vld [vmem:[%s9958_s1 + $0x3a4] ss:$16 sps:$4 sm:$0xff]   ;;  %v5899_v60 = vld [vmem:[%s9958_s1 + $0x3ac] ss:$16 sps:$4 sm:$0xff]  }
  0x70   :  { %886 = vmatprep.subr.bf16.mxu0 %v5870_v46  ;;  %968 = vmatprep.subr.bf16.mxu1 %v5875_v58  ;;  %10757 = vst [vmem:[#allocation71_spill] sm:$0xff] %v5894_v53  ;;  %10758 = vst [vmem:[#allocation72_spill] sm:$0xff] %v5899_v60  ;;  %v5906_v46 = vld [vmem:[%s9958_s1 + $0x3a0] ss:$16 sps:$4 sm:$0xff]   ;;  %v5911_v58 = vld [vmem:[%s9958_s1 + $0x3a8] ss:$16 sps:$4 sm:$0xff]  }
  0x71   :  { %10759 = vst [vmem:[#allocation73_spill] sm:$0xff] %v5906_v46  ;;  %10760 = vst [vmem:[#allocation74_spill] sm:$0xff] %v5911_v58 }
  0x73   :  { %887 = vmatpush1.bf16.msra.mxu0 %v5882_v54  ;;  %969 = vmatpush1.bf16.msra.mxu1 %v5887_v56  ;;  %v5918_v54 = vld [vmem:[%s9958_s1 + $0x3c4] ss:$16 sps:$4 sm:$0xff]   ;;  %v5923_v56 = vld [vmem:[%s9958_s1 + $0x3cc] ss:$16 sps:$4 sm:$0xff]  }
  0x74   :  { %888 = vmatprep.subr.bf16.mxu0 %v5894_v53  ;;  %970 = vmatprep.subr.bf16.mxu1 %v5899_v60  ;;  %10761 = vst [vmem:[#allocation75_spill] sm:$0xff] %v5918_v54  ;;  %10762 = vst [vmem:[#allocation76_spill] sm:$0xff] %v5923_v56  ;;  %v5930_v53 = vld [vmem:[%s9958_s1 + $0x3c0] ss:$16 sps:$4 sm:$0xff]   ;;  %v5935_v60 = vld [vmem:[%s9958_s1 + $0x3c8] ss:$16 sps:$4 sm:$0xff]  }
  0x75   :  { %10763 = vst [vmem:[#allocation77_spill] sm:$0xff] %v5930_v53  ;;  %10764 = vst [vmem:[#allocation78_spill] sm:$0xff] %v5935_v60 }
  0x77   :  { %889 = vmatpush1.bf16.msra.mxu0 %v5906_v46  ;;  %971 = vmatpush1.bf16.msra.mxu1 %v5911_v58  ;;  %v5942_v46 = vld [vmem:[%s9958_s1 + $0x3e4] ss:$16 sps:$4 sm:$0xff]   ;;  %v5947_v58 = vld [vmem:[%s9958_s1 + $0x3ec] ss:$16 sps:$4 sm:$0xff]  }
  0x78   :  { %890 = vmatprep.subr.bf16.mxu0 %v5918_v54  ;;  %972 = vmatprep.subr.bf16.mxu1 %v5923_v56  ;;  %10765 = vst [vmem:[#allocation79_spill] sm:$0xff] %v5942_v46  ;;  %10766 = vst [vmem:[#allocation80_spill] sm:$0xff] %v5947_v58  ;;  %v5954_v54 = vld [vmem:[%s9958_s1 + $0x3e0] ss:$16 sps:$4 sm:$0xff]   ;;  %v5959_v56 = vld [vmem:[%s9958_s1 + $0x3e8] ss:$16 sps:$4 sm:$0xff]  }
  0x79   :  { %10767 = vst [vmem:[#allocation81_spill] sm:$0xff] %v5954_v54  ;;  %10768 = vst [vmem:[#allocation82_spill] sm:$0xff] %v5959_v56 }
  0x7b   :  { %891 = vmatpush1.bf16.msra.mxu0 %v5930_v53  ;;  %973 = vmatpush1.bf16.msra.mxu1 %v5935_v60 }
  0x7c   :  { %892 = vmatprep.subr.bf16.mxu0 %v5942_v46  ;;  %974 = vmatprep.subr.bf16.mxu1 %v5947_v58 }
  0x7f   :  { %893 = vmatpush1.bf16.msra.mxu0 %v5954_v54  ;;  %975 = vmatpush1.bf16.msra.mxu1 %v5959_v56 }
  0x80   :  { %1038 = vmatprep.subr.bf16.mxu0 %v5173_v0  ;;  %1120 = vmatprep.subr.bf16.mxu1 %v5178_v1  ;;  %v10769_v0 = vld [vmem:[#allocation9_spill] sm:$0xff]  ;;  %v10770_v1 = vld [vmem:[#allocation10_spill] sm:$0xff] }
  0x82   :  { %895 = vmatmul.mubr.bf16.vlgmr.msra.gmra.mrb[0].mxu0 %v179_v63  ;;  %977 = vmatmul.mubr.bf16.vlgmr.msra.gmra.mrb[0].mxu1 %v179_v63 }
  0x83   :  { %1039 = vmatpush1.bf16.msra.mxu0 %v5184_v2  ;;  %1121 = vmatpush1.bf16.msra.mxu1 %v5189_v3  ;;  %v10771_v2 = vld [vmem:[#allocation11_spill] sm:$0xff]  ;;  %v10772_v3 = vld [vmem:[#allocation12_spill] sm:$0xff] }
  0x84   :  { %1040 = vmatprep.subr.bf16.mxu0 %v5195_v4  ;;  %1122 = vmatprep.subr.bf16.mxu1 %v5202_v5  ;;  %v10773_v4 = vld [vmem:[#allocation13_spill] sm:$0xff]  ;;  %v10774_v5 = vld [vmem:[#allocation14_spill] sm:$0xff] }
  0x87   :  { %1041 = vmatpush1.bf16.msra.mxu0 %v5207_v6  ;;  %1123 = vmatpush1.bf16.msra.mxu1 %v5213_v7  ;;  %v10775_v6 = vld [vmem:[#allocation15_spill] sm:$0xff]  ;;  %v10776_v7 = vld [vmem:[#allocation16_spill] sm:$0xff] }
  0x88   :  { %1042 = vmatprep.subr.bf16.mxu0 %v5219_v8  ;;  %1124 = vmatprep.subr.bf16.mxu1 %v5224_v9  ;;  %v10777_v8 = vld [vmem:[#allocation17_spill] sm:$0xff]  ;;  %v10778_v9 = vld [vmem:[#allocation18_spill] sm:$0xff] }
  0x8b   :  { %1043 = vmatpush1.bf16.msra.mxu0 %v5229_v10  ;;  %1125 = vmatpush1.bf16.msra.mxu1 %v5234_v11  ;;  %v10779_v10 = vld [vmem:[#allocation19_spill] sm:$0xff]  ;;  %v10780_v11 = vld [vmem:[#allocation20_spill] sm:$0xff] }
  0x8c   :  { %1044 = vmatprep.subr.bf16.mxu0 %v5241_v12  ;;  %1126 = vmatprep.subr.bf16.mxu1 %v5248_v13  ;;  %v10781_v12 = vld [vmem:[#allocation21_spill] sm:$0xff]  ;;  %v10782_v13 = vld [vmem:[#allocation22_spill] sm:$0xff] }
  0x8f   :  { %1045 = vmatpush1.bf16.msra.mxu0 %v5253_v14  ;;  %1127 = vmatpush1.bf16.msra.mxu1 %v5260_v15  ;;  %v10783_v14 = vld [vmem:[#allocation23_spill] sm:$0xff]  ;;  %v10784_v15 = vld [vmem:[#allocation24_spill] sm:$0xff] }
  0x90   :  { %1046 = vmatprep.subr.bf16.mxu0 %v5265_v16  ;;  %1128 = vmatprep.subr.bf16.mxu1 %v5272_v17  ;;  %v991_v16 = vlaneseq }
  0x92   :  { %v992_v17 = vshrl.u32 %v991_v16, 7  ;;  %v10792_v16 = vld [vmem:[#allocation25_spill] sm:$0xff] }
  0x93   :  { %1047 = vmatpush1.bf16.msra.mxu0 %v5277_v18  ;;  %1129 = vmatpush1.bf16.msra.mxu1 %v5282_v19 }
  0x94   :  { %1048 = vmatprep.subr.bf16.mxu0 %v5289_v20  ;;  %1130 = vmatprep.subr.bf16.mxu1 %v5296_v21  ;;  %v6033_v18 = vsub.s32 0, %v992_v17  ;;  %v6035_v19 = vsub.s32 2, %v992_v17  ;;  %v989_v20 = vld [vmem:[%s9960_s3] sm:$0xf]  ;;  %v6040_v21 = vsub.s32 1, %v992_v17 }
  0x96   :  { %10785 = vst [vmem:[#allocation9_spill] sm:$0xff] %v6033_v18  ;;  %10786 = vst [vmem:[#allocation10_spill] sm:$0xff] %v6035_v19 }
  0x97   :  { %1049 = vmatpush1.bf16.msra.mxu0 %v5301_v22  ;;  %1131 = vmatpush1.bf16.msra.mxu1 %v5308_v23  ;;  %10787 = vst [vmem:[#allocation11_spill] sm:$0xff] %v6040_v21  ;;  %v6042_v22 = vsub.s32 3, %v992_v17  ;;  %v994_v23 = vrot.slane %v989_v20, %v6033_v18  ;;  %v10793_v17 = vld [vmem:[#allocation26_spill] sm:$0xff] }
  0x98   :  { %1050 = vmatprep.subr.bf16.mxu0 %v5313_v24  ;;  %1132 = vmatprep.subr.bf16.mxu1 %v5320_v25  ;;  %v1002_v24 = vrot.slane %v989_v20, %v6035_v19 }
  0x99   :  { %10788 = vst [vmem:[#allocation12_spill] sm:$0xff] %v6042_v22 }
  0x9b   :  { %1051 = vmatpush1.bf16.msra.mxu0 %v5325_v26  ;;  %1133 = vmatpush1.bf16.msra.mxu1 %v5330_v27  ;;  %v998_v27 = vrot.slane %v989_v20, %v6040_v21 }
  0x9c   :  { %1052 = vmatprep.subr.bf16.mxu0 %v5337_v28  ;;  %1134 = vmatprep.subr.bf16.mxu1 %v5344_v29  ;;  %v1006_v28 = vrot.slane %v989_v20, %v6042_v22  ;;  %v10789_v29 = vld [vmem:[#allocation8_spill] sm:$0xff]  ;;  %v10794_v20 = vld [vmem:[#allocation27_spill] sm:$0xff] }
  0x9f   :  { %1053 = vmatpush1.bf16.msra.mxu0 %v5349_v30  ;;  %1135 = vmatpush1.bf16.msra.mxu1 %v5356_v31 }
  0xa0   :  { %1054 = vmatprep.subr.bf16.mxu0 %v5361_v32  ;;  %1136 = vmatprep.subr.bf16.mxu1 %v5368_v33 }
  0xa3   :  { %1055 = vmatpush1.bf16.msra.mxu0 %v5373_v34  ;;  %1137 = vmatpush1.bf16.msra.mxu1 %v5378_v35  ;;  %v10790_v34 = vld [vmem:[#allocation7_spill] sm:$0xff] }
  0xa4   :  { %1056 = vmatprep.subr.bf16.mxu0 %v5385_v36  ;;  %1138 = vmatprep.subr.bf16.mxu1 %v5392_v37  ;;  %v10791_v36 = vld [vmem:[#allocation49_spill] sm:$0xff] }
  0xa7   :  { %1057 = vmatpush1.bf16.msra.mxu0 %v5397_v38  ;;  %1139 = vmatpush1.bf16.msra.mxu1 %v5404_v39 }
  0xa8   :  { %1058 = vmatprep.subr.bf16.mxu0 %v5409_v40  ;;  %1140 = vmatprep.subr.bf16.mxu1 %v5416_v41 }
  0xab   :  { %1059 = vmatpush1.bf16.msra.mxu0 %v5421_v42  ;;  %1141 = vmatpush1.bf16.msra.mxu1 %v5426_v43 }
  0xac   :  { %1060 = vmatprep.subr.bf16.mxu0 %v5433_v44  ;;  %1142 = vmatprep.subr.bf16.mxu1 %v5440_v45 }
  0xaf   :  { %1061 = vmatpush1.bf16.msra.mxu0 %v5450_v47  ;;  %1143 = vmatpush1.bf16.msra.mxu1 %v5458_v49 }
  0xb0   :  { %1062 = vmatprep.subr.bf16.mxu0 %v5465_v50  ;;  %1144 = vmatprep.subr.bf16.mxu1 %v5470_v51 }
  0xb3   :  { %1063 = vmatpush1.bf16.msra.mxu0 %v10769_v0  ;;  %1145 = vmatpush1.bf16.msra.mxu1 %v10770_v1 }
  0xb4   :  { %1064 = vmatprep.subr.bf16.mxu0 %v10771_v2  ;;  %1146 = vmatprep.subr.bf16.mxu1 %v10772_v3 }
  0xb7   :  { %1065 = vmatpush1.bf16.msra.mxu0 %v10773_v4  ;;  %1147 = vmatpush1.bf16.msra.mxu1 %v10774_v5 }
  0xb8   :  { %1066 = vmatprep.subr.bf16.mxu0 %v10775_v6  ;;  %1148 = vmatprep.subr.bf16.mxu1 %v10776_v7 }
  0xbb   :  { %1067 = vmatpush1.bf16.msra.mxu0 %v10777_v8  ;;  %1149 = vmatpush1.bf16.msra.mxu1 %v10778_v9 }
  0xbc   :  { %1068 = vmatprep.subr.bf16.mxu0 %v10779_v10  ;;  %1150 = vmatprep.subr.bf16.mxu1 %v10780_v11 }
  0xbf   :  { %1069 = vmatpush1.bf16.msra.mxu0 %v10781_v12  ;;  %1151 = vmatpush1.bf16.msra.mxu1 %v10782_v13 }
  0xc0   :  { %1079 = vmatprep.subr.bf16.mxu0 %v10783_v14  ;;  %1161 = vmatprep.subr.bf16.mxu1 %v10784_v15 }
 0x155   :  { %v896_v25 = vpop.f32.mrb[0].mxu0  ;;  %v978_v26 = vpop.f32.mrb[0].mxu1 }
 0x156   :  { %v985_v30 = vsub.f32 %v896_v25, %v10789_v29  ;;  %v987_v31 = vsub.f32 %v978_v26, %v5736_v62  ;;  %v898_v32 = vpop.f32.mrb[1].mxu0  ;;  %v980_v33 = vpop.f32.mrb[1].mxu1  ;;  %v10797_v25 = vld [vmem:[#allocation30_spill] sm:$0xff]  ;;  %v10798_v26 = vld [vmem:[#allocation31_spill] sm:$0xff] }
 0x157   :  { %v986_v35 = vsub.f32 %v898_v32, %v10790_v34  ;;  %v988_v37 = vsub.f32 %v980_v33, %v10791_v36  ;;  %v900_v38 = vpop.f32.mrb[2].mxu0  ;;  %v982_v39 = vpop.f32.mrb[2].mxu1  ;;  %v10804_v32 = vld [vmem:[#allocation37_spill] sm:$0xff]  ;;  %v10805_v33 = vld [vmem:[#allocation38_spill] sm:$0xff] }
 0x158   :  { %v1011_v40 = vadd.f32 %v994_v23, %v985_v30  ;;  %v1013_v41 = vadd.f32 %v1002_v24, %v987_v31  ;;  %v901_v42 = vpop.f32.mrb[3].mxu0  ;;  %v983_v43 = vpop.f32.mrb[3].mxu1  ;;  %v10795_v23 = vld [vmem:[#allocation28_spill] sm:$0xff]  ;;  %v10796_v24 = vld [vmem:[#allocation29_spill] sm:$0xff]  ;;  %v10802_v30 = vld [vmem:[#allocation35_spill] sm:$0xff] }
 0x159   :  { %v1012_v44 = vadd.f32 %v998_v27, %v986_v35  ;;  %v1014_v45 = vadd.f32 %v1006_v28, %v988_v37  ;;  %v10799_v27 = vld [vmem:[#allocation32_spill] sm:$0xff]  ;;  %v10800_v28 = vld [vmem:[#allocation33_spill] sm:$0xff]  ;;  %v10809_v37 = vld [vmem:[#allocation42_spill] sm:$0xff] }
 0x15a   :  { %v1015_v47 = vmul.f32 0.05, %v1011_v40  ;;  %v1017_v49 = vmul.f32 0.05, %v1013_v41  ;;  %v10803_v31 = vld [vmem:[#allocation36_spill] sm:$0xff]  ;;  %v10810_v38 = vld [vmem:[#allocation43_spill] sm:$0xff] }
 0x15b   :  { %v1016_v50 = vmul.f32 0.05, %v1012_v44  ;;  %v1018_v51 = vmul.f32 0.05, %v1014_v45  ;;  %v10807_v35 = vld [vmem:[#allocation40_spill] sm:$0xff]  ;;  %v10812_v40 = vld [vmem:[#allocation45_spill] sm:$0xff] }
 0x15c   :  { %v6053_v57 = vadd.f32 %v1015_v47, %v10789_v29  ;;  %v6056_v63 = vadd.f32 %v1017_v49, %v5736_v62  ;;  %v10801_v29 = vld [vmem:[#allocation34_spill] sm:$0xff]  ;;  %v10811_v39 = vld [vmem:[#allocation44_spill] sm:$0xff]  ;;  %v10814_v42 = vld [vmem:[#allocation47_spill] sm:$0xff] }
 0x15d   :  { %v6059_v0 = vadd.f32 %v1016_v50, %v10790_v34  ;;  %v6062_v1 = vadd.f32 %v1018_v51, %v10791_v36  ;;  %v10806_v34 = vld [vmem:[#allocation39_spill] sm:$0xff]  ;;  %v10808_v36 = vld [vmem:[#allocation41_spill] sm:$0xff]  ;;  %v10813_v41 = vld [vmem:[#allocation46_spill] sm:$0xff] }
 0x15e   :  { %v1023_v2 = vmax.f32 %v6053_v57, 0.0  ;;  %v6066_v3 = vmax.f32 %v6056_v63, 0.0  ;;  %v10815_v43 = vld [vmem:[#allocation48_spill] sm:$0xff]  ;;  %v10816_v44 = vld [vmem:[#allocation50_spill] sm:$0xff]  ;;  %v10817_v45 = vld [vmem:[#allocation51_spill] sm:$0xff] }
 0x15f   :  { %v1024_v4 = vmax.f32 %v6059_v0, 0.0  ;;  %v1026_v5 = vmax.f32 %v6062_v1, 0.0  ;;  %v10818_v47 = vld [vmem:[#allocation52_spill] sm:$0xff]  ;;  %v10819_v49 = vld [vmem:[#allocation53_spill] sm:$0xff]  ;;  %v10820_v50 = vld [vmem:[#allocation54_spill] sm:$0xff] }
 0x160   :  { %1030 = vst [vmem:[#allocation4 + $0x20] sm:$0xff] %v1023_v2  ;;  %1032 = vst [vmem:[#allocation4 + $0x30] sm:$0xff] %v6066_v3  ;;  %v1034_v6 = vpack.c.bf16 %v1023_v2, %v1023_v2  ;;  %v10821_v51 = vld [vmem:[#allocation55_spill] sm:$0xff]  ;;  %v10822_v2 = vld [vmem:[#allocation56_spill] sm:$0xff] }
 0x161   :  { %1031 = vst [vmem:[#allocation4 + $0x28] sm:$0xff] %v1024_v4  ;;  %v1035_v62 = vpack.c.bf16 %v1024_v4, %v1024_v4  ;;  %1033 = vst [vmem:[#allocation4 + $0x38] sm:$0xff] %v1026_v5  ;;  %v1037_v7 = vpack.c.bf16 %v1026_v5, %v1026_v5  ;;  %v10823_v4 = vld [vmem:[#allocation57_spill] sm:$0xff]  ;;  %v10824_v5 = vld [vmem:[#allocation58_spill] sm:$0xff] }
 0x163   :  { %1070 = vmatprep.mubr.bf16.mxu0 %v1035_v62  ;;  %1152 = vmatprep.mubr.bf16.mxu1 %v1035_v62  ;;  %v10825_v62 = vld [vmem:[#allocation59_spill] sm:$0xff] }
 0x164   :  { %1071 = vmatmul.mubr.bf16.vlgmr.msra.gmra.mrb[4].mxu0 %v1034_v6  ;;  %1153 = vmatmul.mubr.bf16.vlgmr.msra.gmra.mrb[4].mxu1 %v1034_v6  ;;  %v10826_v6 = vld [vmem:[#allocation60_spill] sm:$0xff] }
 0x165   :  { %1080 = vmatpush1.bf16.msra.mxu0 %v10792_v16  ;;  %1162 = vmatpush1.bf16.msra.mxu1 %v10793_v17  ;;  %v10828_v16 = vld [vmem:[#allocation62_spill] sm:$0xff]  ;;  %v10829_v17 = vld [vmem:[#allocation63_spill] sm:$0xff] }
 0x166   :  { %1111 = vmatprep.mubr.bf16.mxu0 %v1037_v7  ;;  %1193 = vmatprep.mubr.bf16.mxu1 %v1037_v7  ;;  %v10827_v7 = vld [vmem:[#allocation61_spill] sm:$0xff] }
 0x167   :  { %1081 = vmatprep.subr.bf16.mxu0 %v10794_v20  ;;  %1163 = vmatprep.subr.bf16.mxu1 %v10795_v23  ;;  %v10830_v20 = vld [vmem:[#allocation64_spill] sm:$0xff]  ;;  %v10831_v23 = vld [vmem:[#allocation65_spill] sm:$0xff] }
 0x169   :  { %1082 = vmatpush1.bf16.msra.mxu0 %v10796_v24  ;;  %1164 = vmatpush1.bf16.msra.mxu1 %v10797_v25  ;;  %v10832_v24 = vld [vmem:[#allocation66_spill] sm:$0xff]  ;;  %v10833_v25 = vld [vmem:[#allocation67_spill] sm:$0xff] }
 0x16a   :  { %1083 = vmatprep.subr.bf16.mxu0 %v10798_v26  ;;  %1165 = vmatprep.subr.bf16.mxu1 %v10799_v27  ;;  %v10834_v26 = vld [vmem:[#allocation68_spill] sm:$0xff]  ;;  %v10835_v27 = vld [vmem:[#allocation69_spill] sm:$0xff] }
 0x16d   :  { %1084 = vmatpush1.bf16.msra.mxu0 %v10800_v28  ;;  %1166 = vmatpush1.bf16.msra.mxu1 %v10801_v29  ;;  %v10836_v28 = vld [vmem:[#allocation70_spill] sm:$0xff] }
 0x16e   :  { %1085 = vmatprep.subr.bf16.mxu0 %v10802_v30  ;;  %1167 = vmatprep.subr.bf16.mxu1 %v10803_v31 }
 0x171   :  { %1086 = vmatpush1.bf16.msra.mxu0 %v10804_v32  ;;  %1168 = vmatpush1.bf16.msra.mxu1 %v10805_v33 }
 0x172   :  { %1087 = vmatprep.subr.bf16.mxu0 %v10806_v34  ;;  %1169 = vmatprep.subr.bf16.mxu1 %v10807_v35 }
 0x175   :  { %1088 = vmatpush1.bf16.msra.mxu0 %v10808_v36  ;;  %1170 = vmatpush1.bf16.msra.mxu1 %v10809_v37 }
 0x176   :  { %1089 = vmatprep.subr.bf16.mxu0 %v10810_v38  ;;  %1171 = vmatprep.subr.bf16.mxu1 %v10811_v39 }
 0x179   :  { %1090 = vmatpush1.bf16.msra.mxu0 %v5697_v48  ;;  %1172 = vmatpush1.bf16.msra.mxu1 %v10812_v40 }
 0x17a   :  { %1091 = vmatprep.subr.bf16.mxu0 %v10813_v41  ;;  %1173 = vmatprep.subr.bf16.mxu1 %v10814_v42 }
 0x17d   :  { %1092 = vmatpush1.bf16.msra.mxu0 %v5721_v61  ;;  %1174 = vmatpush1.bf16.msra.mxu1 %v10815_v43 }
 0x17e   :  { %1093 = vmatprep.subr.bf16.mxu0 %v10816_v44  ;;  %1175 = vmatprep.subr.bf16.mxu1 %v10817_v45 }
 0x181   :  { %1094 = vmatpush1.bf16.msra.mxu0 %v10818_v47  ;;  %1176 = vmatpush1.bf16.msra.mxu1 %v10819_v49 }
 0x182   :  { %1095 = vmatprep.subr.bf16.mxu0 %v10820_v50  ;;  %1177 = vmatprep.subr.bf16.mxu1 %v10821_v51 }
 0x185   :  { %1096 = vmatpush1.bf16.msra.mxu0 %v10822_v2  ;;  %1178 = vmatpush1.bf16.msra.mxu1 %v10823_v4 }
 0x186   :  { %1097 = vmatprep.subr.bf16.mxu0 %v10824_v5  ;;  %1179 = vmatprep.subr.bf16.mxu1 %v10825_v62 }
 0x189   :  { %1098 = vmatpush1.bf16.msra.mxu0 %v5808_v59  ;;  %1180 = vmatpush1.bf16.msra.mxu1 %v5813_v52 }
 0x18a   :  { %1099 = vmatprep.subr.bf16.mxu0 %v5818_v55  ;;  %1181 = vmatprep.subr.bf16.mxu1 %v10826_v6  ;;  %v10837_v6 = vld [vmem:[#allocation71_spill] sm:$0xff] }
 0x18d   :  { %1100 = vmatpush1.bf16.msra.mxu0 %v10827_v7  ;;  %1182 = vmatpush1.bf16.msra.mxu1 %v10828_v16  ;;  %v10838_v7 = vld [vmem:[#allocation72_spill] sm:$0xff]  ;;  %v10839_v16 = vld [vmem:[#allocation73_spill] sm:$0xff] }
 0x18e   :  { %1101 = vmatprep.subr.bf16.mxu0 %v10829_v17  ;;  %1183 = vmatprep.subr.bf16.mxu1 %v10830_v20  ;;  %v10840_v17 = vld [vmem:[#allocation74_spill] sm:$0xff]  ;;  %v10841_v20 = vld [vmem:[#allocation75_spill] sm:$0xff] }
 0x191   :  { %1102 = vmatpush1.bf16.msra.mxu0 %v10831_v23  ;;  %1184 = vmatpush1.bf16.msra.mxu1 %v10832_v24  ;;  %v10842_v23 = vld [vmem:[#allocation76_spill] sm:$0xff] }
 0x192   :  { %1103 = vmatprep.subr.bf16.mxu0 %v10833_v25  ;;  %1185 = vmatprep.subr.bf16.mxu1 %v10834_v26 }
 0x195   :  { %1104 = vmatpush1.bf16.msra.mxu0 %v10835_v27  ;;  %1186 = vmatpush1.bf16.msra.mxu1 %v10836_v28 }
 0x196   :  { %1105 = vmatprep.subr.bf16.mxu0 %v10837_v6  ;;  %1187 = vmatprep.subr.bf16.mxu1 %v10838_v7 }
 0x199   :  { %1106 = vmatpush1.bf16.msra.mxu0 %v10839_v16  ;;  %1188 = vmatpush1.bf16.msra.mxu1 %v10840_v17  ;;  %v1036_v16 = vpack.c.bf16 %v6066_v3, %v6066_v3  ;;  %v6150_v3 = vld [vmem:[%s9958_s1] ss:$16 sps:$4 sm:$0xff]  }
 0x19a   :  { %1107 = vmatprep.subr.bf16.mxu0 %v10841_v20  ;;  %1189 = vmatprep.subr.bf16.mxu1 %v10842_v23  ;;  %v6138_v20 = vld [vmem:[%s9958_s1 + $0x4] ss:$16 sps:$4 sm:$0xff]   ;;  %10845 = vst [vmem:[#allocation15_spill] sm:$0xff] %v6150_v3 }
 0x19b   :  { %10843 = vst [vmem:[#allocation13_spill] sm:$0xff] %v6138_v20 }
 0x19d   :  { %1108 = vmatpush1.bf16.msra.mxu0 %v5930_v53  ;;  %1190 = vmatpush1.bf16.msra.mxu1 %v5935_v60 }
 0x19e   :  { %1109 = vmatprep.subr.bf16.mxu0 %v5942_v46  ;;  %1191 = vmatprep.subr.bf16.mxu1 %v5947_v58  ;;  %v6144_v46 = vld [vmem:[%s9958_s1 + $0xc] ss:$16 sps:$4 sm:$0xff]  }
 0x19f   :  { %10844 = vst [vmem:[#allocation14_spill] sm:$0xff] %v6144_v46 }
 0x1a1   :  { %1110 = vmatpush1.bf16.msra.mxu0 %v5954_v54  ;;  %1192 = vmatpush1.bf16.msra.mxu1 %v5959_v56 }
 0x1a2   :  { %1256 = vmatprep.subr.bf16.mxu0 %v6138_v20  ;;  %1338 = vmatprep.subr.bf16.mxu1 %v6144_v46  ;;  %v6156_v20 = vld [vmem:[%s9958_s1 + $0x8] ss:$16 sps:$4 sm:$0xff]   ;;  %v6162_v46 = vld [vmem:[%s9958_s1 + $0x24] ss:$16 sps:$4 sm:$0xff]  }
 0x1a3   :  { %10846 = vst [vmem:[#allocation16_spill] sm:$0xff] %v6156_v20  ;;  %10847 = vst [vmem:[#allocation17_spill] sm:$0xff] %v6162_v46 }
 0x1a4   :  { %1112 = vmatmul.mubr.bf16.vlgmr.msra.gmra.mrb[4].mxu0 %v1036_v16  ;;  %1194 = vmatmul.mubr.bf16.vlgmr.msra.gmra.mrb[4].mxu1 %v1036_v16  ;;  %v6168_v16 = vld [vmem:[%s9958_s1 + $0x2c] ss:$16 sps:$4 sm:$0xff]  }
 0x1a5   :  { %1257 = vmatpush1.bf16.msra.mxu0 %v6150_v3  ;;  %1339 = vmatpush1.bf16.msra.mxu1 %v6156_v20  ;;  %10848 = vst [vmem:[#allocation18_spill] sm:$0xff] %v6168_v16  ;;  %v6174_v3 = vld [vmem:[%s9958_s1 + $0x20] ss:$16 sps:$4 sm:$0xff]   ;;  %v6180_v20 = vld [vmem:[%s9958_s1 + $0x28] ss:$16 sps:$4 sm:$0xff]  }
 0x1a6   :  { %1258 = vmatprep.subr.bf16.mxu0 %v6162_v46  ;;  %1340 = vmatprep.subr.bf16.mxu1 %v6168_v16  ;;  %10849 = vst [vmem:[#allocation19_spill] sm:$0xff] %v6174_v3  ;;  %10850 = vst [vmem:[#allocation20_spill] sm:$0xff] %v6180_v20  ;;  %v6186_v46 = vld [vmem:[%s9958_s1 + $0x44] ss:$16 sps:$4 sm:$0xff]   ;;  %v6192_v16 = vld [vmem:[%s9958_s1 + $0x4c] ss:$16 sps:$4 sm:$0xff]  }
 0x1a7   :  { %10851 = vst [vmem:[#allocation21_spill] sm:$0xff] %v6186_v46  ;;  %10852 = vst [vmem:[#allocation22_spill] sm:$0xff] %v6192_v16 }
 0x1a9   :  { %1259 = vmatpush1.bf16.msra.mxu0 %v6174_v3  ;;  %1341 = vmatpush1.bf16.msra.mxu1 %v6180_v20  ;;  %v6198_v3 = vld [vmem:[%s9958_s1 + $0x40] ss:$16 sps:$4 sm:$0xff]   ;;  %v6204_v20 = vld [vmem:[%s9958_s1 + $0x48] ss:$16 sps:$4 sm:$0xff]  }
 0x1aa   :  { %1260 = vmatprep.subr.bf16.mxu0 %v6186_v46  ;;  %1342 = vmatprep.subr.bf16.mxu1 %v6192_v16  ;;  %10853 = vst [vmem:[#allocation23_spill] sm:$0xff] %v6198_v3  ;;  %10854 = vst [vmem:[#allocation24_spill] sm:$0xff] %v6204_v20  ;;  %v6210_v46 = vld [vmem:[%s9958_s1 + $0x64] ss:$16 sps:$4 sm:$0xff]   ;;  %v6216_v16 = vld [vmem:[%s9958_s1 + $0x6c] ss:$16 sps:$4 sm:$0xff]  }
 0x1ab   :  { %10855 = vst [vmem:[#allocation8_spill] sm:$0xff] %v6210_v46  ;;  %10856 = vst [vmem:[#allocation7_spill] sm:$0xff] %v6216_v16 }
 0x1ad   :  { %1261 = vmatpush1.bf16.msra.mxu0 %v6198_v3  ;;  %1343 = vmatpush1.bf16.msra.mxu1 %v6204_v20  ;;  %v6222_v3 = vld [vmem:[%s9958_s1 + $0x60] ss:$16 sps:$4 sm:$0xff]   ;;  %v6228_v20 = vld [vmem:[%s9958_s1 + $0x68] ss:$16 sps:$4 sm:$0xff]  }
 0x1ae   :  { %1262 = vmatprep.subr.bf16.mxu0 %v6210_v46  ;;  %1344 = vmatprep.subr.bf16.mxu1 %v6216_v16  ;;  %10857 = vst [vmem:[#allocation49_spill] sm:$0xff] %v6222_v3  ;;  %10858 = vst [vmem:[#allocation25_spill] sm:$0xff] %v6228_v20  ;;  %v6234_v46 = vld [vmem:[%s9958_s1 + $0x84] ss:$16 sps:$4 sm:$0xff]   ;;  %v6240_v16 = vld [vmem:[%s9958_s1 + $0x8c] ss:$16 sps:$4 sm:$0xff]  }
 0x1af   :  { %10859 = vst [vmem:[#allocation26_spill] sm:$0xff] %v6234_v46  ;;  %10860 = vst [vmem:[#allocation27_spill] sm:$0xff] %v6240_v16 }
 0x1b1   :  { %1263 = vmatpush1.bf16.msra.mxu0 %v6222_v3  ;;  %1345 = vmatpush1.bf16.msra.mxu1 %v6228_v20  ;;  %v6246_v3 = vld [vmem:[%s9958_s1 + $0x80] ss:$16 sps:$4 sm:$0xff]   ;;  %v6252_v20 = vld [vmem:[%s9958_s1 + $0x88] ss:$16 sps:$4 sm:$0xff]  }
 0x1b2   :  { %1264 = vmatprep.subr.bf16.mxu0 %v6234_v46  ;;  %1346 = vmatprep.subr.bf16.mxu1 %v6240_v16  ;;  %10861 = vst [vmem:[#allocation28_spill] sm:$0xff] %v6246_v3  ;;  %10862 = vst [vmem:[#allocation29_spill] sm:$0xff] %v6252_v20  ;;  %v6258_v46 = vld [vmem:[%s9958_s1 + $0xa4] ss:$16 sps:$4 sm:$0xff]   ;;  %v6264_v16 = vld [vmem:[%s9958_s1 + $0xac] ss:$16 sps:$4 sm:$0xff]  }
 0x1b3   :  { %10863 = vst [vmem:[#allocation30_spill] sm:$0xff] %v6258_v46  ;;  %10864 = vst [vmem:[#allocation31_spill] sm:$0xff] %v6264_v16 }
 0x1b5   :  { %1265 = vmatpush1.bf16.msra.mxu0 %v6246_v3  ;;  %1347 = vmatpush1.bf16.msra.mxu1 %v6252_v20  ;;  %v6270_v3 = vld [vmem:[%s9958_s1 + $0xa0] ss:$16 sps:$4 sm:$0xff]   ;;  %v6276_v20 = vld [vmem:[%s9958_s1 + $0xa8] ss:$16 sps:$4 sm:$0xff]  }
 0x1b6   :  { %1266 = vmatprep.subr.bf16.mxu0 %v6258_v46  ;;  %1348 = vmatprep.subr.bf16.mxu1 %v6264_v16  ;;  %10865 = vst [vmem:[#allocation32_spill] sm:$0xff] %v6270_v3  ;;  %10866 = vst [vmem:[#allocation33_spill] sm:$0xff] %v6276_v20  ;;  %v6282_v46 = vld [vmem:[%s9958_s1 + $0xc4] ss:$16 sps:$4 sm:$0xff]   ;;  %v6288_v16 = vld [vmem:[%s9958_s1 + $0xcc] ss:$16 sps:$4 sm:$0xff]  }
 0x1b7   :  { %10867 = vst [vmem:[#allocation34_spill] sm:$0xff] %v6282_v46  ;;  %10868 = vst [vmem:[#allocation35_spill] sm:$0xff] %v6288_v16 }
 0x1b9   :  { %1267 = vmatpush1.bf16.msra.mxu0 %v6270_v3  ;;  %1349 = vmatpush1.bf16.msra.mxu1 %v6276_v20  ;;  %v6294_v3 = vld [vmem:[%s9958_s1 + $0xc0] ss:$16 sps:$4 sm:$0xff]   ;;  %v6300_v20 = vld [vmem:[%s9958_s1 + $0xc8] ss:$16 sps:$4 sm:$0xff]  }
 0x1ba   :  { %1268 = vmatprep.subr.bf16.mxu0 %v6282_v46  ;;  %1350 = vmatprep.subr.bf16.mxu1 %v6288_v16  ;;  %10869 = vst [vmem:[#allocation36_spill] sm:$0xff] %v6294_v3  ;;  %10870 = vst [vmem:[#allocation37_spill] sm:$0xff] %v6300_v20  ;;  %v6306_v46 = vld [vmem:[%s9958_s1 + $0xe4] ss:$16 sps:$4 sm:$0xff]   ;;  %v6312_v16 = vld [vmem:[%s9958_s1 + $0xec] ss:$16 sps:$4 sm:$0xff]  }
 0x1bb   :  { %10871 = vst [vmem:[#allocation38_spill] sm:$0xff] %v6306_v46  ;;  %10872 = vst [vmem:[#allocation39_spill] sm:$0xff] %v6312_v16 }
 0x1bd   :  { %1269 = vmatpush1.bf16.msra.mxu0 %v6294_v3  ;;  %1351 = vmatpush1.bf16.msra.mxu1 %v6300_v20  ;;  %v6318_v3 = vld [vmem:[%s9958_s1 + $0xe0] ss:$16 sps:$4 sm:$0xff]   ;;  %v6324_v20 = vld [vmem:[%s9958_s1 + $0xe8] ss:$16 sps:$4 sm:$0xff]  }
 0x1be   :  { %1270 = vmatprep.subr.bf16.mxu0 %v6306_v46  ;;  %1352 = vmatprep.subr.bf16.mxu1 %v6312_v16  ;;  %10873 = vst [vmem:[#allocation40_spill] sm:$0xff] %v6318_v3  ;;  %10874 = vst [vmem:[#allocation41_spill] sm:$0xff] %v6324_v20  ;;  %v6330_v46 = vld [vmem:[%s9958_s1 + $0x104] ss:$16 sps:$4 sm:$0xff]   ;;  %v6336_v16 = vld [vmem:[%s9958_s1 + $0x10c] ss:$16 sps:$4 sm:$0xff]  }
 0x1bf   :  { %10875 = vst [vmem:[#allocation42_spill] sm:$0xff] %v6330_v46  ;;  %10876 = vst [vmem:[#allocation43_spill] sm:$0xff] %v6336_v16 }
 0x1c1   :  { %1271 = vmatpush1.bf16.msra.mxu0 %v6318_v3  ;;  %1353 = vmatpush1.bf16.msra.mxu1 %v6324_v20  ;;  %v6342_v3 = vld [vmem:[%s9958_s1 + $0x100] ss:$16 sps:$4 sm:$0xff]   ;;  %v6348_v20 = vld [vmem:[%s9958_s1 + $0x108] ss:$16 sps:$4 sm:$0xff]  }
 0x1c2   :  { %1272 = vmatprep.subr.bf16.mxu0 %v6330_v46  ;;  %1354 = vmatprep.subr.bf16.mxu1 %v6336_v16  ;;  %10877 = vst [vmem:[#allocation44_spill] sm:$0xff] %v6342_v3  ;;  %10878 = vst [vmem:[#allocation45_spill] sm:$0xff] %v6348_v20  ;;  %v6354_v46 = vld [vmem:[%s9958_s1 + $0x124] ss:$16 sps:$4 sm:$0xff]   ;;  %v6360_v16 = vld [vmem:[%s9958_s1 + $0x12c] ss:$16 sps:$4 sm:$0xff]  }
 0x1c3   :  { %10879 = vst [vmem:[#allocation46_spill] sm:$0xff] %v6354_v46  ;;  %10880 = vst [vmem:[#allocation47_spill] sm:$0xff] %v6360_v16 }
 0x1c5   :  { %1273 = vmatpush1.bf16.msra.mxu0 %v6342_v3  ;;  %1355 = vmatpush1.bf16.msra.mxu1 %v6348_v20  ;;  %v6366_v3 = vld [vmem:[%s9958_s1 + $0x120] ss:$16 sps:$4 sm:$0xff]   ;;  %v6372_v20 = vld [vmem:[%s9958_s1 + $0x128] ss:$16 sps:$4 sm:$0xff]  }
 0x1c6   :  { %1274 = vmatprep.subr.bf16.mxu0 %v6354_v46  ;;  %1356 = vmatprep.subr.bf16.mxu1 %v6360_v16  ;;  %10881 = vst [vmem:[#allocation48_spill] sm:$0xff] %v6366_v3  ;;  %10882 = vst [vmem:[#allocation50_spill] sm:$0xff] %v6372_v20  ;;  %v6378_v46 = vld [vmem:[%s9958_s1 + $0x144] ss:$16 sps:$4 sm:$0xff]   ;;  %v6384_v16 = vld [vmem:[%s9958_s1 + $0x14c] ss:$16 sps:$4 sm:$0xff]  }
 0x1c7   :  { %10883 = vst [vmem:[#allocation51_spill] sm:$0xff] %v6378_v46  ;;  %10884 = vst [vmem:[#allocation52_spill] sm:$0xff] %v6384_v16 }
 0x1c9   :  { %1275 = vmatpush1.bf16.msra.mxu0 %v6366_v3  ;;  %1357 = vmatpush1.bf16.msra.mxu1 %v6372_v20  ;;  %v6390_v3 = vld [vmem:[%s9958_s1 + $0x140] ss:$16 sps:$4 sm:$0xff]   ;;  %v6396_v20 = vld [vmem:[%s9958_s1 + $0x148] ss:$16 sps:$4 sm:$0xff]  }
 0x1ca   :  { %1276 = vmatprep.subr.bf16.mxu0 %v6378_v46  ;;  %1358 = vmatprep.subr.bf16.mxu1 %v6384_v16  ;;  %10885 = vst [vmem:[#allocation53_spill] sm:$0xff] %v6390_v3  ;;  %10886 = vst [vmem:[#allocation54_spill] sm:$0xff] %v6396_v20  ;;  %v6402_v46 = vld [vmem:[%s9958_s1 + $0x164] ss:$16 sps:$4 sm:$0xff]   ;;  %v6408_v16 = vld [vmem:[%s9958_s1 + $0x16c] ss:$16 sps:$4 sm:$0xff]  }
 0x1cb   :  { %10887 = vst [vmem:[#allocation55_spill] sm:$0xff] %v6402_v46  ;;  %10888 = vst [vmem:[#allocation56_spill] sm:$0xff] %v6408_v16 }
 0x1cd   :  { %1277 = vmatpush1.bf16.msra.mxu0 %v6390_v3  ;;  %1359 = vmatpush1.bf16.msra.mxu1 %v6396_v20  ;;  %v6414_v3 = vld [vmem:[%s9958_s1 + $0x160] ss:$16 sps:$4 sm:$0xff]   ;;  %v6420_v20 = vld [vmem:[%s9958_s1 + $0x168] ss:$16 sps:$4 sm:$0xff]  }
 0x1ce   :  { %1278 = vmatprep.subr.bf16.mxu0 %v6402_v46  ;;  %1360 = vmatprep.subr.bf16.mxu1 %v6408_v16  ;;  %10889 = vst [vmem:[#allocation57_spill] sm:$0xff] %v6414_v3  ;;  %10890 = vst [vmem:[#allocation58_spill] sm:$0xff] %v6420_v20  ;;  %v6426_v46 = vld [vmem:[%s9958_s1 + $0x184] ss:$16 sps:$4 sm:$0xff]   ;;  %v6432_v16 = vld [vmem:[%s9958_s1 + $0x18c] ss:$16 sps:$4 sm:$0xff]  }
 0x1cf   :  { %10891 = vst [vmem:[#allocation59_spill] sm:$0xff] %v6426_v46  ;;  %10892 = vst [vmem:[#allocation66_spill] sm:$0xff] %v6432_v16 }
 0x1d1   :  { %1279 = vmatpush1.bf16.msra.mxu0 %v6414_v3  ;;  %1361 = vmatpush1.bf16.msra.mxu1 %v6420_v20  ;;  %v6438_v3 = vld [vmem:[%s9958_s1 + $0x180] ss:$16 sps:$4 sm:$0xff]   ;;  %v6444_v20 = vld [vmem:[%s9958_s1 + $0x188] ss:$16 sps:$4 sm:$0xff]  }
 0x1d2   :  { %1280 = vmatprep.subr.bf16.mxu0 %v6426_v46  ;;  %1362 = vmatprep.subr.bf16.mxu1 %v6432_v16  ;;  %10893 = vst [vmem:[#allocation67_spill] sm:$0xff] %v6438_v3  ;;  %10894 = vst [vmem:[#allocation68_spill] sm:$0xff] %v6444_v20  ;;  %v6450_v46 = vld [vmem:[%s9958_s1 + $0x1a4] ss:$16 sps:$4 sm:$0xff]   ;;  %v6456_v16 = vld [vmem:[%s9958_s1 + $0x1ac] ss:$16 sps:$4 sm:$0xff]  }
 0x1d3   :  { %10895 = vst [vmem:[#allocation69_spill] sm:$0xff] %v6450_v46  ;;  %10896 = vst [vmem:[#allocation70_spill] sm:$0xff] %v6456_v16 }
 0x1d5   :  { %1281 = vmatpush1.bf16.msra.mxu0 %v6438_v3  ;;  %1363 = vmatpush1.bf16.msra.mxu1 %v6444_v20  ;;  %v6462_v3 = vld [vmem:[%s9958_s1 + $0x1a0] ss:$16 sps:$4 sm:$0xff]   ;;  %v6468_v20 = vld [vmem:[%s9958_s1 + $0x1a8] ss:$16 sps:$4 sm:$0xff]  }
 0x1d6   :  { %1282 = vmatprep.subr.bf16.mxu0 %v6450_v46  ;;  %1364 = vmatprep.subr.bf16.mxu1 %v6456_v16  ;;  %10897 = vst [vmem:[#allocation71_spill] sm:$0xff] %v6462_v3  ;;  %10898 = vst [vmem:[#allocation83_spill] sm:$0xff] %v6468_v20  ;;  %v6474_v46 = vld [vmem:[%s9958_s1 + $0x1c4] ss:$16 sps:$4 sm:$0xff]   ;;  %v6480_v16 = vld [vmem:[%s9958_s1 + $0x1cc] ss:$16 sps:$4 sm:$0xff]  }
 0x1d7   :  { %10899 = vst [vmem:[#allocation84_spill] sm:$0xff] %v6474_v46  ;;  %10900 = vst [vmem:[#allocation85_spill] sm:$0xff] %v6480_v16 }
 0x1d9   :  { %1283 = vmatpush1.bf16.msra.mxu0 %v6462_v3  ;;  %1365 = vmatpush1.bf16.msra.mxu1 %v6468_v20 }
 0x1da   :  { %1284 = vmatprep.subr.bf16.mxu0 %v6474_v46  ;;  %1366 = vmatprep.subr.bf16.mxu1 %v6480_v16  ;;  %v4183_v16 = vld [vmem:[%s9960_s3 + $0x4] sm:$0xf] }
 0x1dd   :  { %1285 = vmatpush1.bf16.msra.mxu0 %v10777_v8  ;;  %1367 = vmatpush1.bf16.msra.mxu1 %v10778_v9  ;;  %v1212_v8 = vrot.slane %v4183_v16, %v6033_v18  ;;  %v1220_v9 = vrot.slane %v4183_v16, %v6035_v19 }
 0x1de   :  { %1286 = vmatprep.subr.bf16.mxu0 %v10779_v10  ;;  %1368 = vmatprep.subr.bf16.mxu1 %v10780_v11  ;;  %v1216_v11 = vrot.slane %v4183_v16, %v6040_v21 }
 0x1e1   :  { %1287 = vmatpush1.bf16.msra.mxu0 %v10781_v12  ;;  %1369 = vmatpush1.bf16.msra.mxu1 %v10782_v13  ;;  %v1224_v12 = vrot.slane %v4183_v16, %v6042_v22 }
 0x1e2   :  { %1297 = vmatprep.subr.bf16.mxu0 %v10783_v14  ;;  %1379 = vmatprep.subr.bf16.mxu1 %v10784_v15 }
 0x277   :  { %v1113_v46 = vpop.f32.mrb[4].mxu0  ;;  %v1195_v10 = vpop.f32.mrb[4].mxu1 }
 0x278   :  { %v1202_v13 = vsub.f32 %v1113_v46, %v6053_v57  ;;  %v1204_v14 = vsub.f32 %v1195_v10, %v6056_v63  ;;  %v1115_v20 = vpop.f32.mrb[5].mxu0  ;;  %v1197_v15 = vpop.f32.mrb[5].mxu1 }
 0x279   :  { %v1203_v3 = vsub.f32 %v1115_v20, %v6059_v0  ;;  %v1205_v56 = vsub.f32 %v1197_v15, %v6062_v1  ;;  %v1117_v54 = vpop.f32.mrb[6].mxu0  ;;  %v1199_v18 = vpop.f32.mrb[6].mxu1  ;;  %v10941_v15 = vld [vmem:[#allocation33_spill] sm:$0xff] }
 0x27a   :  { %v1229_v58 = vadd.f32 %v1212_v8, %v1202_v13  ;;  %v1231_v19 = vadd.f32 %v1220_v9, %v1204_v14  ;;  %v1118_v60 = vpop.f32.mrb[7].mxu0  ;;  %v1200_v53 = vpop.f32.mrb[7].mxu1  ;;  %v6572_v8 = vld [vmem:[%s9958_s1 + $0x240] ss:$16 sps:$4 sm:$0xff]   ;;  %v10936_v9 = vld [vmem:[#allocation28_spill] sm:$0xff] }
 0x27b   :  { %v1230_v23 = vadd.f32 %v1216_v11, %v1203_v3  ;;  %v1232_v21 = vadd.f32 %v1224_v12, %v1205_v56  ;;  %v6566_v3 = vld [vmem:[%s9958_s1 + $0x24c] ss:$16 sps:$4 sm:$0xff]   ;;  %v10937_v11 = vld [vmem:[#allocation29_spill] sm:$0xff]  ;;  %v10939_v13 = vld [vmem:[#allocation31_spill] sm:$0xff] }
 0x27c   :  { %v1233_v17 = vmul.f32 0.05, %v1229_v58  ;;  %v1235_v16 = vmul.f32 0.05, %v1231_v19  ;;  %v10938_v12 = vld [vmem:[#allocation30_spill] sm:$0xff]  ;;  %v10940_v14 = vld [vmem:[#allocation32_spill] sm:$0xff] }
 0x27d   :  { %v1234_v22 = vmul.f32 0.05, %v1230_v23  ;;  %v1236_v46 = vmul.f32 0.05, %v1232_v21  ;;  %v6560_v23 = vld [vmem:[%s9958_s1 + $0x244] ss:$16 sps:$4 sm:$0xff]  }
 0x27e   :  { %v6503_v10 = vadd.f32 %v1233_v17, %v6053_v57  ;;  %v6506_v7 = vadd.f32 %v1235_v16, %v6056_v63  ;;  %v6530_v57 = vld [vmem:[%s9958_s1 + $0x208] ss:$16 sps:$4 sm:$0xff]   ;;  %v6536_v63 = vld [vmem:[%s9958_s1 + $0x224] ss:$16 sps:$4 sm:$0xff]  }
 0x27f   :  { %v6509_v20 = vadd.f32 %v1234_v22, %v6059_v0  ;;  %v6512_v54 = vadd.f32 %v1236_v46, %v6062_v1  ;;  %v6524_v22 = vld [vmem:[%s9958_s1 + $0x200] ss:$16 sps:$4 sm:$0xff]   ;;  %v6542_v0 = vld [vmem:[%s9958_s1 + $0x22c] ss:$16 sps:$4 sm:$0xff]   ;;  %v6554_v17 = vld [vmem:[%s9958_s1 + $0x228] ss:$16 sps:$4 sm:$0xff]  }
 0x280   :  { %v1241_v53 = vmax.f32 %v6503_v10, 0.0  ;;  %v6516_v60 = vmax.f32 %v6506_v7, 0.0  ;;  %v6548_v1 = vld [vmem:[%s9958_s1 + $0x220] ss:$16 sps:$4 sm:$0xff]   ;;  %v10942_v16 = vld [vmem:[#allocation34_spill] sm:$0xff] }
 0x281   :  { %v1242_v58 = vmax.f32 %v6509_v20, 0.0  ;;  %v1244_v56 = vmax.f32 %v6512_v54, 0.0  ;;  %v10943_v46 = vld [vmem:[#allocation35_spill] sm:$0xff] }
 0x282   :  { %1248 = vst [vmem:[#allocation4 + $0x40] sm:$0xff] %v1241_v53  ;;  %1250 = vst [vmem:[#allocation4 + $0x50] sm:$0xff] %v6516_v60  ;;  %v1252_v19 = vpack.c.bf16 %v1241_v53, %v1241_v53  ;;  %v10944_v53 = vld [vmem:[#allocation36_spill] sm:$0xff] }
 0x283   :  { %1249 = vst [vmem:[#allocation4 + $0x48] sm:$0xff] %v1242_v58  ;;  %v1253_v18 = vpack.c.bf16 %v1242_v58, %v1242_v58  ;;  %1251 = vst [vmem:[#allocation4 + $0x58] sm:$0xff] %v1244_v56  ;;  %v1255_v21 = vpack.c.bf16 %v1244_v56, %v1244_v56  ;;  %v10946_v58 = vld [vmem:[#allocation38_spill] sm:$0xff]  ;;  %v10947_v56 = vld [vmem:[#allocation39_spill] sm:$0xff] }
 0x285   :  { %1288 = vmatprep.mubr.bf16.mxu0 %v1253_v18  ;;  %1370 = vmatprep.mubr.bf16.mxu1 %v1253_v18  ;;  %v10948_v18 = vld [vmem:[#allocation40_spill] sm:$0xff] }
 0x286   :  { %1289 = vmatmul.mubr.bf16.vlgmr.msra.gmra.mrb[8].mxu0 %v1252_v19  ;;  %1371 = vmatmul.mubr.bf16.vlgmr.msra.gmra.mrb[8].mxu1 %v1252_v19  ;;  %v10949_v19 = vld [vmem:[#allocation41_spill] sm:$0xff] }
 0x287   :  { %1298 = vmatpush1.bf16.msra.mxu0 %v6524_v22  ;;  %1380 = vmatpush1.bf16.msra.mxu1 %v6530_v57 }
 0x288   :  { %1329 = vmatprep.mubr.bf16.mxu0 %v1255_v21  ;;  %1411 = vmatprep.mubr.bf16.mxu1 %v1255_v21  ;;  %v10950_v21 = vld [vmem:[#allocation42_spill] sm:$0xff] }
 0x289   :  { %1299 = vmatprep.subr.bf16.mxu0 %v6536_v63  ;;  %1381 = vmatprep.subr.bf16.mxu1 %v6542_v0 }
 0x28b   :  { %1300 = vmatpush1.bf16.msra.mxu0 %v6548_v1  ;;  %1382 = vmatpush1.bf16.msra.mxu1 %v6554_v17 }
 0x28c   :  { %1301 = vmatprep.subr.bf16.mxu0 %v6560_v23  ;;  %1383 = vmatprep.subr.bf16.mxu1 %v6566_v3 }
 0x28f   :  { %1302 = vmatpush1.bf16.msra.mxu0 %v6572_v8  ;;  %1384 = vmatpush1.bf16.msra.mxu1 %v10801_v29  ;;  %v10903_v29 = vld [vmem:[#allocation62_spill] sm:$0xff] }
 0x290   :  { %1303 = vmatprep.subr.bf16.mxu0 %v10802_v30  ;;  %1385 = vmatprep.subr.bf16.mxu1 %v10803_v31  ;;  %v10904_v30 = vld [vmem:[#allocation63_spill] sm:$0xff]  ;;  %v10905_v31 = vld [vmem:[#allocation64_spill] sm:$0xff] }
 0x293   :  { %1304 = vmatpush1.bf16.msra.mxu0 %v10804_v32  ;;  %1386 = vmatpush1.bf16.msra.mxu1 %v10805_v33  ;;  %v10906_v32 = vld [vmem:[#allocation65_spill] sm:$0xff]  ;;  %v10910_v33 = vld [vmem:[#allocation75_spill] sm:$0xff] }
 0x294   :  { %1305 = vmatprep.subr.bf16.mxu0 %v10806_v34  ;;  %1387 = vmatprep.subr.bf16.mxu1 %v10807_v35  ;;  %v10911_v34 = vld [vmem:[#allocation76_spill] sm:$0xff]  ;;  %v10912_v35 = vld [vmem:[#allocation77_spill] sm:$0xff] }
 0x297   :  { %1306 = vmatpush1.bf16.msra.mxu0 %v10808_v36  ;;  %1388 = vmatpush1.bf16.msra.mxu1 %v10809_v37  ;;  %v10913_v36 = vld [vmem:[#allocation78_spill] sm:$0xff]  ;;  %v10914_v37 = vld [vmem:[#allocation79_spill] sm:$0xff] }
 0x298   :  { %1307 = vmatprep.subr.bf16.mxu0 %v10810_v38  ;;  %1389 = vmatprep.subr.bf16.mxu1 %v10811_v39  ;;  %v10915_v38 = vld [vmem:[#allocation80_spill] sm:$0xff]  ;;  %v10916_v39 = vld [vmem:[#allocation81_spill] sm:$0xff] }
 0x29b   :  { %1308 = vmatpush1.bf16.msra.mxu0 %v5697_v48  ;;  %1390 = vmatpush1.bf16.msra.mxu1 %v10812_v40  ;;  %v10902_v48 = vld [vmem:[#allocation61_spill] sm:$0xff]  ;;  %v10917_v40 = vld [vmem:[#allocation82_spill] sm:$0xff] }
 0x29c   :  { %1309 = vmatprep.subr.bf16.mxu0 %v10813_v41  ;;  %1391 = vmatprep.subr.bf16.mxu1 %v10814_v42  ;;  %v1254_v41 = vpack.c.bf16 %v6516_v60, %v6516_v60  ;;  %v10918_v42 = vld [vmem:[#allocation13_spill] sm:$0xff] }
 0x29d   :  { %v10945_v60 = vld [vmem:[#allocation37_spill] sm:$0xff] }
 0x29f   :  { %1310 = vmatpush1.bf16.msra.mxu0 %v5721_v61  ;;  %1392 = vmatpush1.bf16.msra.mxu1 %v10815_v43  ;;  %v10901_v61 = vld [vmem:[#allocation60_spill] sm:$0xff]  ;;  %v10919_v43 = vld [vmem:[#allocation14_spill] sm:$0xff] }
 0x2a0   :  { %1311 = vmatprep.subr.bf16.mxu0 %v10816_v44  ;;  %1393 = vmatprep.subr.bf16.mxu1 %v10817_v45  ;;  %v10920_v44 = vld [vmem:[#allocation15_spill] sm:$0xff]  ;;  %v10921_v45 = vld [vmem:[#allocation16_spill] sm:$0xff] }
 0x2a3   :  { %1312 = vmatpush1.bf16.msra.mxu0 %v10818_v47  ;;  %1394 = vmatpush1.bf16.msra.mxu1 %v10819_v49  ;;  %v10922_v47 = vld [vmem:[#allocation17_spill] sm:$0xff]  ;;  %v10923_v49 = vld [vmem:[#allocation18_spill] sm:$0xff] }
 0x2a4   :  { %1313 = vmatprep.subr.bf16.mxu0 %v10820_v50  ;;  %1395 = vmatprep.subr.bf16.mxu1 %v10821_v51  ;;  %v10924_v50 = vld [vmem:[#allocation19_spill] sm:$0xff]  ;;  %v10925_v51 = vld [vmem:[#allocation20_spill] sm:$0xff] }
 0x2a7   :  { %1314 = vmatpush1.bf16.msra.mxu0 %v10822_v2  ;;  %1396 = vmatpush1.bf16.msra.mxu1 %v10823_v4  ;;  %v10926_v2 = vld [vmem:[#allocation21_spill] sm:$0xff]  ;;  %v10927_v4 = vld [vmem:[#allocation22_spill] sm:$0xff] }
 0x2a8   :  { %1315 = vmatprep.subr.bf16.mxu0 %v10824_v5  ;;  %1397 = vmatprep.subr.bf16.mxu1 %v10825_v62  ;;  %v10928_v5 = vld [vmem:[#allocation23_spill] sm:$0xff]  ;;  %v10929_v62 = vld [vmem:[#allocation24_spill] sm:$0xff] }
 0x2ab   :  { %1316 = vmatpush1.bf16.msra.mxu0 %v5808_v59  ;;  %1398 = vmatpush1.bf16.msra.mxu1 %v5813_v52  ;;  %v10908_v59 = vld [vmem:[#allocation73_spill] sm:$0xff]  ;;  %v10909_v52 = vld [vmem:[#allocation74_spill] sm:$0xff] }
 0x2ac   :  { %1317 = vmatprep.subr.bf16.mxu0 %v5818_v55  ;;  %1399 = vmatprep.subr.bf16.mxu1 %v10901_v61  ;;  %v10907_v55 = vld [vmem:[#allocation72_spill] sm:$0xff]  ;;  %v10951_v61 = vld [vmem:[#allocation43_spill] sm:$0xff] }
 0x2af   :  { %1318 = vmatpush1.bf16.msra.mxu0 %v10902_v48  ;;  %1400 = vmatpush1.bf16.msra.mxu1 %v10903_v29  ;;  %v10952_v48 = vld [vmem:[#allocation44_spill] sm:$0xff]  ;;  %v10953_v29 = vld [vmem:[#allocation45_spill] sm:$0xff] }
 0x2b0   :  { %1319 = vmatprep.subr.bf16.mxu0 %v10904_v30  ;;  %1401 = vmatprep.subr.bf16.mxu1 %v10905_v31  ;;  %v10954_v30 = vld [vmem:[#allocation46_spill] sm:$0xff]  ;;  %v10955_v31 = vld [vmem:[#allocation47_spill] sm:$0xff] }
 0x2b3   :  { %1320 = vmatpush1.bf16.msra.mxu0 %v10906_v32  ;;  %1402 = vmatpush1.bf16.msra.mxu1 %v10832_v24  ;;  %v10931_v24 = vld [vmem:[#allocation7_spill] sm:$0xff]  ;;  %v10956_v32 = vld [vmem:[#allocation48_spill] sm:$0xff] }
 0x2b4   :  { %1321 = vmatprep.subr.bf16.mxu0 %v10833_v25  ;;  %1403 = vmatprep.subr.bf16.mxu1 %v10834_v26  ;;  %v10932_v25 = vld [vmem:[#allocation49_spill] sm:$0xff] }
 0x2b5   :  { %v10933_v26 = vld [vmem:[#allocation25_spill] sm:$0xff] }
 0x2b7   :  { %1322 = vmatpush1.bf16.msra.mxu0 %v10835_v27  ;;  %1404 = vmatpush1.bf16.msra.mxu1 %v10836_v28  ;;  %v10934_v27 = vld [vmem:[#allocation26_spill] sm:$0xff]  ;;  %v10935_v28 = vld [vmem:[#allocation27_spill] sm:$0xff] }
 0x2b8   :  { %1323 = vmatprep.subr.bf16.mxu0 %v10837_v6  ;;  %1405 = vmatprep.subr.bf16.mxu1 %v10907_v55  ;;  %v10930_v6 = vld [vmem:[#allocation8_spill] sm:$0xff]  ;;  %v10957_v55 = vld [vmem:[#allocation50_spill] sm:$0xff] }
 0x2bb   :  { %1324 = vmatpush1.bf16.msra.mxu0 %v10908_v59  ;;  %1406 = vmatpush1.bf16.msra.mxu1 %v10909_v52  ;;  %v10958_v59 = vld [vmem:[#allocation51_spill] sm:$0xff]  ;;  %v10959_v52 = vld [vmem:[#allocation52_spill] sm:$0xff] }
 0x2bc   :  { %1325 = vmatprep.subr.bf16.mxu0 %v10910_v33  ;;  %1407 = vmatprep.subr.bf16.mxu1 %v10911_v34  ;;  %v10960_v33 = vld [vmem:[#allocation53_spill] sm:$0xff]  ;;  %v10961_v34 = vld [vmem:[#allocation54_spill] sm:$0xff] }
 0x2bf   :  { %1326 = vmatpush1.bf16.msra.mxu0 %v10912_v35  ;;  %1408 = vmatpush1.bf16.msra.mxu1 %v10913_v36  ;;  %v10962_v35 = vld [vmem:[#allocation55_spill] sm:$0xff]  ;;  %v10963_v36 = vld [vmem:[#allocation56_spill] sm:$0xff] }
 0x2c0   :  { %1327 = vmatprep.subr.bf16.mxu0 %v10914_v37  ;;  %1409 = vmatprep.subr.bf16.mxu1 %v10915_v38  ;;  %v10964_v37 = vld [vmem:[#allocation57_spill] sm:$0xff]  ;;  %v10965_v38 = vld [vmem:[#allocation58_spill] sm:$0xff] }
 0x2c3   :  { %1328 = vmatpush1.bf16.msra.mxu0 %v10916_v39  ;;  %1410 = vmatpush1.bf16.msra.mxu1 %v10917_v40  ;;  %v10966_v39 = vld [vmem:[#allocation59_spill] sm:$0xff]  ;;  %v10967_v40 = vld [vmem:[#allocation66_spill] sm:$0xff] }
 0x2c4   :  { %1474 = vmatprep.subr.bf16.mxu0 %v10918_v42  ;;  %1556 = vmatprep.subr.bf16.mxu1 %v10919_v43 }
 0x2c6   :  { %1330 = vmatmul.mubr.bf16.vlgmr.msra.gmra.mrb[8].mxu0 %v1254_v41  ;;  %1412 = vmatmul.mubr.bf16.vlgmr.msra.gmra.mrb[8].mxu1 %v1254_v41  ;;  %v10968_v41 = vld [vmem:[#allocation67_spill] sm:$0xff] }
 0x2c7   :  { %1475 = vmatpush1.bf16.msra.mxu0 %v10920_v44  ;;  %1557 = vmatpush1.bf16.msra.mxu1 %v10921_v45 }
 0x2c8   :  { %1476 = vmatprep.subr.bf16.mxu0 %v10922_v47  ;;  %1558 = vmatprep.subr.bf16.mxu1 %v10923_v49 }
 0x2cb   :  { %1477 = vmatpush1.bf16.msra.mxu0 %v10924_v50  ;;  %1559 = vmatpush1.bf16.msra.mxu1 %v10925_v51 }
 0x2cc   :  { %1478 = vmatprep.subr.bf16.mxu0 %v10926_v2  ;;  %1560 = vmatprep.subr.bf16.mxu1 %v10927_v4 }
 0x2cf   :  { %1479 = vmatpush1.bf16.msra.mxu0 %v10928_v5  ;;  %1561 = vmatpush1.bf16.msra.mxu1 %v10929_v62 }
 0x2d0   :  { %1480 = vmatprep.subr.bf16.mxu0 %v10930_v6  ;;  %1562 = vmatprep.subr.bf16.mxu1 %v10931_v24 }
 0x2d3   :  { %1481 = vmatpush1.bf16.msra.mxu0 %v10932_v25  ;;  %1563 = vmatpush1.bf16.msra.mxu1 %v10933_v26 }
 0x2d4   :  { %1482 = vmatprep.subr.bf16.mxu0 %v10934_v27  ;;  %1564 = vmatprep.subr.bf16.mxu1 %v10935_v28 }
 0x2d7   :  { %1483 = vmatpush1.bf16.msra.mxu0 %v10936_v9  ;;  %1565 = vmatpush1.bf16.msra.mxu1 %v10937_v11 }
 0x2d8   :  { %1484 = vmatprep.subr.bf16.mxu0 %v10938_v12  ;;  %1566 = vmatprep.subr.bf16.mxu1 %v10939_v13 }
 0x2db   :  { %1485 = vmatpush1.bf16.msra.mxu0 %v10940_v14  ;;  %1567 = vmatpush1.bf16.msra.mxu1 %v10941_v15 }
 0x2dc   :  { %1486 = vmatprep.subr.bf16.mxu0 %v10942_v16  ;;  %1568 = vmatprep.subr.bf16.mxu1 %v10943_v46 }
 0x2df   :  { %1487 = vmatpush1.bf16.msra.mxu0 %v10944_v53  ;;  %1569 = vmatpush1.bf16.msra.mxu1 %v10945_v60 }
 0x2e0   :  { %1488 = vmatprep.subr.bf16.mxu0 %v10946_v58  ;;  %1570 = vmatprep.subr.bf16.mxu1 %v10947_v56 }
 0x2e3   :  { %1489 = vmatpush1.bf16.msra.mxu0 %v10948_v18  ;;  %1571 = vmatpush1.bf16.msra.mxu1 %v10949_v19 }
 0x2e4   :  { %1490 = vmatprep.subr.bf16.mxu0 %v10950_v21  ;;  %1572 = vmatprep.subr.bf16.mxu1 %v10951_v61 }
 0x2e7   :  { %1491 = vmatpush1.bf16.msra.mxu0 %v10952_v48  ;;  %1573 = vmatpush1.bf16.msra.mxu1 %v10953_v29 }
 0x2e8   :  { %1492 = vmatprep.subr.bf16.mxu0 %v10954_v30  ;;  %1574 = vmatprep.subr.bf16.mxu1 %v10955_v31 }
 0x2eb   :  { %1493 = vmatpush1.bf16.msra.mxu0 %v10956_v32  ;;  %1575 = vmatpush1.bf16.msra.mxu1 %v10957_v55 }
 0x2ec   :  { %1494 = vmatprep.subr.bf16.mxu0 %v10958_v59  ;;  %1576 = vmatprep.subr.bf16.mxu1 %v10959_v52  ;;  %v10969_v59 = vld [vmem:[#allocation68_spill] sm:$0xff]  ;;  %v10970_v52 = vld [vmem:[#allocation69_spill] sm:$0xff] }
 0x2ef   :  { %1495 = vmatpush1.bf16.msra.mxu0 %v10960_v33  ;;  %1577 = vmatpush1.bf16.msra.mxu1 %v10961_v34  ;;  %v10971_v33 = vld [vmem:[#allocation70_spill] sm:$0xff]  ;;  %v10972_v34 = vld [vmem:[#allocation71_spill] sm:$0xff] }
 0x2f0   :  { %1496 = vmatprep.subr.bf16.mxu0 %v10962_v35  ;;  %1578 = vmatprep.subr.bf16.mxu1 %v10963_v36  ;;  %v10973_v35 = vld [vmem:[#allocation83_spill] sm:$0xff]  ;;  %v10974_v36 = vld [vmem:[#allocation84_spill] sm:$0xff] }
 0x2f3   :  { %1497 = vmatpush1.bf16.msra.mxu0 %v10964_v37  ;;  %1579 = vmatpush1.bf16.msra.mxu1 %v10965_v38  ;;  %v10975_v37 = vld [vmem:[#allocation85_spill] sm:$0xff] }
 0x2f4   :  { %1498 = vmatprep.subr.bf16.mxu0 %v10966_v39  ;;  %1580 = vmatprep.subr.bf16.mxu1 %v10967_v40  ;;  %v6691_v40 = vld [vmem:[%s9958_s1 + $0x1c0] ss:$16 sps:$4 sm:$0xff]  }
 0x2f5   :  { %10976 = vst [vmem:[#allocation60_spill] sm:$0xff] %v6691_v40  ;;  %v10986_v39 = vld [vmem:[#allocation11_spill] sm:$0xff] }
 0x2f7   :  { %1499 = vmatpush1.bf16.msra.mxu0 %v10968_v41  ;;  %1581 = vmatpush1.bf16.msra.mxu1 %v10969_v59 }
 0x2f8   :  { %1500 = vmatprep.subr.bf16.mxu0 %v10970_v52  ;;  %1582 = vmatprep.subr.bf16.mxu1 %v10971_v33  ;;  %v6697_v52 = vld [vmem:[%s9958_s1 + $0x1c8] ss:$16 sps:$4 sm:$0xff]  }
 0x2f9   :  { %10977 = vst [vmem:[#allocation61_spill] sm:$0xff] %v6697_v52 }
 0x2fb   :  { %1501 = vmatpush1.bf16.msra.mxu0 %v10972_v34  ;;  %1583 = vmatpush1.bf16.msra.mxu1 %v10973_v35  ;;  %v10984_v35 = vld [vmem:[#allocation9_spill] sm:$0xff]  ;;  %v10985_v34 = vld [vmem:[#allocation10_spill] sm:$0xff] }
 0x2fc   :  { %1502 = vmatprep.subr.bf16.mxu0 %v10974_v36  ;;  %1584 = vmatprep.subr.bf16.mxu1 %v10975_v37  ;;  %v6703_v36 = vld [vmem:[%s9958_s1 + $0x1e4] ss:$16 sps:$4 sm:$0xff]   ;;  %v6709_v37 = vld [vmem:[%s9958_s1 + $0x1ec] ss:$16 sps:$4 sm:$0xff]  }
 0x2fd   :  { %10978 = vst [vmem:[#allocation62_spill] sm:$0xff] %v6703_v36  ;;  %10979 = vst [vmem:[#allocation63_spill] sm:$0xff] %v6709_v37 }
 0x2ff   :  { %1503 = vmatpush1.bf16.msra.mxu0 %v6691_v40  ;;  %1585 = vmatpush1.bf16.msra.mxu1 %v6697_v52  ;;  %v6715_v40 = vld [vmem:[%s9958_s1 + $0x1e0] ss:$16 sps:$4 sm:$0xff]   ;;  %v6721_v52 = vld [vmem:[%s9958_s1 + $0x1e8] ss:$16 sps:$4 sm:$0xff]  }
 0x300   :  { %1504 = vmatprep.subr.bf16.mxu0 %v6703_v36  ;;  %1586 = vmatprep.subr.bf16.mxu1 %v6709_v37  ;;  %10980 = vst [vmem:[#allocation64_spill] sm:$0xff] %v6715_v40  ;;  %10981 = vst [vmem:[#allocation65_spill] sm:$0xff] %v6721_v52  ;;  %v6727_v36 = vld [vmem:[%s9958_s1 + $0x204] ss:$16 sps:$4 sm:$0xff]   ;;  %v6733_v37 = vld [vmem:[%s9958_s1 + $0x20c] ss:$16 sps:$4 sm:$0xff]  }
 0x301   :  { %10982 = vst [vmem:[#allocation72_spill] sm:$0xff] %v6727_v36  ;;  %10983 = vst [vmem:[#allocation73_spill] sm:$0xff] %v6733_v37 }
 0x303   :  { %1505 = vmatpush1.bf16.msra.mxu0 %v6715_v40  ;;  %1587 = vmatpush1.bf16.msra.mxu1 %v6721_v52  ;;  %v4184_v40 = vld [vmem:[%s9960_s3 + $0x8] sm:$0xf] }
 0x304   :  { %1515 = vmatprep.subr.bf16.mxu0 %v6727_v36  ;;  %1597 = vmatprep.subr.bf16.mxu1 %v6733_v37  ;;  %v1430_v52 = vrot.slane %v4184_v40, %v10984_v35  ;;  %v1438_v33 = vrot.slane %v4184_v40, %v10985_v34  ;;  %v1434_v38 = vrot.slane %v4184_v40, %v10986_v39  ;;  %v10987_v36 = vld [vmem:[#allocation12_spill] sm:$0xff] }
 0x305   :  { %v1442_v55 = vrot.slane %v4184_v40, %v10987_v36 }
 0x399   :  { %v1331_v59 = vpop.f32.mrb[8].mxu0  ;;  %v1413_v41 = vpop.f32.mrb[8].mxu1 }
 0x39a   :  { %v1420_v32 = vsub.f32 %v1331_v59, %v6503_v10  ;;  %v1422_v31 = vsub.f32 %v1413_v41, %v6506_v7  ;;  %v1333_v30 = vpop.f32.mrb[9].mxu0  ;;  %v1415_v37 = vpop.f32.mrb[9].mxu1 }
 0x39b   :  { %v1421_v29 = vsub.f32 %v1333_v30, %v6509_v20  ;;  %v1423_v48 = vsub.f32 %v1415_v37, %v6512_v54  ;;  %v1335_v61 = vpop.f32.mrb[10].mxu0  ;;  %v1417_v35 = vpop.f32.mrb[10].mxu1  ;;  %v6850_v37 = vld [vmem:[%s9958_s1 + $0x2a8] ss:$16 sps:$4 sm:$0xff]  }
 0x39c   :  { %v1447_v21 = vadd.f32 %v1430_v52, %v1420_v32  ;;  %v1449_v34 = vadd.f32 %v1438_v33, %v1422_v31  ;;  %v1336_v19 = vpop.f32.mrb[11].mxu0  ;;  %v1418_v18 = vpop.f32.mrb[11].mxu1  ;;  %v6802_v31 = vld [vmem:[%s9958_s1 + $0x268] ss:$16 sps:$4 sm:$0xff]   ;;  %v6808_v32 = vld [vmem:[%s9958_s1 + $0x284] ss:$16 sps:$4 sm:$0xff]  }
 0x39d   :  { %v1448_v56 = vadd.f32 %v1434_v38, %v1421_v29  ;;  %v1450_v39 = vadd.f32 %v1442_v55, %v1423_v48  ;;  %v6790_v48 = vld [vmem:[%s9958_s1 + $0x26c] ss:$16 sps:$4 sm:$0xff]   ;;  %v6796_v29 = vld [vmem:[%s9958_s1 + $0x260] ss:$16 sps:$4 sm:$0xff]   ;;  %v6826_v33 = vld [vmem:[%s9958_s1 + $0x288] ss:$16 sps:$4 sm:$0xff]  }
 0x39e   :  { %v1451_v58 = vmul.f32 0.05, %v1447_v21  ;;  %v1453_v40 = vmul.f32 0.05, %v1449_v34  ;;  %v6814_v55 = vld [vmem:[%s9958_s1 + $0x28c] ss:$16 sps:$4 sm:$0xff]  }
 0x39f   :  { %v1452_v36 = vmul.f32 0.05, %v1448_v56  ;;  %v1454_v59 = vmul.f32 0.05, %v1450_v39  ;;  %v6820_v52 = vld [vmem:[%s9958_s1 + $0x280] ss:$16 sps:$4 sm:$0xff]  }
 0x3a0   :  { %v6748_v41 = vadd.f32 %v1451_v58, %v6503_v10  ;;  %v6751_v60 = vadd.f32 %v1453_v40, %v6506_v7  ;;  %v6784_v58 = vld [vmem:[%s9958_s1 + $0x264] ss:$16 sps:$4 sm:$0xff]   ;;  %v6838_v35 = vld [vmem:[%s9958_s1 + $0x2ac] ss:$16 sps:$4 sm:$0xff]   ;;  %v6868_v40 = vld [vmem:[%s9958_s1 + $0x2c0] ss:$16 sps:$4 sm:$0xff]  }
 0x3a1   :  { %v6754_v30 = vadd.f32 %v1452_v36, %v6509_v20  ;;  %v6757_v61 = vadd.f32 %v1454_v59, %v6512_v54  ;;  %v6778_v54 = vld [vmem:[%s9958_s1 + $0x248] ss:$16 sps:$4 sm:$0xff]   ;;  %v6832_v34 = vld [vmem:[%s9958_s1 + $0x2a4] ss:$16 sps:$4 sm:$0xff]   ;;  %v6844_v36 = vld [vmem:[%s9958_s1 + $0x2a0] ss:$16 sps:$4 sm:$0xff]  }
 0x3a2   :  { %v1459_v18 = vmax.f32 %v6748_v41, 0.0  ;;  %v6761_v19 = vmax.f32 %v6751_v60, 0.0  ;;  %v6856_v38 = vld [vmem:[%s9958_s1 + $0x2c4] ss:$16 sps:$4 sm:$0xff]   ;;  %v6862_v39 = vld [vmem:[%s9958_s1 + $0x2cc] ss:$16 sps:$4 sm:$0xff]  }
 0x3a3   :  { %v1460_v56 = vmax.f32 %v6754_v30, 0.0  ;;  %v1462_v21 = vmax.f32 %v6757_v61, 0.0  ;;  %v6874_v59 = vld [vmem:[%s9958_s1 + $0x2c8] ss:$16 sps:$4 sm:$0xff]  }
 0x3a4   :  { %1466 = vst [vmem:[#allocation4 + $0x60] sm:$0xff] %v1459_v18  ;;  %1468 = vst [vmem:[#allocation4 + $0x70] sm:$0xff] %v6761_v19  ;;  %v1470_v10 = vpack.c.bf16 %v1459_v18, %v1459_v18  ;;  %v6880_v18 = vld [vmem:[%s9958_s1 + $0x2e4] ss:$16 sps:$4 sm:$0xff]  }
 0x3a5   :  { %1467 = vst [vmem:[#allocation4 + $0x68] sm:$0xff] %v1460_v56  ;;  %v1471_v7 = vpack.c.bf16 %v1460_v56, %v1460_v56  ;;  %1469 = vst [vmem:[#allocation4 + $0x78] sm:$0xff] %v1462_v21  ;;  %v1473_v20 = vpack.c.bf16 %v1462_v21, %v1462_v21  ;;  %v6886_v56 = vld [vmem:[%s9958_s1 + $0x2ec] ss:$16 sps:$4 sm:$0xff]   ;;  %v6892_v21 = vld [vmem:[%s9958_s1 + $0x2e0] ss:$16 sps:$4 sm:$0xff]  }
 0x3a6   :  { %10988 = vst [vmem:[#allocation74_spill] sm:$0xff] %v6892_v21 }
 0x3a7   :  { %1506 = vmatprep.mubr.bf16.mxu0 %v1471_v7  ;;  %1588 = vmatprep.mubr.bf16.mxu1 %v1471_v7  ;;  %v6898_v7 = vld [vmem:[%s9958_s1 + $0x2e8] ss:$16 sps:$4 sm:$0xff]  }
 0x3a8   :  { %1507 = vmatmul.mubr.bf16.vlgmr.msra.gmra.mrb[12].mxu0 %v1470_v10  ;;  %1589 = vmatmul.mubr.bf16.vlgmr.msra.gmra.mrb[12].mxu1 %v1470_v10  ;;  %10989 = vst [vmem:[#allocation75_spill] sm:$0xff] %v6898_v7  ;;  %v6904_v10 = vld [vmem:[%s9958_s1 + $0x304] ss:$16 sps:$4 sm:$0xff]  }
 0x3a9   :  { %1516 = vmatpush1.bf16.msra.mxu0 %v6524_v22  ;;  %1598 = vmatpush1.bf16.msra.mxu1 %v6530_v57  ;;  %10990 = vst [vmem:[#allocation76_spill] sm:$0xff] %v6904_v10 }
 0x3aa   :  { %1547 = vmatprep.mubr.bf16.mxu0 %v1473_v20  ;;  %1629 = vmatprep.mubr.bf16.mxu1 %v1473_v20  ;;  %v6910_v20 = vld [vmem:[%s9958_s1 + $0x30c] ss:$16 sps:$4 sm:$0xff]  }
 0x3ab   :  { %1517 = vmatprep.subr.bf16.mxu0 %v6536_v63  ;;  %1599 = vmatprep.subr.bf16.mxu1 %v6542_v0  ;;  %10991 = vst [vmem:[#allocation77_spill] sm:$0xff] %v6910_v20 }
 0x3ad   :  { %1518 = vmatpush1.bf16.msra.mxu0 %v6548_v1  ;;  %1600 = vmatpush1.bf16.msra.mxu1 %v6554_v17 }
 0x3ae   :  { %1519 = vmatprep.subr.bf16.mxu0 %v6560_v23  ;;  %1601 = vmatprep.subr.bf16.mxu1 %v6566_v3 }
 0x3b1   :  { %1520 = vmatpush1.bf16.msra.mxu0 %v6572_v8  ;;  %1602 = vmatpush1.bf16.msra.mxu1 %v6778_v54 }
 0x3b2   :  { %1521 = vmatprep.subr.bf16.mxu0 %v6784_v58  ;;  %1603 = vmatprep.subr.bf16.mxu1 %v6790_v48 }
 0x3b5   :  { %1522 = vmatpush1.bf16.msra.mxu0 %v6796_v29  ;;  %1604 = vmatpush1.bf16.msra.mxu1 %v6802_v31 }
 0x3b6   :  { %1523 = vmatprep.subr.bf16.mxu0 %v6808_v32  ;;  %1605 = vmatprep.subr.bf16.mxu1 %v6814_v55 }
 0x3b9   :  { %1524 = vmatpush1.bf16.msra.mxu0 %v6820_v52  ;;  %1606 = vmatpush1.bf16.msra.mxu1 %v6826_v33 }
 0x3ba   :  { %1525 = vmatprep.subr.bf16.mxu0 %v6832_v34  ;;  %1607 = vmatprep.subr.bf16.mxu1 %v6838_v35 }
 0x3bd   :  { %1526 = vmatpush1.bf16.msra.mxu0 %v6844_v36  ;;  %1608 = vmatpush1.bf16.msra.mxu1 %v6850_v37 }
 0x3be   :  { %1527 = vmatprep.subr.bf16.mxu0 %v6856_v38  ;;  %1609 = vmatprep.subr.bf16.mxu1 %v6862_v39 }
 0x3c1   :  { %1528 = vmatpush1.bf16.msra.mxu0 %v6868_v40  ;;  %1610 = vmatpush1.bf16.msra.mxu1 %v6874_v59 }
 0x3c2   :  { %1529 = vmatprep.subr.bf16.mxu0 %v6880_v18  ;;  %1611 = vmatprep.subr.bf16.mxu1 %v6886_v56 }
 0x3c5   :  { %1530 = vmatpush1.bf16.msra.mxu0 %v6892_v21  ;;  %1612 = vmatpush1.bf16.msra.mxu1 %v6898_v7  ;;  %v6916_v21 = vld [vmem:[%s9958_s1 + $0x300] ss:$16 sps:$4 sm:$0xff]   ;;  %v6922_v7 = vld [vmem:[%s9958_s1 + $0x308] ss:$16 sps:$4 sm:$0xff]  }
 0x3c6   :  { %1531 = vmatprep.subr.bf16.mxu0 %v6904_v10  ;;  %1613 = vmatprep.subr.bf16.mxu1 %v6910_v20  ;;  %10992 = vst [vmem:[#allocation78_spill] sm:$0xff] %v6916_v21  ;;  %10993 = vst [vmem:[#allocation79_spill] sm:$0xff] %v6922_v7  ;;  %v6928_v10 = vld [vmem:[%s9958_s1 + $0x324] ss:$16 sps:$4 sm:$0xff]   ;;  %v6934_v20 = vld [vmem:[%s9958_s1 + $0x32c] ss:$16 sps:$4 sm:$0xff]  }
 0x3c7   :  { %10994 = vst [vmem:[#allocation80_spill] sm:$0xff] %v6928_v10  ;;  %10995 = vst [vmem:[#allocation81_spill] sm:$0xff] %v6934_v20 }
 0x3c9   :  { %1532 = vmatpush1.bf16.msra.mxu0 %v6916_v21  ;;  %1614 = vmatpush1.bf16.msra.mxu1 %v6922_v7  ;;  %v6940_v21 = vld [vmem:[%s9958_s1 + $0x320] ss:$16 sps:$4 sm:$0xff]   ;;  %v6946_v7 = vld [vmem:[%s9958_s1 + $0x328] ss:$16 sps:$4 sm:$0xff]  }
 0x3ca   :  { %1533 = vmatprep.subr.bf16.mxu0 %v6928_v10  ;;  %1615 = vmatprep.subr.bf16.mxu1 %v6934_v20  ;;  %10996 = vst [vmem:[#allocation82_spill] sm:$0xff] %v6940_v21  ;;  %10997 = vst [vmem:[#allocation13_spill] sm:$0xff] %v6946_v7  ;;  %v6952_v10 = vld [vmem:[%s9958_s1 + $0x344] ss:$16 sps:$4 sm:$0xff]   ;;  %v6958_v20 = vld [vmem:[%s9958_s1 + $0x34c] ss:$16 sps:$4 sm:$0xff]  }
 0x3cb   :  { %10998 = vst [vmem:[#allocation14_spill] sm:$0xff] %v6952_v10  ;;  %10999 = vst [vmem:[#allocation15_spill] sm:$0xff] %v6958_v20 }
 0x3cd   :  { %1534 = vmatpush1.bf16.msra.mxu0 %v6940_v21  ;;  %1616 = vmatpush1.bf16.msra.mxu1 %v6946_v7  ;;  %v6964_v21 = vld [vmem:[%s9958_s1 + $0x340] ss:$16 sps:$4 sm:$0xff]   ;;  %v6970_v7 = vld [vmem:[%s9958_s1 + $0x348] ss:$16 sps:$4 sm:$0xff]  }
 0x3ce   :  { %1535 = vmatprep.subr.bf16.mxu0 %v6952_v10  ;;  %1617 = vmatprep.subr.bf16.mxu1 %v6958_v20  ;;  %11000 = vst [vmem:[#allocation16_spill] sm:$0xff] %v6964_v21  ;;  %11001 = vst [vmem:[#allocation17_spill] sm:$0xff] %v6970_v7  ;;  %v6976_v10 = vld [vmem:[%s9958_s1 + $0x364] ss:$16 sps:$4 sm:$0xff]   ;;  %v6982_v20 = vld [vmem:[%s9958_s1 + $0x36c] ss:$16 sps:$4 sm:$0xff]  }
 0x3cf   :  { %11002 = vst [vmem:[#allocation18_spill] sm:$0xff] %v6976_v10  ;;  %11003 = vst [vmem:[#allocation19_spill] sm:$0xff] %v6982_v20 }
 0x3d1   :  { %1536 = vmatpush1.bf16.msra.mxu0 %v6964_v21  ;;  %1618 = vmatpush1.bf16.msra.mxu1 %v6970_v7  ;;  %v6988_v21 = vld [vmem:[%s9958_s1 + $0x360] ss:$16 sps:$4 sm:$0xff]   ;;  %v6994_v7 = vld [vmem:[%s9958_s1 + $0x368] ss:$16 sps:$4 sm:$0xff]  }
 0x3d2   :  { %1537 = vmatprep.subr.bf16.mxu0 %v6976_v10  ;;  %1619 = vmatprep.subr.bf16.mxu1 %v6982_v20  ;;  %11004 = vst [vmem:[#allocation20_spill] sm:$0xff] %v6988_v21  ;;  %11005 = vst [vmem:[#allocation21_spill] sm:$0xff] %v6994_v7  ;;  %v7000_v10 = vld [vmem:[%s9958_s1 + $0x384] ss:$16 sps:$4 sm:$0xff]   ;;  %v7006_v20 = vld [vmem:[%s9958_s1 + $0x38c] ss:$16 sps:$4 sm:$0xff]  }
 0x3d3   :  { %11006 = vst [vmem:[#allocation22_spill] sm:$0xff] %v7000_v10  ;;  %11007 = vst [vmem:[#allocation23_spill] sm:$0xff] %v7006_v20 }
 0x3d5   :  { %1538 = vmatpush1.bf16.msra.mxu0 %v6988_v21  ;;  %1620 = vmatpush1.bf16.msra.mxu1 %v6994_v7  ;;  %v7012_v21 = vld [vmem:[%s9958_s1 + $0x380] ss:$16 sps:$4 sm:$0xff]   ;;  %v7018_v7 = vld [vmem:[%s9958_s1 + $0x388] ss:$16 sps:$4 sm:$0xff]  }
 0x3d6   :  { %1539 = vmatprep.subr.bf16.mxu0 %v7000_v10  ;;  %1621 = vmatprep.subr.bf16.mxu1 %v7006_v20  ;;  %11008 = vst [vmem:[#allocation24_spill] sm:$0xff] %v7012_v21  ;;  %11009 = vst [vmem:[#allocation8_spill] sm:$0xff] %v7018_v7  ;;  %v7024_v10 = vld [vmem:[%s9958_s1 + $0x3a4] ss:$16 sps:$4 sm:$0xff]   ;;  %v7030_v20 = vld [vmem:[%s9958_s1 + $0x3ac] ss:$16 sps:$4 sm:$0xff]  }
 0x3d7   :  { %11010 = vst [vmem:[#allocation7_spill] sm:$0xff] %v7024_v10  ;;  %11011 = vst [vmem:[#allocation49_spill] sm:$0xff] %v7030_v20 }
 0x3d9   :  { %1540 = vmatpush1.bf16.msra.mxu0 %v7012_v21  ;;  %1622 = vmatpush1.bf16.msra.mxu1 %v7018_v7  ;;  %v7036_v21 = vld [vmem:[%s9958_s1 + $0x3a0] ss:$16 sps:$4 sm:$0xff]   ;;  %v7042_v7 = vld [vmem:[%s9958_s1 + $0x3a8] ss:$16 sps:$4 sm:$0xff]  }
 0x3da   :  { %1541 = vmatprep.subr.bf16.mxu0 %v7024_v10  ;;  %1623 = vmatprep.subr.bf16.mxu1 %v7030_v20  ;;  %11012 = vst [vmem:[#allocation25_spill] sm:$0xff] %v7036_v21  ;;  %11013 = vst [vmem:[#allocation26_spill] sm:$0xff] %v7042_v7  ;;  %v7048_v10 = vld [vmem:[%s9958_s1 + $0x3c4] ss:$16 sps:$4 sm:$0xff]   ;;  %v7054_v20 = vld [vmem:[%s9958_s1 + $0x3cc] ss:$16 sps:$4 sm:$0xff]  }
 0x3db   :  { %11014 = vst [vmem:[#allocation27_spill] sm:$0xff] %v7048_v10  ;;  %11015 = vst [vmem:[#allocation28_spill] sm:$0xff] %v7054_v20 }
 0x3dd   :  { %1542 = vmatpush1.bf16.msra.mxu0 %v7036_v21  ;;  %1624 = vmatpush1.bf16.msra.mxu1 %v7042_v7  ;;  %v7060_v21 = vld [vmem:[%s9958_s1 + $0x3c0] ss:$16 sps:$4 sm:$0xff]   ;;  %v7066_v7 = vld [vmem:[%s9958_s1 + $0x3c8] ss:$16 sps:$4 sm:$0xff]  }
 0x3de   :  { %1543 = vmatprep.subr.bf16.mxu0 %v7048_v10  ;;  %1625 = vmatprep.subr.bf16.mxu1 %v7054_v20  ;;  %11016 = vst [vmem:[#allocation29_spill] sm:$0xff] %v7060_v21  ;;  %11017 = vst [vmem:[#allocation30_spill] sm:$0xff] %v7066_v7  ;;  %v7072_v10 = vld [vmem:[%s9958_s1 + $0x3e4] ss:$16 sps:$4 sm:$0xff]   ;;  %v7078_v20 = vld [vmem:[%s9958_s1 + $0x3ec] ss:$16 sps:$4 sm:$0xff]  }
 0x3df   :  { %11018 = vst [vmem:[#allocation31_spill] sm:$0xff] %v7072_v10  ;;  %11019 = vst [vmem:[#allocation32_spill] sm:$0xff] %v7078_v20 }
 0x3e1   :  { %1544 = vmatpush1.bf16.msra.mxu0 %v7060_v21  ;;  %1626 = vmatpush1.bf16.msra.mxu1 %v7066_v7  ;;  %v7084_v21 = vld [vmem:[%s9958_s1 + $0x3e0] ss:$16 sps:$4 sm:$0xff]   ;;  %v7090_v7 = vld [vmem:[%s9958_s1 + $0x3e8] ss:$16 sps:$4 sm:$0xff]  }
 0x3e2   :  { %1545 = vmatprep.subr.bf16.mxu0 %v7072_v10  ;;  %1627 = vmatprep.subr.bf16.mxu1 %v7078_v20  ;;  %11020 = vst [vmem:[#allocation33_spill] sm:$0xff] %v7084_v21  ;;  %11021 = vst [vmem:[#allocation34_spill] sm:$0xff] %v7090_v7  ;;  %v1472_v10 = vpack.c.bf16 %v6761_v19, %v6761_v19  ;;  %v11049_v19 = vld [vmem:[#allocation71_spill] sm:$0xff] }
 0x3e5   :  { %1546 = vmatpush1.bf16.msra.mxu0 %v7084_v21  ;;  %1628 = vmatpush1.bf16.msra.mxu1 %v7090_v7 }
 0x3e6   :  { %1692 = vmatprep.subr.bf16.mxu0 %v10918_v42  ;;  %1774 = vmatprep.subr.bf16.mxu1 %v10919_v43  ;;  %v11022_v42 = vld [vmem:[#allocation37_spill] sm:$0xff]  ;;  %v11023_v43 = vld [vmem:[#allocation38_spill] sm:$0xff] }
 0x3e8   :  { %1548 = vmatmul.mubr.bf16.vlgmr.msra.gmra.mrb[12].mxu0 %v1472_v10  ;;  %1630 = vmatmul.mubr.bf16.vlgmr.msra.gmra.mrb[12].mxu1 %v1472_v10  ;;  %v11050_v10 = vld [vmem:[#allocation83_spill] sm:$0xff] }
 0x3e9   :  { %1693 = vmatpush1.bf16.msra.mxu0 %v10920_v44  ;;  %1775 = vmatpush1.bf16.msra.mxu1 %v10921_v45  ;;  %v11024_v44 = vld [vmem:[#allocation39_spill] sm:$0xff]  ;;  %v11025_v45 = vld [vmem:[#allocation40_spill] sm:$0xff] }
 0x3ea   :  { %1694 = vmatprep.subr.bf16.mxu0 %v10922_v47  ;;  %1776 = vmatprep.subr.bf16.mxu1 %v10923_v49  ;;  %v11026_v47 = vld [vmem:[#allocation41_spill] sm:$0xff]  ;;  %v11027_v49 = vld [vmem:[#allocation42_spill] sm:$0xff] }
 0x3ed   :  { %1695 = vmatpush1.bf16.msra.mxu0 %v10924_v50  ;;  %1777 = vmatpush1.bf16.msra.mxu1 %v10925_v51  ;;  %v11028_v50 = vld [vmem:[#allocation43_spill] sm:$0xff]  ;;  %v11029_v51 = vld [vmem:[#allocation44_spill] sm:$0xff] }
 0x3ee   :  { %1696 = vmatprep.subr.bf16.mxu0 %v10926_v2  ;;  %1778 = vmatprep.subr.bf16.mxu1 %v10927_v4  ;;  %v11030_v2 = vld [vmem:[#allocation45_spill] sm:$0xff]  ;;  %v11031_v4 = vld [vmem:[#allocation46_spill] sm:$0xff] }
 0x3f1   :  { %1697 = vmatpush1.bf16.msra.mxu0 %v10928_v5  ;;  %1779 = vmatpush1.bf16.msra.mxu1 %v10929_v62  ;;  %v11032_v5 = vld [vmem:[#allocation47_spill] sm:$0xff]  ;;  %v11033_v62 = vld [vmem:[#allocation48_spill] sm:$0xff] }
 0x3f2   :  { %1698 = vmatprep.subr.bf16.mxu0 %v10930_v6  ;;  %1780 = vmatprep.subr.bf16.mxu1 %v10931_v24  ;;  %v11034_v6 = vld [vmem:[#allocation50_spill] sm:$0xff]  ;;  %v11035_v24 = vld [vmem:[#allocation51_spill] sm:$0xff] }
 0x3f5   :  { %1699 = vmatpush1.bf16.msra.mxu0 %v10932_v25  ;;  %1781 = vmatpush1.bf16.msra.mxu1 %v10933_v26  ;;  %v11036_v25 = vld [vmem:[#allocation52_spill] sm:$0xff]  ;;  %v11037_v26 = vld [vmem:[#allocation53_spill] sm:$0xff] }
 0x3f6   :  { %1700 = vmatprep.subr.bf16.mxu0 %v10934_v27  ;;  %1782 = vmatprep.subr.bf16.mxu1 %v10935_v28  ;;  %v11038_v27 = vld [vmem:[#allocation54_spill] sm:$0xff]  ;;  %v11039_v28 = vld [vmem:[#allocation55_spill] sm:$0xff] }
 0x3f9   :  { %1701 = vmatpush1.bf16.msra.mxu0 %v10936_v9  ;;  %1783 = vmatpush1.bf16.msra.mxu1 %v10937_v11  ;;  %v11040_v9 = vld [vmem:[#allocation56_spill] sm:$0xff]  ;;  %v11041_v11 = vld [vmem:[#allocation57_spill] sm:$0xff] }
 0x3fa   :  { %1702 = vmatprep.subr.bf16.mxu0 %v10938_v12  ;;  %1784 = vmatprep.subr.bf16.mxu1 %v10939_v13  ;;  %v11042_v12 = vld [vmem:[#allocation58_spill] sm:$0xff]  ;;  %v11043_v13 = vld [vmem:[#allocation59_spill] sm:$0xff] }
 0x3fd   :  { %1703 = vmatpush1.bf16.msra.mxu0 %v10940_v14  ;;  %1785 = vmatpush1.bf16.msra.mxu1 %v10941_v15  ;;  %v11044_v14 = vld [vmem:[#allocation66_spill] sm:$0xff]  ;;  %v11045_v15 = vld [vmem:[#allocation67_spill] sm:$0xff] }
 0x3fe   :  { %1704 = vmatprep.subr.bf16.mxu0 %v10942_v16  ;;  %1786 = vmatprep.subr.bf16.mxu1 %v10943_v46  ;;  %v11046_v16 = vld [vmem:[#allocation68_spill] sm:$0xff]  ;;  %v11047_v46 = vld [vmem:[#allocation69_spill] sm:$0xff] }
 0x401   :  { %1705 = vmatpush1.bf16.msra.mxu0 %v10944_v53  ;;  %1787 = vmatpush1.bf16.msra.mxu1 %v11022_v42  ;;  %v11048_v53 = vld [vmem:[#allocation70_spill] sm:$0xff]  ;;  %v11051_v42 = vld [vmem:[#allocation84_spill] sm:$0xff] }
 0x402   :  { %1706 = vmatprep.subr.bf16.mxu0 %v11023_v43  ;;  %1788 = vmatprep.subr.bf16.mxu1 %v11024_v44  ;;  %v11052_v43 = vld [vmem:[#allocation85_spill] sm:$0xff]  ;;  %v11053_v44 = vld [vmem:[#allocation60_spill] sm:$0xff] }
 0x405   :  { %1707 = vmatpush1.bf16.msra.mxu0 %v11025_v45  ;;  %1789 = vmatpush1.bf16.msra.mxu1 %v11026_v47  ;;  %v11054_v45 = vld [vmem:[#allocation61_spill] sm:$0xff]  ;;  %v11055_v47 = vld [vmem:[#allocation62_spill] sm:$0xff] }
 0x406   :  { %1708 = vmatprep.subr.bf16.mxu0 %v11027_v49  ;;  %1790 = vmatprep.subr.bf16.mxu1 %v11028_v50  ;;  %v11056_v49 = vld [vmem:[#allocation63_spill] sm:$0xff]  ;;  %v11057_v50 = vld [vmem:[#allocation64_spill] sm:$0xff] }
 0x409   :  { %1709 = vmatpush1.bf16.msra.mxu0 %v11029_v51  ;;  %1791 = vmatpush1.bf16.msra.mxu1 %v11030_v2  ;;  %v11058_v51 = vld [vmem:[#allocation65_spill] sm:$0xff]  ;;  %v11059_v2 = vld [vmem:[#allocation72_spill] sm:$0xff] }
 0x40a   :  { %1710 = vmatprep.subr.bf16.mxu0 %v11031_v4  ;;  %1792 = vmatprep.subr.bf16.mxu1 %v11032_v5  ;;  %v11060_v4 = vld [vmem:[#allocation73_spill] sm:$0xff]  ;;  %v4185_v5 = vld [vmem:[%s9960_s3 + $0xc] sm:$0xf] }
 0x40d   :  { %1711 = vmatpush1.bf16.msra.mxu0 %v11033_v62  ;;  %1793 = vmatpush1.bf16.msra.mxu1 %v11034_v6  ;;  %v11061_v62 = vld [vmem:[#allocation9_spill] sm:$0xff] }
 0x40e   :  { %1712 = vmatprep.subr.bf16.mxu0 %v11035_v24  ;;  %1794 = vmatprep.subr.bf16.mxu1 %v11036_v25  ;;  %v1648_v6 = vrot.slane %v4185_v5, %v11061_v62  ;;  %v11062_v24 = vld [vmem:[#allocation10_spill] sm:$0xff] }
 0x40f   :  { %v1656_v25 = vrot.slane %v4185_v5, %v11062_v24 }
 0x411   :  { %1713 = vmatpush1.bf16.msra.mxu0 %v11037_v26  ;;  %1795 = vmatpush1.bf16.msra.mxu1 %v11038_v27 }
 0x412   :  { %1714 = vmatprep.subr.bf16.mxu0 %v11039_v28  ;;  %1796 = vmatprep.subr.bf16.mxu1 %v11040_v9  ;;  %v11063_v28 = vld [vmem:[#allocation11_spill] sm:$0xff] }
 0x413   :  { %v1652_v9 = vrot.slane %v4185_v5, %v11063_v28 }
 0x415   :  { %1715 = vmatpush1.bf16.msra.mxu0 %v11041_v11  ;;  %1797 = vmatpush1.bf16.msra.mxu1 %v11042_v12  ;;  %v11064_v11 = vld [vmem:[#allocation12_spill] sm:$0xff] }
 0x416   :  { %1716 = vmatprep.subr.bf16.mxu0 %v11043_v13  ;;  %1798 = vmatprep.subr.bf16.mxu1 %v11044_v14  ;;  %v1660_v12 = vrot.slane %v4185_v5, %v11064_v11 }
 0x419   :  { %1717 = vmatpush1.bf16.msra.mxu0 %v11045_v15  ;;  %1799 = vmatpush1.bf16.msra.mxu1 %v11046_v16 }
 0x41a   :  { %1718 = vmatprep.subr.bf16.mxu0 %v11047_v46  ;;  %1800 = vmatprep.subr.bf16.mxu1 %v11048_v53 }
 0x41d   :  { %1719 = vmatpush1.bf16.msra.mxu0 %v11049_v19  ;;  %1801 = vmatpush1.bf16.msra.mxu1 %v11050_v10 }
 0x41e   :  { %1720 = vmatprep.subr.bf16.mxu0 %v11051_v42  ;;  %1802 = vmatprep.subr.bf16.mxu1 %v11052_v43 }
 0x421   :  { %1721 = vmatpush1.bf16.msra.mxu0 %v11053_v44  ;;  %1803 = vmatpush1.bf16.msra.mxu1 %v11054_v45 }
 0x422   :  { %1722 = vmatprep.subr.bf16.mxu0 %v11055_v47  ;;  %1804 = vmatprep.subr.bf16.mxu1 %v11056_v49 }
 0x425   :  { %1723 = vmatpush1.bf16.msra.mxu0 %v11057_v50  ;;  %1805 = vmatpush1.bf16.msra.mxu1 %v11058_v51 }
 0x426   :  { %1733 = vmatprep.subr.bf16.mxu0 %v11059_v2  ;;  %1815 = vmatprep.subr.bf16.mxu1 %v11060_v4 }
 0x4bb   :  { %v1549_v26 = vpop.f32.mrb[12].mxu0  ;;  %v1631_v27 = vpop.f32.mrb[12].mxu1 }
 0x4bc   :  { %v1638_v13 = vsub.f32 %v1549_v26, %v6748_v41  ;;  %v1640_v14 = vsub.f32 %v1631_v27, %v6751_v60  ;;  %v1551_v15 = vpop.f32.mrb[13].mxu0  ;;  %v1633_v16 = vpop.f32.mrb[13].mxu1 }
 0x4bd   :  { %v1639_v46 = vsub.f32 %v1551_v15, %v6754_v30  ;;  %v1641_v53 = vsub.f32 %v1633_v16, %v6757_v61  ;;  %v1553_v19 = vpop.f32.mrb[14].mxu0  ;;  %v1635_v10 = vpop.f32.mrb[14].mxu1  ;;  %v11082_v16 = vld [vmem:[#allocation21_spill] sm:$0xff] }
 0x4be   :  { %v1665_v42 = vadd.f32 %v1648_v6, %v1638_v13  ;;  %v1667_v43 = vadd.f32 %v1656_v25, %v1640_v14  ;;  %v1554_v24 = vpop.f32.mrb[15].mxu0  ;;  %v1636_v62 = vpop.f32.mrb[15].mxu1  ;;  %v11080_v13 = vld [vmem:[#allocation19_spill] sm:$0xff]  ;;  %v11081_v14 = vld [vmem:[#allocation20_spill] sm:$0xff] }
 0x4bf   :  { %v1666_v4 = vadd.f32 %v1652_v9, %v1639_v46  ;;  %v1668_v28 = vadd.f32 %v1660_v12, %v1641_v53  ;;  %v11077_v9 = vld [vmem:[#allocation16_spill] sm:$0xff]  ;;  %v11079_v12 = vld [vmem:[#allocation18_spill] sm:$0xff]  ;;  %v11084_v53 = vld [vmem:[#allocation23_spill] sm:$0xff] }
 0x4c0   :  { %v1669_v2 = vmul.f32 0.05, %v1665_v42  ;;  %v1671_v5 = vmul.f32 0.05, %v1667_v43  ;;  %v11083_v46 = vld [vmem:[#allocation22_spill] sm:$0xff]  ;;  %v11085_v19 = vld [vmem:[#allocation24_spill] sm:$0xff] }
 0x4c1   :  { %v1670_v11 = vmul.f32 0.05, %v1666_v4  ;;  %v1672_v26 = vmul.f32 0.05, %v1668_v28  ;;  %v11076_v28 = vld [vmem:[#allocation15_spill] sm:$0xff]  ;;  %v11086_v10 = vld [vmem:[#allocation8_spill] sm:$0xff] }
 0x4c2   :  { %v7173_v27 = vadd.f32 %v1669_v2, %v6748_v41  ;;  %v7176_v51 = vadd.f32 %v1671_v5, %v6751_v60  ;;  %v11075_v2 = vld [vmem:[#allocation14_spill] sm:$0xff]  ;;  %v11087_v42 = vld [vmem:[#allocation7_spill] sm:$0xff]  ;;  %v11088_v43 = vld [vmem:[#allocation49_spill] sm:$0xff] }
 0x4c3   :  { %v7179_v15 = vadd.f32 %v1670_v11, %v6754_v30  ;;  %v7182_v6 = vadd.f32 %v1672_v26, %v6757_v61  ;;  %v11074_v61 = vld [vmem:[#allocation13_spill] sm:$0xff]  ;;  %v11090_v26 = vld [vmem:[#allocation26_spill] sm:$0xff] }
 0x4c4   :  { %v1677_v62 = vmax.f32 %v7173_v27, 0.0  ;;  %v7186_v24 = vmax.f32 %v7176_v51, 0.0  ;;  %v11078_v11 = vld [vmem:[#allocation17_spill] sm:$0xff] }
 0x4c5   :  { %v1678_v4 = vmax.f32 %v7179_v15, 0.0  ;;  %v1680_v25 = vmax.f32 %v7182_v6, 0.0  ;;  %v11089_v5 = vld [vmem:[#allocation25_spill] sm:$0xff] }
 0x4c6   :  { %1684 = vst [vmem:[#allocation4 + $0x80] sm:$0xff] %v1677_v62  ;;  %1686 = vst [vmem:[#allocation4 + $0x90] sm:$0xff] %v7186_v24  ;;  %v1688_v41 = vpack.c.bf16 %v1677_v62, %v1677_v62  ;;  %v11091_v62 = vld [vmem:[#allocation27_spill] sm:$0xff] }
 0x4c7   :  { %1685 = vst [vmem:[#allocation4 + $0x88] sm:$0xff] %v1678_v4  ;;  %v1689_v60 = vpack.c.bf16 %v1678_v4, %v1678_v4  ;;  %1687 = vst [vmem:[#allocation4 + $0x98] sm:$0xff] %v1680_v25  ;;  %v1691_v30 = vpack.c.bf16 %v1680_v25, %v1680_v25  ;;  %v11092_v4 = vld [vmem:[#allocation28_spill] sm:$0xff]  ;;  %v11093_v25 = vld [vmem:[#allocation29_spill] sm:$0xff] }
 0x4c9   :  { %1724 = vmatprep.mubr.bf16.mxu0 %v1689_v60  ;;  %1806 = vmatprep.mubr.bf16.mxu1 %v1689_v60  ;;  %v11094_v60 = vld [vmem:[#allocation30_spill] sm:$0xff] }
 0x4ca   :  { %1725 = vmatmul.mubr.bf16.vlgmr.msra.gmra.mrb[16].mxu0 %v1688_v41  ;;  %1807 = vmatmul.mubr.bf16.vlgmr.msra.gmra.mrb[16].mxu1 %v1688_v41  ;;  %v11095_v41 = vld [vmem:[#allocation31_spill] sm:$0xff] }
 0x4cb   :  { %1734 = vmatpush1.bf16.msra.mxu0 %v6524_v22  ;;  %1816 = vmatpush1.bf16.msra.mxu1 %v6530_v57  ;;  %v11065_v22 = vld [vmem:[#allocation74_spill] sm:$0xff]  ;;  %v11066_v57 = vld [vmem:[#allocation75_spill] sm:$0xff] }
 0x4cc   :  { %1765 = vmatprep.mubr.bf16.mxu0 %v1691_v30  ;;  %1847 = vmatprep.mubr.bf16.mxu1 %v1691_v30  ;;  %v1690_v30 = vpack.c.bf16 %v7186_v24, %v7186_v24  ;;  %v7270_v24 = vld [vmem:[%s9958_s1] ss:$16 sps:$4 sm:$0xff]  }
 0x4cd   :  { %1735 = vmatprep.subr.bf16.mxu0 %v6536_v63  ;;  %1817 = vmatprep.subr.bf16.mxu1 %v6542_v0  ;;  %v11067_v63 = vld [vmem:[#allocation76_spill] sm:$0xff]  ;;  %v11068_v0 = vld [vmem:[#allocation77_spill] sm:$0xff]  ;;  %11098 = vst [vmem:[#allocation37_spill] sm:$0xff] %v7270_v24 }
 0x4cf   :  { %1736 = vmatpush1.bf16.msra.mxu0 %v6548_v1  ;;  %1818 = vmatpush1.bf16.msra.mxu1 %v6554_v17  ;;  %v11069_v1 = vld [vmem:[#allocation78_spill] sm:$0xff]  ;;  %v11070_v17 = vld [vmem:[#allocation79_spill] sm:$0xff] }
 0x4d0   :  { %1737 = vmatprep.subr.bf16.mxu0 %v6560_v23  ;;  %1819 = vmatprep.subr.bf16.mxu1 %v6566_v3  ;;  %v11071_v23 = vld [vmem:[#allocation80_spill] sm:$0xff]  ;;  %v11072_v3 = vld [vmem:[#allocation81_spill] sm:$0xff] }
 0x4d3   :  { %1738 = vmatpush1.bf16.msra.mxu0 %v6572_v8  ;;  %1820 = vmatpush1.bf16.msra.mxu1 %v6778_v54  ;;  %v11073_v8 = vld [vmem:[#allocation82_spill] sm:$0xff] }
 0x4d4   :  { %1739 = vmatprep.subr.bf16.mxu0 %v6784_v58  ;;  %1821 = vmatprep.subr.bf16.mxu1 %v6790_v48 }
 0x4d7   :  { %1740 = vmatpush1.bf16.msra.mxu0 %v6796_v29  ;;  %1822 = vmatpush1.bf16.msra.mxu1 %v6802_v31 }
 0x4d8   :  { %1741 = vmatprep.subr.bf16.mxu0 %v6808_v32  ;;  %1823 = vmatprep.subr.bf16.mxu1 %v6814_v55 }
 0x4db   :  { %1742 = vmatpush1.bf16.msra.mxu0 %v6820_v52  ;;  %1824 = vmatpush1.bf16.msra.mxu1 %v6826_v33 }
 0x4dc   :  { %1743 = vmatprep.subr.bf16.mxu0 %v6832_v34  ;;  %1825 = vmatprep.subr.bf16.mxu1 %v6838_v35 }
 0x4df   :  { %1744 = vmatpush1.bf16.msra.mxu0 %v6844_v36  ;;  %1826 = vmatpush1.bf16.msra.mxu1 %v6850_v37 }
 0x4e0   :  { %1745 = vmatprep.subr.bf16.mxu0 %v6856_v38  ;;  %1827 = vmatprep.subr.bf16.mxu1 %v6862_v39 }
 0x4e3   :  { %1746 = vmatpush1.bf16.msra.mxu0 %v6868_v40  ;;  %1828 = vmatpush1.bf16.msra.mxu1 %v6874_v59 }
 0x4e4   :  { %1747 = vmatprep.subr.bf16.mxu0 %v6880_v18  ;;  %1829 = vmatprep.subr.bf16.mxu1 %v6886_v56 }
 0x4e7   :  { %1748 = vmatpush1.bf16.msra.mxu0 %v11065_v22  ;;  %1830 = vmatpush1.bf16.msra.mxu1 %v11066_v57 }
 0x4e8   :  { %1749 = vmatprep.subr.bf16.mxu0 %v11067_v63  ;;  %1831 = vmatprep.subr.bf16.mxu1 %v11068_v0 }
 0x4eb   :  { %1750 = vmatpush1.bf16.msra.mxu0 %v11069_v1  ;;  %1832 = vmatpush1.bf16.msra.mxu1 %v11070_v17 }
 0x4ec   :  { %1751 = vmatprep.subr.bf16.mxu0 %v11071_v23  ;;  %1833 = vmatprep.subr.bf16.mxu1 %v11072_v3 }
 0x4ef   :  { %1752 = vmatpush1.bf16.msra.mxu0 %v11073_v8  ;;  %1834 = vmatpush1.bf16.msra.mxu1 %v11074_v61 }
 0x4f0   :  { %1753 = vmatprep.subr.bf16.mxu0 %v11075_v2  ;;  %1835 = vmatprep.subr.bf16.mxu1 %v11076_v28 }
 0x4f3   :  { %1754 = vmatpush1.bf16.msra.mxu0 %v11077_v9  ;;  %1836 = vmatpush1.bf16.msra.mxu1 %v11078_v11 }
 0x4f4   :  { %1755 = vmatprep.subr.bf16.mxu0 %v11079_v12  ;;  %1837 = vmatprep.subr.bf16.mxu1 %v11080_v13 }
 0x4f7   :  { %1756 = vmatpush1.bf16.msra.mxu0 %v11081_v14  ;;  %1838 = vmatpush1.bf16.msra.mxu1 %v11082_v16 }
 0x4f8   :  { %1757 = vmatprep.subr.bf16.mxu0 %v11083_v46  ;;  %1839 = vmatprep.subr.bf16.mxu1 %v11084_v53 }
 0x4fb   :  { %1758 = vmatpush1.bf16.msra.mxu0 %v11085_v19  ;;  %1840 = vmatpush1.bf16.msra.mxu1 %v11086_v10 }
 0x4fc   :  { %1759 = vmatprep.subr.bf16.mxu0 %v11087_v42  ;;  %1841 = vmatprep.subr.bf16.mxu1 %v11088_v43 }
 0x4ff   :  { %1760 = vmatpush1.bf16.msra.mxu0 %v11089_v5  ;;  %1842 = vmatpush1.bf16.msra.mxu1 %v11090_v26 }
 0x500   :  { %1761 = vmatprep.subr.bf16.mxu0 %v11091_v62  ;;  %1843 = vmatprep.subr.bf16.mxu1 %v11092_v4  ;;  %v7258_v62 = vld [vmem:[%s9958_s1 + $0x4] ss:$16 sps:$4 sm:$0xff]  }
 0x501   :  { %11096 = vst [vmem:[#allocation35_spill] sm:$0xff] %v7258_v62 }
 0x503   :  { %1762 = vmatpush1.bf16.msra.mxu0 %v11093_v25  ;;  %1844 = vmatpush1.bf16.msra.mxu1 %v11094_v60  ;;  %v11159_v60 = vld [vmem:[#allocation11_spill] sm:$0xff]  ;;  %v11160_v25 = vld [vmem:[#allocation12_spill] sm:$0xff] }
 0x504   :  { %1763 = vmatprep.subr.bf16.mxu0 %v11095_v41  ;;  %1845 = vmatprep.subr.bf16.mxu1 %v7078_v20  ;;  %v7264_v41 = vld [vmem:[%s9958_s1 + $0xc] ss:$16 sps:$4 sm:$0xff]  }
 0x505   :  { %11097 = vst [vmem:[#allocation36_spill] sm:$0xff] %v7264_v41 }
 0x507   :  { %1764 = vmatpush1.bf16.msra.mxu0 %v7084_v21  ;;  %1846 = vmatpush1.bf16.msra.mxu1 %v7090_v7  ;;  %v11157_v7 = vld [vmem:[#allocation9_spill] sm:$0xff]  ;;  %v11158_v21 = vld [vmem:[#allocation10_spill] sm:$0xff] }
 0x508   :  { %1910 = vmatprep.subr.bf16.mxu0 %v7258_v62  ;;  %1992 = vmatprep.subr.bf16.mxu1 %v7264_v41  ;;  %v7276_v62 = vld [vmem:[%s9958_s1 + $0x8] ss:$16 sps:$4 sm:$0xff]   ;;  %v7282_v41 = vld [vmem:[%s9958_s1 + $0x24] ss:$16 sps:$4 sm:$0xff]  }
 0x509   :  { %11099 = vst [vmem:[#allocation38_spill] sm:$0xff] %v7276_v62  ;;  %11100 = vst [vmem:[#allocation39_spill] sm:$0xff] %v7282_v41 }
 0x50a   :  { %1766 = vmatmul.mubr.bf16.vlgmr.msra.gmra.mrb[16].mxu0 %v1690_v30  ;;  %1848 = vmatmul.mubr.bf16.vlgmr.msra.gmra.mrb[16].mxu1 %v1690_v30  ;;  %v7288_v30 = vld [vmem:[%s9958_s1 + $0x2c] ss:$16 sps:$4 sm:$0xff]  }
 0x50b   :  { %1911 = vmatpush1.bf16.msra.mxu0 %v7270_v24  ;;  %1993 = vmatpush1.bf16.msra.mxu1 %v7276_v62  ;;  %11101 = vst [vmem:[#allocation40_spill] sm:$0xff] %v7288_v30  ;;  %v7294_v24 = vld [vmem:[%s9958_s1 + $0x20] ss:$16 sps:$4 sm:$0xff]   ;;  %v7300_v62 = vld [vmem:[%s9958_s1 + $0x28] ss:$16 sps:$4 sm:$0xff]  }
 0x50c   :  { %1912 = vmatprep.subr.bf16.mxu0 %v7282_v41  ;;  %1994 = vmatprep.subr.bf16.mxu1 %v7288_v30  ;;  %11102 = vst [vmem:[#allocation41_spill] sm:$0xff] %v7294_v24  ;;  %11103 = vst [vmem:[#allocation42_spill] sm:$0xff] %v7300_v62  ;;  %v7306_v41 = vld [vmem:[%s9958_s1 + $0x44] ss:$16 sps:$4 sm:$0xff]   ;;  %v7312_v30 = vld [vmem:[%s9958_s1 + $0x4c] ss:$16 sps:$4 sm:$0xff]  }
 0x50d   :  { %11104 = vst [vmem:[#allocation43_spill] sm:$0xff] %v7306_v41  ;;  %11105 = vst [vmem:[#allocation44_spill] sm:$0xff] %v7312_v30 }
 0x50f   :  { %1913 = vmatpush1.bf16.msra.mxu0 %v7294_v24  ;;  %1995 = vmatpush1.bf16.msra.mxu1 %v7300_v62  ;;  %v7318_v24 = vld [vmem:[%s9958_s1 + $0x40] ss:$16 sps:$4 sm:$0xff]   ;;  %v7324_v62 = vld [vmem:[%s9958_s1 + $0x48] ss:$16 sps:$4 sm:$0xff]  }
 0x510   :  { %1914 = vmatprep.subr.bf16.mxu0 %v7306_v41  ;;  %1996 = vmatprep.subr.bf16.mxu1 %v7312_v30  ;;  %11106 = vst [vmem:[#allocation45_spill] sm:$0xff] %v7318_v24  ;;  %11107 = vst [vmem:[#allocation46_spill] sm:$0xff] %v7324_v62  ;;  %v7330_v41 = vld [vmem:[%s9958_s1 + $0x64] ss:$16 sps:$4 sm:$0xff]   ;;  %v7336_v30 = vld [vmem:[%s9958_s1 + $0x6c] ss:$16 sps:$4 sm:$0xff]  }
 0x511   :  { %11108 = vst [vmem:[#allocation47_spill] sm:$0xff] %v7330_v41  ;;  %11109 = vst [vmem:[#allocation48_spill] sm:$0xff] %v7336_v30 }
 0x513   :  { %1915 = vmatpush1.bf16.msra.mxu0 %v7318_v24  ;;  %1997 = vmatpush1.bf16.msra.mxu1 %v7324_v62  ;;  %v7342_v24 = vld [vmem:[%s9958_s1 + $0x60] ss:$16 sps:$4 sm:$0xff]   ;;  %v7348_v62 = vld [vmem:[%s9958_s1 + $0x68] ss:$16 sps:$4 sm:$0xff]  }
 0x514   :  { %1916 = vmatprep.subr.bf16.mxu0 %v7330_v41  ;;  %1998 = vmatprep.subr.bf16.mxu1 %v7336_v30  ;;  %11110 = vst [vmem:[#allocation50_spill] sm:$0xff] %v7342_v24  ;;  %11111 = vst [vmem:[#allocation51_spill] sm:$0xff] %v7348_v62  ;;  %v7354_v41 = vld [vmem:[%s9958_s1 + $0x84] ss:$16 sps:$4 sm:$0xff]   ;;  %v7360_v30 = vld [vmem:[%s9958_s1 + $0x8c] ss:$16 sps:$4 sm:$0xff]  }
 0x515   :  { %11112 = vst [vmem:[#allocation52_spill] sm:$0xff] %v7354_v41  ;;  %11113 = vst [vmem:[#allocation53_spill] sm:$0xff] %v7360_v30 }
 0x517   :  { %1917 = vmatpush1.bf16.msra.mxu0 %v7342_v24  ;;  %1999 = vmatpush1.bf16.msra.mxu1 %v7348_v62  ;;  %v7366_v24 = vld [vmem:[%s9958_s1 + $0x80] ss:$16 sps:$4 sm:$0xff]   ;;  %v7372_v62 = vld [vmem:[%s9958_s1 + $0x88] ss:$16 sps:$4 sm:$0xff]  }
 0x518   :  { %1918 = vmatprep.subr.bf16.mxu0 %v7354_v41  ;;  %2000 = vmatprep.subr.bf16.mxu1 %v7360_v30  ;;  %11114 = vst [vmem:[#allocation54_spill] sm:$0xff] %v7366_v24  ;;  %11115 = vst [vmem:[#allocation55_spill] sm:$0xff] %v7372_v62  ;;  %v7378_v41 = vld [vmem:[%s9958_s1 + $0xa4] ss:$16 sps:$4 sm:$0xff]   ;;  %v7384_v30 = vld [vmem:[%s9958_s1 + $0xac] ss:$16 sps:$4 sm:$0xff]  }
 0x519   :  { %11116 = vst [vmem:[#allocation56_spill] sm:$0xff] %v7378_v41  ;;  %11117 = vst [vmem:[#allocation57_spill] sm:$0xff] %v7384_v30 }
 0x51b   :  { %1919 = vmatpush1.bf16.msra.mxu0 %v7366_v24  ;;  %2001 = vmatpush1.bf16.msra.mxu1 %v7372_v62  ;;  %v7390_v24 = vld [vmem:[%s9958_s1 + $0xa0] ss:$16 sps:$4 sm:$0xff]   ;;  %v7396_v62 = vld [vmem:[%s9958_s1 + $0xa8] ss:$16 sps:$4 sm:$0xff]  }
 0x51c   :  { %1920 = vmatprep.subr.bf16.mxu0 %v7378_v41  ;;  %2002 = vmatprep.subr.bf16.mxu1 %v7384_v30  ;;  %11118 = vst [vmem:[#allocation58_spill] sm:$0xff] %v7390_v24  ;;  %11119 = vst [vmem:[#allocation59_spill] sm:$0xff] %v7396_v62  ;;  %v7402_v41 = vld [vmem:[%s9958_s1 + $0xc4] ss:$16 sps:$4 sm:$0xff]   ;;  %v7408_v30 = vld [vmem:[%s9958_s1 + $0xcc] ss:$16 sps:$4 sm:$0xff]  }
 0x51d   :  { %11120 = vst [vmem:[#allocation66_spill] sm:$0xff] %v7402_v41  ;;  %11121 = vst [vmem:[#allocation67_spill] sm:$0xff] %v7408_v30 }
 0x51f   :  { %1921 = vmatpush1.bf16.msra.mxu0 %v7390_v24  ;;  %2003 = vmatpush1.bf16.msra.mxu1 %v7396_v62  ;;  %v7414_v24 = vld [vmem:[%s9958_s1 + $0xc0] ss:$16 sps:$4 sm:$0xff]   ;;  %v7420_v62 = vld [vmem:[%s9958_s1 + $0xc8] ss:$16 sps:$4 sm:$0xff]  }
 0x520   :  { %1922 = vmatprep.subr.bf16.mxu0 %v7402_v41  ;;  %2004 = vmatprep.subr.bf16.mxu1 %v7408_v30  ;;  %11122 = vst [vmem:[#allocation68_spill] sm:$0xff] %v7414_v24  ;;  %11123 = vst [vmem:[#allocation69_spill] sm:$0xff] %v7420_v62  ;;  %v7426_v41 = vld [vmem:[%s9958_s1 + $0xe4] ss:$16 sps:$4 sm:$0xff]   ;;  %v7432_v30 = vld [vmem:[%s9958_s1 + $0xec] ss:$16 sps:$4 sm:$0xff]  }
 0x521   :  { %11124 = vst [vmem:[#allocation70_spill] sm:$0xff] %v7426_v41  ;;  %11125 = vst [vmem:[#allocation71_spill] sm:$0xff] %v7432_v30 }
 0x523   :  { %1923 = vmatpush1.bf16.msra.mxu0 %v7414_v24  ;;  %2005 = vmatpush1.bf16.msra.mxu1 %v7420_v62  ;;  %v7438_v24 = vld [vmem:[%s9958_s1 + $0xe0] ss:$16 sps:$4 sm:$0xff]   ;;  %v7444_v62 = vld [vmem:[%s9958_s1 + $0xe8] ss:$16 sps:$4 sm:$0xff]  }
 0x524   :  { %1924 = vmatprep.subr.bf16.mxu0 %v7426_v41  ;;  %2006 = vmatprep.subr.bf16.mxu1 %v7432_v30  ;;  %11126 = vst [vmem:[#allocation83_spill] sm:$0xff] %v7438_v24  ;;  %11127 = vst [vmem:[#allocation84_spill] sm:$0xff] %v7444_v62  ;;  %v7450_v41 = vld [vmem:[%s9958_s1 + $0x104] ss:$16 sps:$4 sm:$0xff]   ;;  %v7456_v30 = vld [vmem:[%s9958_s1 + $0x10c] ss:$16 sps:$4 sm:$0xff]  }
 0x525   :  { %11128 = vst [vmem:[#allocation85_spill] sm:$0xff] %v7450_v41  ;;  %11129 = vst [vmem:[#allocation60_spill] sm:$0xff] %v7456_v30 }
 0x527   :  { %1925 = vmatpush1.bf16.msra.mxu0 %v7438_v24  ;;  %2007 = vmatpush1.bf16.msra.mxu1 %v7444_v62  ;;  %v7462_v24 = vld [vmem:[%s9958_s1 + $0x100] ss:$16 sps:$4 sm:$0xff]   ;;  %v7468_v62 = vld [vmem:[%s9958_s1 + $0x108] ss:$16 sps:$4 sm:$0xff]  }
 0x528   :  { %1926 = vmatprep.subr.bf16.mxu0 %v7450_v41  ;;  %2008 = vmatprep.subr.bf16.mxu1 %v7456_v30  ;;  %11130 = vst [vmem:[#allocation61_spill] sm:$0xff] %v7462_v24  ;;  %11131 = vst [vmem:[#allocation62_spill] sm:$0xff] %v7468_v62  ;;  %v7474_v41 = vld [vmem:[%s9958_s1 + $0x124] ss:$16 sps:$4 sm:$0xff]   ;;  %v7480_v30 = vld [vmem:[%s9958_s1 + $0x12c] ss:$16 sps:$4 sm:$0xff]  }
 0x529   :  { %11132 = vst [vmem:[#allocation63_spill] sm:$0xff] %v7474_v41  ;;  %11133 = vst [vmem:[#allocation64_spill] sm:$0xff] %v7480_v30 }
 0x52b   :  { %1927 = vmatpush1.bf16.msra.mxu0 %v7462_v24  ;;  %2009 = vmatpush1.bf16.msra.mxu1 %v7468_v62  ;;  %v7486_v24 = vld [vmem:[%s9958_s1 + $0x120] ss:$16 sps:$4 sm:$0xff]   ;;  %v7492_v62 = vld [vmem:[%s9958_s1 + $0x128] ss:$16 sps:$4 sm:$0xff]  }
 0x52c   :  { %1928 = vmatprep.subr.bf16.mxu0 %v7474_v41  ;;  %2010 = vmatprep.subr.bf16.mxu1 %v7480_v30  ;;  %11134 = vst [vmem:[#allocation74_spill] sm:$0xff] %v7486_v24  ;;  %11135 = vst [vmem:[#allocation75_spill] sm:$0xff] %v7492_v62  ;;  %v7498_v41 = vld [vmem:[%s9958_s1 + $0x144] ss:$16 sps:$4 sm:$0xff]   ;;  %v7504_v30 = vld [vmem:[%s9958_s1 + $0x14c] ss:$16 sps:$4 sm:$0xff]  }
 0x52d   :  { %11136 = vst [vmem:[#allocation76_spill] sm:$0xff] %v7498_v41  ;;  %11137 = vst [vmem:[#allocation77_spill] sm:$0xff] %v7504_v30 }
 0x52f   :  { %1929 = vmatpush1.bf16.msra.mxu0 %v7486_v24  ;;  %2011 = vmatpush1.bf16.msra.mxu1 %v7492_v62  ;;  %v7510_v24 = vld [vmem:[%s9958_s1 + $0x140] ss:$16 sps:$4 sm:$0xff]   ;;  %v7516_v62 = vld [vmem:[%s9958_s1 + $0x148] ss:$16 sps:$4 sm:$0xff]  }
 0x530   :  { %1930 = vmatprep.subr.bf16.mxu0 %v7498_v41  ;;  %2012 = vmatprep.subr.bf16.mxu1 %v7504_v30  ;;  %11138 = vst [vmem:[#allocation78_spill] sm:$0xff] %v7510_v24  ;;  %11139 = vst [vmem:[#allocation79_spill] sm:$0xff] %v7516_v62  ;;  %v7522_v41 = vld [vmem:[%s9958_s1 + $0x164] ss:$16 sps:$4 sm:$0xff]   ;;  %v7528_v30 = vld [vmem:[%s9958_s1 + $0x16c] ss:$16 sps:$4 sm:$0xff]  }
 0x531   :  { %11140 = vst [vmem:[#allocation80_spill] sm:$0xff] %v7522_v41  ;;  %11141 = vst [vmem:[#allocation81_spill] sm:$0xff] %v7528_v30 }
 0x533   :  { %1931 = vmatpush1.bf16.msra.mxu0 %v7510_v24  ;;  %2013 = vmatpush1.bf16.msra.mxu1 %v7516_v62  ;;  %v7534_v24 = vld [vmem:[%s9958_s1 + $0x160] ss:$16 sps:$4 sm:$0xff]   ;;  %v7540_v62 = vld [vmem:[%s9958_s1 + $0x168] ss:$16 sps:$4 sm:$0xff]  }
 0x534   :  { %1932 = vmatprep.subr.bf16.mxu0 %v7522_v41  ;;  %2014 = vmatprep.subr.bf16.mxu1 %v7528_v30  ;;  %11142 = vst [vmem:[#allocation82_spill] sm:$0xff] %v7534_v24  ;;  %11143 = vst [vmem:[#allocation13_spill] sm:$0xff] %v7540_v62  ;;  %v7546_v41 = vld [vmem:[%s9958_s1 + $0x184] ss:$16 sps:$4 sm:$0xff]   ;;  %v7552_v30 = vld [vmem:[%s9958_s1 + $0x18c] ss:$16 sps:$4 sm:$0xff]  }
 0x535   :  { %11144 = vst [vmem:[#allocation14_spill] sm:$0xff] %v7546_v41  ;;  %11145 = vst [vmem:[#allocation15_spill] sm:$0xff] %v7552_v30 }
 0x537   :  { %1933 = vmatpush1.bf16.msra.mxu0 %v7534_v24  ;;  %2015 = vmatpush1.bf16.msra.mxu1 %v7540_v62  ;;  %v7558_v24 = vld [vmem:[%s9958_s1 + $0x180] ss:$16 sps:$4 sm:$0xff]   ;;  %v7564_v62 = vld [vmem:[%s9958_s1 + $0x188] ss:$16 sps:$4 sm:$0xff]  }
 0x538   :  { %1934 = vmatprep.subr.bf16.mxu0 %v7546_v41  ;;  %2016 = vmatprep.subr.bf16.mxu1 %v7552_v30  ;;  %11146 = vst [vmem:[#allocation16_spill] sm:$0xff] %v7558_v24  ;;  %11147 = vst [vmem:[#allocation17_spill] sm:$0xff] %v7564_v62  ;;  %v7570_v41 = vld [vmem:[%s9958_s1 + $0x1a4] ss:$16 sps:$4 sm:$0xff]   ;;  %v7576_v30 = vld [vmem:[%s9958_s1 + $0x1ac] ss:$16 sps:$4 sm:$0xff]  }
 0x539   :  { %11148 = vst [vmem:[#allocation18_spill] sm:$0xff] %v7570_v41  ;;  %11149 = vst [vmem:[#allocation19_spill] sm:$0xff] %v7576_v30 }
 0x53b   :  { %1935 = vmatpush1.bf16.msra.mxu0 %v7558_v24  ;;  %2017 = vmatpush1.bf16.msra.mxu1 %v7564_v62  ;;  %v7582_v24 = vld [vmem:[%s9958_s1 + $0x1a0] ss:$16 sps:$4 sm:$0xff]   ;;  %v7588_v62 = vld [vmem:[%s9958_s1 + $0x1a8] ss:$16 sps:$4 sm:$0xff]  }
 0x53c   :  { %1936 = vmatprep.subr.bf16.mxu0 %v7570_v41  ;;  %2018 = vmatprep.subr.bf16.mxu1 %v7576_v30  ;;  %11150 = vst [vmem:[#allocation20_spill] sm:$0xff] %v7582_v24  ;;  %11151 = vst [vmem:[#allocation86_spill] sm:$0xff] %v7588_v62  ;;  %v7594_v41 = vld [vmem:[%s9958_s1 + $0x1c4] ss:$16 sps:$4 sm:$0xff]   ;;  %v7600_v30 = vld [vmem:[%s9958_s1 + $0x1cc] ss:$16 sps:$4 sm:$0xff]  }
 0x53d   :  { %11152 = vst [vmem:[#allocation87_spill] sm:$0xff] %v7594_v41  ;;  %11153 = vst [vmem:[#allocation88_spill] sm:$0xff] %v7600_v30 }
 0x53f   :  { %1937 = vmatpush1.bf16.msra.mxu0 %v7582_v24  ;;  %2019 = vmatpush1.bf16.msra.mxu1 %v7588_v62  ;;  %v11154_v62 = vld [vmem:[#allocation65_spill] sm:$0xff] }
 0x540   :  { %1938 = vmatprep.subr.bf16.mxu0 %v7594_v41  ;;  %2020 = vmatprep.subr.bf16.mxu1 %v7600_v30  ;;  %v11155_v41 = vld [vmem:[#allocation72_spill] sm:$0xff]  ;;  %v11156_v24 = vld [vmem:[#allocation73_spill] sm:$0xff] }
 0x541   :  { %v4186_v30 = vld [vmem:[%s9960_s3 + $0x10] sm:$0xf] }
 0x543   :  { %1939 = vmatpush1.bf16.msra.mxu0 %v11053_v44  ;;  %2021 = vmatpush1.bf16.msra.mxu1 %v11054_v45  ;;  %v1866_v44 = vrot.slane %v4186_v30, %v11157_v7  ;;  %v1874_v45 = vrot.slane %v4186_v30, %v11158_v21 }
 0x544   :  { %1940 = vmatprep.subr.bf16.mxu0 %v11055_v47  ;;  %2022 = vmatprep.subr.bf16.mxu1 %v11056_v49  ;;  %v1870_v49 = vrot.slane %v4186_v30, %v11159_v60 }
 0x547   :  { %1941 = vmatpush1.bf16.msra.mxu0 %v11057_v50  ;;  %2023 = vmatpush1.bf16.msra.mxu1 %v11154_v62  ;;  %v1878_v50 = vrot.slane %v4186_v30, %v11160_v25 }
 0x548   :  { %1951 = vmatprep.subr.bf16.mxu0 %v11155_v41  ;;  %2033 = vmatprep.subr.bf16.mxu1 %v11156_v24 }
 0x5dd   :  { %v1767_v20 = vpop.f32.mrb[16].mxu0  ;;  %v1849_v47 = vpop.f32.mrb[16].mxu1 }
 0x5de   :  { %v1856_v62 = vsub.f32 %v1767_v20, %v7173_v27  ;;  %v1858_v41 = vsub.f32 %v1849_v47, %v7176_v51  ;;  %v1769_v4 = vpop.f32.mrb[17].mxu0  ;;  %v1851_v24 = vpop.f32.mrb[17].mxu1 }
 0x5df   :  { %v1857_v26 = vsub.f32 %v1769_v4, %v7179_v15  ;;  %v1859_v5 = vsub.f32 %v1851_v24, %v7182_v6  ;;  %v1771_v43 = vpop.f32.mrb[18].mxu0  ;;  %v1853_v7 = vpop.f32.mrb[18].mxu1  ;;  %v11201_v24 = vld [vmem:[#allocation59_spill] sm:$0xff] }
 0x5e0   :  { %v1883_v42 = vadd.f32 %v1866_v44, %v1856_v62  ;;  %v1885_v21 = vadd.f32 %v1874_v45, %v1858_v41  ;;  %v1772_v10 = vpop.f32.mrb[19].mxu0  ;;  %v1854_v19 = vpop.f32.mrb[19].mxu1  ;;  %v7662_v43 = vld [vmem:[%s9958_s1 + $0x22c] ss:$16 sps:$4 sm:$0xff]   ;;  %v7692_v44 = vld [vmem:[%s9958_s1 + $0x240] ss:$16 sps:$4 sm:$0xff]  }
 0x5e1   :  { %v1884_v53 = vadd.f32 %v1870_v49, %v1857_v26  ;;  %v1886_v60 = vadd.f32 %v1878_v50, %v1859_v5  ;;  %v7668_v5 = vld [vmem:[%s9958_s1 + $0x220] ss:$16 sps:$4 sm:$0xff]   ;;  %v7674_v26 = vld [vmem:[%s9958_s1 + $0x228] ss:$16 sps:$4 sm:$0xff]  }
 0x5e2   :  { %v1887_v46 = vmul.f32 0.05, %v1883_v42  ;;  %v1889_v30 = vmul.f32 0.05, %v1885_v21  ;;  %v7656_v42 = vld [vmem:[%s9958_s1 + $0x224] ss:$16 sps:$4 sm:$0xff]  }
 0x5e3   :  { %v1888_v25 = vmul.f32 0.05, %v1884_v53  ;;  %v1890_v20 = vmul.f32 0.05, %v1886_v60  ;;  %v7686_v60 = vld [vmem:[%s9958_s1 + $0x24c] ss:$16 sps:$4 sm:$0xff]  }
 0x5e4   :  { %v7623_v47 = vadd.f32 %v1887_v46, %v7173_v27  ;;  %v7626_v16 = vadd.f32 %v1889_v30, %v7176_v51  ;;  %v7650_v46 = vld [vmem:[%s9958_s1 + $0x208] ss:$16 sps:$4 sm:$0xff]   ;;  %v11197_v49 = vld [vmem:[#allocation55_spill] sm:$0xff]  ;;  %v11199_v62 = vld [vmem:[#allocation57_spill] sm:$0xff] }
 0x5e5   :  { %v7629_v4 = vadd.f32 %v1888_v25, %v7179_v15  ;;  %v7632_v7 = vadd.f32 %v1890_v20, %v7182_v6  ;;  %v7644_v6 = vld [vmem:[%s9958_s1 + $0x200] ss:$16 sps:$4 sm:$0xff]   ;;  %v7680_v25 = vld [vmem:[%s9958_s1 + $0x244] ss:$16 sps:$4 sm:$0xff]   ;;  %v11196_v45 = vld [vmem:[#allocation54_spill] sm:$0xff] }
 0x5e6   :  { %v1895_v19 = vmax.f32 %v7623_v47, 0.0  ;;  %v7636_v10 = vmax.f32 %v7626_v16, 0.0  ;;  %v11198_v50 = vld [vmem:[#allocation56_spill] sm:$0xff]  ;;  %v11200_v41 = vld [vmem:[#allocation58_spill] sm:$0xff]  ;;  %v11203_v20 = vld [vmem:[#allocation67_spill] sm:$0xff] }
 0x5e7   :  { %v1896_v21 = vmax.f32 %v7629_v4, 0.0  ;;  %v1898_v53 = vmax.f32 %v7632_v7, 0.0  ;;  %v11202_v30 = vld [vmem:[#allocation66_spill] sm:$0xff] }
 0x5e8   :  { %1902 = vst [vmem:[#allocation4 + $0xa0] sm:$0xff] %v1895_v19  ;;  %1904 = vst [vmem:[#allocation4 + $0xb0] sm:$0xff] %v7636_v10  ;;  %v1906_v27 = vpack.c.bf16 %v1895_v19, %v1895_v19  ;;  %v11204_v19 = vld [vmem:[#allocation68_spill] sm:$0xff] }
 0x5e9   :  { %1903 = vst [vmem:[#allocation4 + $0xa8] sm:$0xff] %v1896_v21  ;;  %v1907_v51 = vpack.c.bf16 %v1896_v21, %v1896_v21  ;;  %1905 = vst [vmem:[#allocation4 + $0xb8] sm:$0xff] %v1898_v53  ;;  %v1909_v15 = vpack.c.bf16 %v1898_v53, %v1898_v53  ;;  %v11206_v21 = vld [vmem:[#allocation70_spill] sm:$0xff]  ;;  %v11207_v53 = vld [vmem:[#allocation71_spill] sm:$0xff] }
 0x5eb   :  { %1942 = vmatprep.mubr.bf16.mxu0 %v1907_v51  ;;  %2024 = vmatprep.mubr.bf16.mxu1 %v1907_v51  ;;  %v11208_v51 = vld [vmem:[#allocation83_spill] sm:$0xff] }
 0x5ec   :  { %1943 = vmatmul.mubr.bf16.vlgmr.msra.gmra.mrb[20].mxu0 %v1906_v27  ;;  %2025 = vmatmul.mubr.bf16.vlgmr.msra.gmra.mrb[20].mxu1 %v1906_v27  ;;  %v11209_v27 = vld [vmem:[#allocation84_spill] sm:$0xff] }
 0x5ed   :  { %1952 = vmatpush1.bf16.msra.mxu0 %v7644_v6  ;;  %2034 = vmatpush1.bf16.msra.mxu1 %v7650_v46 }
 0x5ee   :  { %1983 = vmatprep.mubr.bf16.mxu0 %v1909_v15  ;;  %2065 = vmatprep.mubr.bf16.mxu1 %v1909_v15  ;;  %v11210_v15 = vld [vmem:[#allocation85_spill] sm:$0xff] }
 0x5ef   :  { %1953 = vmatprep.subr.bf16.mxu0 %v7656_v42  ;;  %2035 = vmatprep.subr.bf16.mxu1 %v7662_v43 }
 0x5f1   :  { %1954 = vmatpush1.bf16.msra.mxu0 %v7668_v5  ;;  %2036 = vmatpush1.bf16.msra.mxu1 %v7674_v26 }
 0x5f2   :  { %1955 = vmatprep.subr.bf16.mxu0 %v7680_v25  ;;  %2037 = vmatprep.subr.bf16.mxu1 %v7686_v60 }
 0x5f5   :  { %1956 = vmatpush1.bf16.msra.mxu0 %v7692_v44  ;;  %2038 = vmatpush1.bf16.msra.mxu1 %v6778_v54  ;;  %v11161_v54 = vld [vmem:[#allocation21_spill] sm:$0xff] }
 0x5f6   :  { %1957 = vmatprep.subr.bf16.mxu0 %v6784_v58  ;;  %2039 = vmatprep.subr.bf16.mxu1 %v6790_v48  ;;  %v11162_v58 = vld [vmem:[#allocation22_spill] sm:$0xff]  ;;  %v11163_v48 = vld [vmem:[#allocation23_spill] sm:$0xff] }
 0x5f9   :  { %1958 = vmatpush1.bf16.msra.mxu0 %v6796_v29  ;;  %2040 = vmatpush1.bf16.msra.mxu1 %v6802_v31  ;;  %v11164_v29 = vld [vmem:[#allocation24_spill] sm:$0xff] }
 0x5fa   :  { %1959 = vmatprep.subr.bf16.mxu0 %v6808_v32  ;;  %2041 = vmatprep.subr.bf16.mxu1 %v6814_v55  ;;  %v11165_v31 = vld [vmem:[#allocation8_spill] sm:$0xff]  ;;  %v11166_v32 = vld [vmem:[#allocation7_spill] sm:$0xff]  ;;  %v11167_v55 = vld [vmem:[#allocation49_spill] sm:$0xff] }
 0x5fd   :  { %1960 = vmatpush1.bf16.msra.mxu0 %v6820_v52  ;;  %2042 = vmatpush1.bf16.msra.mxu1 %v6826_v33  ;;  %v11168_v52 = vld [vmem:[#allocation25_spill] sm:$0xff]  ;;  %v11169_v33 = vld [vmem:[#allocation26_spill] sm:$0xff] }
 0x5fe   :  { %1961 = vmatprep.subr.bf16.mxu0 %v6832_v34  ;;  %2043 = vmatprep.subr.bf16.mxu1 %v6838_v35  ;;  %v11170_v34 = vld [vmem:[#allocation27_spill] sm:$0xff]  ;;  %v11171_v35 = vld [vmem:[#allocation28_spill] sm:$0xff] }
 0x601   :  { %1962 = vmatpush1.bf16.msra.mxu0 %v6844_v36  ;;  %2044 = vmatpush1.bf16.msra.mxu1 %v6850_v37  ;;  %v11172_v36 = vld [vmem:[#allocation29_spill] sm:$0xff]  ;;  %v11173_v37 = vld [vmem:[#allocation30_spill] sm:$0xff] }
 0x602   :  { %1963 = vmatprep.subr.bf16.mxu0 %v6856_v38  ;;  %2045 = vmatprep.subr.bf16.mxu1 %v6862_v39  ;;  %v11174_v38 = vld [vmem:[#allocation31_spill] sm:$0xff]  ;;  %v11175_v39 = vld [vmem:[#allocation32_spill] sm:$0xff] }
 0x605   :  { %1964 = vmatpush1.bf16.msra.mxu0 %v6868_v40  ;;  %2046 = vmatpush1.bf16.msra.mxu1 %v6874_v59  ;;  %v11176_v40 = vld [vmem:[#allocation33_spill] sm:$0xff]  ;;  %v11177_v59 = vld [vmem:[#allocation34_spill] sm:$0xff] }
 0x606   :  { %1965 = vmatprep.subr.bf16.mxu0 %v6880_v18  ;;  %2047 = vmatprep.subr.bf16.mxu1 %v6886_v56  ;;  %v1908_v18 = vpack.c.bf16 %v7636_v10, %v7636_v10  ;;  %v11178_v56 = vld [vmem:[#allocation35_spill] sm:$0xff]  ;;  %v11205_v10 = vld [vmem:[#allocation69_spill] sm:$0xff] }
 0x609   :  { %1966 = vmatpush1.bf16.msra.mxu0 %v11065_v22  ;;  %2048 = vmatpush1.bf16.msra.mxu1 %v11066_v57  ;;  %v11179_v22 = vld [vmem:[#allocation36_spill] sm:$0xff]  ;;  %v11180_v57 = vld [vmem:[#allocation37_spill] sm:$0xff] }
 0x60a   :  { %1967 = vmatprep.subr.bf16.mxu0 %v11067_v63  ;;  %2049 = vmatprep.subr.bf16.mxu1 %v11068_v0  ;;  %v11181_v63 = vld [vmem:[#allocation38_spill] sm:$0xff]  ;;  %v11182_v0 = vld [vmem:[#allocation39_spill] sm:$0xff] }
 0x60d   :  { %1968 = vmatpush1.bf16.msra.mxu0 %v11069_v1  ;;  %2050 = vmatpush1.bf16.msra.mxu1 %v11070_v17  ;;  %v11183_v1 = vld [vmem:[#allocation40_spill] sm:$0xff]  ;;  %v11184_v17 = vld [vmem:[#allocation41_spill] sm:$0xff] }
 0x60e   :  { %1969 = vmatprep.subr.bf16.mxu0 %v11071_v23  ;;  %2051 = vmatprep.subr.bf16.mxu1 %v11072_v3  ;;  %v11185_v23 = vld [vmem:[#allocation42_spill] sm:$0xff]  ;;  %v11186_v3 = vld [vmem:[#allocation43_spill] sm:$0xff] }
 0x611   :  { %1970 = vmatpush1.bf16.msra.mxu0 %v11073_v8  ;;  %2052 = vmatpush1.bf16.msra.mxu1 %v11074_v61  ;;  %v11187_v8 = vld [vmem:[#allocation44_spill] sm:$0xff]  ;;  %v11188_v61 = vld [vmem:[#allocation45_spill] sm:$0xff] }
 0x612   :  { %1971 = vmatprep.subr.bf16.mxu0 %v11075_v2  ;;  %2053 = vmatprep.subr.bf16.mxu1 %v11076_v28  ;;  %v11189_v2 = vld [vmem:[#allocation46_spill] sm:$0xff]  ;;  %v11190_v28 = vld [vmem:[#allocation47_spill] sm:$0xff] }
 0x615   :  { %1972 = vmatpush1.bf16.msra.mxu0 %v11077_v9  ;;  %2054 = vmatpush1.bf16.msra.mxu1 %v11078_v11  ;;  %v11191_v9 = vld [vmem:[#allocation48_spill] sm:$0xff]  ;;  %v11192_v11 = vld [vmem:[#allocation50_spill] sm:$0xff] }
 0x616   :  { %1973 = vmatprep.subr.bf16.mxu0 %v11079_v12  ;;  %2055 = vmatprep.subr.bf16.mxu1 %v11080_v13  ;;  %v11193_v12 = vld [vmem:[#allocation51_spill] sm:$0xff]  ;;  %v11194_v13 = vld [vmem:[#allocation52_spill] sm:$0xff] }
 0x619   :  { %1974 = vmatpush1.bf16.msra.mxu0 %v11081_v14  ;;  %2056 = vmatpush1.bf16.msra.mxu1 %v11161_v54  ;;  %v11195_v14 = vld [vmem:[#allocation53_spill] sm:$0xff]  ;;  %v11211_v54 = vld [vmem:[#allocation60_spill] sm:$0xff] }
 0x61a   :  { %1975 = vmatprep.subr.bf16.mxu0 %v11162_v58  ;;  %2057 = vmatprep.subr.bf16.mxu1 %v11163_v48  ;;  %v11212_v58 = vld [vmem:[#allocation61_spill] sm:$0xff]  ;;  %v11213_v48 = vld [vmem:[#allocation62_spill] sm:$0xff] }
 0x61d   :  { %1976 = vmatpush1.bf16.msra.mxu0 %v11164_v29  ;;  %2058 = vmatpush1.bf16.msra.mxu1 %v11165_v31  ;;  %v11214_v29 = vld [vmem:[#allocation63_spill] sm:$0xff]  ;;  %v11215_v31 = vld [vmem:[#allocation64_spill] sm:$0xff] }
 0x61e   :  { %1977 = vmatprep.subr.bf16.mxu0 %v11166_v32  ;;  %2059 = vmatprep.subr.bf16.mxu1 %v11167_v55  ;;  %v11216_v32 = vld [vmem:[#allocation74_spill] sm:$0xff]  ;;  %v11217_v55 = vld [vmem:[#allocation75_spill] sm:$0xff] }
 0x621   :  { %1978 = vmatpush1.bf16.msra.mxu0 %v11168_v52  ;;  %2060 = vmatpush1.bf16.msra.mxu1 %v11169_v33  ;;  %v11218_v52 = vld [vmem:[#allocation76_spill] sm:$0xff]  ;;  %v11219_v33 = vld [vmem:[#allocation77_spill] sm:$0xff] }
 0x622   :  { %1979 = vmatprep.subr.bf16.mxu0 %v11170_v34  ;;  %2061 = vmatprep.subr.bf16.mxu1 %v11171_v35  ;;  %v11220_v34 = vld [vmem:[#allocation78_spill] sm:$0xff]  ;;  %v11221_v35 = vld [vmem:[#allocation79_spill] sm:$0xff] }
 0x625   :  { %1980 = vmatpush1.bf16.msra.mxu0 %v11172_v36  ;;  %2062 = vmatpush1.bf16.msra.mxu1 %v11173_v37  ;;  %v11222_v36 = vld [vmem:[#allocation80_spill] sm:$0xff]  ;;  %v11223_v37 = vld [vmem:[#allocation81_spill] sm:$0xff] }
 0x626   :  { %1981 = vmatprep.subr.bf16.mxu0 %v11174_v38  ;;  %2063 = vmatprep.subr.bf16.mxu1 %v11175_v39  ;;  %v11224_v38 = vld [vmem:[#allocation82_spill] sm:$0xff]  ;;  %v11225_v39 = vld [vmem:[#allocation13_spill] sm:$0xff] }
 0x629   :  { %1982 = vmatpush1.bf16.msra.mxu0 %v11176_v40  ;;  %2064 = vmatpush1.bf16.msra.mxu1 %v11177_v59  ;;  %v11226_v40 = vld [vmem:[#allocation14_spill] sm:$0xff]  ;;  %v11227_v59 = vld [vmem:[#allocation15_spill] sm:$0xff] }
 0x62a   :  { %2128 = vmatprep.subr.bf16.mxu0 %v11178_v56  ;;  %2210 = vmatprep.subr.bf16.mxu1 %v11179_v22 }
 0x62c   :  { %1984 = vmatmul.mubr.bf16.vlgmr.msra.gmra.mrb[20].mxu0 %v1908_v18  ;;  %2066 = vmatmul.mubr.bf16.vlgmr.msra.gmra.mrb[20].mxu1 %v1908_v18  ;;  %v11228_v18 = vld [vmem:[#allocation16_spill] sm:$0xff] }
 0x62d   :  { %2129 = vmatpush1.bf16.msra.mxu0 %v11180_v57  ;;  %2211 = vmatpush1.bf16.msra.mxu1 %v11181_v63 }
 0x62e   :  { %2130 = vmatprep.subr.bf16.mxu0 %v11182_v0  ;;  %2212 = vmatprep.subr.bf16.mxu1 %v11183_v1 }
 0x631   :  { %2131 = vmatpush1.bf16.msra.mxu0 %v11184_v17  ;;  %2213 = vmatpush1.bf16.msra.mxu1 %v11185_v23 }
 0x632   :  { %2132 = vmatprep.subr.bf16.mxu0 %v11186_v3  ;;  %2214 = vmatprep.subr.bf16.mxu1 %v11187_v8 }
 0x635   :  { %2133 = vmatpush1.bf16.msra.mxu0 %v11188_v61  ;;  %2215 = vmatpush1.bf16.msra.mxu1 %v11189_v2 }
 0x636   :  { %2134 = vmatprep.subr.bf16.mxu0 %v11190_v28  ;;  %2216 = vmatprep.subr.bf16.mxu1 %v11191_v9 }
 0x639   :  { %2135 = vmatpush1.bf16.msra.mxu0 %v11192_v11  ;;  %2217 = vmatpush1.bf16.msra.mxu1 %v11193_v12 }
 0x63a   :  { %2136 = vmatprep.subr.bf16.mxu0 %v11194_v13  ;;  %2218 = vmatprep.subr.bf16.mxu1 %v11195_v14 }
 0x63d   :  { %2137 = vmatpush1.bf16.msra.mxu0 %v11196_v45  ;;  %2219 = vmatpush1.bf16.msra.mxu1 %v11197_v49 }
 0x63e   :  { %2138 = vmatprep.subr.bf16.mxu0 %v11198_v50  ;;  %2220 = vmatprep.subr.bf16.mxu1 %v11199_v62 }
 0x641   :  { %2139 = vmatpush1.bf16.msra.mxu0 %v11200_v41  ;;  %2221 = vmatpush1.bf16.msra.mxu1 %v11201_v24 }
 0x642   :  { %2140 = vmatprep.subr.bf16.mxu0 %v11202_v30  ;;  %2222 = vmatprep.subr.bf16.mxu1 %v11203_v20 }
 0x645   :  { %2141 = vmatpush1.bf16.msra.mxu0 %v11204_v19  ;;  %2223 = vmatpush1.bf16.msra.mxu1 %v11205_v10 }
 0x646   :  { %2142 = vmatprep.subr.bf16.mxu0 %v11206_v21  ;;  %2224 = vmatprep.subr.bf16.mxu1 %v11207_v53 }
 0x649   :  { %2143 = vmatpush1.bf16.msra.mxu0 %v11208_v51  ;;  %2225 = vmatpush1.bf16.msra.mxu1 %v11209_v27 }
 0x64a   :  { %2144 = vmatprep.subr.bf16.mxu0 %v11210_v15  ;;  %2226 = vmatprep.subr.bf16.mxu1 %v11211_v54 }
 0x64d   :  { %2145 = vmatpush1.bf16.msra.mxu0 %v11212_v58  ;;  %2227 = vmatpush1.bf16.msra.mxu1 %v11213_v48 }
 0x64e   :  { %2146 = vmatprep.subr.bf16.mxu0 %v11214_v29  ;;  %2228 = vmatprep.subr.bf16.mxu1 %v11215_v31 }
 0x651   :  { %2147 = vmatpush1.bf16.msra.mxu0 %v11216_v32  ;;  %2229 = vmatpush1.bf16.msra.mxu1 %v11217_v55 }
 0x652   :  { %2148 = vmatprep.subr.bf16.mxu0 %v11218_v52  ;;  %2230 = vmatprep.subr.bf16.mxu1 %v11219_v33  ;;  %v11229_v52 = vld [vmem:[#allocation17_spill] sm:$0xff]  ;;  %v11230_v33 = vld [vmem:[#allocation18_spill] sm:$0xff] }
 0x655   :  { %2149 = vmatpush1.bf16.msra.mxu0 %v11220_v34  ;;  %2231 = vmatpush1.bf16.msra.mxu1 %v11221_v35  ;;  %v11231_v34 = vld [vmem:[#allocation19_spill] sm:$0xff]  ;;  %v11232_v35 = vld [vmem:[#allocation20_spill] sm:$0xff] }
 0x656   :  { %2150 = vmatprep.subr.bf16.mxu0 %v11222_v36  ;;  %2232 = vmatprep.subr.bf16.mxu1 %v11223_v37  ;;  %v11233_v36 = vld [vmem:[#allocation86_spill] sm:$0xff]  ;;  %v11234_v37 = vld [vmem:[#allocation87_spill] sm:$0xff] }
 0x659   :  { %2151 = vmatpush1.bf16.msra.mxu0 %v11224_v38  ;;  %2233 = vmatpush1.bf16.msra.mxu1 %v11225_v39  ;;  %v11235_v38 = vld [vmem:[#allocation88_spill] sm:$0xff] }
 0x65a   :  { %2152 = vmatprep.subr.bf16.mxu0 %v11226_v40  ;;  %2234 = vmatprep.subr.bf16.mxu1 %v11227_v59  ;;  %v7811_v59 = vld [vmem:[%s9958_s1 + $0x1c0] ss:$16 sps:$4 sm:$0xff]  }
 0x65b   :  { %11236 = vst [vmem:[#allocation65_spill] sm:$0xff] %v7811_v59  ;;  %v11246_v40 = vld [vmem:[#allocation11_spill] sm:$0xff] }
 0x65d   :  { %2153 = vmatpush1.bf16.msra.mxu0 %v11228_v18  ;;  %2235 = vmatpush1.bf16.msra.mxu1 %v11229_v52 }
 0x65e   :  { %2154 = vmatprep.subr.bf16.mxu0 %v11230_v33  ;;  %2236 = vmatprep.subr.bf16.mxu1 %v11231_v34  ;;  %v7817_v33 = vld [vmem:[%s9958_s1 + $0x1c8] ss:$16 sps:$4 sm:$0xff]  }
 0x65f   :  { %11237 = vst [vmem:[#allocation72_spill] sm:$0xff] %v7817_v33 }
 0x661   :  { %2155 = vmatpush1.bf16.msra.mxu0 %v11232_v35  ;;  %2237 = vmatpush1.bf16.msra.mxu1 %v11233_v36  ;;  %v11244_v36 = vld [vmem:[#allocation9_spill] sm:$0xff]  ;;  %v11245_v35 = vld [vmem:[#allocation10_spill] sm:$0xff] }
 0x662   :  { %2156 = vmatprep.subr.bf16.mxu0 %v11234_v37  ;;  %2238 = vmatprep.subr.bf16.mxu1 %v11235_v38  ;;  %v7823_v37 = vld [vmem:[%s9958_s1 + $0x1e4] ss:$16 sps:$4 sm:$0xff]   ;;  %v7829_v38 = vld [vmem:[%s9958_s1 + $0x1ec] ss:$16 sps:$4 sm:$0xff]  }
 0x663   :  { %11238 = vst [vmem:[#allocation73_spill] sm:$0xff] %v7823_v37  ;;  %11239 = vst [vmem:[#allocation21_spill] sm:$0xff] %v7829_v38 }
 0x665   :  { %2157 = vmatpush1.bf16.msra.mxu0 %v7811_v59  ;;  %2239 = vmatpush1.bf16.msra.mxu1 %v7817_v33  ;;  %v7835_v59 = vld [vmem:[%s9958_s1 + $0x1e0] ss:$16 sps:$4 sm:$0xff]   ;;  %v7841_v33 = vld [vmem:[%s9958_s1 + $0x1e8] ss:$16 sps:$4 sm:$0xff]  }
 0x666   :  { %2158 = vmatprep.subr.bf16.mxu0 %v7823_v37  ;;  %2240 = vmatprep.subr.bf16.mxu1 %v7829_v38  ;;  %11240 = vst [vmem:[#allocation22_spill] sm:$0xff] %v7835_v59  ;;  %11241 = vst [vmem:[#allocation23_spill] sm:$0xff] %v7841_v33  ;;  %v7847_v37 = vld [vmem:[%s9958_s1 + $0x204] ss:$16 sps:$4 sm:$0xff]   ;;  %v7853_v38 = vld [vmem:[%s9958_s1 + $0x20c] ss:$16 sps:$4 sm:$0xff]  }
 0x667   :  { %11242 = vst [vmem:[#allocation24_spill] sm:$0xff] %v7847_v37  ;;  %11243 = vst [vmem:[#allocation8_spill] sm:$0xff] %v7853_v38 }
 0x669   :  { %2159 = vmatpush1.bf16.msra.mxu0 %v7835_v59  ;;  %2241 = vmatpush1.bf16.msra.mxu1 %v7841_v33  ;;  %v4187_v59 = vld [vmem:[%s9960_s3 + $0x14] sm:$0xf] }
 0x66a   :  { %2169 = vmatprep.subr.bf16.mxu0 %v7847_v37  ;;  %2251 = vmatprep.subr.bf16.mxu1 %v7853_v38  ;;  %v2084_v33 = vrot.slane %v4187_v59, %v11244_v36  ;;  %v2092_v34 = vrot.slane %v4187_v59, %v11245_v35  ;;  %v2088_v39 = vrot.slane %v4187_v59, %v11246_v40  ;;  %v11247_v37 = vld [vmem:[#allocation12_spill] sm:$0xff] }
 0x66b   :  { %v2096_v55 = vrot.slane %v4187_v59, %v11247_v37 }
 0x6ff   :  { %v1985_v52 = vpop.f32.mrb[20].mxu0  ;;  %v2067_v18 = vpop.f32.mrb[20].mxu1 }
 0x700   :  { %v2074_v32 = vsub.f32 %v1985_v52, %v7623_v47  ;;  %v2076_v31 = vsub.f32 %v2067_v18, %v7626_v16  ;;  %v1987_v29 = vpop.f32.mrb[21].mxu0  ;;  %v2069_v38 = vpop.f32.mrb[21].mxu1 }
 0x701   :  { %v2075_v48 = vsub.f32 %v1987_v29, %v7629_v4  ;;  %v2077_v58 = vsub.f32 %v2069_v38, %v7632_v7  ;;  %v1989_v54 = vpop.f32.mrb[22].mxu0  ;;  %v2071_v36 = vpop.f32.mrb[22].mxu1  ;;  %v7970_v38 = vld [vmem:[%s9958_s1 + $0x2a8] ss:$16 sps:$4 sm:$0xff]  }
 0x702   :  { %v2101_v15 = vadd.f32 %v2084_v33, %v2074_v32  ;;  %v2103_v35 = vadd.f32 %v2092_v34, %v2076_v31  ;;  %v1990_v27 = vpop.f32.mrb[23].mxu0  ;;  %v2072_v51 = vpop.f32.mrb[23].mxu1  ;;  %v7922_v31 = vld [vmem:[%s9958_s1 + $0x268] ss:$16 sps:$4 sm:$0xff]   ;;  %v7928_v32 = vld [vmem:[%s9958_s1 + $0x284] ss:$16 sps:$4 sm:$0xff]  }
 0x703   :  { %v2102_v53 = vadd.f32 %v2088_v39, %v2075_v48  ;;  %v2104_v40 = vadd.f32 %v2096_v55, %v2077_v58  ;;  %v7910_v58 = vld [vmem:[%s9958_s1 + $0x26c] ss:$16 sps:$4 sm:$0xff]   ;;  %v7916_v48 = vld [vmem:[%s9958_s1 + $0x260] ss:$16 sps:$4 sm:$0xff]   ;;  %v7946_v34 = vld [vmem:[%s9958_s1 + $0x288] ss:$16 sps:$4 sm:$0xff]  }
 0x704   :  { %v2105_v21 = vmul.f32 0.05, %v2101_v15  ;;  %v2107_v59 = vmul.f32 0.05, %v2103_v35  ;;  %v7934_v55 = vld [vmem:[%s9958_s1 + $0x28c] ss:$16 sps:$4 sm:$0xff]  }
 0x705   :  { %v2106_v37 = vmul.f32 0.05, %v2102_v53  ;;  %v2108_v52 = vmul.f32 0.05, %v2104_v40  ;;  %v7940_v33 = vld [vmem:[%s9958_s1 + $0x280] ss:$16 sps:$4 sm:$0xff]  }
 0x706   :  { %v7868_v18 = vadd.f32 %v2105_v21, %v7623_v47  ;;  %v7871_v10 = vadd.f32 %v2107_v59, %v7626_v16  ;;  %v7904_v21 = vld [vmem:[%s9958_s1 + $0x264] ss:$16 sps:$4 sm:$0xff]   ;;  %v7958_v36 = vld [vmem:[%s9958_s1 + $0x2ac] ss:$16 sps:$4 sm:$0xff]   ;;  %v7988_v59 = vld [vmem:[%s9958_s1 + $0x2c0] ss:$16 sps:$4 sm:$0xff]  }
 0x707   :  { %v7874_v29 = vadd.f32 %v2106_v37, %v7629_v4  ;;  %v7877_v54 = vadd.f32 %v2108_v52, %v7632_v7  ;;  %v7898_v7 = vld [vmem:[%s9958_s1 + $0x248] ss:$16 sps:$4 sm:$0xff]   ;;  %v7952_v35 = vld [vmem:[%s9958_s1 + $0x2a4] ss:$16 sps:$4 sm:$0xff]   ;;  %v7964_v37 = vld [vmem:[%s9958_s1 + $0x2a0] ss:$16 sps:$4 sm:$0xff]  }
 0x708   :  { %v2113_v51 = vmax.f32 %v7868_v18, 0.0  ;;  %v7881_v27 = vmax.f32 %v7871_v10, 0.0  ;;  %v7976_v39 = vld [vmem:[%s9958_s1 + $0x2c4] ss:$16 sps:$4 sm:$0xff]   ;;  %v7982_v40 = vld [vmem:[%s9958_s1 + $0x2cc] ss:$16 sps:$4 sm:$0xff]  }
 0x709   :  { %v2114_v53 = vmax.f32 %v7874_v29, 0.0  ;;  %v2116_v15 = vmax.f32 %v7877_v54, 0.0  ;;  %v7994_v52 = vld [vmem:[%s9958_s1 + $0x2c8] ss:$16 sps:$4 sm:$0xff]  }
 0x70a   :  { %2120 = vst [vmem:[#allocation4 + $0xc0] sm:$0xff] %v2113_v51  ;;  %2122 = vst [vmem:[#allocation4 + $0xd0] sm:$0xff] %v7881_v27  ;;  %v2124_v47 = vpack.c.bf16 %v2113_v51, %v2113_v51  ;;  %v8000_v51 = vld [vmem:[%s9958_s1 + $0x2e4] ss:$16 sps:$4 sm:$0xff]  }
 0x70b   :  { %2121 = vst [vmem:[#allocation4 + $0xc8] sm:$0xff] %v2114_v53  ;;  %v2125_v16 = vpack.c.bf16 %v2114_v53, %v2114_v53  ;;  %2123 = vst [vmem:[#allocation4 + $0xd8] sm:$0xff] %v2116_v15  ;;  %v2127_v4 = vpack.c.bf16 %v2116_v15, %v2116_v15  ;;  %v8006_v53 = vld [vmem:[%s9958_s1 + $0x2ec] ss:$16 sps:$4 sm:$0xff]   ;;  %v8012_v15 = vld [vmem:[%s9958_s1 + $0x2e0] ss:$16 sps:$4 sm:$0xff]  }
 0x70c   :  { %11248 = vst [vmem:[#allocation7_spill] sm:$0xff] %v8012_v15 }
 0x70d   :  { %2160 = vmatprep.mubr.bf16.mxu0 %v2125_v16  ;;  %2242 = vmatprep.mubr.bf16.mxu1 %v2125_v16  ;;  %v8018_v16 = vld [vmem:[%s9958_s1 + $0x2e8] ss:$16 sps:$4 sm:$0xff]  }
 0x70e   :  { %2161 = vmatmul.mubr.bf16.vlgmr.msra.gmra.mrb[24].mxu0 %v2124_v47  ;;  %2243 = vmatmul.mubr.bf16.vlgmr.msra.gmra.mrb[24].mxu1 %v2124_v47  ;;  %11249 = vst [vmem:[#allocation49_spill] sm:$0xff] %v8018_v16  ;;  %v8024_v47 = vld [vmem:[%s9958_s1 + $0x304] ss:$16 sps:$4 sm:$0xff]  }
 0x70f   :  { %2170 = vmatpush1.bf16.msra.mxu0 %v7644_v6  ;;  %2252 = vmatpush1.bf16.msra.mxu1 %v7650_v46  ;;  %11250 = vst [vmem:[#allocation25_spill] sm:$0xff] %v8024_v47 }
 0x710   :  { %2201 = vmatprep.mubr.bf16.mxu0 %v2127_v4  ;;  %2283 = vmatprep.mubr.bf16.mxu1 %v2127_v4  ;;  %v8030_v4 = vld [vmem:[%s9958_s1 + $0x30c] ss:$16 sps:$4 sm:$0xff]  }
 0x711   :  { %2171 = vmatprep.subr.bf16.mxu0 %v7656_v42  ;;  %2253 = vmatprep.subr.bf16.mxu1 %v7662_v43  ;;  %11251 = vst [vmem:[#allocation26_spill] sm:$0xff] %v8030_v4 }
 0x713   :  { %2172 = vmatpush1.bf16.msra.mxu0 %v7668_v5  ;;  %2254 = vmatpush1.bf16.msra.mxu1 %v7674_v26 }
 0x714   :  { %2173 = vmatprep.subr.bf16.mxu0 %v7680_v25  ;;  %2255 = vmatprep.subr.bf16.mxu1 %v7686_v60 }
 0x717   :  { %2174 = vmatpush1.bf16.msra.mxu0 %v7692_v44  ;;  %2256 = vmatpush1.bf16.msra.mxu1 %v7898_v7 }
 0x718   :  { %2175 = vmatprep.subr.bf16.mxu0 %v7904_v21  ;;  %2257 = vmatprep.subr.bf16.mxu1 %v7910_v58 }
 0x71b   :  { %2176 = vmatpush1.bf16.msra.mxu0 %v7916_v48  ;;  %2258 = vmatpush1.bf16.msra.mxu1 %v7922_v31 }
 0x71c   :  { %2177 = vmatprep.subr.bf16.mxu0 %v7928_v32  ;;  %2259 = vmatprep.subr.bf16.mxu1 %v7934_v55 }
 0x71f   :  { %2178 = vmatpush1.bf16.msra.mxu0 %v7940_v33  ;;  %2260 = vmatpush1.bf16.msra.mxu1 %v7946_v34 }
 0x720   :  { %2179 = vmatprep.subr.bf16.mxu0 %v7952_v35  ;;  %2261 = vmatprep.subr.bf16.mxu1 %v7958_v36 }
 0x723   :  { %2180 = vmatpush1.bf16.msra.mxu0 %v7964_v37  ;;  %2262 = vmatpush1.bf16.msra.mxu1 %v7970_v38 }
 0x724   :  { %2181 = vmatprep.subr.bf16.mxu0 %v7976_v39  ;;  %2263 = vmatprep.subr.bf16.mxu1 %v7982_v40 }
 0x727   :  { %2182 = vmatpush1.bf16.msra.mxu0 %v7988_v59  ;;  %2264 = vmatpush1.bf16.msra.mxu1 %v7994_v52 }
 0x728   :  { %2183 = vmatprep.subr.bf16.mxu0 %v8000_v51  ;;  %2265 = vmatprep.subr.bf16.mxu1 %v8006_v53 }
 0x72b   :  { %2184 = vmatpush1.bf16.msra.mxu0 %v8012_v15  ;;  %2266 = vmatpush1.bf16.msra.mxu1 %v8018_v16  ;;  %v8036_v15 = vld [vmem:[%s9958_s1 + $0x300] ss:$16 sps:$4 sm:$0xff]   ;;  %v8042_v16 = vld [vmem:[%s9958_s1 + $0x308] ss:$16 sps:$4 sm:$0xff]  }
 0x72c   :  { %2185 = vmatprep.subr.bf16.mxu0 %v8024_v47  ;;  %2267 = vmatprep.subr.bf16.mxu1 %v8030_v4  ;;  %11252 = vst [vmem:[#allocation27_spill] sm:$0xff] %v8036_v15  ;;  %11253 = vst [vmem:[#allocation28_spill] sm:$0xff] %v8042_v16  ;;  %v8048_v47 = vld [vmem:[%s9958_s1 + $0x324] ss:$16 sps:$4 sm:$0xff]   ;;  %v8054_v4 = vld [vmem:[%s9958_s1 + $0x32c] ss:$16 sps:$4 sm:$0xff]  }
 0x72d   :  { %11254 = vst [vmem:[#allocation29_spill] sm:$0xff] %v8048_v47  ;;  %11255 = vst [vmem:[#allocation30_spill] sm:$0xff] %v8054_v4 }
 0x72f   :  { %2186 = vmatpush1.bf16.msra.mxu0 %v8036_v15  ;;  %2268 = vmatpush1.bf16.msra.mxu1 %v8042_v16  ;;  %v8060_v15 = vld [vmem:[%s9958_s1 + $0x320] ss:$16 sps:$4 sm:$0xff]   ;;  %v8066_v16 = vld [vmem:[%s9958_s1 + $0x328] ss:$16 sps:$4 sm:$0xff]  }
 0x730   :  { %2187 = vmatprep.subr.bf16.mxu0 %v8048_v47  ;;  %2269 = vmatprep.subr.bf16.mxu1 %v8054_v4  ;;  %11256 = vst [vmem:[#allocation31_spill] sm:$0xff] %v8060_v15  ;;  %11257 = vst [vmem:[#allocation32_spill] sm:$0xff] %v8066_v16  ;;  %v8072_v47 = vld [vmem:[%s9958_s1 + $0x344] ss:$16 sps:$4 sm:$0xff]   ;;  %v8078_v4 = vld [vmem:[%s9958_s1 + $0x34c] ss:$16 sps:$4 sm:$0xff]  }
 0x731   :  { %11258 = vst [vmem:[#allocation33_spill] sm:$0xff] %v8072_v47  ;;  %11259 = vst [vmem:[#allocation34_spill] sm:$0xff] %v8078_v4 }
 0x733   :  { %2188 = vmatpush1.bf16.msra.mxu0 %v8060_v15  ;;  %2270 = vmatpush1.bf16.msra.mxu1 %v8066_v16  ;;  %v8084_v15 = vld [vmem:[%s9958_s1 + $0x340] ss:$16 sps:$4 sm:$0xff]   ;;  %v8090_v16 = vld [vmem:[%s9958_s1 + $0x348] ss:$16 sps:$4 sm:$0xff]  }
 0x734   :  { %2189 = vmatprep.subr.bf16.mxu0 %v8072_v47  ;;  %2271 = vmatprep.subr.bf16.mxu1 %v8078_v4  ;;  %11260 = vst [vmem:[#allocation35_spill] sm:$0xff] %v8084_v15  ;;  %11261 = vst [vmem:[#allocation36_spill] sm:$0xff] %v8090_v16  ;;  %v8096_v47 = vld [vmem:[%s9958_s1 + $0x364] ss:$16 sps:$4 sm:$0xff]   ;;  %v8102_v4 = vld [vmem:[%s9958_s1 + $0x36c] ss:$16 sps:$4 sm:$0xff]  }
 0x735   :  { %11262 = vst [vmem:[#allocation37_spill] sm:$0xff] %v8096_v47  ;;  %11263 = vst [vmem:[#allocation38_spill] sm:$0xff] %v8102_v4 }
 0x737   :  { %2190 = vmatpush1.bf16.msra.mxu0 %v8084_v15  ;;  %2272 = vmatpush1.bf16.msra.mxu1 %v8090_v16  ;;  %v8108_v15 = vld [vmem:[%s9958_s1 + $0x360] ss:$16 sps:$4 sm:$0xff]   ;;  %v8114_v16 = vld [vmem:[%s9958_s1 + $0x368] ss:$16 sps:$4 sm:$0xff]  }
 0x738   :  { %2191 = vmatprep.subr.bf16.mxu0 %v8096_v47  ;;  %2273 = vmatprep.subr.bf16.mxu1 %v8102_v4  ;;  %11264 = vst [vmem:[#allocation39_spill] sm:$0xff] %v8108_v15  ;;  %11265 = vst [vmem:[#allocation40_spill] sm:$0xff] %v8114_v16  ;;  %v8120_v47 = vld [vmem:[%s9958_s1 + $0x384] ss:$16 sps:$4 sm:$0xff]   ;;  %v8126_v4 = vld [vmem:[%s9958_s1 + $0x38c] ss:$16 sps:$4 sm:$0xff]  }
 0x739   :  { %11266 = vst [vmem:[#allocation41_spill] sm:$0xff] %v8120_v47  ;;  %11267 = vst [vmem:[#allocation42_spill] sm:$0xff] %v8126_v4 }
 0x73b   :  { %2192 = vmatpush1.bf16.msra.mxu0 %v8108_v15  ;;  %2274 = vmatpush1.bf16.msra.mxu1 %v8114_v16  ;;  %v8132_v15 = vld [vmem:[%s9958_s1 + $0x380] ss:$16 sps:$4 sm:$0xff]   ;;  %v8138_v16 = vld [vmem:[%s9958_s1 + $0x388] ss:$16 sps:$4 sm:$0xff]  }
 0x73c   :  { %2193 = vmatprep.subr.bf16.mxu0 %v8120_v47  ;;  %2275 = vmatprep.subr.bf16.mxu1 %v8126_v4  ;;  %11268 = vst [vmem:[#allocation43_spill] sm:$0xff] %v8132_v15  ;;  %11269 = vst [vmem:[#allocation44_spill] sm:$0xff] %v8138_v16  ;;  %v8144_v47 = vld [vmem:[%s9958_s1 + $0x3a4] ss:$16 sps:$4 sm:$0xff]   ;;  %v8150_v4 = vld [vmem:[%s9958_s1 + $0x3ac] ss:$16 sps:$4 sm:$0xff]  }
 0x73d   :  { %11270 = vst [vmem:[#allocation45_spill] sm:$0xff] %v8144_v47  ;;  %11271 = vst [vmem:[#allocation46_spill] sm:$0xff] %v8150_v4 }
 0x73f   :  { %2194 = vmatpush1.bf16.msra.mxu0 %v8132_v15  ;;  %2276 = vmatpush1.bf16.msra.mxu1 %v8138_v16  ;;  %v8156_v15 = vld [vmem:[%s9958_s1 + $0x3a0] ss:$16 sps:$4 sm:$0xff]   ;;  %v8162_v16 = vld [vmem:[%s9958_s1 + $0x3a8] ss:$16 sps:$4 sm:$0xff]  }
 0x740   :  { %2195 = vmatprep.subr.bf16.mxu0 %v8144_v47  ;;  %2277 = vmatprep.subr.bf16.mxu1 %v8150_v4  ;;  %11272 = vst [vmem:[#allocation47_spill] sm:$0xff] %v8156_v15  ;;  %11273 = vst [vmem:[#allocation48_spill] sm:$0xff] %v8162_v16  ;;  %v8168_v47 = vld [vmem:[%s9958_s1 + $0x3c4] ss:$16 sps:$4 sm:$0xff]   ;;  %v8174_v4 = vld [vmem:[%s9958_s1 + $0x3cc] ss:$16 sps:$4 sm:$0xff]  }
 0x741   :  { %11274 = vst [vmem:[#allocation50_spill] sm:$0xff] %v8168_v47  ;;  %11275 = vst [vmem:[#allocation51_spill] sm:$0xff] %v8174_v4 }
 0x743   :  { %2196 = vmatpush1.bf16.msra.mxu0 %v8156_v15  ;;  %2278 = vmatpush1.bf16.msra.mxu1 %v8162_v16  ;;  %v8180_v15 = vld [vmem:[%s9958_s1 + $0x3c0] ss:$16 sps:$4 sm:$0xff]   ;;  %v8186_v16 = vld [vmem:[%s9958_s1 + $0x3c8] ss:$16 sps:$4 sm:$0xff]  }
 0x744   :  { %2197 = vmatprep.subr.bf16.mxu0 %v8168_v47  ;;  %2279 = vmatprep.subr.bf16.mxu1 %v8174_v4  ;;  %11276 = vst [vmem:[#allocation52_spill] sm:$0xff] %v8180_v15  ;;  %11277 = vst [vmem:[#allocation53_spill] sm:$0xff] %v8186_v16  ;;  %v8192_v47 = vld [vmem:[%s9958_s1 + $0x3e4] ss:$16 sps:$4 sm:$0xff]   ;;  %v8198_v4 = vld [vmem:[%s9958_s1 + $0x3ec] ss:$16 sps:$4 sm:$0xff]  }
 0x745   :  { %11278 = vst [vmem:[#allocation54_spill] sm:$0xff] %v8192_v47  ;;  %11279 = vst [vmem:[#allocation55_spill] sm:$0xff] %v8198_v4 }
 0x747   :  { %2198 = vmatpush1.bf16.msra.mxu0 %v8180_v15  ;;  %2280 = vmatpush1.bf16.msra.mxu1 %v8186_v16  ;;  %v8204_v15 = vld [vmem:[%s9958_s1 + $0x3e0] ss:$16 sps:$4 sm:$0xff]   ;;  %v8210_v16 = vld [vmem:[%s9958_s1 + $0x3e8] ss:$16 sps:$4 sm:$0xff]  }
 0x748   :  { %2199 = vmatprep.subr.bf16.mxu0 %v8192_v47  ;;  %2281 = vmatprep.subr.bf16.mxu1 %v8198_v4  ;;  %11280 = vst [vmem:[#allocation56_spill] sm:$0xff] %v8204_v15  ;;  %11281 = vst [vmem:[#allocation57_spill] sm:$0xff] %v8210_v16  ;;  %v2126_v47 = vpack.c.bf16 %v7881_v27, %v7881_v27  ;;  %v11309_v27 = vld [vmem:[#allocation20_spill] sm:$0xff] }
 0x74b   :  { %2200 = vmatpush1.bf16.msra.mxu0 %v8204_v15  ;;  %2282 = vmatpush1.bf16.msra.mxu1 %v8210_v16 }
 0x74c   :  { %2346 = vmatprep.subr.bf16.mxu0 %v11178_v56  ;;  %2428 = vmatprep.subr.bf16.mxu1 %v11179_v22  ;;  %v11282_v56 = vld [vmem:[#allocation69_spill] sm:$0xff]  ;;  %v11283_v22 = vld [vmem:[#allocation70_spill] sm:$0xff] }
 0x74e   :  { %2202 = vmatmul.mubr.bf16.vlgmr.msra.gmra.mrb[24].mxu0 %v2126_v47  ;;  %2284 = vmatmul.mubr.bf16.vlgmr.msra.gmra.mrb[24].mxu1 %v2126_v47  ;;  %v11310_v47 = vld [vmem:[#allocation86_spill] sm:$0xff] }
 0x74f   :  { %2347 = vmatpush1.bf16.msra.mxu0 %v11180_v57  ;;  %2429 = vmatpush1.bf16.msra.mxu1 %v11181_v63  ;;  %v11284_v57 = vld [vmem:[#allocation71_spill] sm:$0xff] }
 0x750   :  { %2348 = vmatprep.subr.bf16.mxu0 %v11182_v0  ;;  %2430 = vmatprep.subr.bf16.mxu1 %v11183_v1  ;;  %v11285_v63 = vld [vmem:[#allocation83_spill] sm:$0xff]  ;;  %v11286_v0 = vld [vmem:[#allocation84_spill] sm:$0xff]  ;;  %v11287_v1 = vld [vmem:[#allocation85_spill] sm:$0xff] }
 0x753   :  { %2349 = vmatpush1.bf16.msra.mxu0 %v11184_v17  ;;  %2431 = vmatpush1.bf16.msra.mxu1 %v11185_v23  ;;  %v11288_v17 = vld [vmem:[#allocation60_spill] sm:$0xff]  ;;  %v11289_v23 = vld [vmem:[#allocation61_spill] sm:$0xff] }
 0x754   :  { %2350 = vmatprep.subr.bf16.mxu0 %v11186_v3  ;;  %2432 = vmatprep.subr.bf16.mxu1 %v11187_v8  ;;  %v11290_v3 = vld [vmem:[#allocation62_spill] sm:$0xff]  ;;  %v11291_v8 = vld [vmem:[#allocation63_spill] sm:$0xff] }
 0x757   :  { %2351 = vmatpush1.bf16.msra.mxu0 %v11188_v61  ;;  %2433 = vmatpush1.bf16.msra.mxu1 %v11189_v2  ;;  %v11292_v61 = vld [vmem:[#allocation64_spill] sm:$0xff]  ;;  %v11293_v2 = vld [vmem:[#allocation74_spill] sm:$0xff] }
 0x758   :  { %2352 = vmatprep.subr.bf16.mxu0 %v11190_v28  ;;  %2434 = vmatprep.subr.bf16.mxu1 %v11191_v9  ;;  %v11294_v28 = vld [vmem:[#allocation75_spill] sm:$0xff]  ;;  %v11295_v9 = vld [vmem:[#allocation76_spill] sm:$0xff] }
 0x75b   :  { %2353 = vmatpush1.bf16.msra.mxu0 %v11192_v11  ;;  %2435 = vmatpush1.bf16.msra.mxu1 %v11193_v12  ;;  %v11296_v11 = vld [vmem:[#allocation77_spill] sm:$0xff]  ;;  %v11297_v12 = vld [vmem:[#allocation78_spill] sm:$0xff] }
 0x75c   :  { %2354 = vmatprep.subr.bf16.mxu0 %v11194_v13  ;;  %2436 = vmatprep.subr.bf16.mxu1 %v11195_v14  ;;  %v11298_v13 = vld [vmem:[#allocation79_spill] sm:$0xff]  ;;  %v11299_v14 = vld [vmem:[#allocation80_spill] sm:$0xff] }
 0x75f   :  { %2355 = vmatpush1.bf16.msra.mxu0 %v11196_v45  ;;  %2437 = vmatpush1.bf16.msra.mxu1 %v11197_v49  ;;  %v11300_v45 = vld [vmem:[#allocation81_spill] sm:$0xff]  ;;  %v11301_v49 = vld [vmem:[#allocation82_spill] sm:$0xff] }
 0x760   :  { %2356 = vmatprep.subr.bf16.mxu0 %v11198_v50  ;;  %2438 = vmatprep.subr.bf16.mxu1 %v11199_v62  ;;  %v11302_v50 = vld [vmem:[#allocation13_spill] sm:$0xff]  ;;  %v11303_v62 = vld [vmem:[#allocation14_spill] sm:$0xff] }
 0x763   :  { %2357 = vmatpush1.bf16.msra.mxu0 %v11200_v41  ;;  %2439 = vmatpush1.bf16.msra.mxu1 %v11201_v24  ;;  %v11304_v41 = vld [vmem:[#allocation15_spill] sm:$0xff]  ;;  %v11305_v24 = vld [vmem:[#allocation16_spill] sm:$0xff] }
 0x764   :  { %2358 = vmatprep.subr.bf16.mxu0 %v11202_v30  ;;  %2440 = vmatprep.subr.bf16.mxu1 %v11203_v20  ;;  %v11306_v30 = vld [vmem:[#allocation17_spill] sm:$0xff]  ;;  %v11307_v20 = vld [vmem:[#allocation18_spill] sm:$0xff] }
 0x767   :  { %2359 = vmatpush1.bf16.msra.mxu0 %v11204_v19  ;;  %2441 = vmatpush1.bf16.msra.mxu1 %v11282_v56  ;;  %v11308_v19 = vld [vmem:[#allocation19_spill] sm:$0xff] }
 0x768   :  { %2360 = vmatprep.subr.bf16.mxu0 %v11283_v22  ;;  %2442 = vmatprep.subr.bf16.mxu1 %v11284_v57  ;;  %v11311_v56 = vld [vmem:[#allocation87_spill] sm:$0xff]  ;;  %v11312_v22 = vld [vmem:[#allocation88_spill] sm:$0xff]  ;;  %v11313_v57 = vld [vmem:[#allocation65_spill] sm:$0xff] }
 0x76b   :  { %2361 = vmatpush1.bf16.msra.mxu0 %v11285_v63  ;;  %2443 = vmatpush1.bf16.msra.mxu1 %v11286_v0  ;;  %v11314_v63 = vld [vmem:[#allocation72_spill] sm:$0xff]  ;;  %v11315_v0 = vld [vmem:[#allocation73_spill] sm:$0xff] }
 0x76c   :  { %2362 = vmatprep.subr.bf16.mxu0 %v11287_v1  ;;  %2444 = vmatprep.subr.bf16.mxu1 %v11288_v17  ;;  %v11316_v1 = vld [vmem:[#allocation21_spill] sm:$0xff]  ;;  %v11317_v17 = vld [vmem:[#allocation22_spill] sm:$0xff] }
 0x76f   :  { %2363 = vmatpush1.bf16.msra.mxu0 %v11289_v23  ;;  %2445 = vmatpush1.bf16.msra.mxu1 %v11290_v3  ;;  %v11318_v23 = vld [vmem:[#allocation23_spill] sm:$0xff]  ;;  %v11319_v3 = vld [vmem:[#allocation24_spill] sm:$0xff] }
 0x770   :  { %2364 = vmatprep.subr.bf16.mxu0 %v11291_v8  ;;  %2446 = vmatprep.subr.bf16.mxu1 %v11292_v61  ;;  %v11320_v8 = vld [vmem:[#allocation8_spill] sm:$0xff]  ;;  %v4188_v61 = vld [vmem:[%s9960_s3 + $0x18] sm:$0xf] }
 0x773   :  { %2365 = vmatpush1.bf16.msra.mxu0 %v11293_v2  ;;  %2447 = vmatpush1.bf16.msra.mxu1 %v11294_v28  ;;  %v11321_v2 = vld [vmem:[#allocation9_spill] sm:$0xff] }
 0x774   :  { %2366 = vmatprep.subr.bf16.mxu0 %v11295_v9  ;;  %2448 = vmatprep.subr.bf16.mxu1 %v11296_v11  ;;  %v2302_v28 = vrot.slane %v4188_v61, %v11321_v2  ;;  %v11322_v9 = vld [vmem:[#allocation10_spill] sm:$0xff] }
 0x775   :  { %v2310_v11 = vrot.slane %v4188_v61, %v11322_v9 }
 0x777   :  { %2367 = vmatpush1.bf16.msra.mxu0 %v11297_v12  ;;  %2449 = vmatpush1.bf16.msra.mxu1 %v11298_v13 }
 0x778   :  { %2368 = vmatprep.subr.bf16.mxu0 %v11299_v14  ;;  %2450 = vmatprep.subr.bf16.mxu1 %v11300_v45  ;;  %v11323_v14 = vld [vmem:[#allocation11_spill] sm:$0xff] }
 0x779   :  { %v2306_v45 = vrot.slane %v4188_v61, %v11323_v14 }
 0x77b   :  { %2369 = vmatpush1.bf16.msra.mxu0 %v11301_v49  ;;  %2451 = vmatpush1.bf16.msra.mxu1 %v11302_v50  ;;  %v11324_v49 = vld [vmem:[#allocation12_spill] sm:$0xff] }
 0x77c   :  { %2370 = vmatprep.subr.bf16.mxu0 %v11303_v62  ;;  %2452 = vmatprep.subr.bf16.mxu1 %v11304_v41  ;;  %v2314_v50 = vrot.slane %v4188_v61, %v11324_v49 }
 0x77f   :  { %2371 = vmatpush1.bf16.msra.mxu0 %v11305_v24  ;;  %2453 = vmatpush1.bf16.msra.mxu1 %v11306_v30 }
 0x780   :  { %2372 = vmatprep.subr.bf16.mxu0 %v11307_v20  ;;  %2454 = vmatprep.subr.bf16.mxu1 %v11308_v19 }
 0x783   :  { %2373 = vmatpush1.bf16.msra.mxu0 %v11309_v27  ;;  %2455 = vmatpush1.bf16.msra.mxu1 %v11310_v47 }
 0x784   :  { %2374 = vmatprep.subr.bf16.mxu0 %v11311_v56  ;;  %2456 = vmatprep.subr.bf16.mxu1 %v11312_v22 }
 0x787   :  { %2375 = vmatpush1.bf16.msra.mxu0 %v11313_v57  ;;  %2457 = vmatpush1.bf16.msra.mxu1 %v11314_v63 }
 0x788   :  { %2376 = vmatprep.subr.bf16.mxu0 %v11315_v0  ;;  %2458 = vmatprep.subr.bf16.mxu1 %v11316_v1 }
 0x78b   :  { %2377 = vmatpush1.bf16.msra.mxu0 %v11317_v17  ;;  %2459 = vmatpush1.bf16.msra.mxu1 %v11318_v23 }
 0x78c   :  { %2387 = vmatprep.subr.bf16.mxu0 %v11319_v3  ;;  %2469 = vmatprep.subr.bf16.mxu1 %v11320_v8 }
 0x821   :  { %v2203_v12 = vpop.f32.mrb[24].mxu0  ;;  %v2285_v13 = vpop.f32.mrb[24].mxu1 }
 0x822   :  { %v2292_v62 = vsub.f32 %v2203_v12, %v7868_v18  ;;  %v2294_v41 = vsub.f32 %v2285_v13, %v7871_v10  ;;  %v2205_v24 = vpop.f32.mrb[25].mxu0  ;;  %v2287_v30 = vpop.f32.mrb[25].mxu1 }
 0x823   :  { %v2293_v20 = vsub.f32 %v2205_v24, %v7874_v29  ;;  %v2295_v19 = vsub.f32 %v2287_v30, %v7877_v54  ;;  %v2207_v27 = vpop.f32.mrb[26].mxu0  ;;  %v2289_v47 = vpop.f32.mrb[26].mxu1  ;;  %v11342_v30 = vld [vmem:[#allocation40_spill] sm:$0xff] }
 0x824   :  { %v2319_v56 = vadd.f32 %v2302_v28, %v2292_v62  ;;  %v2321_v22 = vadd.f32 %v2310_v11, %v2294_v41  ;;  %v2208_v9 = vpop.f32.mrb[27].mxu0  ;;  %v2290_v2 = vpop.f32.mrb[27].mxu1  ;;  %v11340_v62 = vld [vmem:[#allocation38_spill] sm:$0xff]  ;;  %v11341_v41 = vld [vmem:[#allocation39_spill] sm:$0xff]  ;;  %v11346_v47 = vld [vmem:[#allocation44_spill] sm:$0xff] }
 0x825   :  { %v2320_v8 = vadd.f32 %v2306_v45, %v2293_v20  ;;  %v2322_v14 = vadd.f32 %v2314_v50, %v2295_v19  ;;  %v11337_v45 = vld [vmem:[#allocation35_spill] sm:$0xff]  ;;  %v11339_v50 = vld [vmem:[#allocation37_spill] sm:$0xff]  ;;  %v11344_v19 = vld [vmem:[#allocation42_spill] sm:$0xff] }
 0x826   :  { %v2323_v3 = vmul.f32 0.05, %v2319_v56  ;;  %v2325_v61 = vmul.f32 0.05, %v2321_v22  ;;  %v11343_v20 = vld [vmem:[#allocation41_spill] sm:$0xff]  ;;  %v11345_v27 = vld [vmem:[#allocation43_spill] sm:$0xff] }
 0x827   :  { %v2324_v49 = vmul.f32 0.05, %v2320_v8  ;;  %v2326_v12 = vmul.f32 0.05, %v2322_v14  ;;  %v11336_v14 = vld [vmem:[#allocation34_spill] sm:$0xff]  ;;  %v11347_v56 = vld [vmem:[#allocation45_spill] sm:$0xff] }
 0x828   :  { %v8293_v13 = vadd.f32 %v2323_v3, %v7868_v18  ;;  %v8296_v23 = vadd.f32 %v2325_v61, %v7871_v10  ;;  %v11335_v3 = vld [vmem:[#allocation33_spill] sm:$0xff]  ;;  %v11348_v22 = vld [vmem:[#allocation46_spill] sm:$0xff]  ;;  %v11349_v61 = vld [vmem:[#allocation47_spill] sm:$0xff] }
 0x829   :  { %v8299_v24 = vadd.f32 %v2324_v49, %v7874_v29  ;;  %v8302_v28 = vadd.f32 %v2326_v12, %v7877_v54  ;;  %v11334_v54 = vld [vmem:[#allocation32_spill] sm:$0xff] }
 0x82a   :  { %v2331_v2 = vmax.f32 %v8293_v13, 0.0  ;;  %v8306_v9 = vmax.f32 %v8296_v23, 0.0  ;;  %v11338_v49 = vld [vmem:[#allocation36_spill] sm:$0xff] }
 0x82b   :  { %v2332_v8 = vmax.f32 %v8299_v24, 0.0  ;;  %v2334_v11 = vmax.f32 %v8302_v28, 0.0  ;;  %v11350_v12 = vld [vmem:[#allocation48_spill] sm:$0xff] }
 0x82c   :  { %2338 = vst [vmem:[#allocation4 + $0xe0] sm:$0xff] %v2331_v2  ;;  %2340 = vst [vmem:[#allocation4 + $0xf0] sm:$0xff] %v8306_v9  ;;  %v2342_v18 = vpack.c.bf16 %v2331_v2, %v2331_v2  ;;  %v11351_v2 = vld [vmem:[#allocation50_spill] sm:$0xff] }
 0x82d   :  { %2339 = vst [vmem:[#allocation4 + $0xe8] sm:$0xff] %v2332_v8  ;;  %v2343_v10 = vpack.c.bf16 %v2332_v8, %v2332_v8  ;;  %2341 = vst [vmem:[#allocation4 + $0xf8] sm:$0xff] %v2334_v11  ;;  %v2345_v29 = vpack.c.bf16 %v2334_v11, %v2334_v11  ;;  %v11352_v8 = vld [vmem:[#allocation51_spill] sm:$0xff]  ;;  %v11353_v11 = vld [vmem:[#allocation52_spill] sm:$0xff] }
 0x82f   :  { %2378 = vmatprep.mubr.bf16.mxu0 %v2343_v10  ;;  %2460 = vmatprep.mubr.bf16.mxu1 %v2343_v10  ;;  %v11354_v10 = vld [vmem:[#allocation53_spill] sm:$0xff] }
 0x830   :  { %2379 = vmatmul.mubr.bf16.vlgmr.msra.gmra.mrb[28].mxu0 %v2342_v18  ;;  %2461 = vmatmul.mubr.bf16.vlgmr.msra.gmra.mrb[28].mxu1 %v2342_v18  ;;  %v11355_v18 = vld [vmem:[#allocation54_spill] sm:$0xff] }
 0x831   :  { %2388 = vmatpush1.bf16.msra.mxu0 %v7644_v6  ;;  %2470 = vmatpush1.bf16.msra.mxu1 %v7650_v46  ;;  %v11325_v6 = vld [vmem:[#allocation7_spill] sm:$0xff]  ;;  %v11326_v46 = vld [vmem:[#allocation49_spill] sm:$0xff] }
 0x832   :  { %2419 = vmatprep.mubr.bf16.mxu0 %v2345_v29  ;;  %2501 = vmatprep.mubr.bf16.mxu1 %v2345_v29  ;;  %v2344_v29 = vpack.c.bf16 %v8306_v9, %v8306_v9  ;;  %v8390_v9 = vld [vmem:[%s9958_s1] ss:$16 sps:$4 sm:$0xff]  }
 0x833   :  { %2389 = vmatprep.subr.bf16.mxu0 %v7656_v42  ;;  %2471 = vmatprep.subr.bf16.mxu1 %v7662_v43  ;;  %v11327_v42 = vld [vmem:[#allocation25_spill] sm:$0xff]  ;;  %v11328_v43 = vld [vmem:[#allocation26_spill] sm:$0xff]  ;;  %11358 = vst [vmem:[#allocation66_spill] sm:$0xff] %v8390_v9 }
 0x835   :  { %2390 = vmatpush1.bf16.msra.mxu0 %v7668_v5  ;;  %2472 = vmatpush1.bf16.msra.mxu1 %v7674_v26  ;;  %v11329_v5 = vld [vmem:[#allocation27_spill] sm:$0xff]  ;;  %v11330_v26 = vld [vmem:[#allocation28_spill] sm:$0xff] }
 0x836   :  { %2391 = vmatprep.subr.bf16.mxu0 %v7680_v25  ;;  %2473 = vmatprep.subr.bf16.mxu1 %v7686_v60  ;;  %v11331_v25 = vld [vmem:[#allocation29_spill] sm:$0xff]  ;;  %v11332_v60 = vld [vmem:[#allocation30_spill] sm:$0xff] }
 0x839   :  { %2392 = vmatpush1.bf16.msra.mxu0 %v7692_v44  ;;  %2474 = vmatpush1.bf16.msra.mxu1 %v7898_v7  ;;  %v11333_v44 = vld [vmem:[#allocation31_spill] sm:$0xff] }
 0x83a   :  { %2393 = vmatprep.subr.bf16.mxu0 %v7904_v21  ;;  %2475 = vmatprep.subr.bf16.mxu1 %v7910_v58 }
 0x83d   :  { %2394 = vmatpush1.bf16.msra.mxu0 %v7916_v48  ;;  %2476 = vmatpush1.bf16.msra.mxu1 %v7922_v31 }
 0x83e   :  { %2395 = vmatprep.subr.bf16.mxu0 %v7928_v32  ;;  %2477 = vmatprep.subr.bf16.mxu1 %v7934_v55 }
 0x841   :  { %2396 = vmatpush1.bf16.msra.mxu0 %v7940_v33  ;;  %2478 = vmatpush1.bf16.msra.mxu1 %v7946_v34 }
 0x842   :  { %2397 = vmatprep.subr.bf16.mxu0 %v7952_v35  ;;  %2479 = vmatprep.subr.bf16.mxu1 %v7958_v36 }
 0x845   :  { %2398 = vmatpush1.bf16.msra.mxu0 %v7964_v37  ;;  %2480 = vmatpush1.bf16.msra.mxu1 %v7970_v38 }
 0x846   :  { %2399 = vmatprep.subr.bf16.mxu0 %v7976_v39  ;;  %2481 = vmatprep.subr.bf16.mxu1 %v7982_v40 }
 0x849   :  { %2400 = vmatpush1.bf16.msra.mxu0 %v7988_v59  ;;  %2482 = vmatpush1.bf16.msra.mxu1 %v7994_v52 }
 0x84a   :  { %2401 = vmatprep.subr.bf16.mxu0 %v8000_v51  ;;  %2483 = vmatprep.subr.bf16.mxu1 %v8006_v53 }
 0x84d   :  { %2402 = vmatpush1.bf16.msra.mxu0 %v11325_v6  ;;  %2484 = vmatpush1.bf16.msra.mxu1 %v11326_v46 }
 0x84e   :  { %2403 = vmatprep.subr.bf16.mxu0 %v11327_v42  ;;  %2485 = vmatprep.subr.bf16.mxu1 %v11328_v43 }
 0x851   :  { %2404 = vmatpush1.bf16.msra.mxu0 %v11329_v5  ;;  %2486 = vmatpush1.bf16.msra.mxu1 %v11330_v26 }
 0x852   :  { %2405 = vmatprep.subr.bf16.mxu0 %v11331_v25  ;;  %2487 = vmatprep.subr.bf16.mxu1 %v11332_v60 }
 0x855   :  { %2406 = vmatpush1.bf16.msra.mxu0 %v11333_v44  ;;  %2488 = vmatpush1.bf16.msra.mxu1 %v11334_v54 }
 0x856   :  { %2407 = vmatprep.subr.bf16.mxu0 %v11335_v3  ;;  %2489 = vmatprep.subr.bf16.mxu1 %v11336_v14 }
 0x859   :  { %2408 = vmatpush1.bf16.msra.mxu0 %v11337_v45  ;;  %2490 = vmatpush1.bf16.msra.mxu1 %v11338_v49 }
 0x85a   :  { %2409 = vmatprep.subr.bf16.mxu0 %v11339_v50  ;;  %2491 = vmatprep.subr.bf16.mxu1 %v11340_v62 }
 0x85d   :  { %2410 = vmatpush1.bf16.msra.mxu0 %v11341_v41  ;;  %2492 = vmatpush1.bf16.msra.mxu1 %v11342_v30 }
 0x85e   :  { %2411 = vmatprep.subr.bf16.mxu0 %v11343_v20  ;;  %2493 = vmatprep.subr.bf16.mxu1 %v11344_v19 }
 0x861   :  { %2412 = vmatpush1.bf16.msra.mxu0 %v11345_v27  ;;  %2494 = vmatpush1.bf16.msra.mxu1 %v11346_v47 }
 0x862   :  { %2413 = vmatprep.subr.bf16.mxu0 %v11347_v56  ;;  %2495 = vmatprep.subr.bf16.mxu1 %v11348_v22 }
 0x865   :  { %2414 = vmatpush1.bf16.msra.mxu0 %v11349_v61  ;;  %2496 = vmatpush1.bf16.msra.mxu1 %v11350_v12 }
 0x866   :  { %2415 = vmatprep.subr.bf16.mxu0 %v11351_v2  ;;  %2497 = vmatprep.subr.bf16.mxu1 %v11352_v8  ;;  %v8378_v2 = vld [vmem:[%s9958_s1 + $0x4] ss:$16 sps:$4 sm:$0xff]  }
 0x867   :  { %11356 = vst [vmem:[#allocation58_spill] sm:$0xff] %v8378_v2 }
 0x869   :  { %2416 = vmatpush1.bf16.msra.mxu0 %v11353_v11  ;;  %2498 = vmatpush1.bf16.msra.mxu1 %v11354_v10  ;;  %v11419_v10 = vld [vmem:[#allocation11_spill] sm:$0xff]  ;;  %v11420_v11 = vld [vmem:[#allocation12_spill] sm:$0xff] }
 0x86a   :  { %2417 = vmatprep.subr.bf16.mxu0 %v11355_v18  ;;  %2499 = vmatprep.subr.bf16.mxu1 %v8198_v4  ;;  %v8384_v18 = vld [vmem:[%s9958_s1 + $0xc] ss:$16 sps:$4 sm:$0xff]  }
 0x86b   :  { %11357 = vst [vmem:[#allocation59_spill] sm:$0xff] %v8384_v18 }
 0x86d   :  { %2418 = vmatpush1.bf16.msra.mxu0 %v8204_v15  ;;  %2500 = vmatpush1.bf16.msra.mxu1 %v8210_v16  ;;  %v11417_v16 = vld [vmem:[#allocation9_spill] sm:$0xff]  ;;  %v11418_v15 = vld [vmem:[#allocation10_spill] sm:$0xff] }
 0x86e   :  { %2564 = vmatprep.subr.bf16.mxu0 %v8378_v2  ;;  %2646 = vmatprep.subr.bf16.mxu1 %v8384_v18  ;;  %v8396_v2 = vld [vmem:[%s9958_s1 + $0x8] ss:$16 sps:$4 sm:$0xff]   ;;  %v8402_v18 = vld [vmem:[%s9958_s1 + $0x24] ss:$16 sps:$4 sm:$0xff]  }
 0x86f   :  { %11359 = vst [vmem:[#allocation67_spill] sm:$0xff] %v8396_v2  ;;  %11360 = vst [vmem:[#allocation68_spill] sm:$0xff] %v8402_v18 }
 0x870   :  { %2420 = vmatmul.mubr.bf16.vlgmr.msra.gmra.mrb[28].mxu0 %v2344_v29  ;;  %2502 = vmatmul.mubr.bf16.vlgmr.msra.gmra.mrb[28].mxu1 %v2344_v29  ;;  %v8408_v29 = vld [vmem:[%s9958_s1 + $0x2c] ss:$16 sps:$4 sm:$0xff]  }
 0x871   :  { %2565 = vmatpush1.bf16.msra.mxu0 %v8390_v9  ;;  %2647 = vmatpush1.bf16.msra.mxu1 %v8396_v2  ;;  %11361 = vst [vmem:[#allocation69_spill] sm:$0xff] %v8408_v29  ;;  %v8414_v9 = vld [vmem:[%s9958_s1 + $0x20] ss:$16 sps:$4 sm:$0xff]   ;;  %v8420_v2 = vld [vmem:[%s9958_s1 + $0x28] ss:$16 sps:$4 sm:$0xff]  }
 0x872   :  { %2566 = vmatprep.subr.bf16.mxu0 %v8402_v18  ;;  %2648 = vmatprep.subr.bf16.mxu1 %v8408_v29  ;;  %11362 = vst [vmem:[#allocation70_spill] sm:$0xff] %v8414_v9  ;;  %11363 = vst [vmem:[#allocation71_spill] sm:$0xff] %v8420_v2  ;;  %v8426_v18 = vld [vmem:[%s9958_s1 + $0x44] ss:$16 sps:$4 sm:$0xff]   ;;  %v8432_v29 = vld [vmem:[%s9958_s1 + $0x4c] ss:$16 sps:$4 sm:$0xff]  }
 0x873   :  { %11364 = vst [vmem:[#allocation83_spill] sm:$0xff] %v8426_v18  ;;  %11365 = vst [vmem:[#allocation84_spill] sm:$0xff] %v8432_v29 }
 0x875   :  { %2567 = vmatpush1.bf16.msra.mxu0 %v8414_v9  ;;  %2649 = vmatpush1.bf16.msra.mxu1 %v8420_v2  ;;  %v8438_v9 = vld [vmem:[%s9958_s1 + $0x40] ss:$16 sps:$4 sm:$0xff]   ;;  %v8444_v2 = vld [vmem:[%s9958_s1 + $0x48] ss:$16 sps:$4 sm:$0xff]  }
 0x876   :  { %2568 = vmatprep.subr.bf16.mxu0 %v8426_v18  ;;  %2650 = vmatprep.subr.bf16.mxu1 %v8432_v29  ;;  %11366 = vst [vmem:[#allocation85_spill] sm:$0xff] %v8438_v9  ;;  %11367 = vst [vmem:[#allocation60_spill] sm:$0xff] %v8444_v2  ;;  %v8450_v18 = vld [vmem:[%s9958_s1 + $0x64] ss:$16 sps:$4 sm:$0xff]   ;;  %v8456_v29 = vld [vmem:[%s9958_s1 + $0x6c] ss:$16 sps:$4 sm:$0xff]  }
 0x877   :  { %11368 = vst [vmem:[#allocation61_spill] sm:$0xff] %v8450_v18  ;;  %11369 = vst [vmem:[#allocation62_spill] sm:$0xff] %v8456_v29 }
 0x879   :  { %2569 = vmatpush1.bf16.msra.mxu0 %v8438_v9  ;;  %2651 = vmatpush1.bf16.msra.mxu1 %v8444_v2  ;;  %v8462_v9 = vld [vmem:[%s9958_s1 + $0x60] ss:$16 sps:$4 sm:$0xff]   ;;  %v8468_v2 = vld [vmem:[%s9958_s1 + $0x68] ss:$16 sps:$4 sm:$0xff]  }
 0x87a   :  { %2570 = vmatprep.subr.bf16.mxu0 %v8450_v18  ;;  %2652 = vmatprep.subr.bf16.mxu1 %v8456_v29  ;;  %11370 = vst [vmem:[#allocation63_spill] sm:$0xff] %v8462_v9  ;;  %11371 = vst [vmem:[#allocation64_spill] sm:$0xff] %v8468_v2  ;;  %v8474_v18 = vld [vmem:[%s9958_s1 + $0x84] ss:$16 sps:$4 sm:$0xff]   ;;  %v8480_v29 = vld [vmem:[%s9958_s1 + $0x8c] ss:$16 sps:$4 sm:$0xff]  }
 0x87b   :  { %11372 = vst [vmem:[#allocation74_spill] sm:$0xff] %v8474_v18  ;;  %11373 = vst [vmem:[#allocation75_spill] sm:$0xff] %v8480_v29 }
 0x87d   :  { %2571 = vmatpush1.bf16.msra.mxu0 %v8462_v9  ;;  %2653 = vmatpush1.bf16.msra.mxu1 %v8468_v2  ;;  %v8486_v9 = vld [vmem:[%s9958_s1 + $0x80] ss:$16 sps:$4 sm:$0xff]   ;;  %v8492_v2 = vld [vmem:[%s9958_s1 + $0x88] ss:$16 sps:$4 sm:$0xff]  }
 0x87e   :  { %2572 = vmatprep.subr.bf16.mxu0 %v8474_v18  ;;  %2654 = vmatprep.subr.bf16.mxu1 %v8480_v29  ;;  %11374 = vst [vmem:[#allocation76_spill] sm:$0xff] %v8486_v9  ;;  %11375 = vst [vmem:[#allocation77_spill] sm:$0xff] %v8492_v2  ;;  %v8498_v18 = vld [vmem:[%s9958_s1 + $0xa4] ss:$16 sps:$4 sm:$0xff]   ;;  %v8504_v29 = vld [vmem:[%s9958_s1 + $0xac] ss:$16 sps:$4 sm:$0xff]  }
 0x87f   :  { %11376 = vst [vmem:[#allocation78_spill] sm:$0xff] %v8498_v18  ;;  %11377 = vst [vmem:[#allocation79_spill] sm:$0xff] %v8504_v29 }
 0x881   :  { %2573 = vmatpush1.bf16.msra.mxu0 %v8486_v9  ;;  %2655 = vmatpush1.bf16.msra.mxu1 %v8492_v2  ;;  %v8510_v9 = vld [vmem:[%s9958_s1 + $0xa0] ss:$16 sps:$4 sm:$0xff]   ;;  %v8516_v2 = vld [vmem:[%s9958_s1 + $0xa8] ss:$16 sps:$4 sm:$0xff]  }
 0x882   :  { %2574 = vmatprep.subr.bf16.mxu0 %v8498_v18  ;;  %2656 = vmatprep.subr.bf16.mxu1 %v8504_v29  ;;  %11378 = vst [vmem:[#allocation80_spill] sm:$0xff] %v8510_v9  ;;  %11379 = vst [vmem:[#allocation81_spill] sm:$0xff] %v8516_v2  ;;  %v8522_v18 = vld [vmem:[%s9958_s1 + $0xc4] ss:$16 sps:$4 sm:$0xff]   ;;  %v8528_v29 = vld [vmem:[%s9958_s1 + $0xcc] ss:$16 sps:$4 sm:$0xff]  }
 0x883   :  { %11380 = vst [vmem:[#allocation82_spill] sm:$0xff] %v8522_v18  ;;  %11381 = vst [vmem:[#allocation13_spill] sm:$0xff] %v8528_v29 }
 0x885   :  { %2575 = vmatpush1.bf16.msra.mxu0 %v8510_v9  ;;  %2657 = vmatpush1.bf16.msra.mxu1 %v8516_v2  ;;  %v8534_v9 = vld [vmem:[%s9958_s1 + $0xc0] ss:$16 sps:$4 sm:$0xff]   ;;  %v8540_v2 = vld [vmem:[%s9958_s1 + $0xc8] ss:$16 sps:$4 sm:$0xff]  }
 0x886   :  { %2576 = vmatprep.subr.bf16.mxu0 %v8522_v18  ;;  %2658 = vmatprep.subr.bf16.mxu1 %v8528_v29  ;;  %11382 = vst [vmem:[#allocation14_spill] sm:$0xff] %v8534_v9  ;;  %11383 = vst [vmem:[#allocation15_spill] sm:$0xff] %v8540_v2  ;;  %v8546_v18 = vld [vmem:[%s9958_s1 + $0xe4] ss:$16 sps:$4 sm:$0xff]   ;;  %v8552_v29 = vld [vmem:[%s9958_s1 + $0xec] ss:$16 sps:$4 sm:$0xff]  }
 0x887   :  { %11384 = vst [vmem:[#allocation16_spill] sm:$0xff] %v8546_v18  ;;  %11385 = vst [vmem:[#allocation17_spill] sm:$0xff] %v8552_v29 }
 0x889   :  { %2577 = vmatpush1.bf16.msra.mxu0 %v8534_v9  ;;  %2659 = vmatpush1.bf16.msra.mxu1 %v8540_v2  ;;  %v8558_v9 = vld [vmem:[%s9958_s1 + $0xe0] ss:$16 sps:$4 sm:$0xff]   ;;  %v8564_v2 = vld [vmem:[%s9958_s1 + $0xe8] ss:$16 sps:$4 sm:$0xff]  }
 0x88a   :  { %2578 = vmatprep.subr.bf16.mxu0 %v8546_v18  ;;  %2660 = vmatprep.subr.bf16.mxu1 %v8552_v29  ;;  %11386 = vst [vmem:[#allocation18_spill] sm:$0xff] %v8558_v9  ;;  %11387 = vst [vmem:[#allocation19_spill] sm:$0xff] %v8564_v2  ;;  %v8570_v18 = vld [vmem:[%s9958_s1 + $0x104] ss:$16 sps:$4 sm:$0xff]   ;;  %v8576_v29 = vld [vmem:[%s9958_s1 + $0x10c] ss:$16 sps:$4 sm:$0xff]  }
 0x88b   :  { %11388 = vst [vmem:[#allocation20_spill] sm:$0xff] %v8570_v18  ;;  %11389 = vst [vmem:[#allocation86_spill] sm:$0xff] %v8576_v29 }
 0x88d   :  { %2579 = vmatpush1.bf16.msra.mxu0 %v8558_v9  ;;  %2661 = vmatpush1.bf16.msra.mxu1 %v8564_v2  ;;  %v8582_v9 = vld [vmem:[%s9958_s1 + $0x100] ss:$16 sps:$4 sm:$0xff]   ;;  %v8588_v2 = vld [vmem:[%s9958_s1 + $0x108] ss:$16 sps:$4 sm:$0xff]  }
 0x88e   :  { %2580 = vmatprep.subr.bf16.mxu0 %v8570_v18  ;;  %2662 = vmatprep.subr.bf16.mxu1 %v8576_v29  ;;  %11390 = vst [vmem:[#allocation87_spill] sm:$0xff] %v8582_v9  ;;  %11391 = vst [vmem:[#allocation88_spill] sm:$0xff] %v8588_v2  ;;  %v8594_v18 = vld [vmem:[%s9958_s1 + $0x124] ss:$16 sps:$4 sm:$0xff]   ;;  %v8600_v29 = vld [vmem:[%s9958_s1 + $0x12c] ss:$16 sps:$4 sm:$0xff]  }
 0x88f   :  { %11392 = vst [vmem:[#allocation65_spill] sm:$0xff] %v8594_v18  ;;  %11393 = vst [vmem:[#allocation72_spill] sm:$0xff] %v8600_v29 }
 0x891   :  { %2581 = vmatpush1.bf16.msra.mxu0 %v8582_v9  ;;  %2663 = vmatpush1.bf16.msra.mxu1 %v8588_v2  ;;  %v8606_v9 = vld [vmem:[%s9958_s1 + $0x120] ss:$16 sps:$4 sm:$0xff]   ;;  %v8612_v2 = vld [vmem:[%s9958_s1 + $0x128] ss:$16 sps:$4 sm:$0xff]  }
 0x892   :  { %2582 = vmatprep.subr.bf16.mxu0 %v8594_v18  ;;  %2664 = vmatprep.subr.bf16.mxu1 %v8600_v29  ;;  %11394 = vst [vmem:[#allocation73_spill] sm:$0xff] %v8606_v9  ;;  %11395 = vst [vmem:[#allocation21_spill] sm:$0xff] %v8612_v2  ;;  %v8618_v18 = vld [vmem:[%s9958_s1 + $0x144] ss:$16 sps:$4 sm:$0xff]   ;;  %v8624_v29 = vld [vmem:[%s9958_s1 + $0x14c] ss:$16 sps:$4 sm:$0xff]  }
 0x893   :  { %11396 = vst [vmem:[#allocation22_spill] sm:$0xff] %v8618_v18  ;;  %11397 = vst [vmem:[#allocation7_spill] sm:$0xff] %v8624_v29 }
 0x895   :  { %2583 = vmatpush1.bf16.msra.mxu0 %v8606_v9  ;;  %2665 = vmatpush1.bf16.msra.mxu1 %v8612_v2  ;;  %v8630_v9 = vld [vmem:[%s9958_s1 + $0x140] ss:$16 sps:$4 sm:$0xff]   ;;  %v8636_v2 = vld [vmem:[%s9958_s1 + $0x148] ss:$16 sps:$4 sm:$0xff]  }
 0x896   :  { %2584 = vmatprep.subr.bf16.mxu0 %v8618_v18  ;;  %2666 = vmatprep.subr.bf16.mxu1 %v8624_v29  ;;  %11398 = vst [vmem:[#allocation49_spill] sm:$0xff] %v8630_v9  ;;  %11399 = vst [vmem:[#allocation25_spill] sm:$0xff] %v8636_v2  ;;  %v8642_v18 = vld [vmem:[%s9958_s1 + $0x164] ss:$16 sps:$4 sm:$0xff]   ;;  %v8648_v29 = vld [vmem:[%s9958_s1 + $0x16c] ss:$16 sps:$4 sm:$0xff]  }
 0x897   :  { %11400 = vst [vmem:[#allocation26_spill] sm:$0xff] %v8642_v18  ;;  %11401 = vst [vmem:[#allocation27_spill] sm:$0xff] %v8648_v29 }
 0x899   :  { %2585 = vmatpush1.bf16.msra.mxu0 %v8630_v9  ;;  %2667 = vmatpush1.bf16.msra.mxu1 %v8636_v2  ;;  %v8654_v9 = vld [vmem:[%s9958_s1 + $0x160] ss:$16 sps:$4 sm:$0xff]   ;;  %v8660_v2 = vld [vmem:[%s9958_s1 + $0x168] ss:$16 sps:$4 sm:$0xff]  }
 0x89a   :  { %2586 = vmatprep.subr.bf16.mxu0 %v8642_v18  ;;  %2668 = vmatprep.subr.bf16.mxu1 %v8648_v29  ;;  %11402 = vst [vmem:[#allocation28_spill] sm:$0xff] %v8654_v9  ;;  %11403 = vst [vmem:[#allocation29_spill] sm:$0xff] %v8660_v2  ;;  %v8666_v18 = vld [vmem:[%s9958_s1 + $0x184] ss:$16 sps:$4 sm:$0xff]   ;;  %v8672_v29 = vld [vmem:[%s9958_s1 + $0x18c] ss:$16 sps:$4 sm:$0xff]  }
 0x89b   :  { %11404 = vst [vmem:[#allocation30_spill] sm:$0xff] %v8666_v18  ;;  %11405 = vst [vmem:[#allocation31_spill] sm:$0xff] %v8672_v29 }
 0x89d   :  { %2587 = vmatpush1.bf16.msra.mxu0 %v8654_v9  ;;  %2669 = vmatpush1.bf16.msra.mxu1 %v8660_v2  ;;  %v8678_v9 = vld [vmem:[%s9958_s1 + $0x180] ss:$16 sps:$4 sm:$0xff]   ;;  %v8684_v2 = vld [vmem:[%s9958_s1 + $0x188] ss:$16 sps:$4 sm:$0xff]  }
 0x89e   :  { %2588 = vmatprep.subr.bf16.mxu0 %v8666_v18  ;;  %2670 = vmatprep.subr.bf16.mxu1 %v8672_v29  ;;  %11406 = vst [vmem:[#allocation32_spill] sm:$0xff] %v8678_v9  ;;  %11407 = vst [vmem:[#allocation33_spill] sm:$0xff] %v8684_v2  ;;  %v8690_v18 = vld [vmem:[%s9958_s1 + $0x1a4] ss:$16 sps:$4 sm:$0xff]   ;;  %v8696_v29 = vld [vmem:[%s9958_s1 + $0x1ac] ss:$16 sps:$4 sm:$0xff]  }
 0x89f   :  { %11408 = vst [vmem:[#allocation34_spill] sm:$0xff] %v8690_v18  ;;  %11409 = vst [vmem:[#allocation35_spill] sm:$0xff] %v8696_v29 }
 0x8a1   :  { %2589 = vmatpush1.bf16.msra.mxu0 %v8678_v9  ;;  %2671 = vmatpush1.bf16.msra.mxu1 %v8684_v2  ;;  %v8702_v9 = vld [vmem:[%s9958_s1 + $0x1a0] ss:$16 sps:$4 sm:$0xff]   ;;  %v8708_v2 = vld [vmem:[%s9958_s1 + $0x1a8] ss:$16 sps:$4 sm:$0xff]  }
 0x8a2   :  { %2590 = vmatprep.subr.bf16.mxu0 %v8690_v18  ;;  %2672 = vmatprep.subr.bf16.mxu1 %v8696_v29  ;;  %11410 = vst [vmem:[#allocation36_spill] sm:$0xff] %v8702_v9  ;;  %11411 = vst [vmem:[#allocation37_spill] sm:$0xff] %v8708_v2  ;;  %v8714_v18 = vld [vmem:[%s9958_s1 + $0x1c4] ss:$16 sps:$4 sm:$0xff]   ;;  %v8720_v29 = vld [vmem:[%s9958_s1 + $0x1cc] ss:$16 sps:$4 sm:$0xff]  }
 0x8a3   :  { %11412 = vst [vmem:[#allocation38_spill] sm:$0xff] %v8714_v18  ;;  %11413 = vst [vmem:[#allocation39_spill] sm:$0xff] %v8720_v29 }
 0x8a5   :  { %2591 = vmatpush1.bf16.msra.mxu0 %v8702_v9  ;;  %2673 = vmatpush1.bf16.msra.mxu1 %v8708_v2  ;;  %v11414_v2 = vld [vmem:[#allocation23_spill] sm:$0xff]  ;;  %v11416_v9 = vld [vmem:[#allocation8_spill] sm:$0xff] }
 0x8a6   :  { %2592 = vmatprep.subr.bf16.mxu0 %v8714_v18  ;;  %2674 = vmatprep.subr.bf16.mxu1 %v8720_v29  ;;  %v11415_v18 = vld [vmem:[#allocation24_spill] sm:$0xff]  ;;  %v4189_v29 = vld [vmem:[%s9960_s3 + $0x1c] sm:$0xf] }
 0x8a9   :  { %2593 = vmatpush1.bf16.msra.mxu0 %v11313_v57  ;;  %2675 = vmatpush1.bf16.msra.mxu1 %v11314_v63  ;;  %v2520_v57 = vrot.slane %v4189_v29, %v11417_v16  ;;  %v2528_v63 = vrot.slane %v4189_v29, %v11418_v15 }
 0x8aa   :  { %2594 = vmatprep.subr.bf16.mxu0 %v11315_v0  ;;  %2676 = vmatprep.subr.bf16.mxu1 %v11316_v1  ;;  %v2524_v1 = vrot.slane %v4189_v29, %v11419_v10 }
 0x8ad   :  { %2595 = vmatpush1.bf16.msra.mxu0 %v11317_v17  ;;  %2677 = vmatpush1.bf16.msra.mxu1 %v11414_v2  ;;  %v2532_v17 = vrot.slane %v4189_v29, %v11420_v11 }
 0x8ae   :  { %2605 = vmatprep.subr.bf16.mxu0 %v11415_v18  ;;  %2687 = vmatprep.subr.bf16.mxu1 %v11416_v9 }
 0x943   :  { %v2421_v4 = vpop.f32.mrb[28].mxu0  ;;  %v2503_v0 = vpop.f32.mrb[28].mxu1 }
 0x944   :  { %v2510_v2 = vsub.f32 %v2421_v4, %v8293_v13  ;;  %v2512_v18 = vsub.f32 %v2503_v0, %v8296_v23  ;;  %v2423_v8 = vpop.f32.mrb[29].mxu0  ;;  %v2505_v9 = vpop.f32.mrb[29].mxu1 }
 0x945   :  { %v2511_v12 = vsub.f32 %v2423_v8, %v8299_v24  ;;  %v2513_v61 = vsub.f32 %v2505_v9, %v8302_v28  ;;  %v2425_v22 = vpop.f32.mrb[30].mxu0  ;;  %v2507_v16 = vpop.f32.mrb[30].mxu1  ;;  %v11461_v9 = vld [vmem:[#allocation81_spill] sm:$0xff] }
 0x946   :  { %v2537_v56 = vadd.f32 %v2520_v57, %v2510_v2  ;;  %v2539_v15 = vadd.f32 %v2528_v63, %v2512_v18  ;;  %v2426_v47 = vpop.f32.mrb[31].mxu0  ;;  %v2508_v27 = vpop.f32.mrb[31].mxu1  ;;  %v8782_v22 = vld [vmem:[%s9958_s1 + $0x22c] ss:$16 sps:$4 sm:$0xff]   ;;  %v8812_v57 = vld [vmem:[%s9958_s1 + $0x240] ss:$16 sps:$4 sm:$0xff]  }
 0x947   :  { %v2538_v19 = vadd.f32 %v2524_v1, %v2511_v12  ;;  %v2540_v10 = vadd.f32 %v2532_v17, %v2513_v61  ;;  %v8788_v61 = vld [vmem:[%s9958_s1 + $0x220] ss:$16 sps:$4 sm:$0xff]   ;;  %v8794_v12 = vld [vmem:[%s9958_s1 + $0x228] ss:$16 sps:$4 sm:$0xff]  }
 0x948   :  { %v2541_v20 = vmul.f32 0.05, %v2537_v56  ;;  %v2543_v29 = vmul.f32 0.05, %v2539_v15  ;;  %v8776_v56 = vld [vmem:[%s9958_s1 + $0x224] ss:$16 sps:$4 sm:$0xff]  }
 0x949   :  { %v2542_v11 = vmul.f32 0.05, %v2538_v19  ;;  %v2544_v4 = vmul.f32 0.05, %v2540_v10  ;;  %v8806_v10 = vld [vmem:[%s9958_s1 + $0x24c] ss:$16 sps:$4 sm:$0xff]  }
 0x94a   :  { %v8743_v0 = vadd.f32 %v2541_v20, %v8293_v13  ;;  %v8746_v30 = vadd.f32 %v2543_v29, %v8296_v23  ;;  %v8770_v20 = vld [vmem:[%s9958_s1 + $0x208] ss:$16 sps:$4 sm:$0xff]   ;;  %v11457_v1 = vld [vmem:[#allocation77_spill] sm:$0xff]  ;;  %v11459_v2 = vld [vmem:[#allocation79_spill] sm:$0xff] }
 0x94b   :  { %v8749_v8 = vadd.f32 %v2542_v11, %v8299_v24  ;;  %v8752_v16 = vadd.f32 %v2544_v4, %v8302_v28  ;;  %v8764_v28 = vld [vmem:[%s9958_s1 + $0x200] ss:$16 sps:$4 sm:$0xff]   ;;  %v8800_v11 = vld [vmem:[%s9958_s1 + $0x244] ss:$16 sps:$4 sm:$0xff]   ;;  %v11456_v63 = vld [vmem:[#allocation76_spill] sm:$0xff] }
 0x94c   :  { %v2549_v27 = vmax.f32 %v8743_v0, 0.0  ;;  %v8756_v47 = vmax.f32 %v8746_v30, 0.0  ;;  %v11458_v17 = vld [vmem:[#allocation78_spill] sm:$0xff]  ;;  %v11460_v18 = vld [vmem:[#allocation80_spill] sm:$0xff]  ;;  %v11463_v4 = vld [vmem:[#allocation13_spill] sm:$0xff] }
 0x94d   :  { %v2550_v15 = vmax.f32 %v8749_v8, 0.0  ;;  %v2552_v19 = vmax.f32 %v8752_v16, 0.0  ;;  %v11462_v29 = vld [vmem:[#allocation82_spill] sm:$0xff] }
 0x94e   :  { %2556 = vst [vmem:[#allocation4 + $0x100] sm:$0xff] %v2549_v27  ;;  %2558 = vst [vmem:[#allocation4 + $0x110] sm:$0xff] %v8756_v47  ;;  %v2560_v13 = vpack.c.bf16 %v2549_v27, %v2549_v27  ;;  %v11464_v27 = vld [vmem:[#allocation14_spill] sm:$0xff] }
 0x94f   :  { %2557 = vst [vmem:[#allocation4 + $0x108] sm:$0xff] %v2550_v15  ;;  %v2561_v23 = vpack.c.bf16 %v2550_v15, %v2550_v15  ;;  %2559 = vst [vmem:[#allocation4 + $0x118] sm:$0xff] %v2552_v19  ;;  %v2563_v24 = vpack.c.bf16 %v2552_v19, %v2552_v19  ;;  %v11466_v15 = vld [vmem:[#allocation16_spill] sm:$0xff]  ;;  %v11467_v19 = vld [vmem:[#allocation17_spill] sm:$0xff] }
 0x951   :  { %2596 = vmatprep.mubr.bf16.mxu0 %v2561_v23  ;;  %2678 = vmatprep.mubr.bf16.mxu1 %v2561_v23  ;;  %v11468_v23 = vld [vmem:[#allocation18_spill] sm:$0xff] }
 0x952   :  { %2597 = vmatmul.mubr.bf16.vlgmr.msra.gmra.mrb[32].mxu0 %v2560_v13  ;;  %2679 = vmatmul.mubr.bf16.vlgmr.msra.gmra.mrb[32].mxu1 %v2560_v13  ;;  %v11469_v13 = vld [vmem:[#allocation19_spill] sm:$0xff] }
 0x953   :  { %2606 = vmatpush1.bf16.msra.mxu0 %v8764_v28  ;;  %2688 = vmatpush1.bf16.msra.mxu1 %v8770_v20 }
 0x954   :  { %2637 = vmatprep.mubr.bf16.mxu0 %v2563_v24  ;;  %2719 = vmatprep.mubr.bf16.mxu1 %v2563_v24  ;;  %v11470_v24 = vld [vmem:[#allocation20_spill] sm:$0xff] }
 0x955   :  { %2607 = vmatprep.subr.bf16.mxu0 %v8776_v56  ;;  %2689 = vmatprep.subr.bf16.mxu1 %v8782_v22 }
 0x957   :  { %2608 = vmatpush1.bf16.msra.mxu0 %v8788_v61  ;;  %2690 = vmatpush1.bf16.msra.mxu1 %v8794_v12 }
 0x958   :  { %2609 = vmatprep.subr.bf16.mxu0 %v8800_v11  ;;  %2691 = vmatprep.subr.bf16.mxu1 %v8806_v10 }
 0x95b   :  { %2610 = vmatpush1.bf16.msra.mxu0 %v8812_v57  ;;  %2692 = vmatpush1.bf16.msra.mxu1 %v7898_v7  ;;  %v11421_v7 = vld [vmem:[#allocation40_spill] sm:$0xff] }
 0x95c   :  { %2611 = vmatprep.subr.bf16.mxu0 %v7904_v21  ;;  %2693 = vmatprep.subr.bf16.mxu1 %v7910_v58  ;;  %v11422_v21 = vld [vmem:[#allocation41_spill] sm:$0xff]  ;;  %v11423_v58 = vld [vmem:[#allocation42_spill] sm:$0xff] }
 0x95f   :  { %2612 = vmatpush1.bf16.msra.mxu0 %v7916_v48  ;;  %2694 = vmatpush1.bf16.msra.mxu1 %v7922_v31  ;;  %v11424_v48 = vld [vmem:[#allocation43_spill] sm:$0xff]  ;;  %v11425_v31 = vld [vmem:[#allocation44_spill] sm:$0xff] }
 0x960   :  { %2613 = vmatprep.subr.bf16.mxu0 %v7928_v32  ;;  %2695 = vmatprep.subr.bf16.mxu1 %v7934_v55  ;;  %v11426_v32 = vld [vmem:[#allocation45_spill] sm:$0xff]  ;;  %v11427_v55 = vld [vmem:[#allocation46_spill] sm:$0xff] }
 0x963   :  { %2614 = vmatpush1.bf16.msra.mxu0 %v7940_v33  ;;  %2696 = vmatpush1.bf16.msra.mxu1 %v7946_v34  ;;  %v11428_v33 = vld [vmem:[#allocation47_spill] sm:$0xff]  ;;  %v11429_v34 = vld [vmem:[#allocation48_spill] sm:$0xff] }
 0x964   :  { %2615 = vmatprep.subr.bf16.mxu0 %v7952_v35  ;;  %2697 = vmatprep.subr.bf16.mxu1 %v7958_v36  ;;  %v11430_v35 = vld [vmem:[#allocation50_spill] sm:$0xff]  ;;  %v11431_v36 = vld [vmem:[#allocation51_spill] sm:$0xff] }
 0x967   :  { %2616 = vmatpush1.bf16.msra.mxu0 %v7964_v37  ;;  %2698 = vmatpush1.bf16.msra.mxu1 %v7970_v38  ;;  %v11432_v37 = vld [vmem:[#allocation52_spill] sm:$0xff]  ;;  %v11433_v38 = vld [vmem:[#allocation53_spill] sm:$0xff] }
 0x968   :  { %2617 = vmatprep.subr.bf16.mxu0 %v7976_v39  ;;  %2699 = vmatprep.subr.bf16.mxu1 %v7982_v40  ;;  %v11434_v39 = vld [vmem:[#allocation54_spill] sm:$0xff]  ;;  %v11435_v40 = vld [vmem:[#allocation55_spill] sm:$0xff] }
 0x96b   :  { %2618 = vmatpush1.bf16.msra.mxu0 %v7988_v59  ;;  %2700 = vmatpush1.bf16.msra.mxu1 %v7994_v52  ;;  %v11436_v59 = vld [vmem:[#allocation56_spill] sm:$0xff]  ;;  %v11437_v52 = vld [vmem:[#allocation57_spill] sm:$0xff] }
 0x96c   :  { %2619 = vmatprep.subr.bf16.mxu0 %v8000_v51  ;;  %2701 = vmatprep.subr.bf16.mxu1 %v8006_v53  ;;  %v2562_v51 = vpack.c.bf16 %v8756_v47, %v8756_v47  ;;  %v11438_v53 = vld [vmem:[#allocation58_spill] sm:$0xff]  ;;  %v11465_v47 = vld [vmem:[#allocation15_spill] sm:$0xff] }
 0x96f   :  { %2620 = vmatpush1.bf16.msra.mxu0 %v11325_v6  ;;  %2702 = vmatpush1.bf16.msra.mxu1 %v11326_v46  ;;  %v11439_v6 = vld [vmem:[#allocation59_spill] sm:$0xff]  ;;  %v11440_v46 = vld [vmem:[#allocation66_spill] sm:$0xff] }
 0x970   :  { %2621 = vmatprep.subr.bf16.mxu0 %v11327_v42  ;;  %2703 = vmatprep.subr.bf16.mxu1 %v11328_v43  ;;  %v11441_v42 = vld [vmem:[#allocation67_spill] sm:$0xff]  ;;  %v11442_v43 = vld [vmem:[#allocation68_spill] sm:$0xff] }
 0x973   :  { %2622 = vmatpush1.bf16.msra.mxu0 %v11329_v5  ;;  %2704 = vmatpush1.bf16.msra.mxu1 %v11330_v26  ;;  %v11443_v5 = vld [vmem:[#allocation69_spill] sm:$0xff]  ;;  %v11444_v26 = vld [vmem:[#allocation70_spill] sm:$0xff] }
 0x974   :  { %2623 = vmatprep.subr.bf16.mxu0 %v11331_v25  ;;  %2705 = vmatprep.subr.bf16.mxu1 %v11332_v60  ;;  %v11445_v25 = vld [vmem:[#allocation71_spill] sm:$0xff] }
 0x975   :  { %v11446_v60 = vld [vmem:[#allocation83_spill] sm:$0xff] }
 0x977   :  { %2624 = vmatpush1.bf16.msra.mxu0 %v11333_v44  ;;  %2706 = vmatpush1.bf16.msra.mxu1 %v11334_v54  ;;  %v11447_v44 = vld [vmem:[#allocation84_spill] sm:$0xff]  ;;  %v11448_v54 = vld [vmem:[#allocation85_spill] sm:$0xff] }
 0x978   :  { %2625 = vmatprep.subr.bf16.mxu0 %v11335_v3  ;;  %2707 = vmatprep.subr.bf16.mxu1 %v11336_v14  ;;  %v11449_v3 = vld [vmem:[#allocation60_spill] sm:$0xff]  ;;  %v11450_v14 = vld [vmem:[#allocation61_spill] sm:$0xff] }
 0x97b   :  { %2626 = vmatpush1.bf16.msra.mxu0 %v11337_v45  ;;  %2708 = vmatpush1.bf16.msra.mxu1 %v11338_v49  ;;  %v11451_v45 = vld [vmem:[#allocation62_spill] sm:$0xff]  ;;  %v11452_v49 = vld [vmem:[#allocation63_spill] sm:$0xff] }
 0x97c   :  { %2627 = vmatprep.subr.bf16.mxu0 %v11339_v50  ;;  %2709 = vmatprep.subr.bf16.mxu1 %v11340_v62  ;;  %v11453_v50 = vld [vmem:[#allocation64_spill] sm:$0xff]  ;;  %v11454_v62 = vld [vmem:[#allocation74_spill] sm:$0xff] }
 0x97f   :  { %2628 = vmatpush1.bf16.msra.mxu0 %v11341_v41  ;;  %2710 = vmatpush1.bf16.msra.mxu1 %v11421_v7  ;;  %v11455_v41 = vld [vmem:[#allocation75_spill] sm:$0xff]  ;;  %v11471_v7 = vld [vmem:[#allocation86_spill] sm:$0xff] }
 0x980   :  { %2629 = vmatprep.subr.bf16.mxu0 %v11422_v21  ;;  %2711 = vmatprep.subr.bf16.mxu1 %v11423_v58  ;;  %v11472_v21 = vld [vmem:[#allocation87_spill] sm:$0xff]  ;;  %v11473_v58 = vld [vmem:[#allocation88_spill] sm:$0xff] }
 0x983   :  { %2630 = vmatpush1.bf16.msra.mxu0 %v11424_v48  ;;  %2712 = vmatpush1.bf16.msra.mxu1 %v11425_v31  ;;  %v11474_v48 = vld [vmem:[#allocation65_spill] sm:$0xff]  ;;  %v11475_v31 = vld [vmem:[#allocation72_spill] sm:$0xff] }
 0x984   :  { %2631 = vmatprep.subr.bf16.mxu0 %v11426_v32  ;;  %2713 = vmatprep.subr.bf16.mxu1 %v11427_v55  ;;  %v11476_v32 = vld [vmem:[#allocation73_spill] sm:$0xff] }
 0x985   :  { %v11477_v55 = vld [vmem:[#allocation21_spill] sm:$0xff] }
 0x987   :  { %2632 = vmatpush1.bf16.msra.mxu0 %v11428_v33  ;;  %2714 = vmatpush1.bf16.msra.mxu1 %v11429_v34  ;;  %v11478_v33 = vld [vmem:[#allocation22_spill] sm:$0xff]  ;;  %v11479_v34 = vld [vmem:[#allocation7_spill] sm:$0xff] }
 0x988   :  { %2633 = vmatprep.subr.bf16.mxu0 %v11430_v35  ;;  %2715 = vmatprep.subr.bf16.mxu1 %v11431_v36  ;;  %v11480_v35 = vld [vmem:[#allocation49_spill] sm:$0xff] }
 0x989   :  { %v11481_v36 = vld [vmem:[#allocation25_spill] sm:$0xff] }
 0x98b   :  { %2634 = vmatpush1.bf16.msra.mxu0 %v11432_v37  ;;  %2716 = vmatpush1.bf16.msra.mxu1 %v11433_v38  ;;  %v11482_v37 = vld [vmem:[#allocation26_spill] sm:$0xff]  ;;  %v11483_v38 = vld [vmem:[#allocation27_spill] sm:$0xff] }
 0x98c   :  { %2635 = vmatprep.subr.bf16.mxu0 %v11434_v39  ;;  %2717 = vmatprep.subr.bf16.mxu1 %v11435_v40  ;;  %v11484_v39 = vld [vmem:[#allocation28_spill] sm:$0xff]  ;;  %v11485_v40 = vld [vmem:[#allocation29_spill] sm:$0xff] }
 0x98f   :  { %2636 = vmatpush1.bf16.msra.mxu0 %v11436_v59  ;;  %2718 = vmatpush1.bf16.msra.mxu1 %v11437_v52  ;;  %v11486_v59 = vld [vmem:[#allocation30_spill] sm:$0xff]  ;;  %v11487_v52 = vld [vmem:[#allocation31_spill] sm:$0xff] }
 0x990   :  { %2782 = vmatprep.subr.bf16.mxu0 %v11438_v53  ;;  %2864 = vmatprep.subr.bf16.mxu1 %v11439_v6 }
 0x992   :  { %2638 = vmatmul.mubr.bf16.vlgmr.msra.gmra.mrb[32].mxu0 %v2562_v51  ;;  %2720 = vmatmul.mubr.bf16.vlgmr.msra.gmra.mrb[32].mxu1 %v2562_v51  ;;  %v11488_v51 = vld [vmem:[#allocation32_spill] sm:$0xff] }
 0x993   :  { %2783 = vmatpush1.bf16.msra.mxu0 %v11440_v46  ;;  %2865 = vmatpush1.bf16.msra.mxu1 %v11441_v42 }
 0x994   :  { %2784 = vmatprep.subr.bf16.mxu0 %v11442_v43  ;;  %2866 = vmatprep.subr.bf16.mxu1 %v11443_v5 }
 0x997   :  { %2785 = vmatpush1.bf16.msra.mxu0 %v11444_v26  ;;  %2867 = vmatpush1.bf16.msra.mxu1 %v11445_v25 }
 0x998   :  { %2786 = vmatprep.subr.bf16.mxu0 %v11446_v60  ;;  %2868 = vmatprep.subr.bf16.mxu1 %v11447_v44 }
 0x99b   :  { %2787 = vmatpush1.bf16.msra.mxu0 %v11448_v54  ;;  %2869 = vmatpush1.bf16.msra.mxu1 %v11449_v3 }
 0x99c   :  { %2788 = vmatprep.subr.bf16.mxu0 %v11450_v14  ;;  %2870 = vmatprep.subr.bf16.mxu1 %v11451_v45 }
 0x99f   :  { %2789 = vmatpush1.bf16.msra.mxu0 %v11452_v49  ;;  %2871 = vmatpush1.bf16.msra.mxu1 %v11453_v50 }
 0x9a0   :  { %2790 = vmatprep.subr.bf16.mxu0 %v11454_v62  ;;  %2872 = vmatprep.subr.bf16.mxu1 %v11455_v41 }
 0x9a3   :  { %2791 = vmatpush1.bf16.msra.mxu0 %v11456_v63  ;;  %2873 = vmatpush1.bf16.msra.mxu1 %v11457_v1 }
 0x9a4   :  { %2792 = vmatprep.subr.bf16.mxu0 %v11458_v17  ;;  %2874 = vmatprep.subr.bf16.mxu1 %v11459_v2 }
 0x9a7   :  { %2793 = vmatpush1.bf16.msra.mxu0 %v11460_v18  ;;  %2875 = vmatpush1.bf16.msra.mxu1 %v11461_v9 }
 0x9a8   :  { %2794 = vmatprep.subr.bf16.mxu0 %v11462_v29  ;;  %2876 = vmatprep.subr.bf16.mxu1 %v11463_v4 }
 0x9ab   :  { %2795 = vmatpush1.bf16.msra.mxu0 %v11464_v27  ;;  %2877 = vmatpush1.bf16.msra.mxu1 %v11465_v47 }
 0x9ac   :  { %2796 = vmatprep.subr.bf16.mxu0 %v11466_v15  ;;  %2878 = vmatprep.subr.bf16.mxu1 %v11467_v19 }
 0x9af   :  { %2797 = vmatpush1.bf16.msra.mxu0 %v11468_v23  ;;  %2879 = vmatpush1.bf16.msra.mxu1 %v11469_v13 }
 0x9b0   :  { %2798 = vmatprep.subr.bf16.mxu0 %v11470_v24  ;;  %2880 = vmatprep.subr.bf16.mxu1 %v11471_v7 }
 0x9b3   :  { %2799 = vmatpush1.bf16.msra.mxu0 %v11472_v21  ;;  %2881 = vmatpush1.bf16.msra.mxu1 %v11473_v58 }
 0x9b4   :  { %2800 = vmatprep.subr.bf16.mxu0 %v11474_v48  ;;  %2882 = vmatprep.subr.bf16.mxu1 %v11475_v31 }
 0x9b7   :  { %2801 = vmatpush1.bf16.msra.mxu0 %v11476_v32  ;;  %2883 = vmatpush1.bf16.msra.mxu1 %v11477_v55 }
 0x9b8   :  { %2802 = vmatprep.subr.bf16.mxu0 %v11478_v33  ;;  %2884 = vmatprep.subr.bf16.mxu1 %v11479_v34  ;;  %v11489_v33 = vld [vmem:[#allocation33_spill] sm:$0xff]  ;;  %v11490_v34 = vld [vmem:[#allocation34_spill] sm:$0xff] }
 0x9bb   :  { %2803 = vmatpush1.bf16.msra.mxu0 %v11480_v35  ;;  %2885 = vmatpush1.bf16.msra.mxu1 %v11481_v36  ;;  %v11491_v35 = vld [vmem:[#allocation35_spill] sm:$0xff]  ;;  %v11492_v36 = vld [vmem:[#allocation36_spill] sm:$0xff] }
 0x9bc   :  { %2804 = vmatprep.subr.bf16.mxu0 %v11482_v37  ;;  %2886 = vmatprep.subr.bf16.mxu1 %v11483_v38  ;;  %v11493_v37 = vld [vmem:[#allocation37_spill] sm:$0xff]  ;;  %v11494_v38 = vld [vmem:[#allocation38_spill] sm:$0xff] }
 0x9bf   :  { %2805 = vmatpush1.bf16.msra.mxu0 %v11484_v39  ;;  %2887 = vmatpush1.bf16.msra.mxu1 %v11485_v40  ;;  %v11495_v39 = vld [vmem:[#allocation39_spill] sm:$0xff] }
 0x9c0   :  { %2806 = vmatprep.subr.bf16.mxu0 %v11486_v59  ;;  %2888 = vmatprep.subr.bf16.mxu1 %v11487_v52  ;;  %v8931_v52 = vld [vmem:[%s9958_s1 + $0x1c0] ss:$16 sps:$4 sm:$0xff]  }
 0x9c1   :  { %11496 = vst [vmem:[#allocation23_spill] sm:$0xff] %v8931_v52  ;;  %v11506_v59 = vld [vmem:[#allocation11_spill] sm:$0xff] }
 0x9c3   :  { %2807 = vmatpush1.bf16.msra.mxu0 %v11488_v51  ;;  %2889 = vmatpush1.bf16.msra.mxu1 %v11489_v33 }
 0x9c4   :  { %2808 = vmatprep.subr.bf16.mxu0 %v11490_v34  ;;  %2890 = vmatprep.subr.bf16.mxu1 %v11491_v35  ;;  %v8937_v34 = vld [vmem:[%s9958_s1 + $0x1c8] ss:$16 sps:$4 sm:$0xff]  }
 0x9c5   :  { %11497 = vst [vmem:[#allocation24_spill] sm:$0xff] %v8937_v34 }
 0x9c7   :  { %2809 = vmatpush1.bf16.msra.mxu0 %v11492_v36  ;;  %2891 = vmatpush1.bf16.msra.mxu1 %v11493_v37  ;;  %v11504_v37 = vld [vmem:[#allocation9_spill] sm:$0xff]  ;;  %v11505_v36 = vld [vmem:[#allocation10_spill] sm:$0xff] }
 0x9c8   :  { %2810 = vmatprep.subr.bf16.mxu0 %v11494_v38  ;;  %2892 = vmatprep.subr.bf16.mxu1 %v11495_v39  ;;  %v8943_v38 = vld [vmem:[%s9958_s1 + $0x1e4] ss:$16 sps:$4 sm:$0xff]   ;;  %v8949_v39 = vld [vmem:[%s9958_s1 + $0x1ec] ss:$16 sps:$4 sm:$0xff]  }
 0x9c9   :  { %11498 = vst [vmem:[#allocation8_spill] sm:$0xff] %v8943_v38  ;;  %11499 = vst [vmem:[#allocation40_spill] sm:$0xff] %v8949_v39 }
 0x9cb   :  { %2811 = vmatpush1.bf16.msra.mxu0 %v8931_v52  ;;  %2893 = vmatpush1.bf16.msra.mxu1 %v8937_v34  ;;  %v8955_v52 = vld [vmem:[%s9958_s1 + $0x1e0] ss:$16 sps:$4 sm:$0xff]   ;;  %v8961_v34 = vld [vmem:[%s9958_s1 + $0x1e8] ss:$16 sps:$4 sm:$0xff]  }
 0x9cc   :  { %2812 = vmatprep.subr.bf16.mxu0 %v8943_v38  ;;  %2894 = vmatprep.subr.bf16.mxu1 %v8949_v39  ;;  %11500 = vst [vmem:[#allocation41_spill] sm:$0xff] %v8955_v52  ;;  %11501 = vst [vmem:[#allocation42_spill] sm:$0xff] %v8961_v34  ;;  %v8967_v38 = vld [vmem:[%s9958_s1 + $0x204] ss:$16 sps:$4 sm:$0xff]   ;;  %v8973_v39 = vld [vmem:[%s9958_s1 + $0x20c] ss:$16 sps:$4 sm:$0xff]  }
 0x9cd   :  { %11502 = vst [vmem:[#allocation43_spill] sm:$0xff] %v8967_v38  ;;  %11503 = vst [vmem:[#allocation44_spill] sm:$0xff] %v8973_v39 }
 0x9cf   :  { %2813 = vmatpush1.bf16.msra.mxu0 %v8955_v52  ;;  %2895 = vmatpush1.bf16.msra.mxu1 %v8961_v34  ;;  %v4190_v52 = vld [vmem:[%s9960_s3 + $0x20] sm:$0xf] }
 0x9d0   :  { %2823 = vmatprep.subr.bf16.mxu0 %v8967_v38  ;;  %2905 = vmatprep.subr.bf16.mxu1 %v8973_v39  ;;  %v2738_v34 = vrot.slane %v4190_v52, %v11504_v37  ;;  %v2746_v35 = vrot.slane %v4190_v52, %v11505_v36  ;;  %v2742_v40 = vrot.slane %v4190_v52, %v11506_v59  ;;  %v11507_v38 = vld [vmem:[#allocation12_spill] sm:$0xff] }
 0x9d1   :  { %v2750_v55 = vrot.slane %v4190_v52, %v11507_v38 }
 0xa65   :  { %v2639_v33 = vpop.f32.mrb[32].mxu0  ;;  %v2721_v51 = vpop.f32.mrb[32].mxu1 }
 0xa66   :  { %v2728_v32 = vsub.f32 %v2639_v33, %v8743_v0  ;;  %v2730_v31 = vsub.f32 %v2721_v51, %v8746_v30  ;;  %v2641_v48 = vpop.f32.mrb[33].mxu0  ;;  %v2723_v39 = vpop.f32.mrb[33].mxu1 }
 0xa67   :  { %v2729_v58 = vsub.f32 %v2641_v48, %v8749_v8  ;;  %v2731_v21 = vsub.f32 %v2723_v39, %v8752_v16  ;;  %v2643_v7 = vpop.f32.mrb[34].mxu0  ;;  %v2725_v37 = vpop.f32.mrb[34].mxu1  ;;  %v9090_v39 = vld [vmem:[%s9958_s1 + $0x2a8] ss:$16 sps:$4 sm:$0xff]  }
 0xa68   :  { %v2755_v24 = vadd.f32 %v2738_v34, %v2728_v32  ;;  %v2757_v36 = vadd.f32 %v2746_v35, %v2730_v31  ;;  %v2644_v13 = vpop.f32.mrb[35].mxu0  ;;  %v2726_v23 = vpop.f32.mrb[35].mxu1  ;;  %v9042_v31 = vld [vmem:[%s9958_s1 + $0x268] ss:$16 sps:$4 sm:$0xff]   ;;  %v9048_v32 = vld [vmem:[%s9958_s1 + $0x284] ss:$16 sps:$4 sm:$0xff]  }
 0xa69   :  { %v2756_v19 = vadd.f32 %v2742_v40, %v2729_v58  ;;  %v2758_v59 = vadd.f32 %v2750_v55, %v2731_v21  ;;  %v9030_v21 = vld [vmem:[%s9958_s1 + $0x26c] ss:$16 sps:$4 sm:$0xff]   ;;  %v9036_v58 = vld [vmem:[%s9958_s1 + $0x260] ss:$16 sps:$4 sm:$0xff]   ;;  %v9066_v35 = vld [vmem:[%s9958_s1 + $0x288] ss:$16 sps:$4 sm:$0xff]  }
 0xa6a   :  { %v2759_v15 = vmul.f32 0.05, %v2755_v24  ;;  %v2761_v52 = vmul.f32 0.05, %v2757_v36  ;;  %v9054_v55 = vld [vmem:[%s9958_s1 + $0x28c] ss:$16 sps:$4 sm:$0xff]  }
 0xa6b   :  { %v2760_v38 = vmul.f32 0.05, %v2756_v19  ;;  %v2762_v33 = vmul.f32 0.05, %v2758_v59  ;;  %v9060_v34 = vld [vmem:[%s9958_s1 + $0x280] ss:$16 sps:$4 sm:$0xff]  }
 0xa6c   :  { %v8988_v51 = vadd.f32 %v2759_v15, %v8743_v0  ;;  %v8991_v47 = vadd.f32 %v2761_v52, %v8746_v30  ;;  %v9024_v15 = vld [vmem:[%s9958_s1 + $0x264] ss:$16 sps:$4 sm:$0xff]   ;;  %v9078_v37 = vld [vmem:[%s9958_s1 + $0x2ac] ss:$16 sps:$4 sm:$0xff]   ;;  %v9108_v52 = vld [vmem:[%s9958_s1 + $0x2c0] ss:$16 sps:$4 sm:$0xff]  }
 0xa6d   :  { %v8994_v48 = vadd.f32 %v2760_v38, %v8749_v8  ;;  %v8997_v7 = vadd.f32 %v2762_v33, %v8752_v16  ;;  %v9018_v16 = vld [vmem:[%s9958_s1 + $0x248] ss:$16 sps:$4 sm:$0xff]   ;;  %v9072_v36 = vld [vmem:[%s9958_s1 + $0x2a4] ss:$16 sps:$4 sm:$0xff]   ;;  %v9084_v38 = vld [vmem:[%s9958_s1 + $0x2a0] ss:$16 sps:$4 sm:$0xff]  }
 0xa6e   :  { %v2767_v23 = vmax.f32 %v8988_v51, 0.0  ;;  %v9001_v13 = vmax.f32 %v8991_v47, 0.0  ;;  %v9096_v40 = vld [vmem:[%s9958_s1 + $0x2c4] ss:$16 sps:$4 sm:$0xff]   ;;  %v9102_v59 = vld [vmem:[%s9958_s1 + $0x2cc] ss:$16 sps:$4 sm:$0xff]  }
 0xa6f   :  { %v2768_v19 = vmax.f32 %v8994_v48, 0.0  ;;  %v2770_v24 = vmax.f32 %v8997_v7, 0.0  ;;  %v9114_v33 = vld [vmem:[%s9958_s1 + $0x2c8] ss:$16 sps:$4 sm:$0xff]  }
 0xa70   :  { %2774 = vst [vmem:[#allocation4 + $0x120] sm:$0xff] %v2767_v23  ;;  %2776 = vst [vmem:[#allocation4 + $0x130] sm:$0xff] %v9001_v13  ;;  %v2778_v0 = vpack.c.bf16 %v2767_v23, %v2767_v23  ;;  %v9120_v23 = vld [vmem:[%s9958_s1 + $0x2e4] ss:$16 sps:$4 sm:$0xff]  }
 0xa71   :  { %2775 = vst [vmem:[#allocation4 + $0x128] sm:$0xff] %v2768_v19  ;;  %v2779_v30 = vpack.c.bf16 %v2768_v19, %v2768_v19  ;;  %2777 = vst [vmem:[#allocation4 + $0x138] sm:$0xff] %v2770_v24  ;;  %v2781_v8 = vpack.c.bf16 %v2770_v24, %v2770_v24  ;;  %v9126_v19 = vld [vmem:[%s9958_s1 + $0x2ec] ss:$16 sps:$4 sm:$0xff]   ;;  %v9132_v24 = vld [vmem:[%s9958_s1 + $0x2e0] ss:$16 sps:$4 sm:$0xff]  }
 0xa72   :  { %11508 = vst [vmem:[#allocation45_spill] sm:$0xff] %v9132_v24 }
 0xa73   :  { %2814 = vmatprep.mubr.bf16.mxu0 %v2779_v30  ;;  %2896 = vmatprep.mubr.bf16.mxu1 %v2779_v30  ;;  %v9138_v30 = vld [vmem:[%s9958_s1 + $0x2e8] ss:$16 sps:$4 sm:$0xff]  }
 0xa74   :  { %2815 = vmatmul.mubr.bf16.vlgmr.msra.gmra.mrb[36].mxu0 %v2778_v0  ;;  %2897 = vmatmul.mubr.bf16.vlgmr.msra.gmra.mrb[36].mxu1 %v2778_v0  ;;  %11509 = vst [vmem:[#allocation46_spill] sm:$0xff] %v9138_v30  ;;  %v9144_v0 = vld [vmem:[%s9958_s1 + $0x304] ss:$16 sps:$4 sm:$0xff]  }
 0xa75   :  { %2824 = vmatpush1.bf16.msra.mxu0 %v8764_v28  ;;  %2906 = vmatpush1.bf16.msra.mxu1 %v8770_v20  ;;  %11510 = vst [vmem:[#allocation47_spill] sm:$0xff] %v9144_v0 }
 0xa76   :  { %2855 = vmatprep.mubr.bf16.mxu0 %v2781_v8  ;;  %2937 = vmatprep.mubr.bf16.mxu1 %v2781_v8  ;;  %v9150_v8 = vld [vmem:[%s9958_s1 + $0x30c] ss:$16 sps:$4 sm:$0xff]  }
 0xa77   :  { %2825 = vmatprep.subr.bf16.mxu0 %v8776_v56  ;;  %2907 = vmatprep.subr.bf16.mxu1 %v8782_v22  ;;  %11511 = vst [vmem:[#allocation48_spill] sm:$0xff] %v9150_v8 }
 0xa79   :  { %2826 = vmatpush1.bf16.msra.mxu0 %v8788_v61  ;;  %2908 = vmatpush1.bf16.msra.mxu1 %v8794_v12 }
 0xa7a   :  { %2827 = vmatprep.subr.bf16.mxu0 %v8800_v11  ;;  %2909 = vmatprep.subr.bf16.mxu1 %v8806_v10 }
 0xa7d   :  { %2828 = vmatpush1.bf16.msra.mxu0 %v8812_v57  ;;  %2910 = vmatpush1.bf16.msra.mxu1 %v9018_v16 }
 0xa7e   :  { %2829 = vmatprep.subr.bf16.mxu0 %v9024_v15  ;;  %2911 = vmatprep.subr.bf16.mxu1 %v9030_v21 }
 0xa81   :  { %2830 = vmatpush1.bf16.msra.mxu0 %v9036_v58  ;;  %2912 = vmatpush1.bf16.msra.mxu1 %v9042_v31 }
 0xa82   :  { %2831 = vmatprep.subr.bf16.mxu0 %v9048_v32  ;;  %2913 = vmatprep.subr.bf16.mxu1 %v9054_v55 }
 0xa85   :  { %2832 = vmatpush1.bf16.msra.mxu0 %v9060_v34  ;;  %2914 = vmatpush1.bf16.msra.mxu1 %v9066_v35 }
 0xa86   :  { %2833 = vmatprep.subr.bf16.mxu0 %v9072_v36  ;;  %2915 = vmatprep.subr.bf16.mxu1 %v9078_v37 }
 0xa89   :  { %2834 = vmatpush1.bf16.msra.mxu0 %v9084_v38  ;;  %2916 = vmatpush1.bf16.msra.mxu1 %v9090_v39 }
 0xa8a   :  { %2835 = vmatprep.subr.bf16.mxu0 %v9096_v40  ;;  %2917 = vmatprep.subr.bf16.mxu1 %v9102_v59 }
 0xa8d   :  { %2836 = vmatpush1.bf16.msra.mxu0 %v9108_v52  ;;  %2918 = vmatpush1.bf16.msra.mxu1 %v9114_v33 }
 0xa8e   :  { %2837 = vmatprep.subr.bf16.mxu0 %v9120_v23  ;;  %2919 = vmatprep.subr.bf16.mxu1 %v9126_v19 }
 0xa91   :  { %2838 = vmatpush1.bf16.msra.mxu0 %v9132_v24  ;;  %2920 = vmatpush1.bf16.msra.mxu1 %v9138_v30  ;;  %v9156_v24 = vld [vmem:[%s9958_s1 + $0x300] ss:$16 sps:$4 sm:$0xff]   ;;  %v9162_v30 = vld [vmem:[%s9958_s1 + $0x308] ss:$16 sps:$4 sm:$0xff]  }
 0xa92   :  { %2839 = vmatprep.subr.bf16.mxu0 %v9144_v0  ;;  %2921 = vmatprep.subr.bf16.mxu1 %v9150_v8  ;;  %11512 = vst [vmem:[#allocation50_spill] sm:$0xff] %v9156_v24  ;;  %11513 = vst [vmem:[#allocation51_spill] sm:$0xff] %v9162_v30  ;;  %v9168_v0 = vld [vmem:[%s9958_s1 + $0x324] ss:$16 sps:$4 sm:$0xff]   ;;  %v9174_v8 = vld [vmem:[%s9958_s1 + $0x32c] ss:$16 sps:$4 sm:$0xff]  }
 0xa93   :  { %11514 = vst [vmem:[#allocation52_spill] sm:$0xff] %v9168_v0  ;;  %11515 = vst [vmem:[#allocation53_spill] sm:$0xff] %v9174_v8 }
 0xa95   :  { %2840 = vmatpush1.bf16.msra.mxu0 %v9156_v24  ;;  %2922 = vmatpush1.bf16.msra.mxu1 %v9162_v30  ;;  %v9180_v24 = vld [vmem:[%s9958_s1 + $0x320] ss:$16 sps:$4 sm:$0xff]   ;;  %v9186_v30 = vld [vmem:[%s9958_s1 + $0x328] ss:$16 sps:$4 sm:$0xff]  }
 0xa96   :  { %2841 = vmatprep.subr.bf16.mxu0 %v9168_v0  ;;  %2923 = vmatprep.subr.bf16.mxu1 %v9174_v8  ;;  %11516 = vst [vmem:[#allocation54_spill] sm:$0xff] %v9180_v24  ;;  %11517 = vst [vmem:[#allocation55_spill] sm:$0xff] %v9186_v30  ;;  %v9192_v0 = vld [vmem:[%s9958_s1 + $0x344] ss:$16 sps:$4 sm:$0xff]   ;;  %v9198_v8 = vld [vmem:[%s9958_s1 + $0x34c] ss:$16 sps:$4 sm:$0xff]  }
 0xa97   :  { %11518 = vst [vmem:[#allocation56_spill] sm:$0xff] %v9192_v0  ;;  %11519 = vst [vmem:[#allocation57_spill] sm:$0xff] %v9198_v8 }
 0xa99   :  { %2842 = vmatpush1.bf16.msra.mxu0 %v9180_v24  ;;  %2924 = vmatpush1.bf16.msra.mxu1 %v9186_v30  ;;  %v9204_v24 = vld [vmem:[%s9958_s1 + $0x340] ss:$16 sps:$4 sm:$0xff]   ;;  %v9210_v30 = vld [vmem:[%s9958_s1 + $0x348] ss:$16 sps:$4 sm:$0xff]  }
 0xa9a   :  { %2843 = vmatprep.subr.bf16.mxu0 %v9192_v0  ;;  %2925 = vmatprep.subr.bf16.mxu1 %v9198_v8  ;;  %11520 = vst [vmem:[#allocation58_spill] sm:$0xff] %v9204_v24  ;;  %11521 = vst [vmem:[#allocation59_spill] sm:$0xff] %v9210_v30  ;;  %v9216_v0 = vld [vmem:[%s9958_s1 + $0x364] ss:$16 sps:$4 sm:$0xff]   ;;  %v9222_v8 = vld [vmem:[%s9958_s1 + $0x36c] ss:$16 sps:$4 sm:$0xff]  }
 0xa9b   :  { %11522 = vst [vmem:[#allocation66_spill] sm:$0xff] %v9216_v0  ;;  %11523 = vst [vmem:[#allocation67_spill] sm:$0xff] %v9222_v8 }
 0xa9d   :  { %2844 = vmatpush1.bf16.msra.mxu0 %v9204_v24  ;;  %2926 = vmatpush1.bf16.msra.mxu1 %v9210_v30  ;;  %v9228_v24 = vld [vmem:[%s9958_s1 + $0x360] ss:$16 sps:$4 sm:$0xff]   ;;  %v9234_v30 = vld [vmem:[%s9958_s1 + $0x368] ss:$16 sps:$4 sm:$0xff]  }
 0xa9e   :  { %2845 = vmatprep.subr.bf16.mxu0 %v9216_v0  ;;  %2927 = vmatprep.subr.bf16.mxu1 %v9222_v8  ;;  %11524 = vst [vmem:[#allocation68_spill] sm:$0xff] %v9228_v24  ;;  %11525 = vst [vmem:[#allocation69_spill] sm:$0xff] %v9234_v30  ;;  %v9240_v0 = vld [vmem:[%s9958_s1 + $0x384] ss:$16 sps:$4 sm:$0xff]   ;;  %v9246_v8 = vld [vmem:[%s9958_s1 + $0x38c] ss:$16 sps:$4 sm:$0xff]  }
 0xa9f   :  { %11526 = vst [vmem:[#allocation70_spill] sm:$0xff] %v9240_v0  ;;  %11527 = vst [vmem:[#allocation71_spill] sm:$0xff] %v9246_v8 }
 0xaa1   :  { %2846 = vmatpush1.bf16.msra.mxu0 %v9228_v24  ;;  %2928 = vmatpush1.bf16.msra.mxu1 %v9234_v30  ;;  %v9252_v24 = vld [vmem:[%s9958_s1 + $0x380] ss:$16 sps:$4 sm:$0xff]   ;;  %v9258_v30 = vld [vmem:[%s9958_s1 + $0x388] ss:$16 sps:$4 sm:$0xff]  }
 0xaa2   :  { %2847 = vmatprep.subr.bf16.mxu0 %v9240_v0  ;;  %2929 = vmatprep.subr.bf16.mxu1 %v9246_v8  ;;  %11528 = vst [vmem:[#allocation83_spill] sm:$0xff] %v9252_v24  ;;  %11529 = vst [vmem:[#allocation84_spill] sm:$0xff] %v9258_v30  ;;  %v9264_v0 = vld [vmem:[%s9958_s1 + $0x3a4] ss:$16 sps:$4 sm:$0xff]   ;;  %v9270_v8 = vld [vmem:[%s9958_s1 + $0x3ac] ss:$16 sps:$4 sm:$0xff]  }
 0xaa3   :  { %11530 = vst [vmem:[#allocation85_spill] sm:$0xff] %v9264_v0  ;;  %11531 = vst [vmem:[#allocation60_spill] sm:$0xff] %v9270_v8 }
 0xaa5   :  { %2848 = vmatpush1.bf16.msra.mxu0 %v9252_v24  ;;  %2930 = vmatpush1.bf16.msra.mxu1 %v9258_v30  ;;  %v9276_v24 = vld [vmem:[%s9958_s1 + $0x3a0] ss:$16 sps:$4 sm:$0xff]   ;;  %v9282_v30 = vld [vmem:[%s9958_s1 + $0x3a8] ss:$16 sps:$4 sm:$0xff]  }
 0xaa6   :  { %2849 = vmatprep.subr.bf16.mxu0 %v9264_v0  ;;  %2931 = vmatprep.subr.bf16.mxu1 %v9270_v8  ;;  %11532 = vst [vmem:[#allocation61_spill] sm:$0xff] %v9276_v24  ;;  %11533 = vst [vmem:[#allocation62_spill] sm:$0xff] %v9282_v30  ;;  %v9288_v0 = vld [vmem:[%s9958_s1 + $0x3c4] ss:$16 sps:$4 sm:$0xff]   ;;  %v9294_v8 = vld [vmem:[%s9958_s1 + $0x3cc] ss:$16 sps:$4 sm:$0xff]  }
 0xaa7   :  { %11534 = vst [vmem:[#allocation63_spill] sm:$0xff] %v9288_v0  ;;  %11535 = vst [vmem:[#allocation64_spill] sm:$0xff] %v9294_v8 }
 0xaa9   :  { %2850 = vmatpush1.bf16.msra.mxu0 %v9276_v24  ;;  %2932 = vmatpush1.bf16.msra.mxu1 %v9282_v30  ;;  %v9300_v24 = vld [vmem:[%s9958_s1 + $0x3c0] ss:$16 sps:$4 sm:$0xff]   ;;  %v9306_v30 = vld [vmem:[%s9958_s1 + $0x3c8] ss:$16 sps:$4 sm:$0xff]  }
 0xaaa   :  { %2851 = vmatprep.subr.bf16.mxu0 %v9288_v0  ;;  %2933 = vmatprep.subr.bf16.mxu1 %v9294_v8  ;;  %11536 = vst [vmem:[#allocation74_spill] sm:$0xff] %v9300_v24  ;;  %11537 = vst [vmem:[#allocation75_spill] sm:$0xff] %v9306_v30  ;;  %v9312_v0 = vld [vmem:[%s9958_s1 + $0x3e4] ss:$16 sps:$4 sm:$0xff]   ;;  %v9318_v8 = vld [vmem:[%s9958_s1 + $0x3ec] ss:$16 sps:$4 sm:$0xff]  }
 0xaab   :  { %11538 = vst [vmem:[#allocation76_spill] sm:$0xff] %v9312_v0  ;;  %11539 = vst [vmem:[#allocation77_spill] sm:$0xff] %v9318_v8 }
 0xaad   :  { %2852 = vmatpush1.bf16.msra.mxu0 %v9300_v24  ;;  %2934 = vmatpush1.bf16.msra.mxu1 %v9306_v30  ;;  %v9324_v24 = vld [vmem:[%s9958_s1 + $0x3e0] ss:$16 sps:$4 sm:$0xff]   ;;  %v9330_v30 = vld [vmem:[%s9958_s1 + $0x3e8] ss:$16 sps:$4 sm:$0xff]  }
 0xaae   :  { %2853 = vmatprep.subr.bf16.mxu0 %v9312_v0  ;;  %2935 = vmatprep.subr.bf16.mxu1 %v9318_v8  ;;  %v2780_v0 = vpack.c.bf16 %v9001_v13, %v9001_v13  ;;  %v11567_v13 = vld [vmem:[#allocation36_spill] sm:$0xff] }
 0xab1   :  { %2854 = vmatpush1.bf16.msra.mxu0 %v9324_v24  ;;  %2936 = vmatpush1.bf16.msra.mxu1 %v9330_v30 }
 0xab2   :  { %3000 = vmatprep.subr.bf16.mxu0 %v11438_v53  ;;  %3082 = vmatprep.subr.bf16.mxu1 %v11439_v6  ;;  %v11540_v53 = vld [vmem:[#allocation15_spill] sm:$0xff]  ;;  %v11541_v6 = vld [vmem:[#allocation16_spill] sm:$0xff] }
 0xab4   :  { %2856 = vmatmul.mubr.bf16.vlgmr.msra.gmra.mrb[36].mxu0 %v2780_v0  ;;  %2938 = vmatmul.mubr.bf16.vlgmr.msra.gmra.mrb[36].mxu1 %v2780_v0  ;;  %v11568_v0 = vld [vmem:[#allocation37_spill] sm:$0xff] }
 0xab5   :  { %3001 = vmatpush1.bf16.msra.mxu0 %v11440_v46  ;;  %3083 = vmatpush1.bf16.msra.mxu1 %v11441_v42  ;;  %v11542_v46 = vld [vmem:[#allocation17_spill] sm:$0xff]  ;;  %v11543_v42 = vld [vmem:[#allocation18_spill] sm:$0xff] }
 0xab6   :  { %3002 = vmatprep.subr.bf16.mxu0 %v11442_v43  ;;  %3084 = vmatprep.subr.bf16.mxu1 %v11443_v5  ;;  %v11544_v43 = vld [vmem:[#allocation19_spill] sm:$0xff]  ;;  %v11545_v5 = vld [vmem:[#allocation20_spill] sm:$0xff] }
 0xab9   :  { %3003 = vmatpush1.bf16.msra.mxu0 %v11444_v26  ;;  %3085 = vmatpush1.bf16.msra.mxu1 %v11445_v25  ;;  %v11546_v26 = vld [vmem:[#allocation86_spill] sm:$0xff]  ;;  %v11547_v25 = vld [vmem:[#allocation87_spill] sm:$0xff] }
 0xaba   :  { %3004 = vmatprep.subr.bf16.mxu0 %v11446_v60  ;;  %3086 = vmatprep.subr.bf16.mxu1 %v11447_v44  ;;  %v11548_v60 = vld [vmem:[#allocation88_spill] sm:$0xff]  ;;  %v11549_v44 = vld [vmem:[#allocation65_spill] sm:$0xff] }
 0xabd   :  { %3005 = vmatpush1.bf16.msra.mxu0 %v11448_v54  ;;  %3087 = vmatpush1.bf16.msra.mxu1 %v11449_v3  ;;  %v11550_v54 = vld [vmem:[#allocation72_spill] sm:$0xff]  ;;  %v11551_v3 = vld [vmem:[#allocation73_spill] sm:$0xff] }
 0xabe   :  { %3006 = vmatprep.subr.bf16.mxu0 %v11450_v14  ;;  %3088 = vmatprep.subr.bf16.mxu1 %v11451_v45  ;;  %v11552_v14 = vld [vmem:[#allocation21_spill] sm:$0xff]  ;;  %v11553_v45 = vld [vmem:[#allocation22_spill] sm:$0xff] }
 0xac1   :  { %3007 = vmatpush1.bf16.msra.mxu0 %v11452_v49  ;;  %3089 = vmatpush1.bf16.msra.mxu1 %v11453_v50  ;;  %v11554_v49 = vld [vmem:[#allocation7_spill] sm:$0xff]  ;;  %v11555_v50 = vld [vmem:[#allocation49_spill] sm:$0xff] }
 0xac2   :  { %3008 = vmatprep.subr.bf16.mxu0 %v11454_v62  ;;  %3090 = vmatprep.subr.bf16.mxu1 %v11455_v41  ;;  %v11556_v62 = vld [vmem:[#allocation25_spill] sm:$0xff]  ;;  %v11557_v41 = vld [vmem:[#allocation26_spill] sm:$0xff] }
 0xac5   :  { %3009 = vmatpush1.bf16.msra.mxu0 %v11456_v63  ;;  %3091 = vmatpush1.bf16.msra.mxu1 %v11457_v1  ;;  %v11558_v63 = vld [vmem:[#allocation27_spill] sm:$0xff]  ;;  %v11559_v1 = vld [vmem:[#allocation28_spill] sm:$0xff] }
 0xac6   :  { %3010 = vmatprep.subr.bf16.mxu0 %v11458_v17  ;;  %3092 = vmatprep.subr.bf16.mxu1 %v11459_v2  ;;  %v11560_v17 = vld [vmem:[#allocation29_spill] sm:$0xff]  ;;  %v11561_v2 = vld [vmem:[#allocation30_spill] sm:$0xff] }
 0xac9   :  { %3011 = vmatpush1.bf16.msra.mxu0 %v11460_v18  ;;  %3093 = vmatpush1.bf16.msra.mxu1 %v11461_v9  ;;  %v11562_v18 = vld [vmem:[#allocation31_spill] sm:$0xff]  ;;  %v11563_v9 = vld [vmem:[#allocation32_spill] sm:$0xff] }
 0xaca   :  { %3012 = vmatprep.subr.bf16.mxu0 %v11462_v29  ;;  %3094 = vmatprep.subr.bf16.mxu1 %v11463_v4  ;;  %v11564_v29 = vld [vmem:[#allocation33_spill] sm:$0xff]  ;;  %v11565_v4 = vld [vmem:[#allocation34_spill] sm:$0xff] }
 0xacd   :  { %3013 = vmatpush1.bf16.msra.mxu0 %v11464_v27  ;;  %3095 = vmatpush1.bf16.msra.mxu1 %v11540_v53  ;;  %v11566_v27 = vld [vmem:[#allocation35_spill] sm:$0xff]  ;;  %v11569_v53 = vld [vmem:[#allocation38_spill] sm:$0xff] }
 0xace   :  { %3014 = vmatprep.subr.bf16.mxu0 %v11541_v6  ;;  %3096 = vmatprep.subr.bf16.mxu1 %v11542_v46  ;;  %v11570_v6 = vld [vmem:[#allocation39_spill] sm:$0xff] }
 0xacf   :  { %v11571_v46 = vld [vmem:[#allocation23_spill] sm:$0xff] }
 0xad1   :  { %3015 = vmatpush1.bf16.msra.mxu0 %v11543_v42  ;;  %3097 = vmatpush1.bf16.msra.mxu1 %v11544_v43  ;;  %v11572_v42 = vld [vmem:[#allocation24_spill] sm:$0xff] }
 0xad2   :  { %3016 = vmatprep.subr.bf16.mxu0 %v11545_v5  ;;  %3098 = vmatprep.subr.bf16.mxu1 %v11546_v26  ;;  %v11573_v43 = vld [vmem:[#allocation8_spill] sm:$0xff]  ;;  %v11575_v26 = vld [vmem:[#allocation41_spill] sm:$0xff] }
 0xad3   :  { %v11574_v5 = vld [vmem:[#allocation40_spill] sm:$0xff] }
 0xad5   :  { %3017 = vmatpush1.bf16.msra.mxu0 %v11547_v25  ;;  %3099 = vmatpush1.bf16.msra.mxu1 %v11548_v60  ;;  %v11576_v25 = vld [vmem:[#allocation42_spill] sm:$0xff]  ;;  %v11577_v60 = vld [vmem:[#allocation43_spill] sm:$0xff] }
 0xad6   :  { %3018 = vmatprep.subr.bf16.mxu0 %v11549_v44  ;;  %3100 = vmatprep.subr.bf16.mxu1 %v11550_v54  ;;  %v11578_v44 = vld [vmem:[#allocation44_spill] sm:$0xff]  ;;  %v4191_v54 = vld [vmem:[%s9960_s3 + $0x24] sm:$0xf] }
 0xad9   :  { %3019 = vmatpush1.bf16.msra.mxu0 %v11551_v3  ;;  %3101 = vmatpush1.bf16.msra.mxu1 %v11552_v14  ;;  %v11579_v3 = vld [vmem:[#allocation9_spill] sm:$0xff] }
 0xada   :  { %3020 = vmatprep.subr.bf16.mxu0 %v11553_v45  ;;  %3102 = vmatprep.subr.bf16.mxu1 %v11554_v49  ;;  %v2956_v14 = vrot.slane %v4191_v54, %v11579_v3  ;;  %v11580_v45 = vld [vmem:[#allocation10_spill] sm:$0xff] }
 0xadb   :  { %v2964_v49 = vrot.slane %v4191_v54, %v11580_v45 }
 0xadd   :  { %3021 = vmatpush1.bf16.msra.mxu0 %v11555_v50  ;;  %3103 = vmatpush1.bf16.msra.mxu1 %v11556_v62 }
 0xade   :  { %3022 = vmatprep.subr.bf16.mxu0 %v11557_v41  ;;  %3104 = vmatprep.subr.bf16.mxu1 %v11558_v63  ;;  %v11581_v41 = vld [vmem:[#allocation11_spill] sm:$0xff] }
 0xadf   :  { %v2960_v63 = vrot.slane %v4191_v54, %v11581_v41 }
 0xae1   :  { %3023 = vmatpush1.bf16.msra.mxu0 %v11559_v1  ;;  %3105 = vmatpush1.bf16.msra.mxu1 %v11560_v17  ;;  %v11582_v1 = vld [vmem:[#allocation12_spill] sm:$0xff] }
 0xae2   :  { %3024 = vmatprep.subr.bf16.mxu0 %v11561_v2  ;;  %3106 = vmatprep.subr.bf16.mxu1 %v11562_v18  ;;  %v2968_v17 = vrot.slane %v4191_v54, %v11582_v1 }
 0xae5   :  { %3025 = vmatpush1.bf16.msra.mxu0 %v11563_v9  ;;  %3107 = vmatpush1.bf16.msra.mxu1 %v11564_v29 }
 0xae6   :  { %3026 = vmatprep.subr.bf16.mxu0 %v11565_v4  ;;  %3108 = vmatprep.subr.bf16.mxu1 %v11566_v27 }
 0xae9   :  { %3027 = vmatpush1.bf16.msra.mxu0 %v11567_v13  ;;  %3109 = vmatpush1.bf16.msra.mxu1 %v11568_v0 }
 0xaea   :  { %3028 = vmatprep.subr.bf16.mxu0 %v11569_v53  ;;  %3110 = vmatprep.subr.bf16.mxu1 %v11570_v6 }
 0xaed   :  { %3029 = vmatpush1.bf16.msra.mxu0 %v11571_v46  ;;  %3111 = vmatpush1.bf16.msra.mxu1 %v11572_v42 }
 0xaee   :  { %3030 = vmatprep.subr.bf16.mxu0 %v11573_v43  ;;  %3112 = vmatprep.subr.bf16.mxu1 %v11574_v5 }
 0xaf1   :  { %3031 = vmatpush1.bf16.msra.mxu0 %v11575_v26  ;;  %3113 = vmatpush1.bf16.msra.mxu1 %v11576_v25 }
 0xaf2   :  { %3041 = vmatprep.subr.bf16.mxu0 %v11577_v60  ;;  %3123 = vmatprep.subr.bf16.mxu1 %v11578_v44 }
 0xb87   :  { %v2857_v50 = vpop.f32.mrb[36].mxu0  ;;  %v2939_v62 = vpop.f32.mrb[36].mxu1 }
 0xb88   :  { %v2946_v2 = vsub.f32 %v2857_v50, %v8988_v51  ;;  %v2948_v18 = vsub.f32 %v2939_v62, %v8991_v47  ;;  %v2859_v9 = vpop.f32.mrb[37].mxu0  ;;  %v2941_v29 = vpop.f32.mrb[37].mxu1 }
 0xb89   :  { %v2947_v4 = vsub.f32 %v2859_v9, %v8994_v48  ;;  %v2949_v27 = vsub.f32 %v2941_v29, %v8997_v7  ;;  %v2861_v13 = vpop.f32.mrb[38].mxu0  ;;  %v2943_v0 = vpop.f32.mrb[38].mxu1  ;;  %v11599_v29 = vld [vmem:[#allocation58_spill] sm:$0xff] }
 0xb8a   :  { %v2973_v53 = vadd.f32 %v2956_v14, %v2946_v2  ;;  %v2975_v6 = vadd.f32 %v2964_v49, %v2948_v18  ;;  %v2862_v25 = vpop.f32.mrb[39].mxu0  ;;  %v2944_v5 = vpop.f32.mrb[39].mxu1  ;;  %v11592_v49 = vld [vmem:[#allocation51_spill] sm:$0xff]  ;;  %v11597_v2 = vld [vmem:[#allocation56_spill] sm:$0xff]  ;;  %v11598_v18 = vld [vmem:[#allocation57_spill] sm:$0xff] }
 0xb8b   :  { %v2974_v42 = vadd.f32 %v2960_v63, %v2947_v4  ;;  %v2976_v41 = vadd.f32 %v2968_v17, %v2949_v27  ;;  %v11594_v63 = vld [vmem:[#allocation53_spill] sm:$0xff]  ;;  %v11596_v17 = vld [vmem:[#allocation55_spill] sm:$0xff]  ;;  %v11601_v27 = vld [vmem:[#allocation66_spill] sm:$0xff] }
 0xb8c   :  { %v2977_v45 = vmul.f32 0.05, %v2973_v53  ;;  %v2979_v54 = vmul.f32 0.05, %v2975_v6  ;;  %v11600_v4 = vld [vmem:[#allocation59_spill] sm:$0xff]  ;;  %v11603_v0 = vld [vmem:[#allocation68_spill] sm:$0xff] }
 0xb8d   :  { %v2978_v1 = vmul.f32 0.05, %v2974_v42  ;;  %v2980_v50 = vmul.f32 0.05, %v2976_v41  ;;  %v11593_v41 = vld [vmem:[#allocation52_spill] sm:$0xff]  ;;  %v11602_v13 = vld [vmem:[#allocation67_spill] sm:$0xff] }
 0xb8e   :  { %v9413_v62 = vadd.f32 %v2977_v45, %v8988_v51  ;;  %v9416_v3 = vadd.f32 %v2979_v54, %v8991_v47  ;;  %v11591_v45 = vld [vmem:[#allocation50_spill] sm:$0xff]  ;;  %v11604_v53 = vld [vmem:[#allocation69_spill] sm:$0xff]  ;;  %v11606_v54 = vld [vmem:[#allocation71_spill] sm:$0xff] }
 0xb8f   :  { %v9419_v9 = vadd.f32 %v2978_v1, %v8994_v48  ;;  %v9422_v14 = vadd.f32 %v2980_v50, %v8997_v7  ;;  %v11595_v1 = vld [vmem:[#allocation54_spill] sm:$0xff]  ;;  %v11607_v50 = vld [vmem:[#allocation83_spill] sm:$0xff] }
 0xb90   :  { %v9425_v5 = vmax.f32 %v9413_v62, 0.0  ;;  %v9428_v25 = vmax.f32 %v9416_v3, 0.0  ;;  %v11605_v6 = vld [vmem:[#allocation70_spill] sm:$0xff] }
 0xb91   :  { %v9431_v42 = vmax.f32 %v9419_v9, 0.0  ;;  %v9434_v51 = vmax.f32 %v9422_v14, 0.0 }
 0xb92   :  { %11583 = vst [vmem:[#allocation78_spill] sm:$0xff] %v9425_v5  ;;  %11584 = vst [vmem:[#allocation79_spill] sm:$0xff] %v9428_v25  ;;  %v2996_v48 = vpack.c.bf16 %v9425_v5, %v9425_v5 }
 0xb93   :  { %11585 = vst [vmem:[#allocation80_spill] sm:$0xff] %v9431_v42  ;;  %11586 = vst [vmem:[#allocation81_spill] sm:$0xff] %v9434_v51  ;;  %v2997_v47 = vpack.c.bf16 %v9431_v42, %v9431_v42  ;;  %v2999_v7 = vpack.c.bf16 %v9434_v51, %v9434_v51 }
 0xb94   :  { %2992 = vst [vmem:[#allocation4 + $0x140] sm:$0xff] %v9425_v5  ;;  %2994 = vst [vmem:[#allocation4 + $0x150] sm:$0xff] %v9428_v25  ;;  %v11611_v5 = vld [vmem:[#allocation61_spill] sm:$0xff] }
 0xb95   :  { %2993 = vst [vmem:[#allocation4 + $0x148] sm:$0xff] %v9431_v42  ;;  %2995 = vst [vmem:[#allocation4 + $0x158] sm:$0xff] %v9434_v51  ;;  %3032 = vmatprep.mubr.bf16.mxu0 %v2997_v47  ;;  %3114 = vmatprep.mubr.bf16.mxu1 %v2997_v47  ;;  %v11608_v47 = vld [vmem:[#allocation84_spill] sm:$0xff]  ;;  %v11612_v51 = vld [vmem:[#allocation62_spill] sm:$0xff] }
 0xb96   :  { %3033 = vmatmul.mubr.bf16.vlgmr.msra.gmra.mrb[40].mxu0 %v2996_v48  ;;  %3115 = vmatmul.mubr.bf16.vlgmr.msra.gmra.mrb[40].mxu1 %v2996_v48  ;;  %v11609_v48 = vld [vmem:[#allocation85_spill] sm:$0xff]  ;;  %v11613_v42 = vld [vmem:[#allocation63_spill] sm:$0xff] }
 0xb97   :  { %3042 = vmatpush1.bf16.msra.mxu0 %v8764_v28  ;;  %3124 = vmatpush1.bf16.msra.mxu1 %v8770_v20  ;;  %v11587_v20 = vld [vmem:[#allocation45_spill] sm:$0xff] }
 0xb98   :  { %3073 = vmatprep.mubr.bf16.mxu0 %v2999_v7  ;;  %3155 = vmatprep.mubr.bf16.mxu1 %v2999_v7  ;;  %v11610_v7 = vld [vmem:[#allocation60_spill] sm:$0xff] }
 0xb99   :  { %3043 = vmatprep.subr.bf16.mxu0 %v8776_v56  ;;  %3125 = vmatprep.subr.bf16.mxu1 %v8782_v22  ;;  %v11588_v22 = vld [vmem:[#allocation46_spill] sm:$0xff] }
 0xb9b   :  { %3044 = vmatpush1.bf16.msra.mxu0 %v8788_v61  ;;  %3126 = vmatpush1.bf16.msra.mxu1 %v8794_v12  ;;  %v11589_v12 = vld [vmem:[#allocation47_spill] sm:$0xff] }
 0xb9c   :  { %3045 = vmatprep.subr.bf16.mxu0 %v8800_v11  ;;  %3127 = vmatprep.subr.bf16.mxu1 %v8806_v10  ;;  %v11590_v10 = vld [vmem:[#allocation48_spill] sm:$0xff] }
 0xb9f   :  { %3046 = vmatpush1.bf16.msra.mxu0 %v8812_v57  ;;  %3128 = vmatpush1.bf16.msra.mxu1 %v9018_v16 }
 0xba0   :  { %3047 = vmatprep.subr.bf16.mxu0 %v9024_v15  ;;  %3129 = vmatprep.subr.bf16.mxu1 %v9030_v21 }
 0xba3   :  { %3048 = vmatpush1.bf16.msra.mxu0 %v9036_v58  ;;  %3130 = vmatpush1.bf16.msra.mxu1 %v9042_v31 }
 0xba4   :  { %3049 = vmatprep.subr.bf16.mxu0 %v9048_v32  ;;  %3131 = vmatprep.subr.bf16.mxu1 %v9054_v55 }
 0xba7   :  { %3050 = vmatpush1.bf16.msra.mxu0 %v9060_v34  ;;  %3132 = vmatpush1.bf16.msra.mxu1 %v9066_v35 }
 0xba8   :  { %3051 = vmatprep.subr.bf16.mxu0 %v9072_v36  ;;  %3133 = vmatprep.subr.bf16.mxu1 %v9078_v37 }
 0xbab   :  { %3052 = vmatpush1.bf16.msra.mxu0 %v9084_v38  ;;  %3134 = vmatpush1.bf16.msra.mxu1 %v9090_v39 }
 0xbac   :  { %3053 = vmatprep.subr.bf16.mxu0 %v9096_v40  ;;  %3135 = vmatprep.subr.bf16.mxu1 %v9102_v59 }
 0xbaf   :  { %3054 = vmatpush1.bf16.msra.mxu0 %v9108_v52  ;;  %3136 = vmatpush1.bf16.msra.mxu1 %v9114_v33 }
 0xbb0   :  { %3055 = vmatprep.subr.bf16.mxu0 %v9120_v23  ;;  %3137 = vmatprep.subr.bf16.mxu1 %v9126_v19 }
 0xbb3   :  { %3056 = vmatpush1.bf16.msra.mxu0 %v11587_v20  ;;  %3138 = vmatpush1.bf16.msra.mxu1 %v11588_v22 }
 0xbb4   :  { %3057 = vmatprep.subr.bf16.mxu0 %v11589_v12  ;;  %3139 = vmatprep.subr.bf16.mxu1 %v11590_v10 }
 0xbb7   :  { %3058 = vmatpush1.bf16.msra.mxu0 %v11591_v45  ;;  %3140 = vmatpush1.bf16.msra.mxu1 %v11592_v49 }
 0xbb8   :  { %3059 = vmatprep.subr.bf16.mxu0 %v11593_v41  ;;  %3141 = vmatprep.subr.bf16.mxu1 %v11594_v63 }
 0xbbb   :  { %3060 = vmatpush1.bf16.msra.mxu0 %v11595_v1  ;;  %3142 = vmatpush1.bf16.msra.mxu1 %v11596_v17 }
 0xbbc   :  { %3061 = vmatprep.subr.bf16.mxu0 %v11597_v2  ;;  %3143 = vmatprep.subr.bf16.mxu1 %v11598_v18 }
 0xbbf   :  { %3062 = vmatpush1.bf16.msra.mxu0 %v11599_v29  ;;  %3144 = vmatpush1.bf16.msra.mxu1 %v11600_v4  ;;  %v11616_v4 = vld [vmem:[#allocation75_spill] sm:$0xff] }
 0xbc0   :  { %3063 = vmatprep.subr.bf16.mxu0 %v11601_v27  ;;  %3145 = vmatprep.subr.bf16.mxu1 %v11602_v13  ;;  %v11614_v13 = vld [vmem:[#allocation64_spill] sm:$0xff] }
 0xbc3   :  { %3064 = vmatpush1.bf16.msra.mxu0 %v11603_v0  ;;  %3146 = vmatpush1.bf16.msra.mxu1 %v11604_v53  ;;  %v11615_v53 = vld [vmem:[#allocation74_spill] sm:$0xff] }
 0xbc4   :  { %3065 = vmatprep.subr.bf16.mxu0 %v11605_v6  ;;  %3147 = vmatprep.subr.bf16.mxu1 %v11606_v54  ;;  %v11617_v54 = vld [vmem:[#allocation76_spill] sm:$0xff] }
 0xbc7   :  { %3066 = vmatpush1.bf16.msra.mxu0 %v11607_v50  ;;  %3148 = vmatpush1.bf16.msra.mxu1 %v11608_v47 }
 0xbc8   :  { %3067 = vmatprep.subr.bf16.mxu0 %v11609_v48  ;;  %3149 = vmatprep.subr.bf16.mxu1 %v11610_v7  ;;  %v2998_v7 = vpack.c.bf16 %v9428_v25, %v9428_v25  ;;  %v5053_v25 = vld [vmem:[%s9958_s1 + $0x24] ss:$16 sps:$4 sm:$0xff]  }
 0xbcb   :  { %3068 = vmatpush1.bf16.msra.mxu0 %v11611_v5  ;;  %3150 = vmatpush1.bf16.msra.mxu1 %v11612_v51  ;;  %v5051_v51 = vld [vmem:[%s9958_s1 + $0x4] ss:$16 sps:$4 sm:$0xff]  }
 0xbcc   :  { %3069 = vmatprep.subr.bf16.mxu0 %v11613_v42  ;;  %3151 = vmatprep.subr.bf16.mxu1 %v11614_v13 }
 0xbcf   :  { %3070 = vmatpush1.bf16.msra.mxu0 %v11615_v53  ;;  %3152 = vmatpush1.bf16.msra.mxu1 %v11616_v4 }
 0xbd0   :  { %3071 = vmatprep.subr.bf16.mxu0 %v11617_v54  ;;  %3153 = vmatprep.subr.bf16.mxu1 %v9318_v8  ;;  %v5052_v8 = vld [vmem:[%s9958_s1] ss:$16 sps:$4 sm:$0xff]  }
 0xbd3   :  { %3072 = vmatpush1.bf16.msra.mxu0 %v9324_v24  ;;  %3154 = vmatpush1.bf16.msra.mxu1 %v9330_v30 }
 0xbd4   :  { %3218 = vmatprep.subr.bf16.mxu0 %v5051_v51  ;;  %3259 = vmatprep.subr.bf16.mxu1 %v11577_v60  ;;  %v5054_v60 = vld [vmem:[%s9958_s1 + $0x20] ss:$16 sps:$4 sm:$0xff]   ;;  %v5071_v51 = vld [vmem:[%s9958_s1 + $0x144] ss:$16 sps:$4 sm:$0xff]  }
 0xbd6   :  { %3074 = vmatmul.mubr.bf16.vlgmr.msra.gmra.mrb[40].mxu0 %v2998_v7  ;;  %3156 = vmatmul.mubr.bf16.vlgmr.msra.gmra.mrb[40].mxu1 %v2998_v7 }
 0xbd7   :  { %3219 = vmatpush1.bf16.msra.mxu0 %v5052_v8  ;;  %3260 = vmatpush1.bf16.msra.mxu1 %v8764_v28  ;;  %v5055_v8 = vld [vmem:[%s9958_s1 + $0x44] ss:$16 sps:$4 sm:$0xff]   ;;  %v5056_v28 = vld [vmem:[%s9958_s1 + $0x40] ss:$16 sps:$4 sm:$0xff]  }
 0xbd8   :  { %3220 = vmatprep.subr.bf16.mxu0 %v5053_v25  ;;  %3261 = vmatprep.subr.bf16.mxu1 %v8776_v56  ;;  %v5057_v56 = vld [vmem:[%s9958_s1 + $0x64] ss:$16 sps:$4 sm:$0xff]   ;;  %v5070_v25 = vld [vmem:[%s9958_s1 + $0x120] ss:$16 sps:$4 sm:$0xff]  }
 0xbdb   :  { %3221 = vmatpush1.bf16.msra.mxu0 %v5054_v60  ;;  %3262 = vmatpush1.bf16.msra.mxu1 %v8788_v61  ;;  %v5058_v61 = vld [vmem:[%s9958_s1 + $0x60] ss:$16 sps:$4 sm:$0xff]  }
 0xbdc   :  { %3222 = vmatprep.subr.bf16.mxu0 %v5055_v8  ;;  %3263 = vmatprep.subr.bf16.mxu1 %v8800_v11  ;;  %v5059_v11 = vld [vmem:[%s9958_s1 + $0x84] ss:$16 sps:$4 sm:$0xff]  }
 0xbdf   :  { %3223 = vmatpush1.bf16.msra.mxu0 %v5056_v28  ;;  %3264 = vmatpush1.bf16.msra.mxu1 %v8812_v57  ;;  %v5060_v57 = vld [vmem:[%s9958_s1 + $0x80] ss:$16 sps:$4 sm:$0xff]  }
 0xbe0   :  { %3224 = vmatprep.subr.bf16.mxu0 %v5057_v56  ;;  %3265 = vmatprep.subr.bf16.mxu1 %v9024_v15  ;;  %v5061_v15 = vld [vmem:[%s9958_s1 + $0xa4] ss:$16 sps:$4 sm:$0xff]  }
 0xbe3   :  { %3225 = vmatpush1.bf16.msra.mxu0 %v5058_v61  ;;  %3266 = vmatpush1.bf16.msra.mxu1 %v9036_v58  ;;  %v5062_v58 = vld [vmem:[%s9958_s1 + $0xa0] ss:$16 sps:$4 sm:$0xff]  }
 0xbe4   :  { %3226 = vmatprep.subr.bf16.mxu0 %v5059_v11  ;;  %3267 = vmatprep.subr.bf16.mxu1 %v9048_v32  ;;  %v5063_v32 = vld [vmem:[%s9958_s1 + $0xc4] ss:$16 sps:$4 sm:$0xff]  }
 0xbe7   :  { %3227 = vmatpush1.bf16.msra.mxu0 %v5060_v57  ;;  %3268 = vmatpush1.bf16.msra.mxu1 %v9060_v34  ;;  %v5064_v34 = vld [vmem:[%s9958_s1 + $0xc0] ss:$16 sps:$4 sm:$0xff]  }
 0xbe8   :  { %3228 = vmatprep.subr.bf16.mxu0 %v5061_v15  ;;  %3269 = vmatprep.subr.bf16.mxu1 %v9072_v36  ;;  %v5065_v36 = vld [vmem:[%s9958_s1 + $0xe4] ss:$16 sps:$4 sm:$0xff]  }
 0xbeb   :  { %3229 = vmatpush1.bf16.msra.mxu0 %v5062_v58  ;;  %3270 = vmatpush1.bf16.msra.mxu1 %v9084_v38  ;;  %v5066_v38 = vld [vmem:[%s9958_s1 + $0xe0] ss:$16 sps:$4 sm:$0xff]  }
 0xbec   :  { %3230 = vmatprep.subr.bf16.mxu0 %v5063_v32  ;;  %3271 = vmatprep.subr.bf16.mxu1 %v9096_v40  ;;  %v5067_v40 = vld [vmem:[%s9958_s1 + $0x104] ss:$16 sps:$4 sm:$0xff]  }
 0xbef   :  { %3231 = vmatpush1.bf16.msra.mxu0 %v5064_v34  ;;  %3272 = vmatpush1.bf16.msra.mxu1 %v9108_v52  ;;  %v5068_v52 = vld [vmem:[%s9958_s1 + $0x100] ss:$16 sps:$4 sm:$0xff]  }
 0xbf0   :  { %3232 = vmatprep.subr.bf16.mxu0 %v5065_v36  ;;  %3273 = vmatprep.subr.bf16.mxu1 %v9120_v23  ;;  %v5069_v23 = vld [vmem:[%s9958_s1 + $0x124] ss:$16 sps:$4 sm:$0xff]  }
 0xbf3   :  { %3233 = vmatpush1.bf16.msra.mxu0 %v5066_v38  ;;  %3274 = vmatpush1.bf16.msra.mxu1 %v11587_v20  ;;  %v5072_v20 = vld [vmem:[%s9958_s1 + $0x140] ss:$16 sps:$4 sm:$0xff]  }
 0xbf4   :  { %3234 = vmatprep.subr.bf16.mxu0 %v5067_v40  ;;  %3275 = vmatprep.subr.bf16.mxu1 %v11589_v12  ;;  %v5073_v12 = vld [vmem:[%s9958_s1 + $0x164] ss:$16 sps:$4 sm:$0xff]  }
 0xbf7   :  { %3235 = vmatpush1.bf16.msra.mxu0 %v5068_v52  ;;  %3276 = vmatpush1.bf16.msra.mxu1 %v11591_v45  ;;  %v5074_v45 = vld [vmem:[%s9958_s1 + $0x160] ss:$16 sps:$4 sm:$0xff]  }
 0xbf8   :  { %3236 = vmatprep.subr.bf16.mxu0 %v5069_v23  ;;  %3277 = vmatprep.subr.bf16.mxu1 %v11593_v41  ;;  %v5075_v41 = vld [vmem:[%s9958_s1 + $0x184] ss:$16 sps:$4 sm:$0xff]  }
 0xbfb   :  { %3237 = vmatpush1.bf16.msra.mxu0 %v5070_v25  ;;  %3278 = vmatpush1.bf16.msra.mxu1 %v11595_v1  ;;  %v5076_v1 = vld [vmem:[%s9958_s1 + $0x180] ss:$16 sps:$4 sm:$0xff]  }
 0xbfc   :  { %3238 = vmatprep.subr.bf16.mxu0 %v5071_v51  ;;  %3279 = vmatprep.subr.bf16.mxu1 %v11597_v2  ;;  %v5077_v2 = vld [vmem:[%s9958_s1 + $0x1a4] ss:$16 sps:$4 sm:$0xff]  }
 0xbff   :  { %3239 = vmatpush1.bf16.msra.mxu0 %v5072_v20  ;;  %3280 = vmatpush1.bf16.msra.mxu1 %v11599_v29  ;;  %v5078_v29 = vld [vmem:[%s9958_s1 + $0x1a0] ss:$16 sps:$4 sm:$0xff]  }
 0xc00   :  { %3240 = vmatprep.subr.bf16.mxu0 %v5073_v12  ;;  %3281 = vmatprep.subr.bf16.mxu1 %v11601_v27  ;;  %v5079_v27 = vld [vmem:[%s9958_s1 + $0x1c4] ss:$16 sps:$4 sm:$0xff]  }
 0xc03   :  { %3241 = vmatpush1.bf16.msra.mxu0 %v5074_v45  ;;  %3282 = vmatpush1.bf16.msra.mxu1 %v11603_v0 }
 0xc04   :  { %3242 = vmatprep.subr.bf16.mxu0 %v5075_v41  ;;  %3283 = vmatprep.subr.bf16.mxu1 %v11605_v6 }
 0xc07   :  { %3243 = vmatpush1.bf16.msra.mxu0 %v5076_v1  ;;  %3284 = vmatpush1.bf16.msra.mxu1 %v11607_v50 }
 0xc08   :  { %3244 = vmatprep.subr.bf16.mxu0 %v5077_v2  ;;  %3285 = vmatprep.subr.bf16.mxu1 %v11609_v48 }
 0xc0b   :  { %3245 = vmatpush1.bf16.msra.mxu0 %v5078_v29  ;;  %3286 = vmatpush1.bf16.msra.mxu1 %v11611_v5  ;;  %v5080_v5 = vld [vmem:[%s9958_s1 + $0xc] ss:$16 sps:$4 sm:$0xff]   ;;  %v5081_v29 = vld [vmem:[%s9958_s1 + $0x8] ss:$16 sps:$4 sm:$0xff]  }
 0xc0c   :  { %3246 = vmatprep.subr.bf16.mxu0 %v5079_v27  ;;  %3287 = vmatprep.subr.bf16.mxu1 %v11613_v42  ;;  %v11618_v42 = vld [vmem:[#allocation9_spill] sm:$0xff]  ;;  %v5082_v27 = vld [vmem:[%s9958_s1 + $0x208] ss:$16 sps:$4 sm:$0xff]  }
 0xc0f   :  { %3247 = vmatpush1.bf16.msra.mxu0 %v11571_v46  ;;  %3288 = vmatpush1.bf16.msra.mxu1 %v11615_v53  ;;  %v4192_v46 = vld [vmem:[%s9960_s3 + $0x28] sm:$0xf] }
 0xc10   :  { %3248 = vmatprep.subr.bf16.mxu0 %v11573_v43  ;;  %3289 = vmatprep.subr.bf16.mxu1 %v11617_v54  ;;  %v3174_v0 = vrot.slane %v4192_v46, %v11618_v42  ;;  %v11619_v43 = vld [vmem:[#allocation10_spill] sm:$0xff] }
 0xc11   :  { %v3182_v53 = vrot.slane %v4192_v46, %v11619_v43  ;;  %v5085_v42 = vld [vmem:[%s9958_s1 + $0x28] ss:$16 sps:$4 sm:$0xff]   ;;  %v5087_v43 = vld [vmem:[%s9958_s1 + $0x4c] ss:$16 sps:$4 sm:$0xff]  }
 0xc13   :  { %3249 = vmatpush1.bf16.msra.mxu0 %v11575_v26  ;;  %3290 = vmatpush1.bf16.msra.mxu1 %v9324_v24  ;;  %v11620_v26 = vld [vmem:[#allocation11_spill] sm:$0xff]  ;;  %v11621_v24 = vld [vmem:[#allocation12_spill] sm:$0xff] }
 0xc14   :  { %3300 = vmatprep.subr.bf16.mxu0 %v5080_v5  ;;  %3341 = vmatprep.subr.bf16.mxu1 %v11578_v44  ;;  %v3178_v50 = vrot.slane %v4192_v46, %v11620_v26  ;;  %v3186_v48 = vrot.slane %v4192_v46, %v11621_v24  ;;  %v5083_v5 = vld [vmem:[%s9958_s1 + $0x2c] ss:$16 sps:$4 sm:$0xff]   ;;  %v5091_v26 = vld [vmem:[%s9958_s1 + $0x68] ss:$16 sps:$4 sm:$0xff]  }
 0xc15   :  { %v5084_v46 = vld [vmem:[%s9958_s1 + $0x22c] ss:$16 sps:$4 sm:$0xff]  }
 0xc16   :  { %v5106_v24 = vld [vmem:[%s9958_s1 + $0x16c] ss:$16 sps:$4 sm:$0xff]  }
 0xca9   :  { %v3075_v6 = vpop.f32.mrb[40].mxu0  ;;  %v3157_v54 = vpop.f32.mrb[40].mxu1 }
 0xcaa   :  { %v3164_v7 = vsub.f32 %v3075_v6, %v9413_v62  ;;  %v3166_v60 = vsub.f32 %v3157_v54, %v9416_v3  ;;  %v3077_v8 = vpop.f32.mrb[41].mxu0  ;;  %v3159_v44 = vpop.f32.mrb[41].mxu1  ;;  %v5089_v6 = vld [vmem:[%s9958_s1 + $0x48] ss:$16 sps:$4 sm:$0xff]   ;;  %v5090_v54 = vld [vmem:[%s9958_s1 + $0x6c] ss:$16 sps:$4 sm:$0xff]  }
 0xcab   :  { %v3165_v28 = vsub.f32 %v3077_v8, %v9419_v9  ;;  %v3167_v56 = vsub.f32 %v3159_v44, %v9422_v14  ;;  %v3079_v61 = vpop.f32.mrb[42].mxu0  ;;  %v3161_v11 = vpop.f32.mrb[42].mxu1  ;;  %v5109_v8 = vld [vmem:[%s9958_s1 + $0x188] ss:$16 sps:$4 sm:$0xff]   ;;  %v5110_v44 = vld [vmem:[%s9958_s1 + $0x1ac] ss:$16 sps:$4 sm:$0xff]  }
 0xcac   :  { %v3191_v57 = vadd.f32 %v3174_v0, %v3164_v7  ;;  %v3193_v15 = vadd.f32 %v3182_v53, %v3166_v60  ;;  %v3080_v58 = vpop.f32.mrb[43].mxu0  ;;  %v3162_v32 = vpop.f32.mrb[43].mxu1  ;;  %v5086_v0 = vld [vmem:[%s9958_s1 + $0x228] ss:$16 sps:$4 sm:$0xff]   ;;  %v5088_v53 = vld [vmem:[%s9958_s1 + $0x24c] ss:$16 sps:$4 sm:$0xff]  }
 0xcad   :  { %v3192_v34 = vadd.f32 %v3178_v50, %v3165_v28  ;;  %v3194_v36 = vadd.f32 %v3186_v48, %v3167_v56  ;;  %v5092_v50 = vld [vmem:[%s9958_s1 + $0x8c] ss:$16 sps:$4 sm:$0xff]   ;;  %v5107_v48 = vld [vmem:[%s9958_s1 + $0x168] ss:$16 sps:$4 sm:$0xff]   ;;  %v11625_v60 = vld [vmem:[#allocation71_spill] sm:$0xff] }
 0xcae   :  { %v3195_v38 = vmul.f32 0.05, %v3191_v57  ;;  %v3197_v40 = vmul.f32 0.05, %v3193_v15  ;;  %v5108_v7 = vld [vmem:[%s9958_s1 + $0x18c] ss:$16 sps:$4 sm:$0xff]  }
 0xcaf   :  { %v3196_v52 = vmul.f32 0.05, %v3192_v34  ;;  %v3198_v23 = vmul.f32 0.05, %v3194_v36  ;;  %v11626_v28 = vld [vmem:[#allocation60_spill] sm:$0xff]  ;;  %v11627_v61 = vld [vmem:[#allocation62_spill] sm:$0xff] }
 0xcb0   :  { %v3199_v25 = vadd.f32 %v3195_v38, %v9413_v62  ;;  %v3201_v51 = vadd.f32 %v3197_v40, %v9416_v3  ;;  %v5111_v56 = vld [vmem:[%s9958_s1 + $0x1a8] ss:$16 sps:$4 sm:$0xff]   ;;  %v5112_v11 = vld [vmem:[%s9958_s1 + $0x1cc] ss:$16 sps:$4 sm:$0xff]   ;;  %v11630_v15 = vld [vmem:[#allocation77_spill] sm:$0xff] }
 0xcb1   :  { %v3200_v20 = vadd.f32 %v3196_v52, %v9419_v9  ;;  %v3202_v12 = vadd.f32 %v3198_v23, %v9422_v14  ;;  %v11629_v57 = vld [vmem:[#allocation40_spill] sm:$0xff]  ;;  %v4635_v58 = vld [vmem:[%s9959_s2 + $0x40] sm:$0xff]   ;;  %v11631_v38 = vld [vmem:[#allocation42_spill] sm:$0xff] }
 0xcb2   :  { %v9651_v45 = vmax.f32 %v3199_v25, 0.0  ;;  %v9653_v41 = vmax.f32 %v3201_v51, 0.0  ;;  %v4636_v32 = vld [vmem:[%s9959_s2 + $0xc0] sm:$0xff]   ;;  %v3426_v34 = vld [vmem:[#allocation4 + $0x8] sm:$0xff]  ;;  %v3432_v40 = vld [vmem:[#allocation4 + $0x38] sm:$0xff] }
 0xcb3   :  { %v9655_v1 = vmax.f32 %v3200_v20, 0.0  ;;  %v9657_v2 = vmax.f32 %v3202_v12, 0.0  ;;  %v3430_v36 = vld [vmem:[#allocation4 + $0x28] sm:$0xff]  ;;  %v4638_v52 = vld [vmem:[%s9959_s2 + $0x80] sm:$0xff]  }
 0xcb4   :  { %3210 = vst [vmem:[#allocation4 + $0x160] sm:$0xff] %v9651_v45  ;;  %3212 = vst [vmem:[#allocation4 + $0x170] sm:$0xff] %v9653_v41  ;;  %v9669_v9 = vpack.c.bf16 %v9651_v45, %v9651_v45  ;;  %v9673_v14 = vpack.c.bf16 %v9653_v41, %v9653_v41  ;;  %v3474_v23 = vpack.c.bf16 %v3430_v36, %v3426_v34  ;;  %v4639_v25 = vld [vmem:[%s9959_s2 + $0x48] sm:$0xff]   ;;  %v3445_v36 = vld [vmem:[#allocation4 + $0xa0] sm:$0xff] }
 0xcb5   :  { %3211 = vst [vmem:[#allocation4 + $0x168] sm:$0xff] %v9655_v1  ;;  %3213 = vst [vmem:[#allocation4 + $0x178] sm:$0xff] %v9657_v2  ;;  %v3215_v3 = vpack.c.bf16 %v9655_v1, %v9655_v1  ;;  %v3217_v62 = vpack.c.bf16 %v9657_v2, %v9657_v2  ;;  %v4641_v20 = vld [vmem:[%s9959_s2 + $0x8] sm:$0xff]  }
 0xcb6   :  { %v4642_v12 = vld [vmem:[%s9959_s2 + $0x88] sm:$0xff]  }
 0xcb7   :  { %3250 = vmatprep.mubr.bf16.mxu0 %v3215_v3  ;;  %3291 = vmatprep.mubr.bf16.mxu1 %v3217_v62 }
 0xcb8   :  { %3251 = vmatmul.mubr.bf16.vlgmr.msra.gmra.mrb[44].mxu0 %v9669_v9  ;;  %3292 = vmatmul.mubr.bf16.vlgmr.msra.gmra.mrb[44].mxu1 %v9673_v14 }
 0xcb9   :  { %3301 = vmatpush1.bf16.msra.mxu0 %v5081_v29  ;;  %3342 = vmatpush1.bf16.msra.mxu1 %v5082_v27  ;;  %v4647_v29 = vld [vmem:[%s9959_s2 + $0x58] sm:$0xff]  }
 0xcba   :  { %3332 = vmatprep.mubr.bf16.mxu0 %v3215_v3  ;;  %3373 = vmatprep.mubr.bf16.mxu1 %v3217_v62  ;;  %v4643_v3 = vld [vmem:[%s9959_s2 + $0x50] sm:$0xff]   ;;  %v4648_v27 = vld [vmem:[%s9959_s2 + $0xd8] sm:$0xff]  }
 0xcbb   :  { %3302 = vmatprep.subr.bf16.mxu0 %v5083_v5  ;;  %3343 = vmatprep.subr.bf16.mxu1 %v5084_v46  ;;  %v4644_v62 = vld [vmem:[%s9959_s2 + $0xd0] sm:$0xff]   ;;  %v4649_v5 = vld [vmem:[%s9959_s2 + $0x18] sm:$0xff]  }
 0xcbc   :  { %v4650_v46 = vld [vmem:[%s9959_s2 + $0x98] sm:$0xff]  }
 0xcbd   :  { %3303 = vmatpush1.bf16.msra.mxu0 %v5085_v42  ;;  %3344 = vmatpush1.bf16.msra.mxu1 %v5086_v0  ;;  %v4651_v42 = vld [vmem:[%s9959_s2 + $0x60] sm:$0xff]  }
 0xcbe   :  { %3304 = vmatprep.subr.bf16.mxu0 %v5087_v43  ;;  %3345 = vmatprep.subr.bf16.mxu1 %v5088_v53  ;;  %v4652_v0 = vld [vmem:[%s9959_s2 + $0xe0] sm:$0xff]  }
 0xcbf   :  { %v4653_v43 = vld [vmem:[%s9959_s2 + $0x20] sm:$0xff]  }
 0xcc0   :  { %v4654_v53 = vld [vmem:[%s9959_s2 + $0xa0] sm:$0xff]  }
 0xcc1   :  { %3305 = vmatpush1.bf16.msra.mxu0 %v5089_v6  ;;  %3346 = vmatpush1.bf16.msra.mxu1 %v9018_v16  ;;  %v5093_v16 = vld [vmem:[%s9958_s1 + $0x88] ss:$16 sps:$4 sm:$0xff]  }
 0xcc2   :  { %3306 = vmatprep.subr.bf16.mxu0 %v5090_v54  ;;  %3347 = vmatprep.subr.bf16.mxu1 %v9030_v21  ;;  %v5094_v21 = vld [vmem:[%s9958_s1 + $0xac] ss:$16 sps:$4 sm:$0xff]  }
 0xcc3   :  { %v4655_v6 = vld [vmem:[%s9959_s2 + $0x68] sm:$0xff]  }
 0xcc4   :  { %v4656_v54 = vld [vmem:[%s9959_s2 + $0xe8] sm:$0xff]  }
 0xcc5   :  { %3307 = vmatpush1.bf16.msra.mxu0 %v5091_v26  ;;  %3348 = vmatpush1.bf16.msra.mxu1 %v9042_v31  ;;  %v5095_v31 = vld [vmem:[%s9958_s1 + $0xa8] ss:$16 sps:$4 sm:$0xff]  }
 0xcc6   :  { %3308 = vmatprep.subr.bf16.mxu0 %v5092_v50  ;;  %3349 = vmatprep.subr.bf16.mxu1 %v9054_v55  ;;  %v5096_v55 = vld [vmem:[%s9958_s1 + $0xcc] ss:$16 sps:$4 sm:$0xff]  }
 0xcc7   :  { %v4657_v26 = vld [vmem:[%s9959_s2 + $0x28] sm:$0xff]  }
 0xcc8   :  { %v4658_v50 = vld [vmem:[%s9959_s2 + $0xa8] sm:$0xff]  }
 0xcc9   :  { %3309 = vmatpush1.bf16.msra.mxu0 %v5093_v16  ;;  %3350 = vmatpush1.bf16.msra.mxu1 %v9066_v35  ;;  %v5097_v35 = vld [vmem:[%s9958_s1 + $0xc8] ss:$16 sps:$4 sm:$0xff]   ;;  %v4659_v16 = vld [vmem:[%s9959_s2 + $0x70] sm:$0xff]  }
 0xcca   :  { %3310 = vmatprep.subr.bf16.mxu0 %v5094_v21  ;;  %3351 = vmatprep.subr.bf16.mxu1 %v9078_v37  ;;  %v5098_v37 = vld [vmem:[%s9958_s1 + $0xec] ss:$16 sps:$4 sm:$0xff]   ;;  %v4660_v21 = vld [vmem:[%s9959_s2 + $0xf0] sm:$0xff]  }
 0xccd   :  { %3311 = vmatpush1.bf16.msra.mxu0 %v5095_v31  ;;  %3352 = vmatpush1.bf16.msra.mxu1 %v9090_v39  ;;  %v5099_v39 = vld [vmem:[%s9958_s1 + $0xe8] ss:$16 sps:$4 sm:$0xff]   ;;  %v4661_v31 = vld [vmem:[%s9959_s2 + $0x30] sm:$0xff]  }
 0xcce   :  { %3312 = vmatprep.subr.bf16.mxu0 %v5096_v55  ;;  %3353 = vmatprep.subr.bf16.mxu1 %v9102_v59  ;;  %v5100_v59 = vld [vmem:[%s9958_s1 + $0x10c] ss:$16 sps:$4 sm:$0xff]   ;;  %v4662_v55 = vld [vmem:[%s9959_s2 + $0xb0] sm:$0xff]  }
 0xcd1   :  { %3313 = vmatpush1.bf16.msra.mxu0 %v5097_v35  ;;  %3354 = vmatpush1.bf16.msra.mxu1 %v9114_v33  ;;  %v5101_v33 = vld [vmem:[%s9958_s1 + $0x108] ss:$16 sps:$4 sm:$0xff]  }
 0xcd2   :  { %3314 = vmatprep.subr.bf16.mxu0 %v5098_v37  ;;  %3355 = vmatprep.subr.bf16.mxu1 %v9126_v19  ;;  %v5102_v19 = vld [vmem:[%s9958_s1 + $0x12c] ss:$16 sps:$4 sm:$0xff]  }
 0xcd3   :  { %v4663_v35 = vld [vmem:[%s9959_s2 + $0x78] sm:$0xff]  }
 0xcd4   :  { %v4664_v37 = vld [vmem:[%s9959_s2 + $0xf8] sm:$0xff]  }
 0xcd5   :  { %3315 = vmatpush1.bf16.msra.mxu0 %v5099_v39  ;;  %3356 = vmatpush1.bf16.msra.mxu1 %v11588_v22  ;;  %v5103_v22 = vld [vmem:[%s9958_s1 + $0x128] ss:$16 sps:$4 sm:$0xff]  }
 0xcd6   :  { %3316 = vmatprep.subr.bf16.mxu0 %v5100_v59  ;;  %3357 = vmatprep.subr.bf16.mxu1 %v11590_v10  ;;  %v5104_v10 = vld [vmem:[%s9958_s1 + $0x14c] ss:$16 sps:$4 sm:$0xff]  }
 0xcd7   :  { %v4665_v39 = vld [vmem:[%s9959_s2 + $0x38] sm:$0xff]  }
 0xcd8   :  { %v4666_v59 = vld [vmem:[%s9959_s2 + $0xb8] sm:$0xff]  }
 0xcd9   :  { %3317 = vmatpush1.bf16.msra.mxu0 %v5101_v33  ;;  %3358 = vmatpush1.bf16.msra.mxu1 %v11592_v49  ;;  %v5105_v49 = vld [vmem:[%s9958_s1 + $0x148] ss:$16 sps:$4 sm:$0xff]   ;;  %v3425_v33 = vld [vmem:[#allocation4] sm:$0xff] }
 0xcda   :  { %3318 = vmatprep.subr.bf16.mxu0 %v5102_v19  ;;  %3359 = vmatprep.subr.bf16.mxu1 %v11594_v63  ;;  %v11622_v63 = vld [vmem:[#allocation59_spill] sm:$0xff] }
 0xcdb   :  { %v3429_v19 = vld [vmem:[#allocation4 + $0x20] sm:$0xff] }
 0xcdd   :  { %3319 = vmatpush1.bf16.msra.mxu0 %v5103_v22  ;;  %3360 = vmatpush1.bf16.msra.mxu1 %v11596_v17  ;;  %v11623_v17 = vld [vmem:[#allocation67_spill] sm:$0xff]  ;;  %v3427_v22 = vld [vmem:[#allocation4 + $0x10] sm:$0xff] }
 0xcde   :  { %3320 = vmatprep.subr.bf16.mxu0 %v5104_v10  ;;  %3361 = vmatprep.subr.bf16.mxu1 %v11598_v18  ;;  %v11624_v18 = vld [vmem:[#allocation69_spill] sm:$0xff] }
 0xcdf   :  { %v3431_v10 = vld [vmem:[#allocation4 + $0x30] sm:$0xff] }
 0xce1   :  { %3321 = vmatpush1.bf16.msra.mxu0 %v5105_v49  ;;  %3362 = vmatpush1.bf16.msra.mxu1 %v11622_v63  ;;  %v3438_v49 = vld [vmem:[#allocation4 + $0x68] sm:$0xff]  ;;  %v3440_v63 = vld [vmem:[#allocation4 + $0x78] sm:$0xff] }
 0xce2   :  { %3322 = vmatprep.subr.bf16.mxu0 %v5106_v24  ;;  %3363 = vmatprep.subr.bf16.mxu1 %v11623_v17  ;;  %v3473_v24 = vpack.c.bf16 %v3429_v19, %v3425_v33  ;;  %v3434_v17 = vld [vmem:[#allocation4 + $0x48] sm:$0xff]  ;;  %v11635_v33 = vld [vmem:[#allocation79_spill] sm:$0xff] }
 0xce3   :  { %v3495_v19 = vpack.c.bf16 %v9653_v41, %v11635_v33 }
 0xce5   :  { %3323 = vmatpush1.bf16.msra.mxu0 %v5107_v48  ;;  %3364 = vmatpush1.bf16.msra.mxu1 %v11624_v18  ;;  %v3475_v48 = vpack.c.bf16 %v3431_v10, %v3427_v22  ;;  %v3478_v18 = vpack.c.bf16 %v3438_v49, %v3434_v17 }
 0xce6   :  { %3324 = vmatprep.subr.bf16.mxu0 %v5108_v7  ;;  %3365 = vmatprep.subr.bf16.mxu1 %v11625_v60  ;;  %v3436_v7 = vld [vmem:[#allocation4 + $0x58] sm:$0xff] }
 0xce7   :  { %v3480_v60 = vpack.c.bf16 %v3440_v63, %v3436_v7 }
 0xce9   :  { %3325 = vmatpush1.bf16.msra.mxu0 %v5109_v8  ;;  %3366 = vmatpush1.bf16.msra.mxu1 %v11608_v47  ;;  %v11628_v47 = vld [vmem:[#allocation24_spill] sm:$0xff]  ;;  %v3437_v8 = vld [vmem:[#allocation4 + $0x60] sm:$0xff] }
 0xcea   :  { %3326 = vmatprep.subr.bf16.mxu0 %v5110_v44  ;;  %3367 = vmatprep.subr.bf16.mxu1 %v11626_v28  ;;  %v3439_v44 = vld [vmem:[#allocation4 + $0x70] sm:$0xff]  ;;  %v3446_v28 = vld [vmem:[#allocation4 + $0xa8] sm:$0xff] }
 0xced   :  { %3327 = vmatpush1.bf16.msra.mxu0 %v5111_v56  ;;  %3368 = vmatpush1.bf16.msra.mxu1 %v11627_v61  ;;  %v3433_v56 = vld [vmem:[#allocation4 + $0x40] sm:$0xff]  ;;  %v3448_v61 = vld [vmem:[#allocation4 + $0xb8] sm:$0xff] }
 0xcee   :  { %3328 = vmatprep.subr.bf16.mxu0 %v5112_v11  ;;  %3369 = vmatprep.subr.bf16.mxu1 %v11614_v13  ;;  %v3428_v13 = vld [vmem:[#allocation4 + $0x18] sm:$0xff]  ;;  %v3477_v11 = vpack.c.bf16 %v3437_v8, %v3433_v56 }
 0xcef   :  { %v3476_v51 = vpack.c.bf16 %v3432_v40, %v3428_v13  ;;  %v3441_v13 = vld [vmem:[#allocation4 + $0x80] sm:$0xff]  ;;  %v3456_v40 = vld [vmem:[#allocation4 + $0xf8] sm:$0xff] }
 0xcf1   :  { %3329 = vmatpush1.bf16.msra.mxu0 %v11628_v47  ;;  %3370 = vmatpush1.bf16.msra.mxu1 %v11616_v4  ;;  %v4637_v4 = vld [vmem:[%s9959_s2] sm:$0xff]   ;;  %v3435_v47 = vld [vmem:[#allocation4 + $0x50] sm:$0xff] }
 0xcf2   :  { %3330 = vmatprep.subr.bf16.mxu0 %v11629_v57  ;;  %3371 = vmatprep.subr.bf16.mxu1 %v11630_v15  ;;  %v3442_v57 = vld [vmem:[#allocation4 + $0x88] sm:$0xff]  ;;  %v3479_v15 = vpack.c.bf16 %v3439_v44, %v3435_v47 }
 0xcf5   :  { %3331 = vmatpush1.bf16.msra.mxu0 %v11631_v38  ;;  %3372 = vmatpush1.bf16.msra.mxu1 %v9330_v30  ;;  %v4640_v30 = vld [vmem:[%s9959_s2 + $0xc8] sm:$0xff]   ;;  %v3447_v38 = vld [vmem:[#allocation4 + $0xb0] sm:$0xff] }
 0xcf6   :  { %4248 = vmatprep.subr.bf16.mxu0 %v4635_v58  ;;  %4300 = vmatprep.subr.bf16.mxu1 %v4636_v32  ;;  %v3482_v58 = vpack.c.bf16 %v3446_v28, %v3442_v57  ;;  %v3444_v32 = vld [vmem:[#allocation4 + $0x98] sm:$0xff] }
 0xcf7   :  { %v3484_v34 = vpack.c.bf16 %v3448_v61, %v3444_v32 }
 0xcf8   :  { %3333 = vmatmul.mubr.bf16.vlgmr.msra.gmra.mrb[48].mxu0 %v9669_v9  ;;  %3374 = vmatmul.mubr.bf16.vlgmr.msra.gmra.mrb[48].mxu1 %v9673_v14  ;;  %v4645_v9 = vld [vmem:[%s9959_s2 + $0x10] sm:$0xff]  }
 0xcf9   :  { %4249 = vmatpush3.bf16.msra.mxu0 %v4637_v4  ;;  %3785 = vmatprep.mubr.bf16.mxu0 %v3474_v23  ;;  %v4646_v14 = vld [vmem:[%s9959_s2 + $0x90] sm:$0xff]   ;;  %v3454_v4 = vld [vmem:[#allocation4 + $0xe8] sm:$0xff]  ;;  %s5137_s2 = smov [#allocation4]  }
 0xcfa   :  { %4301 = vmatpush3.bf16.msra.mxu1 %v4638_v52  ;;  %3866 = vmatprep.mubr.bf16.mxu1 %v3476_v51  ;;  %v3481_v52 = vpack.c.bf16 %v3445_v36, %v3441_v13  ;;  %v3443_v23 = vld [vmem:[#allocation4 + $0x90] sm:$0xff]  ;;  %s4029_s12 = sshll.u32 %s5137_s2, 4  ;;  %s4030_s12 = int_to_ptr.vmem [resolvable:$true] %s4029_s12 }
 0xcfb   :  { %4250 = vmatprep.subr.bf16.mxu0 %v4639_v25  ;;  %4302 = vmatprep.subr.bf16.mxu1 %v4640_v30  ;;  %v3450_v25 = vld [vmem:[#allocation4 + $0xc8] sm:$0xff]  ;;  %v3483_v30 = vpack.c.bf16 %v3447_v38, %v3443_v23  ;;  %s5113_s13 = scalar_lea.vmem %s4030_s12, 6144  ;;  %p5118_p1 = scmp.lt.s32.totalorder %s4030_s12, %s4030_s12 }
 0xcfc   :  { %v3486_v51 = vpack.c.bf16 %v3454_v4, %v3450_v25  ;;  %p5114_p0 = scmp.ne.s32.totalorder %s4030_s12, %s5113_s13  ;;  %p5119_p2 = scmp.lt.s32.totalorder %s5113_s13, %s5113_s13 }
 0xcfd   :  { %4251 = vmatpush3.bf16.msra.mxu0 %v4641_v20  ;;  %v3452_v20 = vld [vmem:[#allocation4 + $0xd8] sm:$0xff] }
 0xcfe   :  { %4303 = vmatpush3.bf16.msra.mxu1 %v4642_v12  ;;  %4252 = vmatprep.subr.bf16.mxu0 %v4643_v3  ;;  %v3488_v12 = vpack.c.bf16 %v3456_v40, %v3452_v20  ;;  %v3453_v3 = vld [vmem:[#allocation4 + $0xe0] sm:$0xff]  ;;  %p5120_p3 = por %p5119_p2, %p5118_p1 }
 0xcff   :  { %4304 = vmatprep.subr.bf16.mxu1 %v4644_v62  ;;  %v3455_v62 = vld [vmem:[#allocation4 + $0xf0] sm:$0xff] }
 0xd00   :  { %p5121_p4 = pnand %p5120_p3, %p5114_p0 }
 0xd01   :  { %4253 = vmatpush3.bf16.msra.mxu0 %v4645_v9  ;;  %v3462_v9 = vld [vmem:[#allocation4 + $0x128] sm:$0xff] }
 0xd02   :  { %4305 = vmatpush3.bf16.msra.mxu1 %v4646_v14  ;;  %4254 = vmatprep.subr.bf16.mxu0 %v4647_v29  ;;  %v3449_v14 = vld [vmem:[#allocation4 + $0xc0] sm:$0xff]  ;;  %v3464_v29 = vld [vmem:[#allocation4 + $0x138] sm:$0xff] }
 0xd03   :  { %4306 = vmatprep.subr.bf16.mxu1 %v4648_v27  ;;  %v3485_v27 = vpack.c.bf16 %v3453_v3, %v3449_v14 }
 0xd05   :  { %4255 = vmatpush3.bf16.msra.mxu0 %v4649_v5  ;;  %v3451_v5 = vld [vmem:[#allocation4 + $0xd0] sm:$0xff] }
 0xd06   :  { %4307 = vmatpush3.bf16.msra.mxu1 %v4650_v46  ;;  %4256 = vmatprep.subr.bf16.mxu0 %v4651_v42  ;;  %v3458_v46 = vld [vmem:[#allocation4 + $0x108] sm:$0xff]  ;;  %v3487_v42 = vpack.c.bf16 %v3455_v62, %v3451_v5 }
 0xd07   :  { %4308 = vmatprep.subr.bf16.mxu1 %v4652_v0  ;;  %v3490_v0 = vpack.c.bf16 %v3462_v9, %v3458_v46 }
 0xd09   :  { %4257 = vmatpush3.bf16.msra.mxu0 %v4653_v43  ;;  %v3460_v43 = vld [vmem:[#allocation4 + $0x118] sm:$0xff] }
 0xd0a   :  { %4309 = vmatpush3.bf16.msra.mxu1 %v4654_v53  ;;  %4258 = vmatprep.subr.bf16.mxu0 %v4655_v6  ;;  %v3492_v53 = vpack.c.bf16 %v3464_v29, %v3460_v43  ;;  %v3461_v6 = vld [vmem:[#allocation4 + $0x120] sm:$0xff] }
 0xd0b   :  { %4310 = vmatprep.subr.bf16.mxu1 %v4656_v54  ;;  %v3463_v54 = vld [vmem:[#allocation4 + $0x130] sm:$0xff] }
 0xd0d   :  { %4259 = vmatpush3.bf16.msra.mxu0 %v4657_v26  ;;  %v3457_v26 = vld [vmem:[#allocation4 + $0x100] sm:$0xff] }
 0xd0e   :  { %4311 = vmatpush3.bf16.msra.mxu1 %v4658_v50  ;;  %4260 = vmatprep.subr.bf16.mxu0 %v4659_v16  ;;  %v3489_v50 = vpack.c.bf16 %v3461_v6, %v3457_v26  ;;  %v3459_v16 = vld [vmem:[#allocation4 + $0x110] sm:$0xff] }
 0xd0f   :  { %4312 = vmatprep.subr.bf16.mxu1 %v4660_v21  ;;  %v3491_v21 = vpack.c.bf16 %v3463_v54, %v3459_v16 }
 0xd11   :  { %4261 = vmatpush3.bf16.msra.mxu0 %v4661_v31  ;;  %v11632_v31 = vld [vmem:[#allocation80_spill] sm:$0xff] }
 0xd12   :  { %4313 = vmatpush3.bf16.msra.mxu1 %v4662_v55  ;;  %4262 = vmatprep.subr.bf16.mxu0 %v4663_v35  ;;  %v3494_v55 = vpack.c.bf16 %v9655_v1, %v11632_v31  ;;  %v11633_v35 = vld [vmem:[#allocation81_spill] sm:$0xff] }
 0xd13   :  { %4314 = vmatprep.subr.bf16.mxu1 %v4664_v37  ;;  %v3496_v37 = vpack.c.bf16 %v9657_v2, %v11633_v35 }
 0xd15   :  { %4263 = vmatpush3.bf16.msra.mxu0 %v4665_v39  ;;  %v11634_v39 = vld [vmem:[#allocation78_spill] sm:$0xff] }
 0xd16   :  { %4315 = vmatpush3.bf16.msra.mxu1 %v4666_v59  ;;  %v3493_v59 = vpack.c.bf16 %v9651_v45, %v11634_v39 }
 0xd18   :  { %3786 = vmatmul.mubr.bf16.vlgmr.msra.gmra.mrb[52].mxu0 %v3473_v24 }
 0xd19   :  { %3867 = vmatmul.mubr.bf16.vlgmr.msra.gmra.mrb[52].mxu1 %v3475_v48  ;;  %3793 = vmatprep.mubr.bf16.mxu0 %v3478_v18 }
 0xd1a   :  { %3874 = vmatprep.mubr.bf16.mxu1 %v3480_v60 }
 0xd20   :  { %3794 = vmatmul.mubr.bf16.gmra.mrb[56].mxu0 %v3477_v11 }
 0xd21   :  { %3875 = vmatmul.mubr.bf16.gmra.mrb[56].mxu1 %v3479_v15  ;;  %3801 = vmatprep.mubr.bf16.mxu0 %v3482_v58 }
 0xd22   :  { %3882 = vmatprep.mubr.bf16.mxu1 %v3484_v34 }
 0xd28   :  { %3802 = vmatmul.mubr.bf16.gmra.mrb[60].mxu0 %v3481_v52 }
 0xd29   :  { %3883 = vmatmul.mubr.bf16.gmra.mrb[60].mxu1 %v3483_v30  ;;  %3809 = vmatprep.mubr.bf16.mxu0 %v3486_v51 }
 0xd2a   :  { %3890 = vmatprep.mubr.bf16.mxu1 %v3488_v12 }
 0xd30   :  { %3810 = vmatmul.mubr.bf16.gmra.mrb[64].mxu0 %v3485_v27 }
 0xd31   :  { %3891 = vmatmul.mubr.bf16.gmra.mrb[64].mxu1 %v3487_v42  ;;  %3817 = vmatprep.mubr.bf16.mxu0 %v3490_v0 }
 0xd32   :  { %3898 = vmatprep.mubr.bf16.mxu1 %v3492_v53 }
 0xd38   :  { %3818 = vmatmul.mubr.bf16.gmra.mrb[68].mxu0 %v3489_v50 }
 0xd39   :  { %3899 = vmatmul.mubr.bf16.gmra.mrb[68].mxu1 %v3491_v21  ;;  %3825 = vmatprep.mubr.bf16.mxu0 %v3494_v55 }
 0xd3a   :  { %3906 = vmatprep.mubr.bf16.mxu1 %v3496_v37 }
 0xd40   :  { %3826 = vmatmul.mubr.bf16.gmra.mrb[72].mxu0 %v3493_v59 }
 0xd41   :  { %3907 = vmatmul.mubr.bf16.gmra.mrb[72].mxu1 %v3495_v19 }
 0xd8b   :  { %v3252_v22 = vpop.f32.mrb[44].mxu0  ;;  %v3293_v10 = vpop.f32.mrb[44].mxu1 }
 0xd8c   :  { %v3254_v49 = vpop.f32.mrb[45].mxu0  ;;  %v3295_v63 = vpop.f32.mrb[45].mxu1 }
 0xd8d   :  { %v3256_v1 = vpop.f32.mrb[46].mxu0  ;;  %v3297_v24 = vpop.f32.mrb[46].mxu1 }
 0xd8e   :  { %v3257_v17 = vpop.f32.mrb[47].mxu0  ;;  %v3298_v48 = vpop.f32.mrb[47].mxu1 }
 0xd8f   :  { %5124 = shalt.err (!%p5121_p4)
}
 0xd90   :  { %s5125_s15 = scalar_lea.hbm %s9961_s4, 6144 }
 0xd91   :  { %p5126_p5 = scmp.ne.s32.totalorder %s9961_s4, %s5125_s15  ;;  %p5129_p6 = scmp.lt.u32.totalorder %s5125_s15, %s9961_s4 }
 0xd93   :  { %p5131_p7 = pnand %p5129_p6, %p5126_p5 }
 0xd95   :  { %5134 = shalt.err (!%p5131_p7)
}
 0xd96   :  { %s5138_s20 = smov 512   ;;  %s5139_s3 = smov 32  }
 0xd97   :  { %4035 = dma.vmem_to_hbm [thread:$0]  %s4030_s12, 6144, %s9961_s4, [#allocation5], %s5138_s20, %s5138_s20, %s5139_s3  }
 0xdcb   :  { %v3334_v45 = vpop.f32.mrb[48].mxu0  ;;  %v3375_v41 = vpop.f32.mrb[48].mxu1 }
 0xdcc   :  { %v3336_v2 = vpop.f32.mrb[49].mxu0  ;;  %v3377_v18 = vpop.f32.mrb[49].mxu1 }
 0xdcd   :  { %v3338_v7 = vpop.f32.mrb[50].mxu0  ;;  %v3379_v60 = vpop.f32.mrb[50].mxu1 }
 0xdce   :  { %v3339_v8 = vpop.f32.mrb[51].mxu0  ;;  %v3380_v44 = vpop.f32.mrb[51].mxu1 }
 0xdeb   :  { %v4264_v28 = vpop.f32.mrb[52].mxu0 }
 0xdec   :  { %v4316_v56 = vpop.f32.mrb[52].mxu1  ;;  %v4265_v61 = vpop.f32.mrb[53].mxu0 }
 0xded   :  { %v4266_v11 = vadd.f32 %v4265_v61, %v4264_v28  ;;  %v4317_v47 = vpop.f32.mrb[53].mxu1  ;;  %v4267_v57 = vpop.f32.mrb[54].mxu0 }
 0xdee   :  { %v4318_v15 = vadd.f32 %v4317_v47, %v4316_v56  ;;  %v4319_v58 = vpop.f32.mrb[54].mxu1  ;;  %v4268_v32 = vpop.f32.mrb[55].mxu0 }
 0xdef   :  { %v4269_v34 = vadd.f32 %v4268_v32, %v4267_v57  ;;  %v4320_v36 = vpop.f32.mrb[55].mxu1 }
 0xdf0   :  { %v3869_v38 = vadd.f32 %v4318_v15, %v4266_v11  ;;  %v4321_v4 = vadd.f32 %v4320_v36, %v4319_v58 }
 0xdf2   :  { %v3915_v13 = vmul.f32 0.2, %v3869_v38  ;;  %v3872_v40 = vadd.f32 %v4321_v4, %v4269_v34 }
 0xdf3   :  { %v4270_v52 = vpop.f32.mrb[56].mxu0 }
 0xdf4   :  { %v3927_v23 = vmul.f32 0.4, %v3915_v13  ;;  %v3916_v25 = vmul.f32 0.2, %v3872_v40  ;;  %v4322_v30 = vpop.f32.mrb[56].mxu1  ;;  %v4271_v51 = vpop.f32.mrb[57].mxu0 }
 0xdf5   :  { %v4272_v20 = vadd.f32 %v4271_v51, %v4270_v52  ;;  %v4323_v12 = vpop.f32.mrb[57].mxu1  ;;  %v4273_v3 = vpop.f32.mrb[58].mxu0 }
 0xdf6   :  { %v3939_v62 = vmax.f32 %v3915_v13, %v3927_v23  ;;  %v3928_v9 = vmul.f32 0.4, %v3916_v25  ;;  %v4324_v14 = vadd.f32 %v4323_v12, %v4322_v30  ;;  %v4325_v29 = vpop.f32.mrb[58].mxu1  ;;  %v4274_v27 = vpop.f32.mrb[59].mxu0 }
 0xdf7   :  { %v4275_v5 = vadd.f32 %v4274_v27, %v4273_v3  ;;  %v4326_v46 = vpop.f32.mrb[59].mxu1 }
 0xdf8   :  { %3967 = vst [vmem:[%s9962_s5] sm:$0xff] %v3939_v62  ;;  %v3970_v42 = vmul.f32 0.8, %v3939_v62  ;;  %v3940_v0 = vmax.f32 %v3916_v25, %v3928_v9  ;;  %v3877_v43 = vadd.f32 %v4324_v14, %v4272_v20  ;;  %v4327_v53 = vadd.f32 %v4326_v46, %v4325_v29 }
 0xdfa   :  { %v3971_v6 = vadd.f32 %v3970_v42, %v3940_v0  ;;  %v3917_v54 = vmul.f32 0.2, %v3877_v43  ;;  %v3880_v26 = vadd.f32 %v4327_v53, %v4275_v5 }
 0xdfb   :  { %v4276_v50 = vpop.f32.mrb[60].mxu0 }
 0xdfc   :  { %4227 = vst [vmem:[%s9962_s5 + $0x8] sm:$0xff] %v3971_v6  ;;  %v3929_v16 = vmul.f32 0.4, %v3917_v54  ;;  %v3918_v21 = vmul.f32 0.2, %v3880_v26  ;;  %v4328_v31 = vpop.f32.mrb[60].mxu1 }
 0xdfd   :  { %v4277_v55 = vpop.f32.mrb[61].mxu0  ;;  %v3975_v37 = vmul.f32 0.8, %v3971_v6  ;;  %v4329_v33 = vpop.f32.mrb[61].mxu1 }
 0xdfe   :  { %v3941_v35 = vmax.f32 %v3917_v54, %v3929_v16  ;;  %v3930_v39 = vmul.f32 0.4, %v3918_v21  ;;  %v4278_v59 = vadd.f32 %v4277_v55, %v4276_v50  ;;  %v4279_v19 = vpop.f32.mrb[62].mxu0  ;;  %v4330_v22 = vadd.f32 %v4329_v33, %v4328_v31  ;;  %v4331_v10 = vpop.f32.mrb[62].mxu1 }
 0xdff   :  { %v4280_v49 = vpop.f32.mrb[63].mxu0  ;;  %v4332_v24 = vpop.f32.mrb[63].mxu1 }
 0xe00   :  { %v3976_v63 = vadd.f32 %v3975_v37, %v3941_v35  ;;  %v4281_v1 = vadd.f32 %v4280_v49, %v4279_v19  ;;  %v3885_v17 = vadd.f32 %v4330_v22, %v4278_v59  ;;  %v4333_v48 = vadd.f32 %v4332_v24, %v4331_v10 }
 0xe01   :  { %v3942_v45 = vmax.f32 %v3918_v21, %v3930_v39 }
 0xe02   :  { %4229 = vst [vmem:[%s9962_s5 + $0x10] sm:$0xff] %v3976_v63  ;;  %v3980_v41 = vmul.f32 0.8, %v3976_v63  ;;  %v3919_v2 = vmul.f32 0.2, %v3885_v17  ;;  %v3888_v18 = vadd.f32 %v4333_v48, %v4281_v1 }
 0xe03   :  { %v4282_v7 = vpop.f32.mrb[64].mxu0 }
 0xe04   :  { %v3981_v60 = vadd.f32 %v3980_v41, %v3942_v45  ;;  %v4334_v8 = vpop.f32.mrb[64].mxu1  ;;  %v4283_v44 = vpop.f32.mrb[65].mxu0  ;;  %v3931_v28 = vmul.f32 0.4, %v3919_v2  ;;  %v3920_v56 = vmul.f32 0.2, %v3888_v18 }
 0xe05   :  { %v4284_v61 = vadd.f32 %v4283_v44, %v4282_v7  ;;  %v4335_v11 = vpop.f32.mrb[65].mxu1  ;;  %v4285_v47 = vpop.f32.mrb[66].mxu0 }
 0xe06   :  { %4231 = vst [vmem:[%s9962_s5 + $0x18] sm:$0xff] %v3981_v60  ;;  %v3985_v57 = vmul.f32 0.8, %v3981_v60  ;;  %v4336_v15 = vadd.f32 %v4335_v11, %v4334_v8  ;;  %v4337_v58 = vpop.f32.mrb[66].mxu1  ;;  %v4286_v32 = vpop.f32.mrb[67].mxu0  ;;  %v3943_v34 = vmax.f32 %v3919_v2, %v3931_v28 }
 0xe07   :  { %v3932_v36 = vmul.f32 0.4, %v3920_v56  ;;  %v4287_v38 = vadd.f32 %v4286_v32, %v4285_v47  ;;  %v4338_v4 = vpop.f32.mrb[67].mxu1 }
 0xe08   :  { %v3893_v13 = vadd.f32 %v4336_v15, %v4284_v61  ;;  %v4339_v40 = vadd.f32 %v4338_v4, %v4337_v58  ;;  %v3986_v52 = vadd.f32 %v3985_v57, %v3943_v34 }
 0xe09   :  { %v3944_v30 = vmax.f32 %v3920_v56, %v3932_v36 }
 0xe0a   :  { %v3921_v23 = vmul.f32 0.2, %v3893_v13  ;;  %v3896_v25 = vadd.f32 %v4339_v40, %v4287_v38  ;;  %4233 = vst [vmem:[%s9962_s5 + $0x20] sm:$0xff] %v3986_v52  ;;  %v3990_v51 = vmul.f32 0.8, %v3986_v52 }
 0xe0b   :  { %v4288_v20 = vpop.f32.mrb[68].mxu0 }
 0xe0c   :  { %v3933_v12 = vmul.f32 0.4, %v3921_v23  ;;  %v3922_v3 = vmul.f32 0.2, %v3896_v25  ;;  %v4340_v62 = vpop.f32.mrb[68].mxu1  ;;  %v4289_v9 = vpop.f32.mrb[69].mxu0  ;;  %v3991_v14 = vadd.f32 %v3990_v51, %v3944_v30 }
 0xe0d   :  { %v4290_v29 = vadd.f32 %v4289_v9, %v4288_v20  ;;  %v4341_v27 = vpop.f32.mrb[69].mxu1  ;;  %v4291_v5 = vpop.f32.mrb[70].mxu0 }
 0xe0e   :  { %v3945_v46 = vmax.f32 %v3921_v23, %v3933_v12  ;;  %v4342_v42 = vadd.f32 %v4341_v27, %v4340_v62  ;;  %v4343_v0 = vpop.f32.mrb[70].mxu1  ;;  %v4292_v43 = vpop.f32.mrb[71].mxu0  ;;  %4235 = vst [vmem:[%s9962_s5 + $0x28] sm:$0xff] %v3991_v14  ;;  %v3995_v53 = vmul.f32 0.8, %v3991_v14 }
 0xe0f   :  { %v3934_v6 = vmul.f32 0.4, %v3922_v3  ;;  %v4293_v54 = vadd.f32 %v4292_v43, %v4291_v5  ;;  %v4344_v26 = vpop.f32.mrb[71].mxu1 }
 0xe10   :  { %v3901_v50 = vadd.f32 %v4342_v42, %v4290_v29  ;;  %v4345_v16 = vadd.f32 %v4344_v26, %v4343_v0  ;;  %v3996_v21 = vadd.f32 %v3995_v53, %v3945_v46 }
 0xe11   :  { %v3946_v35 = vmax.f32 %v3922_v3, %v3934_v6 }
 0xe12   :  { %v3923_v31 = vmul.f32 0.2, %v3901_v50  ;;  %v3904_v55 = vadd.f32 %v4345_v16, %v4293_v54  ;;  %4237 = vst [vmem:[%s9962_s5 + $0x30] sm:$0xff] %v3996_v21  ;;  %v4000_v37 = vmul.f32 0.8, %v3996_v21 }
 0xe13   :  { %v4294_v39 = vpop.f32.mrb[72].mxu0 }
 0xe14   :  { %v3935_v59 = vmul.f32 0.4, %v3923_v31  ;;  %v3924_v33 = vmul.f32 0.2, %v3904_v55  ;;  %v4346_v19 = vpop.f32.mrb[72].mxu1  ;;  %v4295_v22 = vpop.f32.mrb[73].mxu0  ;;  %v4001_v10 = vadd.f32 %v4000_v37, %v3946_v35 }
 0xe15   :  { %v4296_v49 = vadd.f32 %v4295_v22, %v4294_v39  ;;  %v4347_v63 = vpop.f32.mrb[73].mxu1  ;;  %v4297_v1 = vpop.f32.mrb[74].mxu0 }
 0xe16   :  { %v3947_v24 = vmax.f32 %v3923_v31, %v3935_v59  ;;  %v4348_v17 = vadd.f32 %v4347_v63, %v4346_v19  ;;  %v4349_v48 = vpop.f32.mrb[74].mxu1  ;;  %v4298_v45 = vpop.f32.mrb[75].mxu0  ;;  %4239 = vst [vmem:[%s9962_s5 + $0x38] sm:$0xff] %v4001_v10  ;;  %v4005_v41 = vmul.f32 0.8, %v4001_v10 }
 0xe17   :  { %v3936_v2 = vmul.f32 0.4, %v3924_v33  ;;  %v4299_v18 = vadd.f32 %v4298_v45, %v4297_v1  ;;  %v4350_v7 = vpop.f32.mrb[75].mxu1 }
 0xe18   :  { %v3909_v60 = vadd.f32 %v4348_v17, %v4296_v49  ;;  %v4351_v8 = vadd.f32 %v4350_v7, %v4349_v48  ;;  %v4006_v44 = vadd.f32 %v4005_v41, %v3947_v24 }
 0xe19   :  { %v3948_v61 = vmax.f32 %v3924_v33, %v3936_v2 }
 0xe1a   :  { %v3925_v28 = vmul.f32 0.2, %v3909_v60  ;;  %v3912_v56 = vadd.f32 %v4351_v8, %v4299_v18  ;;  %4241 = vst [vmem:[%s9962_s5 + $0x40] sm:$0xff] %v4006_v44  ;;  %v4010_v11 = vmul.f32 0.8, %v4006_v44 }
 0xe1c   :  { %v3937_v47 = vmul.f32 0.4, %v3925_v28  ;;  %v3926_v57 = vmul.f32 0.2, %v3912_v56  ;;  %v4011_v15 = vadd.f32 %v4010_v11, %v3948_v61 }
 0xe1e   :  { %v3949_v58 = vmax.f32 %v3925_v28, %v3937_v47  ;;  %4243 = vst [vmem:[%s9962_s5 + $0x48] sm:$0xff] %v4011_v15  ;;  %v4015_v32 = vmul.f32 0.8, %v4011_v15  ;;  %v3938_v34 = vmul.f32 0.4, %v3926_v57 }
 0xe20   :  { %v4016_v36 = vadd.f32 %v4015_v32, %v3949_v58  ;;  %v3950_v38 = vmax.f32 %v3926_v57, %v3938_v34 }
 0xe22   :  { %4245 = vst [vmem:[%s9962_s5 + $0x50] sm:$0xff] %v4016_v36  ;;  %v4020_v4 = vmul.f32 0.8, %v4016_v36 }
 0xe24   :  { %v4021_v13 = vadd.f32 %v4020_v4, %v3950_v38 }
 0xe26   :  { %4247 = vst [vmem:[%s9962_s5 + $0x58] sm:$0xff] %v4021_v13 }
 0xe27   :  { %5135 = dma.done.wait [#allocation5], 6144  }
 0xe28   :  { %5136 = vsyncadd [#allocation5], 4294961152 }
 0xe29   :  { %4043 = vsyncpa [#allocation5], 1 }

</bundles_post_ra>
